<compile_context>
chip_gen: v5e
topology: v5e:2x2
jax: 0.10.0
libtpu: 0.0.40
codegen_flags: <defaults>
</compile_context>

<pallas_src>
import jax
import jax.numpy as jnp
from jax.experimental import pallas as pl
from jax.experimental.pallas import tpu as pltpu

BN_EPS = 1e-5


# ----------------------------------------------------------------------------
# Fused kernel
# ----------------------------------------------------------------------------
def cvae_kernel(pt_ref,
                e1w_ref, e1b_ref, e1s_ref, e1t_ref,
                e2w_ref, e2b_ref, e2s_ref, e2t_ref,
                e3w_ref, e3b_ref, e3s_ref, e3t_ref,
                eps_ref,
                wm1_hbm, bm1_ref,
                wzm_ref, bzm_ref, wzs_ref, bzs_ref,
                wez_ref, bez_ref,
                wm2_hbm, bm2_ref,
                d1w_ref, d1b_ref, d1s_ref, d1t_ref,
                d2w_ref, d2b_ref, d2s_ref, d2t_ref,
                d3w_ref, d3b_ref, d3s_ref, d3t_ref,
                out_ref, z_ref, zm_ref, zs_ref,
                wm1_buf, wm2_buf, sem):
    """Whole CVAE forward in one kernel (channels-first, pixels in lanes).

    pt_ref  : (32, B*H*W)        im2col'd input (K padded 27->32), f32
    e*w_ref : conv weights, channels-first (Cout, K) / (Cout, Cin)
    e*b/s/t : per-channel bias / folded-BN scale / shift, column vectors (C,1)
    wm1_hbm : (last_conv, B*H*W, hidden) bf16, HBM (manually prefetched)
    wm2_hbm : (B*last_conv, hidden, H*W) bf16, HBM (manually prefetched)
    out_ref : (B, ch_sz, H*W)    lane-dense NCHW output
    """
    f32 = jnp.float32
    bf16 = jnp.bfloat16

    # --- async prefetch of the two big bf16 linear weights (hidden behind
    #     encoder / bottleneck compute) -------------------------------------
    cp1 = pltpu.make_async_copy(wm1_hbm, wm1_buf, sem.at[0])
    cp2 = pltpu.make_async_copy(wm2_hbm, wm2_buf, sem.at[1])
    cp1.start()
    cp2.start()

    # --- encoder: 3x3 conv (single K=32 im2col matmul) + two 1x1 convs ------
    y = jnp.dot(e1w_ref[...], pt_ref[...], preferred_element_type=f32)   # (64, BHW)
    y = jnp.maximum(y + e1b_ref[...], 0.0) * e1s_ref[...] + e1t_ref[...]
    y = jnp.dot(e2w_ref[...], y, preferred_element_type=f32)             # (16, BHW)
    y = jnp.maximum(y + e2b_ref[...], 0.0) * e2s_ref[...] + e2t_ref[...]
    y = jnp.dot(e3w_ref[...], y, preferred_element_type=f32)             # (4, BHW)
    enc = jnp.maximum(y + e3b_ref[...], 0.0) * e3s_ref[...] + e3t_ref[...]

    last_conv = enc.shape[0]

    # --- m1: Linear(flat, hidden) + ReLU.  torch's NCHW flatten is baked into
    #     the (last_conv, BHW, hidden) weight re-blocking -> no activation
    #     reshape/transpose needed.  bf16 x bf16 MXU, f32 accumulate. ---------
    cp1.wait()
    h = bm1_ref[...]                                                     # (1, hidden)
    for c in range(last_conv):
        h = h + jnp.dot(enc[c:c + 1, :].astype(bf16), wm1_buf[c],
                        preferred_element_type=f32)
    h = jnp.maximum(h, 0.0)

    # --- bottleneck ----------------------------------------------------------
    zm = jnp.dot(h, wzm_ref[...], preferred_element_type=f32) + bzm_ref[...]
    zs = jnp.dot(h, wzs_ref[...], preferred_element_type=f32) + bzs_ref[...]
    z = zm + eps_ref[...] * jnp.exp(0.5 * zs)        # z = mean + eps*exp(0.5*logvar)
    z_ref[...] = z
    zm_ref[...] = zm
    zs_ref[...] = zs

    # --- expand_z + m2 (Linear + ReLU), output re-blocked straight into the
    #     decoder's NCHW channels-first rows --------------------------------
    hz = jnp.dot(z, wez_ref[...], preferred_element_type=f32) + bez_ref[...]  # (1, hidden)
    cp2.wait()
    hz_bf = hz.astype(bf16)
    n_rows = wm2_buf.shape[0]                         # B * last_conv
    dec_rows = []
    for r in range(n_rows):
        row = jnp.dot(hz_bf, wm2_buf[r],
                      preferred_element_type=f32) + bm2_ref[r:r + 1, :]
        dec_rows.append(jnp.maximum(row, 0.0))        # (1, HW) each

    # --- decoder: per-batch channels-first 1x1 convs; output already NCHW ----
    B = out_ref.shape[0]
    for b in range(B):
        xb = jnp.concatenate(dec_rows[b * last_conv:(b + 1) * last_conv],
                             axis=0)                                      # (4, HW)
        yb = jnp.dot(d1w_ref[...], xb, preferred_element_type=f32)        # (16, HW)
        yb = jnp.maximum(yb + d1b_ref[...], 0.0) * d1s_ref[...] + d1t_ref[...]
        yb = jnp.dot(d2w_ref[...], yb, preferred_element_type=f32)        # (64, HW)
        yb = jnp.maximum(yb + d2b_ref[...], 0.0) * d2s_ref[...] + d2t_ref[...]
        yb = jnp.dot(d3w_ref[...], yb, preferred_element_type=f32)        # (3, HW)
        yb = jax.nn.sigmoid(yb + d3b_ref[...]) * d3s_ref[...] + d3t_ref[...]
        out_ref[b] = yb


# ----------------------------------------------------------------------------
# pallas_call wrapper (no grid: whole problem is VMEM-resident at this size)
# ----------------------------------------------------------------------------
def _vmem():
    return pl.BlockSpec(memory_space=pltpu.MemorySpace.VMEM)


def _hbm():
    return pl.BlockSpec(memory_space=pl.ANY)


def cvae_call(pt, eps, p):
    wm1 = p["m1"]["w"]                       # (last_conv, B*HW, hidden) bf16
    wm2 = p["m2"]["w"]                       # (B*last_conv, hidden, HW) bf16
    last_conv = wm1.shape[0]
    n_rows, _, HW = wm2.shape
    B = n_rows // last_conv
    c_out = p["dec3"]["w"].shape[0]
    z_size = p["zmean"]["w"].shape[-1]

    return pl.pallas_call(
        cvae_kernel,
        out_shape=(
            jax.ShapeDtypeStruct((B, c_out, HW), jnp.float32),   # NCHW, lane-dense
            jax.ShapeDtypeStruct((1, z_size), jnp.float32),      # z
            jax.ShapeDtypeStruct((1, z_size), jnp.float32),      # z_mean
            jax.ShapeDtypeStruct((1, z_size), jnp.float32),      # z_stdev (logvar)
        ),
        in_specs=[_vmem()] * 14 + [_hbm()] + [_vmem()] * 7 + [_hbm()] + [_vmem()] * 13,
        out_specs=(_vmem(), _vmem(), _vmem(), _vmem()),
        scratch_shapes=[
            pltpu.VMEM(wm1.shape, jnp.bfloat16),     # prefetched m1 weight
            pltpu.VMEM(wm2.shape, jnp.bfloat16),     # prefetched m2 weight
            pltpu.SemaphoreType.DMA((2,)),
        ],
    )(pt,
      p["enc1"]["w"], p["enc1"]["b"], p["enc1"]["s"], p["enc1"]["t"],
      p["enc2"]["w"], p["enc2"]["b"], p["enc2"]["s"], p["enc2"]["t"],
      p["enc3"]["w"], p["enc3"]["b"], p["enc3"]["s"], p["enc3"]["t"],
      eps,
      wm1, p["m1"]["b"],
      p["zmean"]["w"], p["zmean"]["b"],
      p["zstdev"]["w"], p["zstdev"]["b"],
      p["expand_z"]["w"], p["expand_z"]["b"],
      wm2, p["m2"]["b"],
      p["dec1"]["w"], p["dec1"]["b"], p["dec1"]["s"], p["dec1"]["t"],
      p["dec2"]["w"], p["dec2"]["b"], p["dec2"]["s"], p["dec2"]["t"],
      p["dec3"]["w"], p["dec3"]["b"], p["dec3"]["s"], p["dec3"]["t"])


# ----------------------------------------------------------------------------
# Forward pass (mirrors CVAE.forward)
# ----------------------------------------------------------------------------
def cvae_forward(params, x_nchw, eps):
    B, C, H, W = x_nchw.shape
    k_pad = params["enc1"]["w"].shape[1]            # 32 (9*C padded)

    # im2col, transposed (channels-first): rows = (tap, cin), cols = (b, h, w).
    # ~64 KiB of XLA glue; negligible DMA (review item 3).
    xp = jnp.pad(x_nchw, ((0, 0), (0, 0), (1, 1), (1, 1)))
    taps = [xp[:, :, dy:dy + H, dx:dx + W] for dy in range(3) for dx in range(3)]
    pt = jnp.stack(taps, axis=0).transpose(0, 2, 1, 3, 4).reshape(9 * C, B * H * W)
    pt = jnp.pad(pt, ((0, k_pad - 9 * C), (0, 0)))

    out_bc, z, zm, zs = cvae_call(pt, eps, params)
    out = out_bc.reshape(B, -1, H, W)               # contiguous -> free reshape
    return out, z[0], zm[0], zs[0]


# ----------------------------------------------------------------------------
# Deterministic synthetic parameters ("module" layout) + kernel repacking
# ----------------------------------------------------------------------------
def init_params(key, *, ch_sz=3, last_conv=4, B=2, H=16, W=16,
                hidden=256, z_size=64):
    """Synthetic params in module layout: conv w (kh,kw,Cin,Cout); linear w
    (in,out) with flat dims in torch NCHW order (matching flatten/reshape);
    BatchNorm params per-channel (C,)."""
    flat = B * last_conv * H * W
    keys = iter(jax.random.split(key, 64))

    def bn(c):
        return dict(
            gamma=1.0 + 0.1 * jax.random.normal(next(keys), (c,), jnp.float32),
            beta=0.1 * jax.random.normal(next(keys), (c,), jnp.float32),
            mean=0.1 * jax.random.normal(next(keys), (c,), jnp.float32),
            var=1.0 + 0.1 * jnp.abs(jax.random.normal(next(keys), (c,), jnp.float32)),
        )

    def convbn(cin, cout, k):
        scale = 1.0 / jnp.sqrt(float(cin * k * k))
        return dict(
            w=scale * jax.random.normal(next(keys), (k, k, cin, cout), jnp.float32),
            b=0.1 * jax.random.normal(next(keys), (cout,), jnp.float32),
            **bn(cout),
        )

    def linear(din, dout):
        scale = 1.0 / jnp.sqrt(float(din))
        return dict(
            w=scale * jax.random.normal(next(keys), (din, dout), jnp.float32),
            b=0.1 * jax.random.normal(next(keys), (dout,), jnp.float32),
        )

    return dict(
        enc1=convbn(ch_sz, 64, 3), enc2=convbn(64, 16, 1),
        enc3=convbn(16, last_conv, 1),
        m1=linear(flat, hidden),
        zmean=linear(hidden, z_size), zstdev=linear(hidden, z_size),
        expand_z=linear(z_size, hidden),
        m2=linear(hidden, flat),
        dec1=convbn(last_conv, 16, 1), dec2=convbn(16, 64, 1),
        dec3=convbn(64, ch_sz, 1),
    )


def prepare_params(raw, *, B, H, W, last_conv, k_pad=32):
    """One-time host-side repacking (free at runtime):
       * eval BatchNorm folded to per-channel scale s / shift t
       * conv weights flattened channels-first (Cout, K); 3x3 K padded 27->32
       * biases/s/t as column vectors (C, 1) (channels live in sublanes)
       * m1 re-blocked to (last_conv, B*HW, hidden) and m2 to
         (B*last_conv, hidden, HW), reproducing torch's NCHW flatten/reshape
         with zero in-kernel reshapes; both cast to bf16 (HBM bandwidth)."""
    HW = H * W

    def fold_bn(p):
        s = p["gamma"] * jax.lax.rsqrt(p["var"] + BN_EPS)
        t = p["beta"] - p["mean"] * s
        return s, t

    def conv_cf(p):
        w = p["w"]
        kh, kw, cin, cout = w.shape
        wT = w.transpose(3, 0, 1, 2).reshape(cout, kh * kw * cin)
        if kh * kw > 1:                               # pad im2col K to 32
            wT = jnp.pad(wT, ((0, 0), (0, k_pad - kh * kw * cin)))
        s, t = fold_bn(p)
        return dict(w=wT, b=p["b"].reshape(cout, 1),
                    s=s.reshape(cout, 1), t=t.reshape(cout, 1))

    def linear(p):
        return dict(w=p["w"], b=p["b"].reshape(1, -1))

    out = {k: conv_cf(raw[k])
           for k in ("enc1", "enc2", "enc3", "dec1", "dec2", "dec3")}
    out["zmean"] = linear(raw["zmean"])
    out["zstdev"] = linear(raw["zstdev"])
    out["expand_z"] = linear(raw["expand_z"])

    flat, hidden = raw["m1"]["w"].shape
    # m1 rows (torch NCHW-flat) -> (last_conv, B*HW, hidden)
    wm1 = (raw["m1"]["w"].reshape(B, last_conv, HW, hidden)
           .transpose(1, 0, 2, 3).reshape(last_conv, B * HW, hidden))
    out["m1"] = dict(w=wm1.astype(jnp.bfloat16),
                     b=raw["m1"]["b"].reshape(1, hidden))
    # m2 columns (torch NCHW-flat) -> (B*last_conv, hidden, HW)
    wm2 = raw["m2"]["w"].reshape(hidden, B * last_conv, HW).transpose(1, 0, 2)
    bm2 = raw["m2"]["b"].reshape(B * last_conv, HW)
    out["m2"] = dict(w=wm2.astype(jnp.bfloat16), b=bm2)
    return out


if __name__ == "__main__":
    B, C, H, W = 2, 3, 16, 16        # spatial scaled down from the 300x400 original
    z_size, hidden, last_conv = 64, 256, 4

    root = jax.random.PRNGKey(0)
    kp, kx, ke = jax.random.split(root, 3)
    raw = init_params(kp, ch_sz=C, last_conv=last_conv, B=B, H=H, W=W,
                      hidden=hidden, z_size=z_size)
    params = prepare_params(raw, B=B, H=H, W=W, last_conv=last_conv)

    x = jax.random.normal(kx, (B, C, H, W), jnp.float32)
    # TODO(synk): torch.randn_like inside bottleneck replaced by host-side eps.
    eps = jax.random.normal(ke, (1, z_size), jnp.float32)

    fwd = jax.jit(cvae_forward)
    out, z, z_mean, z_stdev = fwd(params, x, eps)
    jax.block_until_ready((out, z, z_mean, z_stdev))

    assert out.shape == (B, C, H, W) and out.dtype == jnp.float32
    assert z.shape == (z_size,)
    assert z_mean.shape == (z_size,)
    assert z_stdev.shape == (z_size,)
    assert bool(jnp.all(jnp.isfinite(out)))
    assert bool(jnp.all(jnp.isfinite(z)))
    print("KERNEL_OK")
</pallas_src>

<mosaic_0001>
module attributes {stable_mosaic.version = 11 : i64} {
  func.func @cvae_kernel(%arg0: memref<32x512xf32, #tpu.memory_space<vmem>>, %arg1: memref<64x32xf32, #tpu.memory_space<vmem>>, %arg2: memref<64x1xf32, #tpu.memory_space<vmem>>, %arg3: memref<64x1xf32, #tpu.memory_space<vmem>>, %arg4: memref<64x1xf32, #tpu.memory_space<vmem>>, %arg5: memref<16x64xf32, #tpu.memory_space<vmem>>, %arg6: memref<16x1xf32, #tpu.memory_space<vmem>>, %arg7: memref<16x1xf32, #tpu.memory_space<vmem>>, %arg8: memref<16x1xf32, #tpu.memory_space<vmem>>, %arg9: memref<4x16xf32, #tpu.memory_space<vmem>>, %arg10: memref<4x1xf32, #tpu.memory_space<vmem>>, %arg11: memref<4x1xf32, #tpu.memory_space<vmem>>, %arg12: memref<4x1xf32, #tpu.memory_space<vmem>>, %arg13: memref<1x64xf32, #tpu.memory_space<vmem>>, %arg14: memref<4x512x256xbf16, #tpu.memory_space<any>>, %arg15: memref<1x256xf32, #tpu.memory_space<vmem>>, %arg16: memref<256x64xf32, #tpu.memory_space<vmem>>, %arg17: memref<1x64xf32, #tpu.memory_space<vmem>>, %arg18: memref<256x64xf32, #tpu.memory_space<vmem>>, %arg19: memref<1x64xf32, #tpu.memory_space<vmem>>, %arg20: memref<64x256xf32, #tpu.memory_space<vmem>>, %arg21: memref<1x256xf32, #tpu.memory_space<vmem>>, %arg22: memref<8x256x256xbf16, #tpu.memory_space<any>>, %arg23: memref<8x256xf32, #tpu.memory_space<vmem>>, %arg24: memref<16x4xf32, #tpu.memory_space<vmem>>, %arg25: memref<16x1xf32, #tpu.memory_space<vmem>>, %arg26: memref<16x1xf32, #tpu.memory_space<vmem>>, %arg27: memref<16x1xf32, #tpu.memory_space<vmem>>, %arg28: memref<64x16xf32, #tpu.memory_space<vmem>>, %arg29: memref<64x1xf32, #tpu.memory_space<vmem>>, %arg30: memref<64x1xf32, #tpu.memory_space<vmem>>, %arg31: memref<64x1xf32, #tpu.memory_space<vmem>>, %arg32: memref<3x64xf32, #tpu.memory_space<vmem>>, %arg33: memref<3x1xf32, #tpu.memory_space<vmem>>, %arg34: memref<3x1xf32, #tpu.memory_space<vmem>>, %arg35: memref<3x1xf32, #tpu.memory_space<vmem>>, %arg36: memref<2x3x256xf32, #tpu.memory_space<vmem>>, %arg37: memref<1x64xf32, #tpu.memory_space<vmem>>, %arg38: memref<1x64xf32, #tpu.memory_space<vmem>>, %arg39: memref<1x64xf32, #tpu.memory_space<vmem>>, %arg40: memref<4x512x256xbf16, #tpu.memory_space<vmem>>, %arg41: memref<8x256x256xbf16, #tpu.memory_space<vmem>>, %arg42: memref<2x!tpu.dma_semaphore, #tpu.memory_space<semaphore_mem>>) attributes {dimension_semantics = [], scalar_prefetch = 0 : i64, scratch_operands = 3 : i64, tpu.core_type = #tpu.core_type<tc>} {
    %c0_i32 = arith.constant 0 : i32
    %0 = tpu.memref_slice %arg42[%c0_i32] : memref<2x!tpu.dma_semaphore, #tpu.memory_space<semaphore_mem>> -> memref<1x!tpu.dma_semaphore, #tpu.memory_space<semaphore_mem>>
    %1 = tpu.memref_squeeze %0 : memref<1x!tpu.dma_semaphore, #tpu.memory_space<semaphore_mem>> -> memref<!tpu.dma_semaphore, #tpu.memory_space<semaphore_mem>>
    tpu.enqueue_dma source(%arg14 : memref<4x512x256xbf16, #tpu.memory_space<any>>) target(%arg40 : memref<4x512x256xbf16, #tpu.memory_space<vmem>>) target_semaphore(%1 : memref<!tpu.dma_semaphore, #tpu.memory_space<semaphore_mem>>)
    %c1_i32 = arith.constant 1 : i32
    %2 = tpu.memref_slice %arg42[%c1_i32] : memref<2x!tpu.dma_semaphore, #tpu.memory_space<semaphore_mem>> -> memref<1x!tpu.dma_semaphore, #tpu.memory_space<semaphore_mem>>
    %3 = tpu.memref_squeeze %2 : memref<1x!tpu.dma_semaphore, #tpu.memory_space<semaphore_mem>> -> memref<!tpu.dma_semaphore, #tpu.memory_space<semaphore_mem>>
    tpu.enqueue_dma source(%arg22 : memref<8x256x256xbf16, #tpu.memory_space<any>>) target(%arg41 : memref<8x256x256xbf16, #tpu.memory_space<vmem>>) target_semaphore(%3 : memref<!tpu.dma_semaphore, #tpu.memory_space<semaphore_mem>>)
    %c0 = arith.constant 0 : index
    %c0_0 = arith.constant 0 : index
    %4 = vector.load %arg1[%c0, %c0_0] : memref<64x32xf32, #tpu.memory_space<vmem>>, vector<64x32xf32>
    %c0_1 = arith.constant 0 : index
    %c0_2 = arith.constant 0 : index
    %5 = vector.load %arg0[%c0_1, %c0_2] : memref<32x512xf32, #tpu.memory_space<vmem>>, vector<32x512xf32>
    %cst = arith.constant dense<0.000000e+00> : vector<64x512xf32>
    %6 = tpu.matmul %4, %5, %cst {dimension_numbers = #tpu.dot_dimension_numbers<[1], [0], [0], [1], [0, 0, 1, 1], [], []>} : vector<64x32xf32>, vector<32x512xf32>, vector<64x512xf32> -> vector<64x512xf32>
    %c0_3 = arith.constant 0 : index
    %c0_4 = arith.constant 0 : index
    %7 = vector.load %arg2[%c0_3, %c0_4] : memref<64x1xf32, #tpu.memory_space<vmem>>, vector<64x1xf32>
    %8 = vector.broadcast %7 : vector<64x1xf32> to vector<64x512xf32>
    %9 = arith.addf %6, %8 : vector<64x512xf32>
    %cst_5 = arith.constant 0.000000e+00 : f32
    %10 = vector.broadcast %cst_5 : f32 to vector<64x512xf32>
    %11 = arith.maximumf %9, %10 : vector<64x512xf32>
    %c0_6 = arith.constant 0 : index
    %c0_7 = arith.constant 0 : index
    %12 = vector.load %arg3[%c0_6, %c0_7] : memref<64x1xf32, #tpu.memory_space<vmem>>, vector<64x1xf32>
    %13 = vector.broadcast %12 : vector<64x1xf32> to vector<64x512xf32>
    %14 = arith.mulf %11, %13 : vector<64x512xf32>
    %c0_8 = arith.constant 0 : index
    %c0_9 = arith.constant 0 : index
    %15 = vector.load %arg4[%c0_8, %c0_9] : memref<64x1xf32, #tpu.memory_space<vmem>>, vector<64x1xf32>
    %16 = vector.broadcast %15 : vector<64x1xf32> to vector<64x512xf32>
    %17 = arith.addf %14, %16 : vector<64x512xf32>
    %c0_10 = arith.constant 0 : index
    %c0_11 = arith.constant 0 : index
    %18 = vector.load %arg5[%c0_10, %c0_11] : memref<16x64xf32, #tpu.memory_space<vmem>>, vector<16x64xf32>
    %cst_12 = arith.constant dense<0.000000e+00> : vector<16x512xf32>
    %19 = tpu.matmul %18, %17, %cst_12 {dimension_numbers = #tpu.dot_dimension_numbers<[1], [0], [0], [1], [0, 0, 1, 1], [], []>} : vector<16x64xf32>, vector<64x512xf32>, vector<16x512xf32> -> vector<16x512xf32>
    %c0_13 = arith.constant 0 : index
    %c0_14 = arith.constant 0 : index
    %20 = vector.load %arg6[%c0_13, %c0_14] : memref<16x1xf32, #tpu.memory_space<vmem>>, vector<16x1xf32>
    %21 = vector.broadcast %20 : vector<16x1xf32> to vector<16x512xf32>
    %22 = arith.addf %19, %21 : vector<16x512xf32>
    %cst_15 = arith.constant 0.000000e+00 : f32
    %23 = vector.broadcast %cst_15 : f32 to vector<16x512xf32>
    %24 = arith.maximumf %22, %23 : vector<16x512xf32>
    %c0_16 = arith.constant 0 : index
    %c0_17 = arith.constant 0 : index
    %25 = vector.load %arg7[%c0_16, %c0_17] : memref<16x1xf32, #tpu.memory_space<vmem>>, vector<16x1xf32>
    %26 = vector.broadcast %25 : vector<16x1xf32> to vector<16x512xf32>
    %27 = arith.mulf %24, %26 : vector<16x512xf32>
    %c0_18 = arith.constant 0 : index
    %c0_19 = arith.constant 0 : index
    %28 = vector.load %arg8[%c0_18, %c0_19] : memref<16x1xf32, #tpu.memory_space<vmem>>, vector<16x1xf32>
    %29 = vector.broadcast %28 : vector<16x1xf32> to vector<16x512xf32>
    %30 = arith.addf %27, %29 : vector<16x512xf32>
    %c0_20 = arith.constant 0 : index
    %c0_21 = arith.constant 0 : index
    %31 = vector.load %arg9[%c0_20, %c0_21] : memref<4x16xf32, #tpu.memory_space<vmem>>, vector<4x16xf32>
    %cst_22 = arith.constant dense<0.000000e+00> : vector<4x512xf32>
    %32 = tpu.matmul %31, %30, %cst_22 {dimension_numbers = #tpu.dot_dimension_numbers<[1], [0], [0], [1], [0, 0, 1, 1], [], []>} : vector<4x16xf32>, vector<16x512xf32>, vector<4x512xf32> -> vector<4x512xf32>
    %c0_23 = arith.constant 0 : index
    %c0_24 = arith.constant 0 : index
    %33 = vector.load %arg10[%c0_23, %c0_24] : memref<4x1xf32, #tpu.memory_space<vmem>>, vector<4x1xf32>
    %34 = vector.broadcast %33 : vector<4x1xf32> to vector<4x512xf32>
    %35 = arith.addf %32, %34 : vector<4x512xf32>
    %cst_25 = arith.constant 0.000000e+00 : f32
    %36 = vector.broadcast %cst_25 : f32 to vector<4x512xf32>
    %37 = arith.maximumf %35, %36 : vector<4x512xf32>
    %c0_26 = arith.constant 0 : index
    %c0_27 = arith.constant 0 : index
    %38 = vector.load %arg11[%c0_26, %c0_27] : memref<4x1xf32, #tpu.memory_space<vmem>>, vector<4x1xf32>
    %39 = vector.broadcast %38 : vector<4x1xf32> to vector<4x512xf32>
    %40 = arith.mulf %37, %39 : vector<4x512xf32>
    %c0_28 = arith.constant 0 : index
    %c0_29 = arith.constant 0 : index
    %41 = vector.load %arg12[%c0_28, %c0_29] : memref<4x1xf32, #tpu.memory_space<vmem>>, vector<4x1xf32>
    %42 = vector.broadcast %41 : vector<4x1xf32> to vector<4x512xf32>
    %43 = arith.addf %40, %42 : vector<4x512xf32>
    %c0_i32_30 = arith.constant 0 : i32
    %44 = tpu.memref_slice %arg42[%c0_i32_30] : memref<2x!tpu.dma_semaphore, #tpu.memory_space<semaphore_mem>> -> memref<1x!tpu.dma_semaphore, #tpu.memory_space<semaphore_mem>>
    %45 = tpu.memref_squeeze %44 : memref<1x!tpu.dma_semaphore, #tpu.memory_space<semaphore_mem>> -> memref<!tpu.dma_semaphore, #tpu.memory_space<semaphore_mem>>
    tpu.wait_dma2 semaphore(%45 : memref<!tpu.dma_semaphore, #tpu.memory_space<semaphore_mem>>) src(%arg14 : memref<4x512x256xbf16, #tpu.memory_space<any>>) dst(%arg40 : memref<4x512x256xbf16, #tpu.memory_space<vmem>>)
    %c0_31 = arith.constant 0 : index
    %c0_32 = arith.constant 0 : index
    %46 = vector.load %arg15[%c0_31, %c0_32] : memref<1x256xf32, #tpu.memory_space<vmem>>, vector<1x256xf32>
    %47 = vector.extract_strided_slice %43 {offsets = [0, 0], sizes = [1, 512], strides = [1, 1]} : vector<4x512xf32> to vector<1x512xf32>
    %48 = arith.truncf %47 : vector<1x512xf32> to vector<1x512xbf16>
    %c0_33 = arith.constant 0 : index
    %c0_34 = arith.constant 0 : index
    %c0_35 = arith.constant 0 : index
    %49 = vector.load %arg40[%c0_33, %c0_34, %c0_35] : memref<4x512x256xbf16, #tpu.memory_space<vmem>>, vector<1x512x256xbf16>
    %50 = vector.shape_cast %49 : vector<1x512x256xbf16> to vector<512x256xbf16>
    %cst_36 = arith.constant dense<0.000000e+00> : vector<1x256xf32>
    %51 = tpu.matmul %48, %50, %cst_36 {dimension_numbers = #tpu.dot_dimension_numbers<[1], [0], [0], [1], [0, 0, 1, 1], [], []>} : vector<1x512xbf16>, vector<512x256xbf16>, vector<1x256xf32> -> vector<1x256xf32>
    %52 = arith.addf %46, %51 : vector<1x256xf32>
    %53 = vector.extract_strided_slice %43 {offsets = [1, 0], sizes = [1, 512], strides = [1, 1]} : vector<4x512xf32> to vector<1x512xf32>
    %54 = arith.truncf %53 : vector<1x512xf32> to vector<1x512xbf16>
    %c1 = arith.constant 1 : index
    %c0_37 = arith.constant 0 : index
    %c0_38 = arith.constant 0 : index
    %55 = vector.load %arg40[%c1, %c0_37, %c0_38] : memref<4x512x256xbf16, #tpu.memory_space<vmem>>, vector<1x512x256xbf16>
    %56 = vector.shape_cast %55 : vector<1x512x256xbf16> to vector<512x256xbf16>
    %cst_39 = arith.constant dense<0.000000e+00> : vector<1x256xf32>
    %57 = tpu.matmul %54, %56, %cst_39 {dimension_numbers = #tpu.dot_dimension_numbers<[1], [0], [0], [1], [0, 0, 1, 1], [], []>} : vector<1x512xbf16>, vector<512x256xbf16>, vector<1x256xf32> -> vector<1x256xf32>
    %58 = arith.addf %52, %57 : vector<1x256xf32>
    %59 = vector.extract_strided_slice %43 {offsets = [2, 0], sizes = [1, 512], strides = [1, 1]} : vector<4x512xf32> to vector<1x512xf32>
    %60 = arith.truncf %59 : vector<1x512xf32> to vector<1x512xbf16>
    %c2 = arith.constant 2 : index
    %c0_40 = arith.constant 0 : index
    %c0_41 = arith.constant 0 : index
    %61 = vector.load %arg40[%c2, %c0_40, %c0_41] : memref<4x512x256xbf16, #tpu.memory_space<vmem>>, vector<1x512x256xbf16>
    %62 = vector.shape_cast %61 : vector<1x512x256xbf16> to vector<512x256xbf16>
    %cst_42 = arith.constant dense<0.000000e+00> : vector<1x256xf32>
    %63 = tpu.matmul %60, %62, %cst_42 {dimension_numbers = #tpu.dot_dimension_numbers<[1], [0], [0], [1], [0, 0, 1, 1], [], []>} : vector<1x512xbf16>, vector<512x256xbf16>, vector<1x256xf32> -> vector<1x256xf32>
    %64 = arith.addf %58, %63 : vector<1x256xf32>
    %65 = vector.extract_strided_slice %43 {offsets = [3, 0], sizes = [1, 512], strides = [1, 1]} : vector<4x512xf32> to vector<1x512xf32>
    %66 = arith.truncf %65 : vector<1x512xf32> to vector<1x512xbf16>
    %c3 = arith.constant 3 : index
    %c0_43 = arith.constant 0 : index
    %c0_44 = arith.constant 0 : index
    %67 = vector.load %arg40[%c3, %c0_43, %c0_44] : memref<4x512x256xbf16, #tpu.memory_space<vmem>>, vector<1x512x256xbf16>
    %68 = vector.shape_cast %67 : vector<1x512x256xbf16> to vector<512x256xbf16>
    %cst_45 = arith.constant dense<0.000000e+00> : vector<1x256xf32>
    %69 = tpu.matmul %66, %68, %cst_45 {dimension_numbers = #tpu.dot_dimension_numbers<[1], [0], [0], [1], [0, 0, 1, 1], [], []>} : vector<1x512xbf16>, vector<512x256xbf16>, vector<1x256xf32> -> vector<1x256xf32>
    %70 = arith.addf %64, %69 : vector<1x256xf32>
    %cst_46 = arith.constant 0.000000e+00 : f32
    %71 = vector.broadcast %cst_46 : f32 to vector<1x256xf32>
    %72 = arith.maximumf %70, %71 : vector<1x256xf32>
    %c0_47 = arith.constant 0 : index
    %c0_48 = arith.constant 0 : index
    %73 = vector.load %arg16[%c0_47, %c0_48] : memref<256x64xf32, #tpu.memory_space<vmem>>, vector<256x64xf32>
    %cst_49 = arith.constant dense<0.000000e+00> : vector<1x64xf32>
    %74 = tpu.matmul %72, %73, %cst_49 {dimension_numbers = #tpu.dot_dimension_numbers<[1], [0], [0], [1], [0, 0, 1, 1], [], []>} : vector<1x256xf32>, vector<256x64xf32>, vector<1x64xf32> -> vector<1x64xf32>
    %c0_50 = arith.constant 0 : index
    %c0_51 = arith.constant 0 : index
    %75 = vector.load %arg17[%c0_50, %c0_51] : memref<1x64xf32, #tpu.memory_space<vmem>>, vector<1x64xf32>
    %76 = arith.addf %74, %75 : vector<1x64xf32>
    %c0_52 = arith.constant 0 : index
    %c0_53 = arith.constant 0 : index
    %77 = vector.load %arg18[%c0_52, %c0_53] : memref<256x64xf32, #tpu.memory_space<vmem>>, vector<256x64xf32>
    %cst_54 = arith.constant dense<0.000000e+00> : vector<1x64xf32>
    %78 = tpu.matmul %72, %77, %cst_54 {dimension_numbers = #tpu.dot_dimension_numbers<[1], [0], [0], [1], [0, 0, 1, 1], [], []>} : vector<1x256xf32>, vector<256x64xf32>, vector<1x64xf32> -> vector<1x64xf32>
    %c0_55 = arith.constant 0 : index
    %c0_56 = arith.constant 0 : index
    %79 = vector.load %arg19[%c0_55, %c0_56] : memref<1x64xf32, #tpu.memory_space<vmem>>, vector<1x64xf32>
    %80 = arith.addf %78, %79 : vector<1x64xf32>
    %c0_57 = arith.constant 0 : index
    %c0_58 = arith.constant 0 : index
    %81 = vector.load %arg13[%c0_57, %c0_58] : memref<1x64xf32, #tpu.memory_space<vmem>>, vector<1x64xf32>
    %cst_59 = arith.constant 5.000000e-01 : f32
    %82 = vector.broadcast %cst_59 : f32 to vector<1x64xf32>
    %83 = arith.mulf %82, %80 : vector<1x64xf32>
    %84 = math.exp %83 : vector<1x64xf32>
    %85 = arith.mulf %81, %84 : vector<1x64xf32>
    %86 = arith.addf %76, %85 : vector<1x64xf32>
    %c0_60 = arith.constant 0 : index
    %c0_61 = arith.constant 0 : index
    %87 = vector.load %arg37[%c0_60, %c0_61] : memref<1x64xf32, #tpu.memory_space<vmem>>, vector<1x64xf32>
    tpu.vector_store %arg37[%c0_60, %c0_61], %86 {strides = array<i32>} : memref<1x64xf32, #tpu.memory_space<vmem>>, vector<1x64xf32>,
    %c0_62 = arith.constant 0 : index
    %c0_63 = arith.constant 0 : index
    %88 = vector.load %arg38[%c0_62, %c0_63] : memref<1x64xf32, #tpu.memory_space<vmem>>, vector<1x64xf32>
    tpu.vector_store %arg38[%c0_62, %c0_63], %76 {strides = array<i32>} : memref<1x64xf32, #tpu.memory_space<vmem>>, vector<1x64xf32>,
    %c0_64 = arith.constant 0 : index
    %c0_65 = arith.constant 0 : index
    %89 = vector.load %arg39[%c0_64, %c0_65] : memref<1x64xf32, #tpu.memory_space<vmem>>, vector<1x64xf32>
    tpu.vector_store %arg39[%c0_64, %c0_65], %80 {strides = array<i32>} : memref<1x64xf32, #tpu.memory_space<vmem>>, vector<1x64xf32>,
    %c0_66 = arith.constant 0 : index
    %c0_67 = arith.constant 0 : index
    %90 = vector.load %arg20[%c0_66, %c0_67] : memref<64x256xf32, #tpu.memory_space<vmem>>, vector<64x256xf32>
    %cst_68 = arith.constant dense<0.000000e+00> : vector<1x256xf32>
    %91 = tpu.matmul %86, %90, %cst_68 {dimension_numbers = #tpu.dot_dimension_numbers<[1], [0], [0], [1], [0, 0, 1, 1], [], []>} : vector<1x64xf32>, vector<64x256xf32>, vector<1x256xf32> -> vector<1x256xf32>
    %c0_69 = arith.constant 0 : index
    %c0_70 = arith.constant 0 : index
    %92 = vector.load %arg21[%c0_69, %c0_70] : memref<1x256xf32, #tpu.memory_space<vmem>>, vector<1x256xf32>
    %93 = arith.addf %91, %92 : vector<1x256xf32>
    %c1_i32_71 = arith.constant 1 : i32
    %94 = tpu.memref_slice %arg42[%c1_i32_71] : memref<2x!tpu.dma_semaphore, #tpu.memory_space<semaphore_mem>> -> memref<1x!tpu.dma_semaphore, #tpu.memory_space<semaphore_mem>>
    %95 = tpu.memref_squeeze %94 : memref<1x!tpu.dma_semaphore, #tpu.memory_space<semaphore_mem>> -> memref<!tpu.dma_semaphore, #tpu.memory_space<semaphore_mem>>
    tpu.wait_dma2 semaphore(%95 : memref<!tpu.dma_semaphore, #tpu.memory_space<semaphore_mem>>) src(%arg22 : memref<8x256x256xbf16, #tpu.memory_space<any>>) dst(%arg41 : memref<8x256x256xbf16, #tpu.memory_space<vmem>>)
    %96 = arith.truncf %93 : vector<1x256xf32> to vector<1x256xbf16>
    %c0_72 = arith.constant 0 : index
    %c0_73 = arith.constant 0 : index
    %c0_74 = arith.constant 0 : index
    %97 = vector.load %arg41[%c0_72, %c0_73, %c0_74] : memref<8x256x256xbf16, #tpu.memory_space<vmem>>, vector<1x256x256xbf16>
    %98 = vector.shape_cast %97 : vector<1x256x256xbf16> to vector<256x256xbf16>
    %cst_75 = arith.constant dense<0.000000e+00> : vector<1x256xf32>
    %99 = tpu.matmul %96, %98, %cst_75 {dimension_numbers = #tpu.dot_dimension_numbers<[1], [0], [0], [1], [0, 0, 1, 1], [], []>} : vector<1x256xbf16>, vector<256x256xbf16>, vector<1x256xf32> -> vector<1x256xf32>
    %c0_76 = arith.constant 0 : index
    %c0_77 = arith.constant 0 : index
    %100 = vector.load %arg23[%c0_76, %c0_77] : memref<8x256xf32, #tpu.memory_space<vmem>>, vector<1x256xf32>
    %101 = arith.addf %99, %100 : vector<1x256xf32>
    %cst_78 = arith.constant 0.000000e+00 : f32
    %102 = vector.broadcast %cst_78 : f32 to vector<1x256xf32>
    %103 = arith.maximumf %101, %102 : vector<1x256xf32>
    %c1_79 = arith.constant 1 : index
    %c0_80 = arith.constant 0 : index
    %c0_81 = arith.constant 0 : index
    %104 = vector.load %arg41[%c1_79, %c0_80, %c0_81] : memref<8x256x256xbf16, #tpu.memory_space<vmem>>, vector<1x256x256xbf16>
    %105 = vector.shape_cast %104 : vector<1x256x256xbf16> to vector<256x256xbf16>
    %cst_82 = arith.constant dense<0.000000e+00> : vector<1x256xf32>
    %106 = tpu.matmul %96, %105, %cst_82 {dimension_numbers = #tpu.dot_dimension_numbers<[1], [0], [0], [1], [0, 0, 1, 1], [], []>} : vector<1x256xbf16>, vector<256x256xbf16>, vector<1x256xf32> -> vector<1x256xf32>
    %c1_83 = arith.constant 1 : index
    %c0_84 = arith.constant 0 : index
    %107 = vector.load %arg23[%c1_83, %c0_84] : memref<8x256xf32, #tpu.memory_space<vmem>>, vector<1x256xf32>
    %108 = arith.addf %106, %107 : vector<1x256xf32>
    %cst_85 = arith.constant 0.000000e+00 : f32
    %109 = vector.broadcast %cst_85 : f32 to vector<1x256xf32>
    %110 = arith.maximumf %108, %109 : vector<1x256xf32>
    %c2_86 = arith.constant 2 : index
    %c0_87 = arith.constant 0 : index
    %c0_88 = arith.constant 0 : index
    %111 = vector.load %arg41[%c2_86, %c0_87, %c0_88] : memref<8x256x256xbf16, #tpu.memory_space<vmem>>, vector<1x256x256xbf16>
    %112 = vector.shape_cast %111 : vector<1x256x256xbf16> to vector<256x256xbf16>
    %cst_89 = arith.constant dense<0.000000e+00> : vector<1x256xf32>
    %113 = tpu.matmul %96, %112, %cst_89 {dimension_numbers = #tpu.dot_dimension_numbers<[1], [0], [0], [1], [0, 0, 1, 1], [], []>} : vector<1x256xbf16>, vector<256x256xbf16>, vector<1x256xf32> -> vector<1x256xf32>
    %c2_90 = arith.constant 2 : index
    %c0_91 = arith.constant 0 : index
    %114 = vector.load %arg23[%c2_90, %c0_91] : memref<8x256xf32, #tpu.memory_space<vmem>>, vector<1x256xf32>
    %115 = arith.addf %113, %114 : vector<1x256xf32>
    %cst_92 = arith.constant 0.000000e+00 : f32
    %116 = vector.broadcast %cst_92 : f32 to vector<1x256xf32>
    %117 = arith.maximumf %115, %116 : vector<1x256xf32>
    %c3_93 = arith.constant 3 : index
    %c0_94 = arith.constant 0 : index
    %c0_95 = arith.constant 0 : index
    %118 = vector.load %arg41[%c3_93, %c0_94, %c0_95] : memref<8x256x256xbf16, #tpu.memory_space<vmem>>, vector<1x256x256xbf16>
    %119 = vector.shape_cast %118 : vector<1x256x256xbf16> to vector<256x256xbf16>
    %cst_96 = arith.constant dense<0.000000e+00> : vector<1x256xf32>
    %120 = tpu.matmul %96, %119, %cst_96 {dimension_numbers = #tpu.dot_dimension_numbers<[1], [0], [0], [1], [0, 0, 1, 1], [], []>} : vector<1x256xbf16>, vector<256x256xbf16>, vector<1x256xf32> -> vector<1x256xf32>
    %c3_97 = arith.constant 3 : index
    %c0_98 = arith.constant 0 : index
    %121 = vector.load %arg23[%c3_97, %c0_98] : memref<8x256xf32, #tpu.memory_space<vmem>>, vector<1x256xf32>
    %122 = arith.addf %120, %121 : vector<1x256xf32>
    %cst_99 = arith.constant 0.000000e+00 : f32
    %123 = vector.broadcast %cst_99 : f32 to vector<1x256xf32>
    %124 = arith.maximumf %122, %123 : vector<1x256xf32>
    %c4 = arith.constant 4 : index
    %c0_100 = arith.constant 0 : index
    %c0_101 = arith.constant 0 : index
    %125 = vector.load %arg41[%c4, %c0_100, %c0_101] : memref<8x256x256xbf16, #tpu.memory_space<vmem>>, vector<1x256x256xbf16>
    %126 = vector.shape_cast %125 : vector<1x256x256xbf16> to vector<256x256xbf16>
    %cst_102 = arith.constant dense<0.000000e+00> : vector<1x256xf32>
    %127 = tpu.matmul %96, %126, %cst_102 {dimension_numbers = #tpu.dot_dimension_numbers<[1], [0], [0], [1], [0, 0, 1, 1], [], []>} : vector<1x256xbf16>, vector<256x256xbf16>, vector<1x256xf32> -> vector<1x256xf32>
    %c4_103 = arith.constant 4 : index
    %c0_104 = arith.constant 0 : index
    %128 = vector.load %arg23[%c4_103, %c0_104] : memref<8x256xf32, #tpu.memory_space<vmem>>, vector<1x256xf32>
    %129 = arith.addf %127, %128 : vector<1x256xf32>
    %cst_105 = arith.constant 0.000000e+00 : f32
    %130 = vector.broadcast %cst_105 : f32 to vector<1x256xf32>
    %131 = arith.maximumf %129, %130 : vector<1x256xf32>
    %c5 = arith.constant 5 : index
    %c0_106 = arith.constant 0 : index
    %c0_107 = arith.constant 0 : index
    %132 = vector.load %arg41[%c5, %c0_106, %c0_107] : memref<8x256x256xbf16, #tpu.memory_space<vmem>>, vector<1x256x256xbf16>
    %133 = vector.shape_cast %132 : vector<1x256x256xbf16> to vector<256x256xbf16>
    %cst_108 = arith.constant dense<0.000000e+00> : vector<1x256xf32>
    %134 = tpu.matmul %96, %133, %cst_108 {dimension_numbers = #tpu.dot_dimension_numbers<[1], [0], [0], [1], [0, 0, 1, 1], [], []>} : vector<1x256xbf16>, vector<256x256xbf16>, vector<1x256xf32> -> vector<1x256xf32>
    %c5_109 = arith.constant 5 : index
    %c0_110 = arith.constant 0 : index
    %135 = vector.load %arg23[%c5_109, %c0_110] : memref<8x256xf32, #tpu.memory_space<vmem>>, vector<1x256xf32>
    %136 = arith.addf %134, %135 : vector<1x256xf32>
    %cst_111 = arith.constant 0.000000e+00 : f32
    %137 = vector.broadcast %cst_111 : f32 to vector<1x256xf32>
    %138 = arith.maximumf %136, %137 : vector<1x256xf32>
    %c6 = arith.constant 6 : index
    %c0_112 = arith.constant 0 : index
    %c0_113 = arith.constant 0 : index
    %139 = vector.load %arg41[%c6, %c0_112, %c0_113] : memref<8x256x256xbf16, #tpu.memory_space<vmem>>, vector<1x256x256xbf16>
    %140 = vector.shape_cast %139 : vector<1x256x256xbf16> to vector<256x256xbf16>
    %cst_114 = arith.constant dense<0.000000e+00> : vector<1x256xf32>
    %141 = tpu.matmul %96, %140, %cst_114 {dimension_numbers = #tpu.dot_dimension_numbers<[1], [0], [0], [1], [0, 0, 1, 1], [], []>} : vector<1x256xbf16>, vector<256x256xbf16>, vector<1x256xf32> -> vector<1x256xf32>
    %c6_115 = arith.constant 6 : index
    %c0_116 = arith.constant 0 : index
    %142 = vector.load %arg23[%c6_115, %c0_116] : memref<8x256xf32, #tpu.memory_space<vmem>>, vector<1x256xf32>
    %143 = arith.addf %141, %142 : vector<1x256xf32>
    %cst_117 = arith.constant 0.000000e+00 : f32
    %144 = vector.broadcast %cst_117 : f32 to vector<1x256xf32>
    %145 = arith.maximumf %143, %144 : vector<1x256xf32>
    %c7 = arith.constant 7 : index
    %c0_118 = arith.constant 0 : index
    %c0_119 = arith.constant 0 : index
    %146 = vector.load %arg41[%c7, %c0_118, %c0_119] : memref<8x256x256xbf16, #tpu.memory_space<vmem>>, vector<1x256x256xbf16>
    %147 = vector.shape_cast %146 : vector<1x256x256xbf16> to vector<256x256xbf16>
    %cst_120 = arith.constant dense<0.000000e+00> : vector<1x256xf32>
    %148 = tpu.matmul %96, %147, %cst_120 {dimension_numbers = #tpu.dot_dimension_numbers<[1], [0], [0], [1], [0, 0, 1, 1], [], []>} : vector<1x256xbf16>, vector<256x256xbf16>, vector<1x256xf32> -> vector<1x256xf32>
    %c7_121 = arith.constant 7 : index
    %c0_122 = arith.constant 0 : index
    %149 = vector.load %arg23[%c7_121, %c0_122] : memref<8x256xf32, #tpu.memory_space<vmem>>, vector<1x256xf32>
    %150 = arith.addf %148, %149 : vector<1x256xf32>
    %cst_123 = arith.constant 0.000000e+00 : f32
    %151 = vector.broadcast %cst_123 : f32 to vector<1x256xf32>
    %152 = arith.maximumf %150, %151 : vector<1x256xf32>
    %153 = tpu.concatenate %103, %110, %117, %124 in 0 : vector<1x256xf32>, vector<1x256xf32>, vector<1x256xf32>, vector<1x256xf32> -> vector<4x256xf32>
    %c0_124 = arith.constant 0 : index
    %c0_125 = arith.constant 0 : index
    %154 = vector.load %arg24[%c0_124, %c0_125] : memref<16x4xf32, #tpu.memory_space<vmem>>, vector<16x4xf32>
    %cst_126 = arith.constant dense<0.000000e+00> : vector<16x256xf32>
    %155 = tpu.matmul %154, %153, %cst_126 {dimension_numbers = #tpu.dot_dimension_numbers<[1], [0], [0], [1], [0, 0, 1, 1], [], []>} : vector<16x4xf32>, vector<4x256xf32>, vector<16x256xf32> -> vector<16x256xf32>
    %c0_127 = arith.constant 0 : index
    %c0_128 = arith.constant 0 : index
    %156 = vector.load %arg25[%c0_127, %c0_128] : memref<16x1xf32, #tpu.memory_space<vmem>>, vector<16x1xf32>
    %157 = vector.broadcast %156 : vector<16x1xf32> to vector<16x256xf32>
    %158 = arith.addf %155, %157 : vector<16x256xf32>
    %cst_129 = arith.constant 0.000000e+00 : f32
    %159 = vector.broadcast %cst_129 : f32 to vector<16x256xf32>
    %160 = arith.maximumf %158, %159 : vector<16x256xf32>
    %c0_130 = arith.constant 0 : index
    %c0_131 = arith.constant 0 : index
    %161 = vector.load %arg26[%c0_130, %c0_131] : memref<16x1xf32, #tpu.memory_space<vmem>>, vector<16x1xf32>
    %162 = vector.broadcast %161 : vector<16x1xf32> to vector<16x256xf32>
    %163 = arith.mulf %160, %162 : vector<16x256xf32>
    %c0_132 = arith.constant 0 : index
    %c0_133 = arith.constant 0 : index
    %164 = vector.load %arg27[%c0_132, %c0_133] : memref<16x1xf32, #tpu.memory_space<vmem>>, vector<16x1xf32>
    %165 = vector.broadcast %164 : vector<16x1xf32> to vector<16x256xf32>
    %166 = arith.addf %163, %165 : vector<16x256xf32>
    %c0_134 = arith.constant 0 : index
    %c0_135 = arith.constant 0 : index
    %167 = vector.load %arg28[%c0_134, %c0_135] : memref<64x16xf32, #tpu.memory_space<vmem>>, vector<64x16xf32>
    %cst_136 = arith.constant dense<0.000000e+00> : vector<64x256xf32>
    %168 = tpu.matmul %167, %166, %cst_136 {dimension_numbers = #tpu.dot_dimension_numbers<[1], [0], [0], [1], [0, 0, 1, 1], [], []>} : vector<64x16xf32>, vector<16x256xf32>, vector<64x256xf32> -> vector<64x256xf32>
    %c0_137 = arith.constant 0 : index
    %c0_138 = arith.constant 0 : index
    %169 = vector.load %arg29[%c0_137, %c0_138] : memref<64x1xf32, #tpu.memory_space<vmem>>, vector<64x1xf32>
    %170 = vector.broadcast %169 : vector<64x1xf32> to vector<64x256xf32>
    %171 = arith.addf %168, %170 : vector<64x256xf32>
    %cst_139 = arith.constant 0.000000e+00 : f32
    %172 = vector.broadcast %cst_139 : f32 to vector<64x256xf32>
    %173 = arith.maximumf %171, %172 : vector<64x256xf32>
    %c0_140 = arith.constant 0 : index
    %c0_141 = arith.constant 0 : index
    %174 = vector.load %arg30[%c0_140, %c0_141] : memref<64x1xf32, #tpu.memory_space<vmem>>, vector<64x1xf32>
    %175 = vector.broadcast %174 : vector<64x1xf32> to vector<64x256xf32>
    %176 = arith.mulf %173, %175 : vector<64x256xf32>
    %c0_142 = arith.constant 0 : index
    %c0_143 = arith.constant 0 : index
    %177 = vector.load %arg31[%c0_142, %c0_143] : memref<64x1xf32, #tpu.memory_space<vmem>>, vector<64x1xf32>
    %178 = vector.broadcast %177 : vector<64x1xf32> to vector<64x256xf32>
    %179 = arith.addf %176, %178 : vector<64x256xf32>
    %c0_144 = arith.constant 0 : index
    %c0_145 = arith.constant 0 : index
    %180 = vector.load %arg32[%c0_144, %c0_145] : memref<3x64xf32, #tpu.memory_space<vmem>>, vector<3x64xf32>
    %cst_146 = arith.constant dense<0.000000e+00> : vector<3x256xf32>
    %181 = tpu.matmul %180, %179, %cst_146 {dimension_numbers = #tpu.dot_dimension_numbers<[1], [0], [0], [1], [0, 0, 1, 1], [], []>} : vector<3x64xf32>, vector<64x256xf32>, vector<3x256xf32> -> vector<3x256xf32>
    %c0_147 = arith.constant 0 : index
    %c0_148 = arith.constant 0 : index
    %182 = vector.load %arg33[%c0_147, %c0_148] : memref<3x1xf32, #tpu.memory_space<vmem>>, vector<3x1xf32>
    %183 = vector.broadcast %182 : vector<3x1xf32> to vector<3x256xf32>
    %184 = arith.addf %181, %183 : vector<3x256xf32>
    %185 = arith.negf %184 : vector<3x256xf32>
    %186 = math.exp %185 : vector<3x256xf32>
    %cst_149 = arith.constant 1.000000e+00 : f32
    %187 = vector.broadcast %cst_149 : f32 to vector<3x256xf32>
    %188 = arith.addf %187, %186 : vector<3x256xf32>
    %189 = arith.divf %187, %188 : vector<3x256xf32>
    %c0_150 = arith.constant 0 : index
    %c0_151 = arith.constant 0 : index
    %190 = vector.load %arg34[%c0_150, %c0_151] : memref<3x1xf32, #tpu.memory_space<vmem>>, vector<3x1xf32>
    %191 = vector.broadcast %190 : vector<3x1xf32> to vector<3x256xf32>
    %192 = arith.mulf %189, %191 : vector<3x256xf32>
    %c0_152 = arith.constant 0 : index
    %c0_153 = arith.constant 0 : index
    %193 = vector.load %arg35[%c0_152, %c0_153] : memref<3x1xf32, #tpu.memory_space<vmem>>, vector<3x1xf32>
    %194 = vector.broadcast %193 : vector<3x1xf32> to vector<3x256xf32>
    %195 = arith.addf %192, %194 : vector<3x256xf32>
    %c0_154 = arith.constant 0 : index
    %c0_155 = arith.constant 0 : index
    %c0_156 = arith.constant 0 : index
    %196 = vector.load %arg36[%c0_154, %c0_155, %c0_156] : memref<2x3x256xf32, #tpu.memory_space<vmem>>, vector<1x3x256xf32>
    %197 = vector.shape_cast %196 : vector<1x3x256xf32> to vector<3x256xf32>
    %198 = vector.shape_cast %195 : vector<3x256xf32> to vector<1x3x256xf32>
    tpu.vector_store %arg36[%c0_154, %c0_155, %c0_156], %198 {strides = array<i32>} : memref<2x3x256xf32, #tpu.memory_space<vmem>>, vector<1x3x256xf32>,
    %199 = tpu.concatenate %131, %138, %145, %152 in 0 : vector<1x256xf32>, vector<1x256xf32>, vector<1x256xf32>, vector<1x256xf32> -> vector<4x256xf32>
    %c0_157 = arith.constant 0 : index
    %c0_158 = arith.constant 0 : index
    %200 = vector.load %arg24[%c0_157, %c0_158] : memref<16x4xf32, #tpu.memory_space<vmem>>, vector<16x4xf32>
    %cst_159 = arith.constant dense<0.000000e+00> : vector<16x256xf32>
    %201 = tpu.matmul %200, %199, %cst_159 {dimension_numbers = #tpu.dot_dimension_numbers<[1], [0], [0], [1], [0, 0, 1, 1], [], []>} : vector<16x4xf32>, vector<4x256xf32>, vector<16x256xf32> -> vector<16x256xf32>
    %c0_160 = arith.constant 0 : index
    %c0_161 = arith.constant 0 : index
    %202 = vector.load %arg25[%c0_160, %c0_161] : memref<16x1xf32, #tpu.memory_space<vmem>>, vector<16x1xf32>
    %203 = vector.broadcast %202 : vector<16x1xf32> to vector<16x256xf32>
    %204 = arith.addf %201, %203 : vector<16x256xf32>
    %cst_162 = arith.constant 0.000000e+00 : f32
    %205 = vector.broadcast %cst_162 : f32 to vector<16x256xf32>
    %206 = arith.maximumf %204, %205 : vector<16x256xf32>
    %c0_163 = arith.constant 0 : index
    %c0_164 = arith.constant 0 : index
    %207 = vector.load %arg26[%c0_163, %c0_164] : memref<16x1xf32, #tpu.memory_space<vmem>>, vector<16x1xf32>
    %208 = vector.broadcast %207 : vector<16x1xf32> to vector<16x256xf32>
    %209 = arith.mulf %206, %208 : vector<16x256xf32>
    %c0_165 = arith.constant 0 : index
    %c0_166 = arith.constant 0 : index
    %210 = vector.load %arg27[%c0_165, %c0_166] : memref<16x1xf32, #tpu.memory_space<vmem>>, vector<16x1xf32>
    %211 = vector.broadcast %210 : vector<16x1xf32> to vector<16x256xf32>
    %212 = arith.addf %209, %211 : vector<16x256xf32>
    %c0_167 = arith.constant 0 : index
    %c0_168 = arith.constant 0 : index
    %213 = vector.load %arg28[%c0_167, %c0_168] : memref<64x16xf32, #tpu.memory_space<vmem>>, vector<64x16xf32>
    %cst_169 = arith.constant dense<0.000000e+00> : vector<64x256xf32>
    %214 = tpu.matmul %213, %212, %cst_169 {dimension_numbers = #tpu.dot_dimension_numbers<[1], [0], [0], [1], [0, 0, 1, 1], [], []>} : vector<64x16xf32>, vector<16x256xf32>, vector<64x256xf32> -> vector<64x256xf32>
    %c0_170 = arith.constant 0 : index
    %c0_171 = arith.constant 0 : index
    %215 = vector.load %arg29[%c0_170, %c0_171] : memref<64x1xf32, #tpu.memory_space<vmem>>, vector<64x1xf32>
    %216 = vector.broadcast %215 : vector<64x1xf32> to vector<64x256xf32>
    %217 = arith.addf %214, %216 : vector<64x256xf32>
    %cst_172 = arith.constant 0.000000e+00 : f32
    %218 = vector.broadcast %cst_172 : f32 to vector<64x256xf32>
    %219 = arith.maximumf %217, %218 : vector<64x256xf32>
    %c0_173 = arith.constant 0 : index
    %c0_174 = arith.constant 0 : index
    %220 = vector.load %arg30[%c0_173, %c0_174] : memref<64x1xf32, #tpu.memory_space<vmem>>, vector<64x1xf32>
    %221 = vector.broadcast %220 : vector<64x1xf32> to vector<64x256xf32>
    %222 = arith.mulf %219, %221 : vector<64x256xf32>
    %c0_175 = arith.constant 0 : index
    %c0_176 = arith.constant 0 : index
    %223 = vector.load %arg31[%c0_175, %c0_176] : memref<64x1xf32, #tpu.memory_space<vmem>>, vector<64x1xf32>
    %224 = vector.broadcast %223 : vector<64x1xf32> to vector<64x256xf32>
    %225 = arith.addf %222, %224 : vector<64x256xf32>
    %c0_177 = arith.constant 0 : index
    %c0_178 = arith.constant 0 : index
    %226 = vector.load %arg32[%c0_177, %c0_178] : memref<3x64xf32, #tpu.memory_space<vmem>>, vector<3x64xf32>
    %cst_179 = arith.constant dense<0.000000e+00> : vector<3x256xf32>
    %227 = tpu.matmul %226, %225, %cst_179 {dimension_numbers = #tpu.dot_dimension_numbers<[1], [0], [0], [1], [0, 0, 1, 1], [], []>} : vector<3x64xf32>, vector<64x256xf32>, vector<3x256xf32> -> vector<3x256xf32>
    %c0_180 = arith.constant 0 : index
    %c0_181 = arith.constant 0 : index
    %228 = vector.load %arg33[%c0_180, %c0_181] : memref<3x1xf32, #tpu.memory_space<vmem>>, vector<3x1xf32>
    %229 = vector.broadcast %228 : vector<3x1xf32> to vector<3x256xf32>
    %230 = arith.addf %227, %229 : vector<3x256xf32>
    %231 = arith.negf %230 : vector<3x256xf32>
    %232 = math.exp %231 : vector<3x256xf32>
    %cst_182 = arith.constant 1.000000e+00 : f32
    %233 = vector.broadcast %cst_182 : f32 to vector<3x256xf32>
    %234 = arith.addf %233, %232 : vector<3x256xf32>
    %235 = arith.divf %233, %234 : vector<3x256xf32>
    %c0_183 = arith.constant 0 : index
    %c0_184 = arith.constant 0 : index
    %236 = vector.load %arg34[%c0_183, %c0_184] : memref<3x1xf32, #tpu.memory_space<vmem>>, vector<3x1xf32>
    %237 = vector.broadcast %236 : vector<3x1xf32> to vector<3x256xf32>
    %238 = arith.mulf %235, %237 : vector<3x256xf32>
    %c0_185 = arith.constant 0 : index
    %c0_186 = arith.constant 0 : index
    %239 = vector.load %arg35[%c0_185, %c0_186] : memref<3x1xf32, #tpu.memory_space<vmem>>, vector<3x1xf32>
    %240 = vector.broadcast %239 : vector<3x1xf32> to vector<3x256xf32>
    %241 = arith.addf %238, %240 : vector<3x256xf32>
    %c1_187 = arith.constant 1 : index
    %c0_188 = arith.constant 0 : index
    %c0_189 = arith.constant 0 : index
    %242 = vector.load %arg36[%c1_187, %c0_188, %c0_189] : memref<2x3x256xf32, #tpu.memory_space<vmem>>, vector<1x3x256xf32>
    %243 = vector.shape_cast %242 : vector<1x3x256xf32> to vector<3x256xf32>
    %244 = vector.shape_cast %241 : vector<3x256xf32> to vector<1x3x256xf32>
    tpu.vector_store %arg36[%c1_187, %c0_188, %c0_189], %244 {strides = array<i32>} : memref<2x3x256xf32, #tpu.memory_space<vmem>>, vector<1x3x256xf32>,
    return
  }
}

</mosaic_0001>

<bundles_post_ra>
// kernel: cvae_forward.1
= control target key start
LH: loop header
LB: loop body
LE: loop exit
PB: predicated region body
PF: predicated region fallthrough
CT: control target
= control target key end

     0   :  { %s10274_s6 = smov 1   ;;  %s10275_s10 = smov 2   ;;  %s12123_s0 = inlined_call_operand.smem [shape: u32[40], index: -1, kind: input, shape index: {}] }
   0x1   :  { %s10325_s5 = sld [smem:[%s12123_s0]]   ;;  %s10276_s14 = smov 3  }
   0x2   :  { %s10330_s9 = sld [smem:[%s12123_s0 + %s10274_s6]]   ;;  %s10277_s18 = smov 4  }
   0x3   :  { %s10335_s13 = sld [smem:[%s12123_s0 + %s10275_s10]]   ;;  %s10278_s22 = smov 5  }
   0x4   :  { %s10340_s17 = sld [smem:[%s12123_s0 + %s10276_s14]]   ;;  %s10279_s26 = smov 6  }
   0x5   :  { %s10345_s21 = sld [smem:[%s12123_s0 + %s10277_s18]]   ;;  %s10280_s30 = smov 7  }
   0x6   :  { %s10350_s25 = sld [smem:[%s12123_s0 + %s10278_s22]]   ;;  %s10281_s4 = smov 8  }
   0x7   :  { %s10355_s29 = sld [smem:[%s12123_s0 + %s10279_s26]]   ;;  %s10282_s10 = smov 9  }
   0x8   :  { %s10360_s3 = sld [smem:[%s12123_s0 + %s10280_s30]]   ;;  %s10283_s15 = smov 10  }
   0x9   :  { %s10365_s8 = sld [smem:[%s12123_s0 + %s10281_s4]]   ;;  %s10284_s20 = smov 11  }
   0xa   :  { %s10370_s14 = sld [smem:[%s12123_s0 + %s10282_s10]]   ;;  %s10285_s26 = smov 12  }
   0xb   :  { %s10375_s19 = sld [smem:[%s12123_s0 + %s10283_s15]]   ;;  %s10286_s1 = smov 13  }
   0xc   :  { %s10380_s24 = sld [smem:[%s12123_s0 + %s10284_s20]]   ;;  %s10287_s7 = smov 14  }
   0xd   :  { %s10385_s30 = sld [smem:[%s12123_s0 + %s10285_s26]]   ;;  %s10288_s15 = smov 15  }
   0xe   :  { %s10390_s6 = sld [smem:[%s12123_s0 + %s10286_s1]]   ;;  %s10289_s22 = smov 16  }
   0xf   :  { %s10395_s12 = sld [smem:[%s12123_s0 + %s10287_s7]]   ;;  %s10290_s28 = smov 17  }
  0x10   :  { %12140 = sst [smem:[#allocation16_spill]] %s10370_s14  ;;  %s10291_s7 = smov 18  }
  0x11   :  { %s10400_s20 = sld [smem:[%s12123_s0 + %s10288_s15]]   ;;  %s10292_s15 = smov 19  }
  0x12   :  { %s10405_s27 = sld [smem:[%s12123_s0 + %s10289_s22]]   ;;  %s10293_s22 = smov 20  }
  0x13   :  { %s10410_s4 = sld [smem:[%s12123_s0 + %s10290_s28]]   ;;  %s10294_s28 = smov 21  }
  0x14   :  { %12141 = sst [smem:[#allocation17_spill]] %s10390_s6 }
  0x15   :  { %s10415_s6 = sld [smem:[%s12123_s0 + %s10291_s7]]   ;;  %s10295_s7 = smov 22  }
  0x17   :  { %12142 = sst [smem:[#allocation18_spill]] %s10400_s20 }
  0x18   :  { %12143 = sst [smem:[#allocation19_spill]] %s10405_s27 }
  0x19   :  { %12144 = sst [smem:[#allocation20_spill]] %s10410_s4 }
  0x1a   :  { %s10420_s20 = sld [smem:[%s12123_s0 + %s10292_s15]]   ;;  %s10296_s15 = smov 23  }
  0x1b   :  { %12145 = sst [smem:[#allocation21_spill]] %s10415_s6 }
  0x1c   :  { %s10425_s27 = sld [smem:[%s12123_s0 + %s10293_s22]]   ;;  %s10297_s22 = smov 24  }
  0x1d   :  { %s10430_s4 = sld [smem:[%s12123_s0 + %s10294_s28]]   ;;  %s10298_s28 = smov 25  }
  0x1e   :  { %s10435_s6 = sld [smem:[%s12123_s0 + %s10295_s7]]   ;;  %s10299_s7 = smov 26  }
  0x1f   :  { %s10455_s14 = sld [smem:[%s12123_s0 + %s10299_s7]]   ;;  %s10303_s7 = smov 30  }
  0x20   :  { %12146 = sst [smem:[#allocation22_spill]] %s10420_s20 }
  0x21   :  { %s10440_s20 = sld [smem:[%s12123_s0 + %s10296_s15]]   ;;  %s10300_s15 = smov 27  }
  0x22   :  { %12147 = sst [smem:[#allocation23_spill]] %s10425_s27 }
  0x23   :  { %12148 = sst [smem:[#allocation24_spill]] %s10430_s4 }
  0x24   :  { %s10445_s27 = sld [smem:[%s12123_s0 + %s10297_s22]]   ;;  %s10301_s22 = smov 28  }
  0x25   :  { %s10450_s4 = sld [smem:[%s12123_s0 + %s10298_s28]]   ;;  %s10302_s28 = smov 29  }
  0x26   :  { %12152 = sst [smem:[#allocation28_spill]] %s10455_s14 }
  0x27   :  { %12149 = sst [smem:[#allocation25_spill]] %s10440_s20 }
  0x28   :  { %s10460_s20 = sld [smem:[%s12123_s0 + %s10300_s15]]   ;;  %s10304_s15 = smov 31  }
  0x29   :  { %s10475_s14 = sld [smem:[%s12123_s0 + %s10303_s7]]   ;;  %s10307_s7 = smov 34  }
  0x2a   :  { %12150 = sst [smem:[#allocation26_spill]] %s10445_s27 }
  0x2b   :  { %12151 = sst [smem:[#allocation27_spill]] %s10450_s4 }
  0x2c   :  { %s10465_s27 = sld [smem:[%s12123_s0 + %s10301_s22]]   ;;  %s10305_s22 = smov 32  }
  0x2d   :  { %s10470_s4 = sld [smem:[%s12123_s0 + %s10302_s28]]   ;;  %s10306_s28 = smov 33  }
  0x2e   :  { %12153 = sst [smem:[#allocation29_spill]] %s10460_s20 }
  0x2f   :  { %12156 = sst [smem:[#allocation32_spill]] %s10475_s14 }
  0x30   :  { %s10480_s20 = sld [smem:[%s12123_s0 + %s10304_s15]]   ;;  %s10308_s15 = smov 35  }
  0x31   :  { %s10495_s14 = sld [smem:[%s12123_s0 + %s10307_s7]]   ;;  %s10311_s7 = smov 38  }
  0x32   :  { %12154 = sst [smem:[#allocation30_spill]] %s10465_s27 }
  0x33   :  { %12155 = sst [smem:[#allocation31_spill]] %s10470_s4 }
  0x34   :  { %s10485_s27 = sld [smem:[%s12123_s0 + %s10305_s22]]   ;;  %s10309_s22 = smov 36  }
  0x35   :  { %s10490_s4 = sld [smem:[%s12123_s0 + %s10306_s28]]   ;;  %s10310_s28 = smov 37  }
  0x36   :  { %12157 = sst [smem:[#allocation33_spill]] %s10480_s20 }
  0x37   :  { %12160 = sst [smem:[#allocation36_spill]] %s10495_s14 }
  0x38   :  { %s10500_s20 = sld [smem:[%s12123_s0 + %s10308_s15]]   ;;  %s10312_s15 = smov 39  }
  0x39   :  { %s10515_s14 = sld [smem:[%s12123_s0 + %s10311_s7]]  }
  0x3a   :  { %12158 = sst [smem:[#allocation34_spill]] %s10485_s27 }
  0x3b   :  { %12159 = sst [smem:[#allocation35_spill]] %s10490_s4 }
  0x3c   :  { %s10505_s27 = sld [smem:[%s12123_s0 + %s10309_s22]]  }
  0x3d   :  { %s10510_s4 = sld [smem:[%s12123_s0 + %s10310_s28]]  }
  0x3e   :  { %12161 = sst [smem:[#allocation37_spill]] %s10500_s20 }
  0x3f   :  { %s10520_s20 = sld [smem:[%s12123_s0 + %s10312_s15]]  }
  0x40   :  { %85 = vsyncpa [#allocation6], 0 }
  0x41   :  { %86 = vsyncpa [#allocation8], 0  ;;  %v165_v0 = vld [vmem:[%s10395_s12] sm:$0xff]  ;;  %v167_v1 = vld [vmem:[%s10395_s12 + $0x8] sm:$0xff] }
  0x42   :  { %166 = vst [vmem:[#allocation2] sm:$0xff] %v165_v0  ;;  %v169_v2 = vld [vmem:[%s10395_s12 + $0x10] sm:$0xff]  ;;  %v171_v3 = vld [vmem:[%s10395_s12 + $0x18] sm:$0xff]  ;;  %v173_v4 = vld [vmem:[%s10395_s12 + $0x20] sm:$0xff] }
  0x43   :  { %168 = vst [vmem:[#allocation2 + $0x8] sm:$0xff] %v167_v1  ;;  %v175_v5 = vld [vmem:[%s10395_s12 + $0x28] sm:$0xff]  ;;  %v177_v6 = vld [vmem:[%s10395_s12 + $0x30] sm:$0xff]  ;;  %v179_v7 = vld [vmem:[%s10395_s12 + $0x38] sm:$0xff] }
  0x44   :  { %170 = vst [vmem:[#allocation2 + $0x10] sm:$0xff] %v169_v2  ;;  %v181_v8 = vld [vmem:[%s10395_s12 + $0x40] sm:$0xff]  ;;  %v183_v9 = vld [vmem:[%s10395_s12 + $0x48] sm:$0xff]  ;;  %v185_v10 = vld [vmem:[%s10395_s12 + $0x50] sm:$0xff] }
  0x45   :  { %172 = vst [vmem:[#allocation2 + $0x18] sm:$0xff] %v171_v3  ;;  %v187_v11 = vld [vmem:[%s10395_s12 + $0x58] sm:$0xff]  ;;  %v189_v12 = vld [vmem:[%s10395_s12 + $0x60] sm:$0xff]  ;;  %v191_v13 = vld [vmem:[%s10395_s12 + $0x68] sm:$0xff] }
  0x46   :  { %174 = vst [vmem:[#allocation2 + $0x20] sm:$0xff] %v173_v4  ;;  %v193_v14 = vld [vmem:[%s10395_s12 + $0x70] sm:$0xff]  ;;  %v195_v15 = vld [vmem:[%s10395_s12 + $0x78] sm:$0xff]  ;;  %v197_v16 = vld [vmem:[%s10395_s12 + $0x80] sm:$0xff] }
  0x47   :  { %176 = vst [vmem:[#allocation2 + $0x28] sm:$0xff] %v175_v5  ;;  %v199_v17 = vld [vmem:[%s10395_s12 + $0x88] sm:$0xff]  ;;  %v201_v18 = vld [vmem:[%s10395_s12 + $0x90] sm:$0xff]  ;;  %v203_v19 = vld [vmem:[%s10395_s12 + $0x98] sm:$0xff] }
  0x48   :  { %178 = vst [vmem:[#allocation2 + $0x30] sm:$0xff] %v177_v6  ;;  %v205_v20 = vld [vmem:[%s10395_s12 + $0xa0] sm:$0xff]  ;;  %v207_v21 = vld [vmem:[%s10395_s12 + $0xa8] sm:$0xff]  ;;  %v209_v22 = vld [vmem:[%s10395_s12 + $0xb0] sm:$0xff] }
  0x49   :  { %180 = vst [vmem:[#allocation2 + $0x38] sm:$0xff] %v179_v7  ;;  %v211_v23 = vld [vmem:[%s10395_s12 + $0xb8] sm:$0xff]  ;;  %v213_v24 = vld [vmem:[%s10395_s12 + $0xc0] sm:$0xff]  ;;  %v215_v25 = vld [vmem:[%s10395_s12 + $0xc8] sm:$0xff] }
  0x4a   :  { %182 = vst [vmem:[#allocation2 + $0x40] sm:$0xff] %v181_v8  ;;  %v217_v26 = vld [vmem:[%s10395_s12 + $0xd0] sm:$0xff]  ;;  %v219_v27 = vld [vmem:[%s10395_s12 + $0xd8] sm:$0xff]  ;;  %v221_v28 = vld [vmem:[%s10395_s12 + $0xe0] sm:$0xff] }
  0x4b   :  { %184 = vst [vmem:[#allocation2 + $0x48] sm:$0xff] %v183_v9  ;;  %v223_v29 = vld [vmem:[%s10395_s12 + $0xe8] sm:$0xff]  ;;  %v225_v30 = vld [vmem:[%s10395_s12 + $0xf0] sm:$0xff]  ;;  %v227_v31 = vld [vmem:[%s10395_s12 + $0xf8] sm:$0xff] }
  0x4c   :  { %186 = vst [vmem:[#allocation2 + $0x50] sm:$0xff] %v185_v10  ;;  %v229_v32 = vld [vmem:[%s10395_s12 + $0x100] sm:$0xff]  ;;  %v231_v33 = vld [vmem:[%s10395_s12 + $0x108] sm:$0xff]  ;;  %v233_v34 = vld [vmem:[%s10395_s12 + $0x110] sm:$0xff] }
  0x4d   :  { %188 = vst [vmem:[#allocation2 + $0x58] sm:$0xff] %v187_v11  ;;  %v235_v35 = vld [vmem:[%s10395_s12 + $0x118] sm:$0xff]  ;;  %v237_v36 = vld [vmem:[%s10395_s12 + $0x120] sm:$0xff]  ;;  %v239_v37 = vld [vmem:[%s10395_s12 + $0x128] sm:$0xff] }
  0x4e   :  { %190 = vst [vmem:[#allocation2 + $0x60] sm:$0xff] %v189_v12  ;;  %v241_v38 = vld [vmem:[%s10395_s12 + $0x130] sm:$0xff]  ;;  %v243_v39 = vld [vmem:[%s10395_s12 + $0x138] sm:$0xff]  ;;  %v245_v40 = vld [vmem:[%s10395_s12 + $0x140] sm:$0xff] }
  0x4f   :  { %192 = vst [vmem:[#allocation2 + $0x68] sm:$0xff] %v191_v13  ;;  %v247_v41 = vld [vmem:[%s10395_s12 + $0x148] sm:$0xff]  ;;  %v249_v42 = vld [vmem:[%s10395_s12 + $0x150] sm:$0xff]  ;;  %v251_v43 = vld [vmem:[%s10395_s12 + $0x158] sm:$0xff] }
  0x50   :  { %194 = vst [vmem:[#allocation2 + $0x70] sm:$0xff] %v193_v14  ;;  %v253_v44 = vld [vmem:[%s10395_s12 + $0x160] sm:$0xff]  ;;  %v255_v45 = vld [vmem:[%s10395_s12 + $0x168] sm:$0xff]  ;;  %v257_v46 = vld [vmem:[%s10395_s12 + $0x170] sm:$0xff] }
  0x51   :  { %196 = vst [vmem:[#allocation2 + $0x78] sm:$0xff] %v195_v15  ;;  %v259_v47 = vld [vmem:[%s10395_s12 + $0x178] sm:$0xff]  ;;  %v261_v48 = vld [vmem:[%s10395_s12 + $0x180] sm:$0xff]  ;;  %v263_v49 = vld [vmem:[%s10395_s12 + $0x188] sm:$0xff] }
  0x52   :  { %198 = vst [vmem:[#allocation2 + $0x80] sm:$0xff] %v197_v16  ;;  %v265_v50 = vld [vmem:[%s10395_s12 + $0x190] sm:$0xff]  ;;  %v267_v51 = vld [vmem:[%s10395_s12 + $0x198] sm:$0xff]  ;;  %v269_v52 = vld [vmem:[%s10395_s12 + $0x1a0] sm:$0xff] }
  0x53   :  { %200 = vst [vmem:[#allocation2 + $0x88] sm:$0xff] %v199_v17  ;;  %v271_v53 = vld [vmem:[%s10395_s12 + $0x1a8] sm:$0xff]  ;;  %v273_v54 = vld [vmem:[%s10395_s12 + $0x1b0] sm:$0xff]  ;;  %v275_v55 = vld [vmem:[%s10395_s12 + $0x1b8] sm:$0xff] }
  0x54   :  { %202 = vst [vmem:[#allocation2 + $0x90] sm:$0xff] %v201_v18  ;;  %v277_v56 = vld [vmem:[%s10395_s12 + $0x1c0] sm:$0xff]  ;;  %v279_v57 = vld [vmem:[%s10395_s12 + $0x1c8] sm:$0xff]  ;;  %v281_v58 = vld [vmem:[%s10395_s12 + $0x1d0] sm:$0xff] }
  0x55   :  { %204 = vst [vmem:[#allocation2 + $0x98] sm:$0xff] %v203_v19  ;;  %v283_v59 = vld [vmem:[%s10395_s12 + $0x1d8] sm:$0xff]  ;;  %v285_v60 = vld [vmem:[%s10395_s12 + $0x1e0] sm:$0xff]  ;;  %v287_v61 = vld [vmem:[%s10395_s12 + $0x1e8] sm:$0xff] }
  0x56   :  { %206 = vst [vmem:[#allocation2 + $0xa0] sm:$0xff] %v205_v20  ;;  %v289_v62 = vld [vmem:[%s10395_s12 + $0x1f0] sm:$0xff]  ;;  %v291_v63 = vld [vmem:[%s10395_s12 + $0x1f8] sm:$0xff]  ;;  %v293_v0 = vld [vmem:[%s10395_s12 + $0x200] sm:$0xff] }
  0x57   :  { %208 = vst [vmem:[#allocation2 + $0xa8] sm:$0xff] %v207_v21  ;;  %v295_v1 = vld [vmem:[%s10395_s12 + $0x208] sm:$0xff]  ;;  %v297_v2 = vld [vmem:[%s10395_s12 + $0x210] sm:$0xff]  ;;  %v299_v3 = vld [vmem:[%s10395_s12 + $0x218] sm:$0xff] }
  0x58   :  { %210 = vst [vmem:[#allocation2 + $0xb0] sm:$0xff] %v209_v22  ;;  %v301_v4 = vld [vmem:[%s10395_s12 + $0x220] sm:$0xff]  ;;  %v303_v5 = vld [vmem:[%s10395_s12 + $0x228] sm:$0xff]  ;;  %v305_v6 = vld [vmem:[%s10395_s12 + $0x230] sm:$0xff] }
  0x59   :  { %212 = vst [vmem:[#allocation2 + $0xb8] sm:$0xff] %v211_v23  ;;  %v307_v7 = vld [vmem:[%s10395_s12 + $0x238] sm:$0xff]  ;;  %v309_v8 = vld [vmem:[%s10395_s12 + $0x240] sm:$0xff]  ;;  %v311_v9 = vld [vmem:[%s10395_s12 + $0x248] sm:$0xff] }
  0x5a   :  { %214 = vst [vmem:[#allocation2 + $0xc0] sm:$0xff] %v213_v24  ;;  %v313_v10 = vld [vmem:[%s10395_s12 + $0x250] sm:$0xff]  ;;  %v315_v11 = vld [vmem:[%s10395_s12 + $0x258] sm:$0xff]  ;;  %v317_v12 = vld [vmem:[%s10395_s12 + $0x260] sm:$0xff] }
  0x5b   :  { %216 = vst [vmem:[#allocation2 + $0xc8] sm:$0xff] %v215_v25  ;;  %v319_v13 = vld [vmem:[%s10395_s12 + $0x268] sm:$0xff]  ;;  %v321_v14 = vld [vmem:[%s10395_s12 + $0x270] sm:$0xff]  ;;  %v323_v15 = vld [vmem:[%s10395_s12 + $0x278] sm:$0xff] }
  0x5c   :  { %218 = vst [vmem:[#allocation2 + $0xd0] sm:$0xff] %v217_v26  ;;  %v325_v16 = vld [vmem:[%s10395_s12 + $0x280] sm:$0xff]  ;;  %v327_v17 = vld [vmem:[%s10395_s12 + $0x288] sm:$0xff]  ;;  %v329_v18 = vld [vmem:[%s10395_s12 + $0x290] sm:$0xff] }
  0x5d   :  { %220 = vst [vmem:[#allocation2 + $0xd8] sm:$0xff] %v219_v27  ;;  %v331_v19 = vld [vmem:[%s10395_s12 + $0x298] sm:$0xff]  ;;  %v333_v20 = vld [vmem:[%s10395_s12 + $0x2a0] sm:$0xff]  ;;  %v335_v21 = vld [vmem:[%s10395_s12 + $0x2a8] sm:$0xff] }
  0x5e   :  { %222 = vst [vmem:[#allocation2 + $0xe0] sm:$0xff] %v221_v28  ;;  %v337_v22 = vld [vmem:[%s10395_s12 + $0x2b0] sm:$0xff]  ;;  %v339_v23 = vld [vmem:[%s10395_s12 + $0x2b8] sm:$0xff]  ;;  %v341_v24 = vld [vmem:[%s10395_s12 + $0x2c0] sm:$0xff] }
  0x5f   :  { %224 = vst [vmem:[#allocation2 + $0xe8] sm:$0xff] %v223_v29  ;;  %v343_v25 = vld [vmem:[%s10395_s12 + $0x2c8] sm:$0xff]  ;;  %v345_v26 = vld [vmem:[%s10395_s12 + $0x2d0] sm:$0xff]  ;;  %v347_v27 = vld [vmem:[%s10395_s12 + $0x2d8] sm:$0xff] }
  0x60   :  { %226 = vst [vmem:[#allocation2 + $0xf0] sm:$0xff] %v225_v30  ;;  %v349_v28 = vld [vmem:[%s10395_s12 + $0x2e0] sm:$0xff]  ;;  %v351_v29 = vld [vmem:[%s10395_s12 + $0x2e8] sm:$0xff]  ;;  %v353_v30 = vld [vmem:[%s10395_s12 + $0x2f0] sm:$0xff] }
  0x61   :  { %228 = vst [vmem:[#allocation2 + $0xf8] sm:$0xff] %v227_v31  ;;  %v355_v31 = vld [vmem:[%s10395_s12 + $0x2f8] sm:$0xff] }
  0x62   :  { %230 = vst [vmem:[#allocation2 + $0x100] sm:$0xff] %v229_v32  ;;  %v357_v32 = vld [vmem:[%s10395_s12 + $0x300] sm:$0xff] }
  0x63   :  { %232 = vst [vmem:[#allocation2 + $0x108] sm:$0xff] %v231_v33  ;;  %v359_v33 = vld [vmem:[%s10395_s12 + $0x308] sm:$0xff] }
  0x64   :  { %234 = vst [vmem:[#allocation2 + $0x110] sm:$0xff] %v233_v34  ;;  %v361_v34 = vld [vmem:[%s10395_s12 + $0x310] sm:$0xff] }
  0x65   :  { %236 = vst [vmem:[#allocation2 + $0x118] sm:$0xff] %v235_v35  ;;  %v363_v35 = vld [vmem:[%s10395_s12 + $0x318] sm:$0xff] }
  0x66   :  { %238 = vst [vmem:[#allocation2 + $0x120] sm:$0xff] %v237_v36  ;;  %v365_v36 = vld [vmem:[%s10395_s12 + $0x320] sm:$0xff] }
  0x67   :  { %240 = vst [vmem:[#allocation2 + $0x128] sm:$0xff] %v239_v37  ;;  %v367_v37 = vld [vmem:[%s10395_s12 + $0x328] sm:$0xff] }
  0x68   :  { %242 = vst [vmem:[#allocation2 + $0x130] sm:$0xff] %v241_v38  ;;  %v369_v38 = vld [vmem:[%s10395_s12 + $0x330] sm:$0xff] }
  0x69   :  { %244 = vst [vmem:[#allocation2 + $0x138] sm:$0xff] %v243_v39  ;;  %v371_v39 = vld [vmem:[%s10395_s12 + $0x338] sm:$0xff] }
  0x6a   :  { %246 = vst [vmem:[#allocation2 + $0x140] sm:$0xff] %v245_v40  ;;  %v373_v40 = vld [vmem:[%s10395_s12 + $0x340] sm:$0xff] }
  0x6b   :  { %248 = vst [vmem:[#allocation2 + $0x148] sm:$0xff] %v247_v41  ;;  %v375_v41 = vld [vmem:[%s10395_s12 + $0x348] sm:$0xff] }
  0x6c   :  { %250 = vst [vmem:[#allocation2 + $0x150] sm:$0xff] %v249_v42  ;;  %v377_v42 = vld [vmem:[%s10395_s12 + $0x350] sm:$0xff] }
  0x6d   :  { %252 = vst [vmem:[#allocation2 + $0x158] sm:$0xff] %v251_v43  ;;  %v379_v43 = vld [vmem:[%s10395_s12 + $0x358] sm:$0xff] }
  0x6e   :  { %254 = vst [vmem:[#allocation2 + $0x160] sm:$0xff] %v253_v44  ;;  %v381_v44 = vld [vmem:[%s10395_s12 + $0x360] sm:$0xff] }
  0x6f   :  { %256 = vst [vmem:[#allocation2 + $0x168] sm:$0xff] %v255_v45  ;;  %v383_v45 = vld [vmem:[%s10395_s12 + $0x368] sm:$0xff] }
  0x70   :  { %258 = vst [vmem:[#allocation2 + $0x170] sm:$0xff] %v257_v46  ;;  %v385_v46 = vld [vmem:[%s10395_s12 + $0x370] sm:$0xff] }
  0x71   :  { %260 = vst [vmem:[#allocation2 + $0x178] sm:$0xff] %v259_v47  ;;  %v387_v47 = vld [vmem:[%s10395_s12 + $0x378] sm:$0xff] }
  0x72   :  { %262 = vst [vmem:[#allocation2 + $0x180] sm:$0xff] %v261_v48  ;;  %v389_v48 = vld [vmem:[%s10395_s12 + $0x380] sm:$0xff] }
  0x73   :  { %264 = vst [vmem:[#allocation2 + $0x188] sm:$0xff] %v263_v49  ;;  %v391_v49 = vld [vmem:[%s10395_s12 + $0x388] sm:$0xff] }
  0x74   :  { %266 = vst [vmem:[#allocation2 + $0x190] sm:$0xff] %v265_v50  ;;  %v393_v50 = vld [vmem:[%s10395_s12 + $0x390] sm:$0xff] }
  0x75   :  { %268 = vst [vmem:[#allocation2 + $0x198] sm:$0xff] %v267_v51  ;;  %v395_v51 = vld [vmem:[%s10395_s12 + $0x398] sm:$0xff] }
  0x76   :  { %270 = vst [vmem:[#allocation2 + $0x1a0] sm:$0xff] %v269_v52  ;;  %v397_v52 = vld [vmem:[%s10395_s12 + $0x3a0] sm:$0xff] }
  0x77   :  { %272 = vst [vmem:[#allocation2 + $0x1a8] sm:$0xff] %v271_v53  ;;  %v399_v53 = vld [vmem:[%s10395_s12 + $0x3a8] sm:$0xff] }
  0x78   :  { %274 = vst [vmem:[#allocation2 + $0x1b0] sm:$0xff] %v273_v54  ;;  %v401_v54 = vld [vmem:[%s10395_s12 + $0x3b0] sm:$0xff] }
  0x79   :  { %276 = vst [vmem:[#allocation2 + $0x1b8] sm:$0xff] %v275_v55  ;;  %v403_v55 = vld [vmem:[%s10395_s12 + $0x3b8] sm:$0xff] }
  0x7a   :  { %278 = vst [vmem:[#allocation2 + $0x1c0] sm:$0xff] %v277_v56  ;;  %v405_v56 = vld [vmem:[%s10395_s12 + $0x3c0] sm:$0xff] }
  0x7b   :  { %280 = vst [vmem:[#allocation2 + $0x1c8] sm:$0xff] %v279_v57  ;;  %v407_v57 = vld [vmem:[%s10395_s12 + $0x3c8] sm:$0xff] }
  0x7c   :  { %282 = vst [vmem:[#allocation2 + $0x1d0] sm:$0xff] %v281_v58  ;;  %v409_v58 = vld [vmem:[%s10395_s12 + $0x3d0] sm:$0xff] }
  0x7d   :  { %284 = vst [vmem:[#allocation2 + $0x1d8] sm:$0xff] %v283_v59  ;;  %v411_v59 = vld [vmem:[%s10395_s12 + $0x3d8] sm:$0xff] }
  0x7e   :  { %286 = vst [vmem:[#allocation2 + $0x1e0] sm:$0xff] %v285_v60  ;;  %v413_v60 = vld [vmem:[%s10395_s12 + $0x3e0] sm:$0xff] }
  0x7f   :  { %288 = vst [vmem:[#allocation2 + $0x1e8] sm:$0xff] %v287_v61  ;;  %v415_v61 = vld [vmem:[%s10395_s12 + $0x3e8] sm:$0xff] }
  0x80   :  { %290 = vst [vmem:[#allocation2 + $0x1f0] sm:$0xff] %v289_v62  ;;  %v417_v62 = vld [vmem:[%s10395_s12 + $0x3f0] sm:$0xff] }
  0x81   :  { %292 = vst [vmem:[#allocation2 + $0x1f8] sm:$0xff] %v291_v63  ;;  %v419_v63 = vld [vmem:[%s10395_s12 + $0x3f8] sm:$0xff] }
  0x82   :  { %294 = vst [vmem:[#allocation2 + $0x200] sm:$0xff] %v293_v0  ;;  %v421_v0 = vld [vmem:[%s10395_s12 + $0x400] sm:$0xff] }
  0x83   :  { %296 = vst [vmem:[#allocation2 + $0x208] sm:$0xff] %v295_v1  ;;  %v423_v1 = vld [vmem:[%s10395_s12 + $0x408] sm:$0xff] }
  0x84   :  { %298 = vst [vmem:[#allocation2 + $0x210] sm:$0xff] %v297_v2  ;;  %v425_v2 = vld [vmem:[%s10395_s12 + $0x410] sm:$0xff] }
  0x85   :  { %300 = vst [vmem:[#allocation2 + $0x218] sm:$0xff] %v299_v3  ;;  %v427_v3 = vld [vmem:[%s10395_s12 + $0x418] sm:$0xff] }
  0x86   :  { %302 = vst [vmem:[#allocation2 + $0x220] sm:$0xff] %v301_v4  ;;  %v429_v4 = vld [vmem:[%s10395_s12 + $0x420] sm:$0xff] }
  0x87   :  { %304 = vst [vmem:[#allocation2 + $0x228] sm:$0xff] %v303_v5  ;;  %v431_v5 = vld [vmem:[%s10395_s12 + $0x428] sm:$0xff] }
  0x88   :  { %306 = vst [vmem:[#allocation2 + $0x230] sm:$0xff] %v305_v6  ;;  %v433_v6 = vld [vmem:[%s10395_s12 + $0x430] sm:$0xff] }
  0x89   :  { %308 = vst [vmem:[#allocation2 + $0x238] sm:$0xff] %v307_v7  ;;  %v435_v7 = vld [vmem:[%s10395_s12 + $0x438] sm:$0xff] }
  0x8a   :  { %310 = vst [vmem:[#allocation2 + $0x240] sm:$0xff] %v309_v8  ;;  %v437_v8 = vld [vmem:[%s10395_s12 + $0x440] sm:$0xff] }
  0x8b   :  { %312 = vst [vmem:[#allocation2 + $0x248] sm:$0xff] %v311_v9  ;;  %v439_v9 = vld [vmem:[%s10395_s12 + $0x448] sm:$0xff] }
  0x8c   :  { %314 = vst [vmem:[#allocation2 + $0x250] sm:$0xff] %v313_v10  ;;  %v441_v10 = vld [vmem:[%s10395_s12 + $0x450] sm:$0xff] }
  0x8d   :  { %316 = vst [vmem:[#allocation2 + $0x258] sm:$0xff] %v315_v11  ;;  %v443_v11 = vld [vmem:[%s10395_s12 + $0x458] sm:$0xff] }
  0x8e   :  { %318 = vst [vmem:[#allocation2 + $0x260] sm:$0xff] %v317_v12  ;;  %v445_v12 = vld [vmem:[%s10395_s12 + $0x460] sm:$0xff] }
  0x8f   :  { %320 = vst [vmem:[#allocation2 + $0x268] sm:$0xff] %v319_v13  ;;  %v447_v13 = vld [vmem:[%s10395_s12 + $0x468] sm:$0xff] }
  0x90   :  { %322 = vst [vmem:[#allocation2 + $0x270] sm:$0xff] %v321_v14  ;;  %v449_v14 = vld [vmem:[%s10395_s12 + $0x470] sm:$0xff] }
  0x91   :  { %324 = vst [vmem:[#allocation2 + $0x278] sm:$0xff] %v323_v15  ;;  %v451_v15 = vld [vmem:[%s10395_s12 + $0x478] sm:$0xff] }
  0x92   :  { %326 = vst [vmem:[#allocation2 + $0x280] sm:$0xff] %v325_v16  ;;  %v453_v16 = vld [vmem:[%s10395_s12 + $0x480] sm:$0xff] }
  0x93   :  { %328 = vst [vmem:[#allocation2 + $0x288] sm:$0xff] %v327_v17  ;;  %v455_v17 = vld [vmem:[%s10395_s12 + $0x488] sm:$0xff] }
  0x94   :  { %330 = vst [vmem:[#allocation2 + $0x290] sm:$0xff] %v329_v18  ;;  %v457_v18 = vld [vmem:[%s10395_s12 + $0x490] sm:$0xff] }
  0x95   :  { %332 = vst [vmem:[#allocation2 + $0x298] sm:$0xff] %v331_v19  ;;  %v459_v19 = vld [vmem:[%s10395_s12 + $0x498] sm:$0xff] }
  0x96   :  { %334 = vst [vmem:[#allocation2 + $0x2a0] sm:$0xff] %v333_v20  ;;  %v461_v20 = vld [vmem:[%s10395_s12 + $0x4a0] sm:$0xff] }
  0x97   :  { %336 = vst [vmem:[#allocation2 + $0x2a8] sm:$0xff] %v335_v21  ;;  %v463_v21 = vld [vmem:[%s10395_s12 + $0x4a8] sm:$0xff] }
  0x98   :  { %338 = vst [vmem:[#allocation2 + $0x2b0] sm:$0xff] %v337_v22  ;;  %v465_v22 = vld [vmem:[%s10395_s12 + $0x4b0] sm:$0xff] }
  0x99   :  { %340 = vst [vmem:[#allocation2 + $0x2b8] sm:$0xff] %v339_v23  ;;  %v467_v23 = vld [vmem:[%s10395_s12 + $0x4b8] sm:$0xff] }
  0x9a   :  { %342 = vst [vmem:[#allocation2 + $0x2c0] sm:$0xff] %v341_v24  ;;  %v469_v24 = vld [vmem:[%s10395_s12 + $0x4c0] sm:$0xff] }
  0x9b   :  { %344 = vst [vmem:[#allocation2 + $0x2c8] sm:$0xff] %v343_v25  ;;  %v471_v25 = vld [vmem:[%s10395_s12 + $0x4c8] sm:$0xff] }
  0x9c   :  { %346 = vst [vmem:[#allocation2 + $0x2d0] sm:$0xff] %v345_v26  ;;  %v473_v26 = vld [vmem:[%s10395_s12 + $0x4d0] sm:$0xff] }
  0x9d   :  { %348 = vst [vmem:[#allocation2 + $0x2d8] sm:$0xff] %v347_v27  ;;  %v475_v27 = vld [vmem:[%s10395_s12 + $0x4d8] sm:$0xff] }
  0x9e   :  { %350 = vst [vmem:[#allocation2 + $0x2e0] sm:$0xff] %v349_v28  ;;  %v477_v28 = vld [vmem:[%s10395_s12 + $0x4e0] sm:$0xff] }
  0x9f   :  { %352 = vst [vmem:[#allocation2 + $0x2e8] sm:$0xff] %v351_v29  ;;  %v479_v29 = vld [vmem:[%s10395_s12 + $0x4e8] sm:$0xff] }
  0xa0   :  { %354 = vst [vmem:[#allocation2 + $0x2f0] sm:$0xff] %v353_v30  ;;  %v481_v30 = vld [vmem:[%s10395_s12 + $0x4f0] sm:$0xff] }
  0xa1   :  { %356 = vst [vmem:[#allocation2 + $0x2f8] sm:$0xff] %v355_v31  ;;  %v483_v31 = vld [vmem:[%s10395_s12 + $0x4f8] sm:$0xff] }
  0xa2   :  { %358 = vst [vmem:[#allocation2 + $0x300] sm:$0xff] %v357_v32  ;;  %v485_v32 = vld [vmem:[%s10395_s12 + $0x500] sm:$0xff] }
  0xa3   :  { %360 = vst [vmem:[#allocation2 + $0x308] sm:$0xff] %v359_v33  ;;  %v487_v33 = vld [vmem:[%s10395_s12 + $0x508] sm:$0xff] }
  0xa4   :  { %362 = vst [vmem:[#allocation2 + $0x310] sm:$0xff] %v361_v34  ;;  %v489_v34 = vld [vmem:[%s10395_s12 + $0x510] sm:$0xff] }
  0xa5   :  { %364 = vst [vmem:[#allocation2 + $0x318] sm:$0xff] %v363_v35  ;;  %v491_v35 = vld [vmem:[%s10395_s12 + $0x518] sm:$0xff] }
  0xa6   :  { %366 = vst [vmem:[#allocation2 + $0x320] sm:$0xff] %v365_v36  ;;  %v493_v36 = vld [vmem:[%s10395_s12 + $0x520] sm:$0xff] }
  0xa7   :  { %368 = vst [vmem:[#allocation2 + $0x328] sm:$0xff] %v367_v37  ;;  %v495_v37 = vld [vmem:[%s10395_s12 + $0x528] sm:$0xff] }
  0xa8   :  { %370 = vst [vmem:[#allocation2 + $0x330] sm:$0xff] %v369_v38  ;;  %v497_v38 = vld [vmem:[%s10395_s12 + $0x530] sm:$0xff] }
  0xa9   :  { %372 = vst [vmem:[#allocation2 + $0x338] sm:$0xff] %v371_v39  ;;  %v499_v39 = vld [vmem:[%s10395_s12 + $0x538] sm:$0xff] }
  0xaa   :  { %374 = vst [vmem:[#allocation2 + $0x340] sm:$0xff] %v373_v40  ;;  %v501_v40 = vld [vmem:[%s10395_s12 + $0x540] sm:$0xff] }
  0xab   :  { %376 = vst [vmem:[#allocation2 + $0x348] sm:$0xff] %v375_v41  ;;  %v503_v41 = vld [vmem:[%s10395_s12 + $0x548] sm:$0xff] }
  0xac   :  { %378 = vst [vmem:[#allocation2 + $0x350] sm:$0xff] %v377_v42  ;;  %v505_v42 = vld [vmem:[%s10395_s12 + $0x550] sm:$0xff] }
  0xad   :  { %380 = vst [vmem:[#allocation2 + $0x358] sm:$0xff] %v379_v43  ;;  %v507_v43 = vld [vmem:[%s10395_s12 + $0x558] sm:$0xff] }
  0xae   :  { %382 = vst [vmem:[#allocation2 + $0x360] sm:$0xff] %v381_v44  ;;  %v509_v44 = vld [vmem:[%s10395_s12 + $0x560] sm:$0xff] }
  0xaf   :  { %384 = vst [vmem:[#allocation2 + $0x368] sm:$0xff] %v383_v45  ;;  %v511_v45 = vld [vmem:[%s10395_s12 + $0x568] sm:$0xff] }
  0xb0   :  { %386 = vst [vmem:[#allocation2 + $0x370] sm:$0xff] %v385_v46  ;;  %v513_v46 = vld [vmem:[%s10395_s12 + $0x570] sm:$0xff] }
  0xb1   :  { %388 = vst [vmem:[#allocation2 + $0x378] sm:$0xff] %v387_v47  ;;  %v515_v47 = vld [vmem:[%s10395_s12 + $0x578] sm:$0xff] }
  0xb2   :  { %390 = vst [vmem:[#allocation2 + $0x380] sm:$0xff] %v389_v48  ;;  %v517_v48 = vld [vmem:[%s10395_s12 + $0x580] sm:$0xff] }
  0xb3   :  { %392 = vst [vmem:[#allocation2 + $0x388] sm:$0xff] %v391_v49  ;;  %v519_v49 = vld [vmem:[%s10395_s12 + $0x588] sm:$0xff] }
  0xb4   :  { %394 = vst [vmem:[#allocation2 + $0x390] sm:$0xff] %v393_v50  ;;  %v521_v50 = vld [vmem:[%s10395_s12 + $0x590] sm:$0xff] }
  0xb5   :  { %396 = vst [vmem:[#allocation2 + $0x398] sm:$0xff] %v395_v51  ;;  %v523_v51 = vld [vmem:[%s10395_s12 + $0x598] sm:$0xff] }
  0xb6   :  { %398 = vst [vmem:[#allocation2 + $0x3a0] sm:$0xff] %v397_v52  ;;  %v525_v52 = vld [vmem:[%s10395_s12 + $0x5a0] sm:$0xff] }
  0xb7   :  { %400 = vst [vmem:[#allocation2 + $0x3a8] sm:$0xff] %v399_v53  ;;  %v527_v53 = vld [vmem:[%s10395_s12 + $0x5a8] sm:$0xff] }
  0xb8   :  { %402 = vst [vmem:[#allocation2 + $0x3b0] sm:$0xff] %v401_v54  ;;  %v529_v54 = vld [vmem:[%s10395_s12 + $0x5b0] sm:$0xff] }
  0xb9   :  { %404 = vst [vmem:[#allocation2 + $0x3b8] sm:$0xff] %v403_v55  ;;  %v531_v55 = vld [vmem:[%s10395_s12 + $0x5b8] sm:$0xff] }
  0xba   :  { %406 = vst [vmem:[#allocation2 + $0x3c0] sm:$0xff] %v405_v56  ;;  %v533_v56 = vld [vmem:[%s10395_s12 + $0x5c0] sm:$0xff] }
  0xbb   :  { %408 = vst [vmem:[#allocation2 + $0x3c8] sm:$0xff] %v407_v57  ;;  %v535_v57 = vld [vmem:[%s10395_s12 + $0x5c8] sm:$0xff] }
  0xbc   :  { %410 = vst [vmem:[#allocation2 + $0x3d0] sm:$0xff] %v409_v58  ;;  %v537_v58 = vld [vmem:[%s10395_s12 + $0x5d0] sm:$0xff] }
  0xbd   :  { %412 = vst [vmem:[#allocation2 + $0x3d8] sm:$0xff] %v411_v59  ;;  %v539_v59 = vld [vmem:[%s10395_s12 + $0x5d8] sm:$0xff] }
  0xbe   :  { %414 = vst [vmem:[#allocation2 + $0x3e0] sm:$0xff] %v413_v60  ;;  %v541_v60 = vld [vmem:[%s10395_s12 + $0x5e0] sm:$0xff] }
  0xbf   :  { %416 = vst [vmem:[#allocation2 + $0x3e8] sm:$0xff] %v415_v61  ;;  %v543_v61 = vld [vmem:[%s10395_s12 + $0x5e8] sm:$0xff] }
  0xc0   :  { %418 = vst [vmem:[#allocation2 + $0x3f0] sm:$0xff] %v417_v62  ;;  %v545_v62 = vld [vmem:[%s10395_s12 + $0x5f0] sm:$0xff] }
  0xc1   :  { %420 = vst [vmem:[#allocation2 + $0x3f8] sm:$0xff] %v419_v63  ;;  %v547_v63 = vld [vmem:[%s10395_s12 + $0x5f8] sm:$0xff] }
  0xc2   :  { %422 = vst [vmem:[#allocation2 + $0x400] sm:$0xff] %v421_v0  ;;  %v549_v0 = vld [vmem:[%s10395_s12 + $0x600] sm:$0xff] }
  0xc3   :  { %424 = vst [vmem:[#allocation2 + $0x408] sm:$0xff] %v423_v1  ;;  %v551_v1 = vld [vmem:[%s10395_s12 + $0x608] sm:$0xff] }
  0xc4   :  { %426 = vst [vmem:[#allocation2 + $0x410] sm:$0xff] %v425_v2  ;;  %v553_v2 = vld [vmem:[%s10395_s12 + $0x610] sm:$0xff] }
  0xc5   :  { %428 = vst [vmem:[#allocation2 + $0x418] sm:$0xff] %v427_v3  ;;  %v555_v3 = vld [vmem:[%s10395_s12 + $0x618] sm:$0xff] }
  0xc6   :  { %430 = vst [vmem:[#allocation2 + $0x420] sm:$0xff] %v429_v4  ;;  %v557_v4 = vld [vmem:[%s10395_s12 + $0x620] sm:$0xff] }
  0xc7   :  { %432 = vst [vmem:[#allocation2 + $0x428] sm:$0xff] %v431_v5  ;;  %v559_v5 = vld [vmem:[%s10395_s12 + $0x628] sm:$0xff] }
  0xc8   :  { %434 = vst [vmem:[#allocation2 + $0x430] sm:$0xff] %v433_v6  ;;  %v561_v6 = vld [vmem:[%s10395_s12 + $0x630] sm:$0xff] }
  0xc9   :  { %436 = vst [vmem:[#allocation2 + $0x438] sm:$0xff] %v435_v7  ;;  %v563_v7 = vld [vmem:[%s10395_s12 + $0x638] sm:$0xff] }
  0xca   :  { %438 = vst [vmem:[#allocation2 + $0x440] sm:$0xff] %v437_v8  ;;  %v565_v8 = vld [vmem:[%s10395_s12 + $0x640] sm:$0xff] }
  0xcb   :  { %440 = vst [vmem:[#allocation2 + $0x448] sm:$0xff] %v439_v9  ;;  %v567_v9 = vld [vmem:[%s10395_s12 + $0x648] sm:$0xff] }
  0xcc   :  { %442 = vst [vmem:[#allocation2 + $0x450] sm:$0xff] %v441_v10  ;;  %v569_v10 = vld [vmem:[%s10395_s12 + $0x650] sm:$0xff] }
  0xcd   :  { %444 = vst [vmem:[#allocation2 + $0x458] sm:$0xff] %v443_v11  ;;  %v571_v11 = vld [vmem:[%s10395_s12 + $0x658] sm:$0xff] }
  0xce   :  { %446 = vst [vmem:[#allocation2 + $0x460] sm:$0xff] %v445_v12  ;;  %v573_v12 = vld [vmem:[%s10395_s12 + $0x660] sm:$0xff] }
  0xcf   :  { %448 = vst [vmem:[#allocation2 + $0x468] sm:$0xff] %v447_v13  ;;  %v575_v13 = vld [vmem:[%s10395_s12 + $0x668] sm:$0xff] }
  0xd0   :  { %450 = vst [vmem:[#allocation2 + $0x470] sm:$0xff] %v449_v14  ;;  %v577_v14 = vld [vmem:[%s10395_s12 + $0x670] sm:$0xff] }
  0xd1   :  { %452 = vst [vmem:[#allocation2 + $0x478] sm:$0xff] %v451_v15  ;;  %v579_v15 = vld [vmem:[%s10395_s12 + $0x678] sm:$0xff] }
  0xd2   :  { %454 = vst [vmem:[#allocation2 + $0x480] sm:$0xff] %v453_v16  ;;  %v581_v16 = vld [vmem:[%s10395_s12 + $0x680] sm:$0xff] }
  0xd3   :  { %456 = vst [vmem:[#allocation2 + $0x488] sm:$0xff] %v455_v17  ;;  %v583_v17 = vld [vmem:[%s10395_s12 + $0x688] sm:$0xff] }
  0xd4   :  { %458 = vst [vmem:[#allocation2 + $0x490] sm:$0xff] %v457_v18  ;;  %v585_v18 = vld [vmem:[%s10395_s12 + $0x690] sm:$0xff] }
  0xd5   :  { %460 = vst [vmem:[#allocation2 + $0x498] sm:$0xff] %v459_v19  ;;  %v587_v19 = vld [vmem:[%s10395_s12 + $0x698] sm:$0xff] }
  0xd6   :  { %462 = vst [vmem:[#allocation2 + $0x4a0] sm:$0xff] %v461_v20  ;;  %v589_v20 = vld [vmem:[%s10395_s12 + $0x6a0] sm:$0xff] }
  0xd7   :  { %464 = vst [vmem:[#allocation2 + $0x4a8] sm:$0xff] %v463_v21  ;;  %v591_v21 = vld [vmem:[%s10395_s12 + $0x6a8] sm:$0xff] }
  0xd8   :  { %466 = vst [vmem:[#allocation2 + $0x4b0] sm:$0xff] %v465_v22  ;;  %v593_v22 = vld [vmem:[%s10395_s12 + $0x6b0] sm:$0xff] }
  0xd9   :  { %468 = vst [vmem:[#allocation2 + $0x4b8] sm:$0xff] %v467_v23  ;;  %v595_v23 = vld [vmem:[%s10395_s12 + $0x6b8] sm:$0xff] }
  0xda   :  { %470 = vst [vmem:[#allocation2 + $0x4c0] sm:$0xff] %v469_v24  ;;  %v597_v24 = vld [vmem:[%s10395_s12 + $0x6c0] sm:$0xff] }
  0xdb   :  { %472 = vst [vmem:[#allocation2 + $0x4c8] sm:$0xff] %v471_v25  ;;  %v599_v25 = vld [vmem:[%s10395_s12 + $0x6c8] sm:$0xff] }
  0xdc   :  { %474 = vst [vmem:[#allocation2 + $0x4d0] sm:$0xff] %v473_v26  ;;  %v601_v26 = vld [vmem:[%s10395_s12 + $0x6d0] sm:$0xff] }
  0xdd   :  { %476 = vst [vmem:[#allocation2 + $0x4d8] sm:$0xff] %v475_v27  ;;  %v603_v27 = vld [vmem:[%s10395_s12 + $0x6d8] sm:$0xff] }
  0xde   :  { %478 = vst [vmem:[#allocation2 + $0x4e0] sm:$0xff] %v477_v28  ;;  %v605_v28 = vld [vmem:[%s10395_s12 + $0x6e0] sm:$0xff] }
  0xdf   :  { %480 = vst [vmem:[#allocation2 + $0x4e8] sm:$0xff] %v479_v29  ;;  %v607_v29 = vld [vmem:[%s10395_s12 + $0x6e8] sm:$0xff] }
  0xe0   :  { %482 = vst [vmem:[#allocation2 + $0x4f0] sm:$0xff] %v481_v30  ;;  %v609_v30 = vld [vmem:[%s10395_s12 + $0x6f0] sm:$0xff] }
  0xe1   :  { %484 = vst [vmem:[#allocation2 + $0x4f8] sm:$0xff] %v483_v31  ;;  %v611_v31 = vld [vmem:[%s10395_s12 + $0x6f8] sm:$0xff] }
  0xe2   :  { %486 = vst [vmem:[#allocation2 + $0x500] sm:$0xff] %v485_v32  ;;  %v613_v32 = vld [vmem:[%s10395_s12 + $0x700] sm:$0xff] }
  0xe3   :  { %488 = vst [vmem:[#allocation2 + $0x508] sm:$0xff] %v487_v33  ;;  %v615_v33 = vld [vmem:[%s10395_s12 + $0x708] sm:$0xff] }
  0xe4   :  { %490 = vst [vmem:[#allocation2 + $0x510] sm:$0xff] %v489_v34  ;;  %v617_v34 = vld [vmem:[%s10395_s12 + $0x710] sm:$0xff] }
  0xe5   :  { %492 = vst [vmem:[#allocation2 + $0x518] sm:$0xff] %v491_v35  ;;  %v619_v35 = vld [vmem:[%s10395_s12 + $0x718] sm:$0xff] }
  0xe6   :  { %494 = vst [vmem:[#allocation2 + $0x520] sm:$0xff] %v493_v36  ;;  %v621_v36 = vld [vmem:[%s10395_s12 + $0x720] sm:$0xff] }
  0xe7   :  { %496 = vst [vmem:[#allocation2 + $0x528] sm:$0xff] %v495_v37  ;;  %v623_v37 = vld [vmem:[%s10395_s12 + $0x728] sm:$0xff] }
  0xe8   :  { %498 = vst [vmem:[#allocation2 + $0x530] sm:$0xff] %v497_v38  ;;  %v625_v38 = vld [vmem:[%s10395_s12 + $0x730] sm:$0xff] }
  0xe9   :  { %500 = vst [vmem:[#allocation2 + $0x538] sm:$0xff] %v499_v39  ;;  %v627_v39 = vld [vmem:[%s10395_s12 + $0x738] sm:$0xff] }
  0xea   :  { %502 = vst [vmem:[#allocation2 + $0x540] sm:$0xff] %v501_v40  ;;  %v629_v40 = vld [vmem:[%s10395_s12 + $0x740] sm:$0xff] }
  0xeb   :  { %504 = vst [vmem:[#allocation2 + $0x548] sm:$0xff] %v503_v41  ;;  %v631_v41 = vld [vmem:[%s10395_s12 + $0x748] sm:$0xff] }
  0xec   :  { %506 = vst [vmem:[#allocation2 + $0x550] sm:$0xff] %v505_v42  ;;  %v633_v42 = vld [vmem:[%s10395_s12 + $0x750] sm:$0xff] }
  0xed   :  { %508 = vst [vmem:[#allocation2 + $0x558] sm:$0xff] %v507_v43  ;;  %v635_v43 = vld [vmem:[%s10395_s12 + $0x758] sm:$0xff] }
  0xee   :  { %510 = vst [vmem:[#allocation2 + $0x560] sm:$0xff] %v509_v44  ;;  %v637_v44 = vld [vmem:[%s10395_s12 + $0x760] sm:$0xff] }
  0xef   :  { %512 = vst [vmem:[#allocation2 + $0x568] sm:$0xff] %v511_v45  ;;  %v639_v45 = vld [vmem:[%s10395_s12 + $0x768] sm:$0xff] }
  0xf0   :  { %514 = vst [vmem:[#allocation2 + $0x570] sm:$0xff] %v513_v46  ;;  %v641_v46 = vld [vmem:[%s10395_s12 + $0x770] sm:$0xff] }
  0xf1   :  { %516 = vst [vmem:[#allocation2 + $0x578] sm:$0xff] %v515_v47  ;;  %v643_v47 = vld [vmem:[%s10395_s12 + $0x778] sm:$0xff] }
  0xf2   :  { %518 = vst [vmem:[#allocation2 + $0x580] sm:$0xff] %v517_v48  ;;  %v645_v48 = vld [vmem:[%s10395_s12 + $0x780] sm:$0xff] }
  0xf3   :  { %520 = vst [vmem:[#allocation2 + $0x588] sm:$0xff] %v519_v49  ;;  %v647_v49 = vld [vmem:[%s10395_s12 + $0x788] sm:$0xff] }
  0xf4   :  { %522 = vst [vmem:[#allocation2 + $0x590] sm:$0xff] %v521_v50  ;;  %v649_v50 = vld [vmem:[%s10395_s12 + $0x790] sm:$0xff] }
  0xf5   :  { %524 = vst [vmem:[#allocation2 + $0x598] sm:$0xff] %v523_v51  ;;  %v651_v51 = vld [vmem:[%s10395_s12 + $0x798] sm:$0xff] }
  0xf6   :  { %526 = vst [vmem:[#allocation2 + $0x5a0] sm:$0xff] %v525_v52  ;;  %v653_v52 = vld [vmem:[%s10395_s12 + $0x7a0] sm:$0xff] }
  0xf7   :  { %528 = vst [vmem:[#allocation2 + $0x5a8] sm:$0xff] %v527_v53  ;;  %v655_v53 = vld [vmem:[%s10395_s12 + $0x7a8] sm:$0xff] }
  0xf8   :  { %530 = vst [vmem:[#allocation2 + $0x5b0] sm:$0xff] %v529_v54  ;;  %v657_v54 = vld [vmem:[%s10395_s12 + $0x7b0] sm:$0xff] }
  0xf9   :  { %532 = vst [vmem:[#allocation2 + $0x5b8] sm:$0xff] %v531_v55  ;;  %v659_v55 = vld [vmem:[%s10395_s12 + $0x7b8] sm:$0xff] }
  0xfa   :  { %534 = vst [vmem:[#allocation2 + $0x5c0] sm:$0xff] %v533_v56  ;;  %v661_v56 = vld [vmem:[%s10395_s12 + $0x7c0] sm:$0xff] }
  0xfb   :  { %536 = vst [vmem:[#allocation2 + $0x5c8] sm:$0xff] %v535_v57  ;;  %v663_v57 = vld [vmem:[%s10395_s12 + $0x7c8] sm:$0xff] }
  0xfc   :  { %538 = vst [vmem:[#allocation2 + $0x5d0] sm:$0xff] %v537_v58  ;;  %v665_v58 = vld [vmem:[%s10395_s12 + $0x7d0] sm:$0xff] }
  0xfd   :  { %540 = vst [vmem:[#allocation2 + $0x5d8] sm:$0xff] %v539_v59  ;;  %v667_v59 = vld [vmem:[%s10395_s12 + $0x7d8] sm:$0xff] }
  0xfe   :  { %542 = vst [vmem:[#allocation2 + $0x5e0] sm:$0xff] %v541_v60  ;;  %v669_v60 = vld [vmem:[%s10395_s12 + $0x7e0] sm:$0xff] }
  0xff   :  { %544 = vst [vmem:[#allocation2 + $0x5e8] sm:$0xff] %v543_v61  ;;  %v671_v61 = vld [vmem:[%s10395_s12 + $0x7e8] sm:$0xff] }
 0x100   :  { %546 = vst [vmem:[#allocation2 + $0x5f0] sm:$0xff] %v545_v62  ;;  %v673_v62 = vld [vmem:[%s10395_s12 + $0x7f0] sm:$0xff] }
 0x101   :  { %548 = vst [vmem:[#allocation2 + $0x5f8] sm:$0xff] %v547_v63  ;;  %v675_v63 = vld [vmem:[%s10395_s12 + $0x7f8] sm:$0xff] }
 0x102   :  { %550 = vst [vmem:[#allocation2 + $0x600] sm:$0xff] %v549_v0 }
 0x103   :  { %552 = vst [vmem:[#allocation2 + $0x608] sm:$0xff] %v551_v1 }
 0x104   :  { %554 = vst [vmem:[#allocation2 + $0x610] sm:$0xff] %v553_v2 }
 0x105   :  { %556 = vst [vmem:[#allocation2 + $0x618] sm:$0xff] %v555_v3 }
 0x106   :  { %558 = vst [vmem:[#allocation2 + $0x620] sm:$0xff] %v557_v4 }
 0x107   :  { %560 = vst [vmem:[#allocation2 + $0x628] sm:$0xff] %v559_v5 }
 0x108   :  { %562 = vst [vmem:[#allocation2 + $0x630] sm:$0xff] %v561_v6 }
 0x109   :  { %564 = vst [vmem:[#allocation2 + $0x638] sm:$0xff] %v563_v7 }
 0x10a   :  { %566 = vst [vmem:[#allocation2 + $0x640] sm:$0xff] %v565_v8 }
 0x10b   :  { %568 = vst [vmem:[#allocation2 + $0x648] sm:$0xff] %v567_v9 }
 0x10c   :  { %570 = vst [vmem:[#allocation2 + $0x650] sm:$0xff] %v569_v10 }
 0x10d   :  { %572 = vst [vmem:[#allocation2 + $0x658] sm:$0xff] %v571_v11 }
 0x10e   :  { %574 = vst [vmem:[#allocation2 + $0x660] sm:$0xff] %v573_v12 }
 0x10f   :  { %576 = vst [vmem:[#allocation2 + $0x668] sm:$0xff] %v575_v13 }
 0x110   :  { %578 = vst [vmem:[#allocation2 + $0x670] sm:$0xff] %v577_v14 }
 0x111   :  { %580 = vst [vmem:[#allocation2 + $0x678] sm:$0xff] %v579_v15 }
 0x112   :  { %582 = vst [vmem:[#allocation2 + $0x680] sm:$0xff] %v581_v16 }
 0x113   :  { %584 = vst [vmem:[#allocation2 + $0x688] sm:$0xff] %v583_v17 }
 0x114   :  { %586 = vst [vmem:[#allocation2 + $0x690] sm:$0xff] %v585_v18 }
 0x115   :  { %588 = vst [vmem:[#allocation2 + $0x698] sm:$0xff] %v587_v19 }
 0x116   :  { %590 = vst [vmem:[#allocation2 + $0x6a0] sm:$0xff] %v589_v20 }
 0x117   :  { %592 = vst [vmem:[#allocation2 + $0x6a8] sm:$0xff] %v591_v21 }
 0x118   :  { %594 = vst [vmem:[#allocation2 + $0x6b0] sm:$0xff] %v593_v22 }
 0x119   :  { %596 = vst [vmem:[#allocation2 + $0x6b8] sm:$0xff] %v595_v23 }
 0x11a   :  { %598 = vst [vmem:[#allocation2 + $0x6c0] sm:$0xff] %v597_v24 }
 0x11b   :  { %600 = vst [vmem:[#allocation2 + $0x6c8] sm:$0xff] %v599_v25 }
 0x11c   :  { %602 = vst [vmem:[#allocation2 + $0x6d0] sm:$0xff] %v601_v26 }
 0x11d   :  { %604 = vst [vmem:[#allocation2 + $0x6d8] sm:$0xff] %v603_v27 }
 0x11e   :  { %606 = vst [vmem:[#allocation2 + $0x6e0] sm:$0xff] %v605_v28 }
 0x11f   :  { %608 = vst [vmem:[#allocation2 + $0x6e8] sm:$0xff] %v607_v29 }
 0x120   :  { %610 = vst [vmem:[#allocation2 + $0x6f0] sm:$0xff] %v609_v30 }
 0x121   :  { %612 = vst [vmem:[#allocation2 + $0x6f8] sm:$0xff] %v611_v31 }
 0x122   :  { %614 = vst [vmem:[#allocation2 + $0x700] sm:$0xff] %v613_v32 }
 0x123   :  { %616 = vst [vmem:[#allocation2 + $0x708] sm:$0xff] %v615_v33 }
 0x124   :  { %618 = vst [vmem:[#allocation2 + $0x710] sm:$0xff] %v617_v34 }
 0x125   :  { %620 = vst [vmem:[#allocation2 + $0x718] sm:$0xff] %v619_v35 }
 0x126   :  { %622 = vst [vmem:[#allocation2 + $0x720] sm:$0xff] %v621_v36 }
 0x127   :  { %624 = vst [vmem:[#allocation2 + $0x728] sm:$0xff] %v623_v37 }
 0x128   :  { %626 = vst [vmem:[#allocation2 + $0x730] sm:$0xff] %v625_v38 }
 0x129   :  { %628 = vst [vmem:[#allocation2 + $0x738] sm:$0xff] %v627_v39 }
 0x12a   :  { %630 = vst [vmem:[#allocation2 + $0x740] sm:$0xff] %v629_v40 }
 0x12b   :  { %632 = vst [vmem:[#allocation2 + $0x748] sm:$0xff] %v631_v41 }
 0x12c   :  { %634 = vst [vmem:[#allocation2 + $0x750] sm:$0xff] %v633_v42 }
 0x12d   :  { %636 = vst [vmem:[#allocation2 + $0x758] sm:$0xff] %v635_v43 }
 0x12e   :  { %638 = vst [vmem:[#allocation2 + $0x760] sm:$0xff] %v637_v44 }
 0x12f   :  { %640 = vst [vmem:[#allocation2 + $0x768] sm:$0xff] %v639_v45 }
 0x130   :  { %642 = vst [vmem:[#allocation2 + $0x770] sm:$0xff] %v641_v46 }
 0x131   :  { %644 = vst [vmem:[#allocation2 + $0x778] sm:$0xff] %v643_v47 }
 0x132   :  { %646 = vst [vmem:[#allocation2 + $0x780] sm:$0xff] %v645_v48 }
 0x133   :  { %648 = vst [vmem:[#allocation2 + $0x788] sm:$0xff] %v647_v49 }
 0x134   :  { %650 = vst [vmem:[#allocation2 + $0x790] sm:$0xff] %v649_v50 }
 0x135   :  { %652 = vst [vmem:[#allocation2 + $0x798] sm:$0xff] %v651_v51 }
 0x136   :  { %654 = vst [vmem:[#allocation2 + $0x7a0] sm:$0xff] %v653_v52 }
 0x137   :  { %656 = vst [vmem:[#allocation2 + $0x7a8] sm:$0xff] %v655_v53 }
 0x138   :  { %658 = vst [vmem:[#allocation2 + $0x7b0] sm:$0xff] %v657_v54 }
 0x139   :  { %660 = vst [vmem:[#allocation2 + $0x7b8] sm:$0xff] %v659_v55 }
 0x13a   :  { %662 = vst [vmem:[#allocation2 + $0x7c0] sm:$0xff] %v661_v56 }
 0x13b   :  { %664 = vst [vmem:[#allocation2 + $0x7c8] sm:$0xff] %v663_v57 }
 0x13c   :  { %666 = vst [vmem:[#allocation2 + $0x7d0] sm:$0xff] %v665_v58 }
 0x13d   :  { %668 = vst [vmem:[#allocation2 + $0x7d8] sm:$0xff] %v667_v59 }
 0x13e   :  { %670 = vst [vmem:[#allocation2 + $0x7e0] sm:$0xff] %v669_v60 }
 0x13f   :  { %672 = vst [vmem:[#allocation2 + $0x7e8] sm:$0xff] %v671_v61 }
 0x140   :  { %674 = vst [vmem:[#allocation2 + $0x7f0] sm:$0xff] %v673_v62 }
 0x141   :  { %676 = vst [vmem:[#allocation2 + $0x7f8] sm:$0xff] %v675_v63 }
 0x142   :  { %682 = vsyncadd [#allocation4], 32768  ;;  %v694_v0 = vld [vmem:[%s10435_s6] sm:$0xff]  ;;  %v696_v1 = vld [vmem:[%s10435_s6 + $0x8] sm:$0xff] }
 0x143   :  { %695 = vst [vmem:[#allocation3] sm:$0xff] %v694_v0  ;;  %v698_v2 = vld [vmem:[%s10435_s6 + $0x10] sm:$0xff]  ;;  %v700_v3 = vld [vmem:[%s10435_s6 + $0x18] sm:$0xff]  ;;  %v702_v4 = vld [vmem:[%s10435_s6 + $0x20] sm:$0xff] }
 0x144   :  { %697 = vst [vmem:[#allocation3 + $0x8] sm:$0xff] %v696_v1  ;;  %v704_v5 = vld [vmem:[%s10435_s6 + $0x28] sm:$0xff]  ;;  %v706_v6 = vld [vmem:[%s10435_s6 + $0x30] sm:$0xff]  ;;  %v708_v7 = vld [vmem:[%s10435_s6 + $0x38] sm:$0xff] }
 0x145   :  { %699 = vst [vmem:[#allocation3 + $0x10] sm:$0xff] %v698_v2  ;;  %v710_v8 = vld [vmem:[%s10435_s6 + $0x40] sm:$0xff]  ;;  %v712_v9 = vld [vmem:[%s10435_s6 + $0x48] sm:$0xff]  ;;  %v714_v10 = vld [vmem:[%s10435_s6 + $0x50] sm:$0xff] }
 0x146   :  { %701 = vst [vmem:[#allocation3 + $0x18] sm:$0xff] %v700_v3  ;;  %v716_v11 = vld [vmem:[%s10435_s6 + $0x58] sm:$0xff]  ;;  %v718_v12 = vld [vmem:[%s10435_s6 + $0x60] sm:$0xff]  ;;  %v720_v13 = vld [vmem:[%s10435_s6 + $0x68] sm:$0xff] }
 0x147   :  { %703 = vst [vmem:[#allocation3 + $0x20] sm:$0xff] %v702_v4  ;;  %v722_v14 = vld [vmem:[%s10435_s6 + $0x70] sm:$0xff]  ;;  %v724_v15 = vld [vmem:[%s10435_s6 + $0x78] sm:$0xff]  ;;  %v726_v16 = vld [vmem:[%s10435_s6 + $0x80] sm:$0xff] }
 0x148   :  { %705 = vst [vmem:[#allocation3 + $0x28] sm:$0xff] %v704_v5  ;;  %v728_v17 = vld [vmem:[%s10435_s6 + $0x88] sm:$0xff]  ;;  %v730_v18 = vld [vmem:[%s10435_s6 + $0x90] sm:$0xff]  ;;  %v732_v19 = vld [vmem:[%s10435_s6 + $0x98] sm:$0xff] }
 0x149   :  { %707 = vst [vmem:[#allocation3 + $0x30] sm:$0xff] %v706_v6  ;;  %v734_v20 = vld [vmem:[%s10435_s6 + $0xa0] sm:$0xff]  ;;  %v736_v21 = vld [vmem:[%s10435_s6 + $0xa8] sm:$0xff]  ;;  %v738_v22 = vld [vmem:[%s10435_s6 + $0xb0] sm:$0xff] }
 0x14a   :  { %709 = vst [vmem:[#allocation3 + $0x38] sm:$0xff] %v708_v7  ;;  %v740_v23 = vld [vmem:[%s10435_s6 + $0xb8] sm:$0xff]  ;;  %v742_v24 = vld [vmem:[%s10435_s6 + $0xc0] sm:$0xff]  ;;  %v744_v25 = vld [vmem:[%s10435_s6 + $0xc8] sm:$0xff] }
 0x14b   :  { %711 = vst [vmem:[#allocation3 + $0x40] sm:$0xff] %v710_v8  ;;  %v746_v26 = vld [vmem:[%s10435_s6 + $0xd0] sm:$0xff]  ;;  %v748_v27 = vld [vmem:[%s10435_s6 + $0xd8] sm:$0xff]  ;;  %v750_v28 = vld [vmem:[%s10435_s6 + $0xe0] sm:$0xff] }
 0x14c   :  { %713 = vst [vmem:[#allocation3 + $0x48] sm:$0xff] %v712_v9  ;;  %v752_v29 = vld [vmem:[%s10435_s6 + $0xe8] sm:$0xff]  ;;  %v754_v30 = vld [vmem:[%s10435_s6 + $0xf0] sm:$0xff]  ;;  %v756_v31 = vld [vmem:[%s10435_s6 + $0xf8] sm:$0xff] }
 0x14d   :  { %715 = vst [vmem:[#allocation3 + $0x50] sm:$0xff] %v714_v10  ;;  %v758_v32 = vld [vmem:[%s10435_s6 + $0x100] sm:$0xff]  ;;  %v760_v33 = vld [vmem:[%s10435_s6 + $0x108] sm:$0xff]  ;;  %v762_v34 = vld [vmem:[%s10435_s6 + $0x110] sm:$0xff] }
 0x14e   :  { %717 = vst [vmem:[#allocation3 + $0x58] sm:$0xff] %v716_v11  ;;  %v764_v35 = vld [vmem:[%s10435_s6 + $0x118] sm:$0xff]  ;;  %v766_v36 = vld [vmem:[%s10435_s6 + $0x120] sm:$0xff]  ;;  %v768_v37 = vld [vmem:[%s10435_s6 + $0x128] sm:$0xff] }
 0x14f   :  { %719 = vst [vmem:[#allocation3 + $0x60] sm:$0xff] %v718_v12  ;;  %v770_v38 = vld [vmem:[%s10435_s6 + $0x130] sm:$0xff]  ;;  %v772_v39 = vld [vmem:[%s10435_s6 + $0x138] sm:$0xff]  ;;  %v774_v40 = vld [vmem:[%s10435_s6 + $0x140] sm:$0xff] }
 0x150   :  { %721 = vst [vmem:[#allocation3 + $0x68] sm:$0xff] %v720_v13  ;;  %v776_v41 = vld [vmem:[%s10435_s6 + $0x148] sm:$0xff]  ;;  %v778_v42 = vld [vmem:[%s10435_s6 + $0x150] sm:$0xff]  ;;  %v780_v43 = vld [vmem:[%s10435_s6 + $0x158] sm:$0xff] }
 0x151   :  { %723 = vst [vmem:[#allocation3 + $0x70] sm:$0xff] %v722_v14  ;;  %v782_v44 = vld [vmem:[%s10435_s6 + $0x160] sm:$0xff]  ;;  %v784_v45 = vld [vmem:[%s10435_s6 + $0x168] sm:$0xff]  ;;  %v786_v46 = vld [vmem:[%s10435_s6 + $0x170] sm:$0xff] }
 0x152   :  { %725 = vst [vmem:[#allocation3 + $0x78] sm:$0xff] %v724_v15  ;;  %v788_v47 = vld [vmem:[%s10435_s6 + $0x178] sm:$0xff]  ;;  %v790_v48 = vld [vmem:[%s10435_s6 + $0x180] sm:$0xff]  ;;  %v792_v49 = vld [vmem:[%s10435_s6 + $0x188] sm:$0xff] }
 0x153   :  { %727 = vst [vmem:[#allocation3 + $0x80] sm:$0xff] %v726_v16  ;;  %v794_v50 = vld [vmem:[%s10435_s6 + $0x190] sm:$0xff]  ;;  %v796_v51 = vld [vmem:[%s10435_s6 + $0x198] sm:$0xff]  ;;  %v798_v52 = vld [vmem:[%s10435_s6 + $0x1a0] sm:$0xff] }
 0x154   :  { %729 = vst [vmem:[#allocation3 + $0x88] sm:$0xff] %v728_v17  ;;  %v800_v53 = vld [vmem:[%s10435_s6 + $0x1a8] sm:$0xff]  ;;  %v802_v54 = vld [vmem:[%s10435_s6 + $0x1b0] sm:$0xff]  ;;  %v804_v55 = vld [vmem:[%s10435_s6 + $0x1b8] sm:$0xff] }
 0x155   :  { %731 = vst [vmem:[#allocation3 + $0x90] sm:$0xff] %v730_v18  ;;  %v806_v56 = vld [vmem:[%s10435_s6 + $0x1c0] sm:$0xff]  ;;  %v808_v57 = vld [vmem:[%s10435_s6 + $0x1c8] sm:$0xff]  ;;  %v810_v58 = vld [vmem:[%s10435_s6 + $0x1d0] sm:$0xff] }
 0x156   :  { %733 = vst [vmem:[#allocation3 + $0x98] sm:$0xff] %v732_v19  ;;  %v812_v59 = vld [vmem:[%s10435_s6 + $0x1d8] sm:$0xff]  ;;  %v814_v60 = vld [vmem:[%s10435_s6 + $0x1e0] sm:$0xff]  ;;  %v816_v61 = vld [vmem:[%s10435_s6 + $0x1e8] sm:$0xff] }
 0x157   :  { %735 = vst [vmem:[#allocation3 + $0xa0] sm:$0xff] %v734_v20  ;;  %v818_v62 = vld [vmem:[%s10435_s6 + $0x1f0] sm:$0xff]  ;;  %v820_v63 = vld [vmem:[%s10435_s6 + $0x1f8] sm:$0xff]  ;;  %v822_v0 = vld [vmem:[%s10435_s6 + $0x200] sm:$0xff] }
 0x158   :  { %737 = vst [vmem:[#allocation3 + $0xa8] sm:$0xff] %v736_v21  ;;  %v824_v1 = vld [vmem:[%s10435_s6 + $0x208] sm:$0xff]  ;;  %v826_v2 = vld [vmem:[%s10435_s6 + $0x210] sm:$0xff]  ;;  %v828_v3 = vld [vmem:[%s10435_s6 + $0x218] sm:$0xff] }
 0x159   :  { %739 = vst [vmem:[#allocation3 + $0xb0] sm:$0xff] %v738_v22  ;;  %v830_v4 = vld [vmem:[%s10435_s6 + $0x220] sm:$0xff]  ;;  %v832_v5 = vld [vmem:[%s10435_s6 + $0x228] sm:$0xff]  ;;  %v834_v6 = vld [vmem:[%s10435_s6 + $0x230] sm:$0xff] }
 0x15a   :  { %741 = vst [vmem:[#allocation3 + $0xb8] sm:$0xff] %v740_v23  ;;  %v836_v7 = vld [vmem:[%s10435_s6 + $0x238] sm:$0xff]  ;;  %v838_v8 = vld [vmem:[%s10435_s6 + $0x240] sm:$0xff]  ;;  %v840_v9 = vld [vmem:[%s10435_s6 + $0x248] sm:$0xff] }
 0x15b   :  { %743 = vst [vmem:[#allocation3 + $0xc0] sm:$0xff] %v742_v24  ;;  %v842_v10 = vld [vmem:[%s10435_s6 + $0x250] sm:$0xff]  ;;  %v844_v11 = vld [vmem:[%s10435_s6 + $0x258] sm:$0xff]  ;;  %v846_v12 = vld [vmem:[%s10435_s6 + $0x260] sm:$0xff] }
 0x15c   :  { %745 = vst [vmem:[#allocation3 + $0xc8] sm:$0xff] %v744_v25  ;;  %v848_v13 = vld [vmem:[%s10435_s6 + $0x268] sm:$0xff]  ;;  %v850_v14 = vld [vmem:[%s10435_s6 + $0x270] sm:$0xff]  ;;  %v852_v15 = vld [vmem:[%s10435_s6 + $0x278] sm:$0xff] }
 0x15d   :  { %747 = vst [vmem:[#allocation3 + $0xd0] sm:$0xff] %v746_v26  ;;  %v854_v16 = vld [vmem:[%s10435_s6 + $0x280] sm:$0xff]  ;;  %v856_v17 = vld [vmem:[%s10435_s6 + $0x288] sm:$0xff]  ;;  %v858_v18 = vld [vmem:[%s10435_s6 + $0x290] sm:$0xff] }
 0x15e   :  { %749 = vst [vmem:[#allocation3 + $0xd8] sm:$0xff] %v748_v27  ;;  %v860_v19 = vld [vmem:[%s10435_s6 + $0x298] sm:$0xff]  ;;  %v862_v20 = vld [vmem:[%s10435_s6 + $0x2a0] sm:$0xff]  ;;  %v864_v21 = vld [vmem:[%s10435_s6 + $0x2a8] sm:$0xff] }
 0x15f   :  { %751 = vst [vmem:[#allocation3 + $0xe0] sm:$0xff] %v750_v28  ;;  %v866_v22 = vld [vmem:[%s10435_s6 + $0x2b0] sm:$0xff]  ;;  %v868_v23 = vld [vmem:[%s10435_s6 + $0x2b8] sm:$0xff]  ;;  %v870_v24 = vld [vmem:[%s10435_s6 + $0x2c0] sm:$0xff] }
 0x160   :  { %753 = vst [vmem:[#allocation3 + $0xe8] sm:$0xff] %v752_v29  ;;  %v872_v25 = vld [vmem:[%s10435_s6 + $0x2c8] sm:$0xff]  ;;  %v874_v26 = vld [vmem:[%s10435_s6 + $0x2d0] sm:$0xff]  ;;  %v876_v27 = vld [vmem:[%s10435_s6 + $0x2d8] sm:$0xff] }
 0x161   :  { %755 = vst [vmem:[#allocation3 + $0xf0] sm:$0xff] %v754_v30  ;;  %v878_v28 = vld [vmem:[%s10435_s6 + $0x2e0] sm:$0xff]  ;;  %v880_v29 = vld [vmem:[%s10435_s6 + $0x2e8] sm:$0xff]  ;;  %v882_v30 = vld [vmem:[%s10435_s6 + $0x2f0] sm:$0xff] }
 0x162   :  { %757 = vst [vmem:[#allocation3 + $0xf8] sm:$0xff] %v756_v31  ;;  %v884_v31 = vld [vmem:[%s10435_s6 + $0x2f8] sm:$0xff] }
 0x163   :  { %759 = vst [vmem:[#allocation3 + $0x100] sm:$0xff] %v758_v32  ;;  %v886_v32 = vld [vmem:[%s10435_s6 + $0x300] sm:$0xff] }
 0x164   :  { %761 = vst [vmem:[#allocation3 + $0x108] sm:$0xff] %v760_v33  ;;  %v888_v33 = vld [vmem:[%s10435_s6 + $0x308] sm:$0xff] }
 0x165   :  { %763 = vst [vmem:[#allocation3 + $0x110] sm:$0xff] %v762_v34  ;;  %v890_v34 = vld [vmem:[%s10435_s6 + $0x310] sm:$0xff] }
 0x166   :  { %765 = vst [vmem:[#allocation3 + $0x118] sm:$0xff] %v764_v35  ;;  %v892_v35 = vld [vmem:[%s10435_s6 + $0x318] sm:$0xff] }
 0x167   :  { %767 = vst [vmem:[#allocation3 + $0x120] sm:$0xff] %v766_v36  ;;  %v894_v36 = vld [vmem:[%s10435_s6 + $0x320] sm:$0xff] }
 0x168   :  { %769 = vst [vmem:[#allocation3 + $0x128] sm:$0xff] %v768_v37  ;;  %v896_v37 = vld [vmem:[%s10435_s6 + $0x328] sm:$0xff] }
 0x169   :  { %771 = vst [vmem:[#allocation3 + $0x130] sm:$0xff] %v770_v38  ;;  %v898_v38 = vld [vmem:[%s10435_s6 + $0x330] sm:$0xff] }
 0x16a   :  { %773 = vst [vmem:[#allocation3 + $0x138] sm:$0xff] %v772_v39  ;;  %v900_v39 = vld [vmem:[%s10435_s6 + $0x338] sm:$0xff] }
 0x16b   :  { %775 = vst [vmem:[#allocation3 + $0x140] sm:$0xff] %v774_v40  ;;  %v902_v40 = vld [vmem:[%s10435_s6 + $0x340] sm:$0xff] }
 0x16c   :  { %777 = vst [vmem:[#allocation3 + $0x148] sm:$0xff] %v776_v41  ;;  %v904_v41 = vld [vmem:[%s10435_s6 + $0x348] sm:$0xff] }
 0x16d   :  { %779 = vst [vmem:[#allocation3 + $0x150] sm:$0xff] %v778_v42  ;;  %v906_v42 = vld [vmem:[%s10435_s6 + $0x350] sm:$0xff] }
 0x16e   :  { %781 = vst [vmem:[#allocation3 + $0x158] sm:$0xff] %v780_v43  ;;  %v908_v43 = vld [vmem:[%s10435_s6 + $0x358] sm:$0xff] }
 0x16f   :  { %783 = vst [vmem:[#allocation3 + $0x160] sm:$0xff] %v782_v44  ;;  %v910_v44 = vld [vmem:[%s10435_s6 + $0x360] sm:$0xff] }
 0x170   :  { %785 = vst [vmem:[#allocation3 + $0x168] sm:$0xff] %v784_v45  ;;  %v912_v45 = vld [vmem:[%s10435_s6 + $0x368] sm:$0xff] }
 0x171   :  { %787 = vst [vmem:[#allocation3 + $0x170] sm:$0xff] %v786_v46  ;;  %v914_v46 = vld [vmem:[%s10435_s6 + $0x370] sm:$0xff] }
 0x172   :  { %789 = vst [vmem:[#allocation3 + $0x178] sm:$0xff] %v788_v47  ;;  %v916_v47 = vld [vmem:[%s10435_s6 + $0x378] sm:$0xff] }
 0x173   :  { %791 = vst [vmem:[#allocation3 + $0x180] sm:$0xff] %v790_v48  ;;  %v918_v48 = vld [vmem:[%s10435_s6 + $0x380] sm:$0xff] }
 0x174   :  { %793 = vst [vmem:[#allocation3 + $0x188] sm:$0xff] %v792_v49  ;;  %v920_v49 = vld [vmem:[%s10435_s6 + $0x388] sm:$0xff] }
 0x175   :  { %795 = vst [vmem:[#allocation3 + $0x190] sm:$0xff] %v794_v50  ;;  %v922_v50 = vld [vmem:[%s10435_s6 + $0x390] sm:$0xff] }
 0x176   :  { %797 = vst [vmem:[#allocation3 + $0x198] sm:$0xff] %v796_v51  ;;  %v924_v51 = vld [vmem:[%s10435_s6 + $0x398] sm:$0xff] }
 0x177   :  { %799 = vst [vmem:[#allocation3 + $0x1a0] sm:$0xff] %v798_v52  ;;  %v926_v52 = vld [vmem:[%s10435_s6 + $0x3a0] sm:$0xff] }
 0x178   :  { %801 = vst [vmem:[#allocation3 + $0x1a8] sm:$0xff] %v800_v53  ;;  %v928_v53 = vld [vmem:[%s10435_s6 + $0x3a8] sm:$0xff] }
 0x179   :  { %803 = vst [vmem:[#allocation3 + $0x1b0] sm:$0xff] %v802_v54  ;;  %v930_v54 = vld [vmem:[%s10435_s6 + $0x3b0] sm:$0xff] }
 0x17a   :  { %805 = vst [vmem:[#allocation3 + $0x1b8] sm:$0xff] %v804_v55  ;;  %v932_v55 = vld [vmem:[%s10435_s6 + $0x3b8] sm:$0xff] }
 0x17b   :  { %807 = vst [vmem:[#allocation3 + $0x1c0] sm:$0xff] %v806_v56  ;;  %v934_v56 = vld [vmem:[%s10435_s6 + $0x3c0] sm:$0xff] }
 0x17c   :  { %809 = vst [vmem:[#allocation3 + $0x1c8] sm:$0xff] %v808_v57  ;;  %v936_v57 = vld [vmem:[%s10435_s6 + $0x3c8] sm:$0xff] }
 0x17d   :  { %811 = vst [vmem:[#allocation3 + $0x1d0] sm:$0xff] %v810_v58  ;;  %v938_v58 = vld [vmem:[%s10435_s6 + $0x3d0] sm:$0xff] }
 0x17e   :  { %813 = vst [vmem:[#allocation3 + $0x1d8] sm:$0xff] %v812_v59  ;;  %v940_v59 = vld [vmem:[%s10435_s6 + $0x3d8] sm:$0xff] }
 0x17f   :  { %815 = vst [vmem:[#allocation3 + $0x1e0] sm:$0xff] %v814_v60  ;;  %v942_v60 = vld [vmem:[%s10435_s6 + $0x3e0] sm:$0xff] }
 0x180   :  { %817 = vst [vmem:[#allocation3 + $0x1e8] sm:$0xff] %v816_v61  ;;  %v944_v61 = vld [vmem:[%s10435_s6 + $0x3e8] sm:$0xff] }
 0x181   :  { %819 = vst [vmem:[#allocation3 + $0x1f0] sm:$0xff] %v818_v62  ;;  %v946_v62 = vld [vmem:[%s10435_s6 + $0x3f0] sm:$0xff] }
 0x182   :  { %821 = vst [vmem:[#allocation3 + $0x1f8] sm:$0xff] %v820_v63  ;;  %v948_v63 = vld [vmem:[%s10435_s6 + $0x3f8] sm:$0xff] }
 0x183   :  { %823 = vst [vmem:[#allocation3 + $0x200] sm:$0xff] %v822_v0  ;;  %v950_v0 = vld [vmem:[%s10435_s6 + $0x400] sm:$0xff] }
 0x184   :  { %825 = vst [vmem:[#allocation3 + $0x208] sm:$0xff] %v824_v1  ;;  %v952_v1 = vld [vmem:[%s10435_s6 + $0x408] sm:$0xff] }
 0x185   :  { %827 = vst [vmem:[#allocation3 + $0x210] sm:$0xff] %v826_v2  ;;  %v954_v2 = vld [vmem:[%s10435_s6 + $0x410] sm:$0xff] }
 0x186   :  { %829 = vst [vmem:[#allocation3 + $0x218] sm:$0xff] %v828_v3  ;;  %v956_v3 = vld [vmem:[%s10435_s6 + $0x418] sm:$0xff] }
 0x187   :  { %831 = vst [vmem:[#allocation3 + $0x220] sm:$0xff] %v830_v4  ;;  %v958_v4 = vld [vmem:[%s10435_s6 + $0x420] sm:$0xff] }
 0x188   :  { %833 = vst [vmem:[#allocation3 + $0x228] sm:$0xff] %v832_v5  ;;  %v960_v5 = vld [vmem:[%s10435_s6 + $0x428] sm:$0xff] }
 0x189   :  { %835 = vst [vmem:[#allocation3 + $0x230] sm:$0xff] %v834_v6  ;;  %v962_v6 = vld [vmem:[%s10435_s6 + $0x430] sm:$0xff] }
 0x18a   :  { %837 = vst [vmem:[#allocation3 + $0x238] sm:$0xff] %v836_v7  ;;  %v964_v7 = vld [vmem:[%s10435_s6 + $0x438] sm:$0xff] }
 0x18b   :  { %839 = vst [vmem:[#allocation3 + $0x240] sm:$0xff] %v838_v8  ;;  %v966_v8 = vld [vmem:[%s10435_s6 + $0x440] sm:$0xff] }
 0x18c   :  { %841 = vst [vmem:[#allocation3 + $0x248] sm:$0xff] %v840_v9  ;;  %v968_v9 = vld [vmem:[%s10435_s6 + $0x448] sm:$0xff] }
 0x18d   :  { %843 = vst [vmem:[#allocation3 + $0x250] sm:$0xff] %v842_v10  ;;  %v970_v10 = vld [vmem:[%s10435_s6 + $0x450] sm:$0xff] }
 0x18e   :  { %845 = vst [vmem:[#allocation3 + $0x258] sm:$0xff] %v844_v11  ;;  %v972_v11 = vld [vmem:[%s10435_s6 + $0x458] sm:$0xff] }
 0x18f   :  { %847 = vst [vmem:[#allocation3 + $0x260] sm:$0xff] %v846_v12  ;;  %v974_v12 = vld [vmem:[%s10435_s6 + $0x460] sm:$0xff] }
 0x190   :  { %849 = vst [vmem:[#allocation3 + $0x268] sm:$0xff] %v848_v13  ;;  %v976_v13 = vld [vmem:[%s10435_s6 + $0x468] sm:$0xff] }
 0x191   :  { %851 = vst [vmem:[#allocation3 + $0x270] sm:$0xff] %v850_v14  ;;  %v978_v14 = vld [vmem:[%s10435_s6 + $0x470] sm:$0xff] }
 0x192   :  { %853 = vst [vmem:[#allocation3 + $0x278] sm:$0xff] %v852_v15  ;;  %v980_v15 = vld [vmem:[%s10435_s6 + $0x478] sm:$0xff] }
 0x193   :  { %855 = vst [vmem:[#allocation3 + $0x280] sm:$0xff] %v854_v16  ;;  %v982_v16 = vld [vmem:[%s10435_s6 + $0x480] sm:$0xff] }
 0x194   :  { %857 = vst [vmem:[#allocation3 + $0x288] sm:$0xff] %v856_v17  ;;  %v984_v17 = vld [vmem:[%s10435_s6 + $0x488] sm:$0xff] }
 0x195   :  { %859 = vst [vmem:[#allocation3 + $0x290] sm:$0xff] %v858_v18  ;;  %v986_v18 = vld [vmem:[%s10435_s6 + $0x490] sm:$0xff] }
 0x196   :  { %861 = vst [vmem:[#allocation3 + $0x298] sm:$0xff] %v860_v19  ;;  %v988_v19 = vld [vmem:[%s10435_s6 + $0x498] sm:$0xff] }
 0x197   :  { %863 = vst [vmem:[#allocation3 + $0x2a0] sm:$0xff] %v862_v20  ;;  %v990_v20 = vld [vmem:[%s10435_s6 + $0x4a0] sm:$0xff] }
 0x198   :  { %865 = vst [vmem:[#allocation3 + $0x2a8] sm:$0xff] %v864_v21  ;;  %v992_v21 = vld [vmem:[%s10435_s6 + $0x4a8] sm:$0xff] }
 0x199   :  { %867 = vst [vmem:[#allocation3 + $0x2b0] sm:$0xff] %v866_v22  ;;  %v994_v22 = vld [vmem:[%s10435_s6 + $0x4b0] sm:$0xff] }
 0x19a   :  { %869 = vst [vmem:[#allocation3 + $0x2b8] sm:$0xff] %v868_v23  ;;  %v996_v23 = vld [vmem:[%s10435_s6 + $0x4b8] sm:$0xff] }
 0x19b   :  { %871 = vst [vmem:[#allocation3 + $0x2c0] sm:$0xff] %v870_v24  ;;  %v998_v24 = vld [vmem:[%s10435_s6 + $0x4c0] sm:$0xff] }
 0x19c   :  { %873 = vst [vmem:[#allocation3 + $0x2c8] sm:$0xff] %v872_v25  ;;  %v1000_v25 = vld [vmem:[%s10435_s6 + $0x4c8] sm:$0xff] }
 0x19d   :  { %875 = vst [vmem:[#allocation3 + $0x2d0] sm:$0xff] %v874_v26  ;;  %v1002_v26 = vld [vmem:[%s10435_s6 + $0x4d0] sm:$0xff] }
 0x19e   :  { %877 = vst [vmem:[#allocation3 + $0x2d8] sm:$0xff] %v876_v27  ;;  %v1004_v27 = vld [vmem:[%s10435_s6 + $0x4d8] sm:$0xff] }
 0x19f   :  { %879 = vst [vmem:[#allocation3 + $0x2e0] sm:$0xff] %v878_v28  ;;  %v1006_v28 = vld [vmem:[%s10435_s6 + $0x4e0] sm:$0xff] }
 0x1a0   :  { %881 = vst [vmem:[#allocation3 + $0x2e8] sm:$0xff] %v880_v29  ;;  %v1008_v29 = vld [vmem:[%s10435_s6 + $0x4e8] sm:$0xff] }
 0x1a1   :  { %883 = vst [vmem:[#allocation3 + $0x2f0] sm:$0xff] %v882_v30  ;;  %v1010_v30 = vld [vmem:[%s10435_s6 + $0x4f0] sm:$0xff] }
 0x1a2   :  { %885 = vst [vmem:[#allocation3 + $0x2f8] sm:$0xff] %v884_v31  ;;  %v1012_v31 = vld [vmem:[%s10435_s6 + $0x4f8] sm:$0xff] }
 0x1a3   :  { %887 = vst [vmem:[#allocation3 + $0x300] sm:$0xff] %v886_v32  ;;  %v1014_v32 = vld [vmem:[%s10435_s6 + $0x500] sm:$0xff] }
 0x1a4   :  { %889 = vst [vmem:[#allocation3 + $0x308] sm:$0xff] %v888_v33  ;;  %v1016_v33 = vld [vmem:[%s10435_s6 + $0x508] sm:$0xff] }
 0x1a5   :  { %891 = vst [vmem:[#allocation3 + $0x310] sm:$0xff] %v890_v34  ;;  %v1018_v34 = vld [vmem:[%s10435_s6 + $0x510] sm:$0xff] }
 0x1a6   :  { %893 = vst [vmem:[#allocation3 + $0x318] sm:$0xff] %v892_v35  ;;  %v1020_v35 = vld [vmem:[%s10435_s6 + $0x518] sm:$0xff] }
 0x1a7   :  { %895 = vst [vmem:[#allocation3 + $0x320] sm:$0xff] %v894_v36  ;;  %v1022_v36 = vld [vmem:[%s10435_s6 + $0x520] sm:$0xff] }
 0x1a8   :  { %897 = vst [vmem:[#allocation3 + $0x328] sm:$0xff] %v896_v37  ;;  %v1024_v37 = vld [vmem:[%s10435_s6 + $0x528] sm:$0xff] }
 0x1a9   :  { %899 = vst [vmem:[#allocation3 + $0x330] sm:$0xff] %v898_v38  ;;  %v1026_v38 = vld [vmem:[%s10435_s6 + $0x530] sm:$0xff] }
 0x1aa   :  { %901 = vst [vmem:[#allocation3 + $0x338] sm:$0xff] %v900_v39  ;;  %v1028_v39 = vld [vmem:[%s10435_s6 + $0x538] sm:$0xff] }
 0x1ab   :  { %903 = vst [vmem:[#allocation3 + $0x340] sm:$0xff] %v902_v40  ;;  %v1030_v40 = vld [vmem:[%s10435_s6 + $0x540] sm:$0xff] }
 0x1ac   :  { %905 = vst [vmem:[#allocation3 + $0x348] sm:$0xff] %v904_v41  ;;  %v1032_v41 = vld [vmem:[%s10435_s6 + $0x548] sm:$0xff] }
 0x1ad   :  { %907 = vst [vmem:[#allocation3 + $0x350] sm:$0xff] %v906_v42  ;;  %v1034_v42 = vld [vmem:[%s10435_s6 + $0x550] sm:$0xff] }
 0x1ae   :  { %909 = vst [vmem:[#allocation3 + $0x358] sm:$0xff] %v908_v43  ;;  %v1036_v43 = vld [vmem:[%s10435_s6 + $0x558] sm:$0xff] }
 0x1af   :  { %911 = vst [vmem:[#allocation3 + $0x360] sm:$0xff] %v910_v44  ;;  %v1038_v44 = vld [vmem:[%s10435_s6 + $0x560] sm:$0xff] }
 0x1b0   :  { %913 = vst [vmem:[#allocation3 + $0x368] sm:$0xff] %v912_v45  ;;  %v1040_v45 = vld [vmem:[%s10435_s6 + $0x568] sm:$0xff] }
 0x1b1   :  { %915 = vst [vmem:[#allocation3 + $0x370] sm:$0xff] %v914_v46  ;;  %v1042_v46 = vld [vmem:[%s10435_s6 + $0x570] sm:$0xff] }
 0x1b2   :  { %917 = vst [vmem:[#allocation3 + $0x378] sm:$0xff] %v916_v47  ;;  %v1044_v47 = vld [vmem:[%s10435_s6 + $0x578] sm:$0xff] }
 0x1b3   :  { %919 = vst [vmem:[#allocation3 + $0x380] sm:$0xff] %v918_v48  ;;  %v1046_v48 = vld [vmem:[%s10435_s6 + $0x580] sm:$0xff] }
 0x1b4   :  { %921 = vst [vmem:[#allocation3 + $0x388] sm:$0xff] %v920_v49  ;;  %v1048_v49 = vld [vmem:[%s10435_s6 + $0x588] sm:$0xff] }
 0x1b5   :  { %923 = vst [vmem:[#allocation3 + $0x390] sm:$0xff] %v922_v50  ;;  %v1050_v50 = vld [vmem:[%s10435_s6 + $0x590] sm:$0xff] }
 0x1b6   :  { %925 = vst [vmem:[#allocation3 + $0x398] sm:$0xff] %v924_v51  ;;  %v1052_v51 = vld [vmem:[%s10435_s6 + $0x598] sm:$0xff] }
 0x1b7   :  { %927 = vst [vmem:[#allocation3 + $0x3a0] sm:$0xff] %v926_v52  ;;  %v1054_v52 = vld [vmem:[%s10435_s6 + $0x5a0] sm:$0xff] }
 0x1b8   :  { %929 = vst [vmem:[#allocation3 + $0x3a8] sm:$0xff] %v928_v53  ;;  %v1056_v53 = vld [vmem:[%s10435_s6 + $0x5a8] sm:$0xff] }
 0x1b9   :  { %931 = vst [vmem:[#allocation3 + $0x3b0] sm:$0xff] %v930_v54  ;;  %v1058_v54 = vld [vmem:[%s10435_s6 + $0x5b0] sm:$0xff] }
 0x1ba   :  { %933 = vst [vmem:[#allocation3 + $0x3b8] sm:$0xff] %v932_v55  ;;  %v1060_v55 = vld [vmem:[%s10435_s6 + $0x5b8] sm:$0xff] }
 0x1bb   :  { %935 = vst [vmem:[#allocation3 + $0x3c0] sm:$0xff] %v934_v56  ;;  %v1062_v56 = vld [vmem:[%s10435_s6 + $0x5c0] sm:$0xff] }
 0x1bc   :  { %937 = vst [vmem:[#allocation3 + $0x3c8] sm:$0xff] %v936_v57  ;;  %v1064_v57 = vld [vmem:[%s10435_s6 + $0x5c8] sm:$0xff] }
 0x1bd   :  { %939 = vst [vmem:[#allocation3 + $0x3d0] sm:$0xff] %v938_v58  ;;  %v1066_v58 = vld [vmem:[%s10435_s6 + $0x5d0] sm:$0xff] }
 0x1be   :  { %941 = vst [vmem:[#allocation3 + $0x3d8] sm:$0xff] %v940_v59  ;;  %v1068_v59 = vld [vmem:[%s10435_s6 + $0x5d8] sm:$0xff] }
 0x1bf   :  { %943 = vst [vmem:[#allocation3 + $0x3e0] sm:$0xff] %v942_v60  ;;  %v1070_v60 = vld [vmem:[%s10435_s6 + $0x5e0] sm:$0xff] }
 0x1c0   :  { %945 = vst [vmem:[#allocation3 + $0x3e8] sm:$0xff] %v944_v61  ;;  %v1072_v61 = vld [vmem:[%s10435_s6 + $0x5e8] sm:$0xff] }
 0x1c1   :  { %947 = vst [vmem:[#allocation3 + $0x3f0] sm:$0xff] %v946_v62  ;;  %v1074_v62 = vld [vmem:[%s10435_s6 + $0x5f0] sm:$0xff] }
 0x1c2   :  { %949 = vst [vmem:[#allocation3 + $0x3f8] sm:$0xff] %v948_v63  ;;  %v1076_v63 = vld [vmem:[%s10435_s6 + $0x5f8] sm:$0xff] }
 0x1c3   :  { %951 = vst [vmem:[#allocation3 + $0x400] sm:$0xff] %v950_v0  ;;  %v1078_v0 = vld [vmem:[%s10435_s6 + $0x600] sm:$0xff] }
 0x1c4   :  { %953 = vst [vmem:[#allocation3 + $0x408] sm:$0xff] %v952_v1  ;;  %v1080_v1 = vld [vmem:[%s10435_s6 + $0x608] sm:$0xff] }
 0x1c5   :  { %955 = vst [vmem:[#allocation3 + $0x410] sm:$0xff] %v954_v2  ;;  %v1082_v2 = vld [vmem:[%s10435_s6 + $0x610] sm:$0xff] }
 0x1c6   :  { %957 = vst [vmem:[#allocation3 + $0x418] sm:$0xff] %v956_v3  ;;  %v1084_v3 = vld [vmem:[%s10435_s6 + $0x618] sm:$0xff] }
 0x1c7   :  { %959 = vst [vmem:[#allocation3 + $0x420] sm:$0xff] %v958_v4  ;;  %v1086_v4 = vld [vmem:[%s10435_s6 + $0x620] sm:$0xff] }
 0x1c8   :  { %961 = vst [vmem:[#allocation3 + $0x428] sm:$0xff] %v960_v5  ;;  %v1088_v5 = vld [vmem:[%s10435_s6 + $0x628] sm:$0xff] }
 0x1c9   :  { %963 = vst [vmem:[#allocation3 + $0x430] sm:$0xff] %v962_v6  ;;  %v1090_v6 = vld [vmem:[%s10435_s6 + $0x630] sm:$0xff] }
 0x1ca   :  { %965 = vst [vmem:[#allocation3 + $0x438] sm:$0xff] %v964_v7  ;;  %v1092_v7 = vld [vmem:[%s10435_s6 + $0x638] sm:$0xff] }
 0x1cb   :  { %967 = vst [vmem:[#allocation3 + $0x440] sm:$0xff] %v966_v8  ;;  %v1094_v8 = vld [vmem:[%s10435_s6 + $0x640] sm:$0xff] }
 0x1cc   :  { %969 = vst [vmem:[#allocation3 + $0x448] sm:$0xff] %v968_v9  ;;  %v1096_v9 = vld [vmem:[%s10435_s6 + $0x648] sm:$0xff] }
 0x1cd   :  { %971 = vst [vmem:[#allocation3 + $0x450] sm:$0xff] %v970_v10  ;;  %v1098_v10 = vld [vmem:[%s10435_s6 + $0x650] sm:$0xff] }
 0x1ce   :  { %973 = vst [vmem:[#allocation3 + $0x458] sm:$0xff] %v972_v11  ;;  %v1100_v11 = vld [vmem:[%s10435_s6 + $0x658] sm:$0xff] }
 0x1cf   :  { %975 = vst [vmem:[#allocation3 + $0x460] sm:$0xff] %v974_v12  ;;  %v1102_v12 = vld [vmem:[%s10435_s6 + $0x660] sm:$0xff] }
 0x1d0   :  { %977 = vst [vmem:[#allocation3 + $0x468] sm:$0xff] %v976_v13  ;;  %v1104_v13 = vld [vmem:[%s10435_s6 + $0x668] sm:$0xff] }
 0x1d1   :  { %979 = vst [vmem:[#allocation3 + $0x470] sm:$0xff] %v978_v14  ;;  %v1106_v14 = vld [vmem:[%s10435_s6 + $0x670] sm:$0xff] }
 0x1d2   :  { %981 = vst [vmem:[#allocation3 + $0x478] sm:$0xff] %v980_v15  ;;  %v1108_v15 = vld [vmem:[%s10435_s6 + $0x678] sm:$0xff] }
 0x1d3   :  { %983 = vst [vmem:[#allocation3 + $0x480] sm:$0xff] %v982_v16  ;;  %v1110_v16 = vld [vmem:[%s10435_s6 + $0x680] sm:$0xff] }
 0x1d4   :  { %985 = vst [vmem:[#allocation3 + $0x488] sm:$0xff] %v984_v17  ;;  %v1112_v17 = vld [vmem:[%s10435_s6 + $0x688] sm:$0xff] }
 0x1d5   :  { %987 = vst [vmem:[#allocation3 + $0x490] sm:$0xff] %v986_v18  ;;  %v1114_v18 = vld [vmem:[%s10435_s6 + $0x690] sm:$0xff] }
 0x1d6   :  { %989 = vst [vmem:[#allocation3 + $0x498] sm:$0xff] %v988_v19  ;;  %v1116_v19 = vld [vmem:[%s10435_s6 + $0x698] sm:$0xff] }
 0x1d7   :  { %991 = vst [vmem:[#allocation3 + $0x4a0] sm:$0xff] %v990_v20  ;;  %v1118_v20 = vld [vmem:[%s10435_s6 + $0x6a0] sm:$0xff] }
 0x1d8   :  { %993 = vst [vmem:[#allocation3 + $0x4a8] sm:$0xff] %v992_v21  ;;  %v1120_v21 = vld [vmem:[%s10435_s6 + $0x6a8] sm:$0xff] }
 0x1d9   :  { %995 = vst [vmem:[#allocation3 + $0x4b0] sm:$0xff] %v994_v22  ;;  %v1122_v22 = vld [vmem:[%s10435_s6 + $0x6b0] sm:$0xff] }
 0x1da   :  { %997 = vst [vmem:[#allocation3 + $0x4b8] sm:$0xff] %v996_v23  ;;  %v1124_v23 = vld [vmem:[%s10435_s6 + $0x6b8] sm:$0xff] }
 0x1db   :  { %999 = vst [vmem:[#allocation3 + $0x4c0] sm:$0xff] %v998_v24  ;;  %v1126_v24 = vld [vmem:[%s10435_s6 + $0x6c0] sm:$0xff] }
 0x1dc   :  { %1001 = vst [vmem:[#allocation3 + $0x4c8] sm:$0xff] %v1000_v25  ;;  %v1128_v25 = vld [vmem:[%s10435_s6 + $0x6c8] sm:$0xff] }
 0x1dd   :  { %1003 = vst [vmem:[#allocation3 + $0x4d0] sm:$0xff] %v1002_v26  ;;  %v1130_v26 = vld [vmem:[%s10435_s6 + $0x6d0] sm:$0xff] }
 0x1de   :  { %1005 = vst [vmem:[#allocation3 + $0x4d8] sm:$0xff] %v1004_v27  ;;  %v1132_v27 = vld [vmem:[%s10435_s6 + $0x6d8] sm:$0xff] }
 0x1df   :  { %1007 = vst [vmem:[#allocation3 + $0x4e0] sm:$0xff] %v1006_v28  ;;  %v1134_v28 = vld [vmem:[%s10435_s6 + $0x6e0] sm:$0xff] }
 0x1e0   :  { %1009 = vst [vmem:[#allocation3 + $0x4e8] sm:$0xff] %v1008_v29  ;;  %v1136_v29 = vld [vmem:[%s10435_s6 + $0x6e8] sm:$0xff] }
 0x1e1   :  { %1011 = vst [vmem:[#allocation3 + $0x4f0] sm:$0xff] %v1010_v30  ;;  %v1138_v30 = vld [vmem:[%s10435_s6 + $0x6f0] sm:$0xff] }
 0x1e2   :  { %1013 = vst [vmem:[#allocation3 + $0x4f8] sm:$0xff] %v1012_v31  ;;  %v1140_v31 = vld [vmem:[%s10435_s6 + $0x6f8] sm:$0xff] }
 0x1e3   :  { %1015 = vst [vmem:[#allocation3 + $0x500] sm:$0xff] %v1014_v32  ;;  %v1142_v32 = vld [vmem:[%s10435_s6 + $0x700] sm:$0xff] }
 0x1e4   :  { %1017 = vst [vmem:[#allocation3 + $0x508] sm:$0xff] %v1016_v33  ;;  %v1144_v33 = vld [vmem:[%s10435_s6 + $0x708] sm:$0xff] }
 0x1e5   :  { %1019 = vst [vmem:[#allocation3 + $0x510] sm:$0xff] %v1018_v34  ;;  %v1146_v34 = vld [vmem:[%s10435_s6 + $0x710] sm:$0xff] }
 0x1e6   :  { %1021 = vst [vmem:[#allocation3 + $0x518] sm:$0xff] %v1020_v35  ;;  %v1148_v35 = vld [vmem:[%s10435_s6 + $0x718] sm:$0xff] }
 0x1e7   :  { %1023 = vst [vmem:[#allocation3 + $0x520] sm:$0xff] %v1022_v36  ;;  %v1150_v36 = vld [vmem:[%s10435_s6 + $0x720] sm:$0xff] }
 0x1e8   :  { %1025 = vst [vmem:[#allocation3 + $0x528] sm:$0xff] %v1024_v37  ;;  %v1152_v37 = vld [vmem:[%s10435_s6 + $0x728] sm:$0xff] }
 0x1e9   :  { %1027 = vst [vmem:[#allocation3 + $0x530] sm:$0xff] %v1026_v38  ;;  %v1154_v38 = vld [vmem:[%s10435_s6 + $0x730] sm:$0xff] }
 0x1ea   :  { %1029 = vst [vmem:[#allocation3 + $0x538] sm:$0xff] %v1028_v39  ;;  %v1156_v39 = vld [vmem:[%s10435_s6 + $0x738] sm:$0xff] }
 0x1eb   :  { %1031 = vst [vmem:[#allocation3 + $0x540] sm:$0xff] %v1030_v40  ;;  %v1158_v40 = vld [vmem:[%s10435_s6 + $0x740] sm:$0xff] }
 0x1ec   :  { %1033 = vst [vmem:[#allocation3 + $0x548] sm:$0xff] %v1032_v41  ;;  %v1160_v41 = vld [vmem:[%s10435_s6 + $0x748] sm:$0xff] }
 0x1ed   :  { %1035 = vst [vmem:[#allocation3 + $0x550] sm:$0xff] %v1034_v42  ;;  %v1162_v42 = vld [vmem:[%s10435_s6 + $0x750] sm:$0xff] }
 0x1ee   :  { %1037 = vst [vmem:[#allocation3 + $0x558] sm:$0xff] %v1036_v43  ;;  %v1164_v43 = vld [vmem:[%s10435_s6 + $0x758] sm:$0xff] }
 0x1ef   :  { %1039 = vst [vmem:[#allocation3 + $0x560] sm:$0xff] %v1038_v44  ;;  %v1166_v44 = vld [vmem:[%s10435_s6 + $0x760] sm:$0xff] }
 0x1f0   :  { %1041 = vst [vmem:[#allocation3 + $0x568] sm:$0xff] %v1040_v45  ;;  %v1168_v45 = vld [vmem:[%s10435_s6 + $0x768] sm:$0xff] }
 0x1f1   :  { %1043 = vst [vmem:[#allocation3 + $0x570] sm:$0xff] %v1042_v46  ;;  %v1170_v46 = vld [vmem:[%s10435_s6 + $0x770] sm:$0xff] }
 0x1f2   :  { %1045 = vst [vmem:[#allocation3 + $0x578] sm:$0xff] %v1044_v47  ;;  %v1172_v47 = vld [vmem:[%s10435_s6 + $0x778] sm:$0xff] }
 0x1f3   :  { %1047 = vst [vmem:[#allocation3 + $0x580] sm:$0xff] %v1046_v48  ;;  %v1174_v48 = vld [vmem:[%s10435_s6 + $0x780] sm:$0xff] }
 0x1f4   :  { %1049 = vst [vmem:[#allocation3 + $0x588] sm:$0xff] %v1048_v49  ;;  %v1176_v49 = vld [vmem:[%s10435_s6 + $0x788] sm:$0xff] }
 0x1f5   :  { %1051 = vst [vmem:[#allocation3 + $0x590] sm:$0xff] %v1050_v50  ;;  %v1178_v50 = vld [vmem:[%s10435_s6 + $0x790] sm:$0xff] }
 0x1f6   :  { %1053 = vst [vmem:[#allocation3 + $0x598] sm:$0xff] %v1052_v51  ;;  %v1180_v51 = vld [vmem:[%s10435_s6 + $0x798] sm:$0xff] }
 0x1f7   :  { %1055 = vst [vmem:[#allocation3 + $0x5a0] sm:$0xff] %v1054_v52  ;;  %v1182_v52 = vld [vmem:[%s10435_s6 + $0x7a0] sm:$0xff] }
 0x1f8   :  { %1057 = vst [vmem:[#allocation3 + $0x5a8] sm:$0xff] %v1056_v53  ;;  %v1184_v53 = vld [vmem:[%s10435_s6 + $0x7a8] sm:$0xff] }
 0x1f9   :  { %1059 = vst [vmem:[#allocation3 + $0x5b0] sm:$0xff] %v1058_v54  ;;  %v1186_v54 = vld [vmem:[%s10435_s6 + $0x7b0] sm:$0xff] }
 0x1fa   :  { %1061 = vst [vmem:[#allocation3 + $0x5b8] sm:$0xff] %v1060_v55  ;;  %v1188_v55 = vld [vmem:[%s10435_s6 + $0x7b8] sm:$0xff] }
 0x1fb   :  { %1063 = vst [vmem:[#allocation3 + $0x5c0] sm:$0xff] %v1062_v56  ;;  %v1190_v56 = vld [vmem:[%s10435_s6 + $0x7c0] sm:$0xff] }
 0x1fc   :  { %1065 = vst [vmem:[#allocation3 + $0x5c8] sm:$0xff] %v1064_v57  ;;  %v1192_v57 = vld [vmem:[%s10435_s6 + $0x7c8] sm:$0xff] }
 0x1fd   :  { %1067 = vst [vmem:[#allocation3 + $0x5d0] sm:$0xff] %v1066_v58  ;;  %v1194_v58 = vld [vmem:[%s10435_s6 + $0x7d0] sm:$0xff] }
 0x1fe   :  { %1069 = vst [vmem:[#allocation3 + $0x5d8] sm:$0xff] %v1068_v59  ;;  %v1196_v59 = vld [vmem:[%s10435_s6 + $0x7d8] sm:$0xff] }
 0x1ff   :  { %1071 = vst [vmem:[#allocation3 + $0x5e0] sm:$0xff] %v1070_v60  ;;  %v1198_v60 = vld [vmem:[%s10435_s6 + $0x7e0] sm:$0xff] }
 0x200   :  { %1073 = vst [vmem:[#allocation3 + $0x5e8] sm:$0xff] %v1072_v61  ;;  %v1200_v61 = vld [vmem:[%s10435_s6 + $0x7e8] sm:$0xff] }
 0x201   :  { %1075 = vst [vmem:[#allocation3 + $0x5f0] sm:$0xff] %v1074_v62  ;;  %v1202_v62 = vld [vmem:[%s10435_s6 + $0x7f0] sm:$0xff] }
 0x202   :  { %1077 = vst [vmem:[#allocation3 + $0x5f8] sm:$0xff] %v1076_v63  ;;  %v1204_v63 = vld [vmem:[%s10435_s6 + $0x7f8] sm:$0xff] }
 0x203   :  { %1079 = vst [vmem:[#allocation3 + $0x600] sm:$0xff] %v1078_v0 }
 0x204   :  { %1081 = vst [vmem:[#allocation3 + $0x608] sm:$0xff] %v1080_v1 }
 0x205   :  { %1083 = vst [vmem:[#allocation3 + $0x610] sm:$0xff] %v1082_v2 }
 0x206   :  { %1085 = vst [vmem:[#allocation3 + $0x618] sm:$0xff] %v1084_v3 }
 0x207   :  { %1087 = vst [vmem:[#allocation3 + $0x620] sm:$0xff] %v1086_v4 }
 0x208   :  { %1089 = vst [vmem:[#allocation3 + $0x628] sm:$0xff] %v1088_v5 }
 0x209   :  { %1091 = vst [vmem:[#allocation3 + $0x630] sm:$0xff] %v1090_v6 }
 0x20a   :  { %1093 = vst [vmem:[#allocation3 + $0x638] sm:$0xff] %v1092_v7 }
 0x20b   :  { %1095 = vst [vmem:[#allocation3 + $0x640] sm:$0xff] %v1094_v8 }
 0x20c   :  { %1097 = vst [vmem:[#allocation3 + $0x648] sm:$0xff] %v1096_v9 }
 0x20d   :  { %1099 = vst [vmem:[#allocation3 + $0x650] sm:$0xff] %v1098_v10 }
 0x20e   :  { %1101 = vst [vmem:[#allocation3 + $0x658] sm:$0xff] %v1100_v11 }
 0x20f   :  { %1103 = vst [vmem:[#allocation3 + $0x660] sm:$0xff] %v1102_v12 }
 0x210   :  { %1105 = vst [vmem:[#allocation3 + $0x668] sm:$0xff] %v1104_v13 }
 0x211   :  { %1107 = vst [vmem:[#allocation3 + $0x670] sm:$0xff] %v1106_v14 }
 0x212   :  { %1109 = vst [vmem:[#allocation3 + $0x678] sm:$0xff] %v1108_v15 }
 0x213   :  { %1111 = vst [vmem:[#allocation3 + $0x680] sm:$0xff] %v1110_v16 }
 0x214   :  { %1113 = vst [vmem:[#allocation3 + $0x688] sm:$0xff] %v1112_v17 }
 0x215   :  { %1115 = vst [vmem:[#allocation3 + $0x690] sm:$0xff] %v1114_v18 }
 0x216   :  { %1117 = vst [vmem:[#allocation3 + $0x698] sm:$0xff] %v1116_v19 }
 0x217   :  { %1119 = vst [vmem:[#allocation3 + $0x6a0] sm:$0xff] %v1118_v20 }
 0x218   :  { %1121 = vst [vmem:[#allocation3 + $0x6a8] sm:$0xff] %v1120_v21 }
 0x219   :  { %1123 = vst [vmem:[#allocation3 + $0x6b0] sm:$0xff] %v1122_v22 }
 0x21a   :  { %1125 = vst [vmem:[#allocation3 + $0x6b8] sm:$0xff] %v1124_v23 }
 0x21b   :  { %1127 = vst [vmem:[#allocation3 + $0x6c0] sm:$0xff] %v1126_v24 }
 0x21c   :  { %1129 = vst [vmem:[#allocation3 + $0x6c8] sm:$0xff] %v1128_v25 }
 0x21d   :  { %1131 = vst [vmem:[#allocation3 + $0x6d0] sm:$0xff] %v1130_v26 }
 0x21e   :  { %1133 = vst [vmem:[#allocation3 + $0x6d8] sm:$0xff] %v1132_v27 }
 0x21f   :  { %1135 = vst [vmem:[#allocation3 + $0x6e0] sm:$0xff] %v1134_v28 }
 0x220   :  { %1137 = vst [vmem:[#allocation3 + $0x6e8] sm:$0xff] %v1136_v29 }
 0x221   :  { %1139 = vst [vmem:[#allocation3 + $0x6f0] sm:$0xff] %v1138_v30 }
 0x222   :  { %1141 = vst [vmem:[#allocation3 + $0x6f8] sm:$0xff] %v1140_v31 }
 0x223   :  { %1143 = vst [vmem:[#allocation3 + $0x700] sm:$0xff] %v1142_v32 }
 0x224   :  { %1145 = vst [vmem:[#allocation3 + $0x708] sm:$0xff] %v1144_v33 }
 0x225   :  { %1147 = vst [vmem:[#allocation3 + $0x710] sm:$0xff] %v1146_v34 }
 0x226   :  { %1149 = vst [vmem:[#allocation3 + $0x718] sm:$0xff] %v1148_v35 }
 0x227   :  { %1151 = vst [vmem:[#allocation3 + $0x720] sm:$0xff] %v1150_v36 }
 0x228   :  { %1153 = vst [vmem:[#allocation3 + $0x728] sm:$0xff] %v1152_v37 }
 0x229   :  { %1155 = vst [vmem:[#allocation3 + $0x730] sm:$0xff] %v1154_v38 }
 0x22a   :  { %1157 = vst [vmem:[#allocation3 + $0x738] sm:$0xff] %v1156_v39 }
 0x22b   :  { %1159 = vst [vmem:[#allocation3 + $0x740] sm:$0xff] %v1158_v40 }
 0x22c   :  { %1161 = vst [vmem:[#allocation3 + $0x748] sm:$0xff] %v1160_v41 }
 0x22d   :  { %1163 = vst [vmem:[#allocation3 + $0x750] sm:$0xff] %v1162_v42 }
 0x22e   :  { %1165 = vst [vmem:[#allocation3 + $0x758] sm:$0xff] %v1164_v43 }
 0x22f   :  { %1167 = vst [vmem:[#allocation3 + $0x760] sm:$0xff] %v1166_v44 }
 0x230   :  { %1169 = vst [vmem:[#allocation3 + $0x768] sm:$0xff] %v1168_v45 }
 0x231   :  { %1171 = vst [vmem:[#allocation3 + $0x770] sm:$0xff] %v1170_v46 }
 0x232   :  { %1173 = vst [vmem:[#allocation3 + $0x778] sm:$0xff] %v1172_v47 }
 0x233   :  { %1175 = vst [vmem:[#allocation3 + $0x780] sm:$0xff] %v1174_v48 }
 0x234   :  { %1177 = vst [vmem:[#allocation3 + $0x788] sm:$0xff] %v1176_v49 }
 0x235   :  { %1179 = vst [vmem:[#allocation3 + $0x790] sm:$0xff] %v1178_v50 }
 0x236   :  { %1181 = vst [vmem:[#allocation3 + $0x798] sm:$0xff] %v1180_v51 }
 0x237   :  { %1183 = vst [vmem:[#allocation3 + $0x7a0] sm:$0xff] %v1182_v52 }
 0x238   :  { %1185 = vst [vmem:[#allocation3 + $0x7a8] sm:$0xff] %v1184_v53 }
 0x239   :  { %1187 = vst [vmem:[#allocation3 + $0x7b0] sm:$0xff] %v1186_v54 }
 0x23a   :  { %1189 = vst [vmem:[#allocation3 + $0x7b8] sm:$0xff] %v1188_v55 }
 0x23b   :  { %1191 = vst [vmem:[#allocation3 + $0x7c0] sm:$0xff] %v1190_v56 }
 0x23c   :  { %1193 = vst [vmem:[#allocation3 + $0x7c8] sm:$0xff] %v1192_v57 }
 0x23d   :  { %1195 = vst [vmem:[#allocation3 + $0x7d0] sm:$0xff] %v1194_v58 }
 0x23e   :  { %1197 = vst [vmem:[#allocation3 + $0x7d8] sm:$0xff] %v1196_v59 }
 0x23f   :  { %1199 = vst [vmem:[#allocation3 + $0x7e0] sm:$0xff] %v1198_v60 }
 0x240   :  { %1201 = vst [vmem:[#allocation3 + $0x7e8] sm:$0xff] %v1200_v61 }
 0x241   :  { %1203 = vst [vmem:[#allocation3 + $0x7f0] sm:$0xff] %v1202_v62 }
 0x242   :  { %1205 = vst [vmem:[#allocation3 + $0x7f8] sm:$0xff] %v1204_v63 }
 0x243   :  { %1211 = vsyncadd [#allocation4 + $0x1], 32768  ;;  %v1232_v0 = vld [vmem:[%s10325_s5 + $0x60] sm:$0xff]  ;;  %v1233_v1 = vld [vmem:[%s10325_s5 + $0x68] sm:$0xff]  ;;  %v10313_v2 = vmov 0   ;;  %vm1284_vm0 = vcmask 261120  }
 0x244   :  { %10171 = vset.pattern.permute.xlu1 %v10313_v2  ;;  %10170 = vset.pattern.permute.xlu0 %v10313_v2  ;;  %v1234_v3 = vld [vmem:[%s10325_s5 + $0x70] sm:$0xff]  ;;  %v1235_v4 = vld [vmem:[%s10325_s5 + $0x78] sm:$0xff]  ;;  %v1241_v6 = vld [vmem:[%s10335_s13 + $0x28] sm:$0xff]  ;;  %vm1679_vm1 = vcmask 523264   ;;  %s12162_s0 = sld [smem:[#allocation16_spill]]  ;;  %vm1833_vm2 = vcmask 130048  }
 0x245   :  { %v1243_v5 = vld [vmem:[%s10335_s13 + $0x38] sm:$0xff]  ;;  %1321 = vmatpush.msra.mxu0 %v1232_v0  ;;  %1362 = vmatpush.msra.mxu1 %v1233_v1  ;;  %v1228_v7 = vld [vmem:[%s10325_s5 + $0x40] sm:$0xff]  ;;  %v1229_v8 = vld [vmem:[%s10325_s5 + $0x48] sm:$0xff] }
 0x246   :  { %1403 = vmatpush.msra.mxu2 %v1234_v3  ;;  %1444 = vmatpush.msra.mxu3 %v1235_v4  ;;  %v1230_v9 = vld [vmem:[%s10325_s5 + $0x50] sm:$0xff]  ;;  %v1231_v10 = vld [vmem:[%s10325_s5 + $0x58] sm:$0xff]  ;;  %v1224_v11 = vld [vmem:[%s10325_s5 + $0x20] sm:$0xff] }
 0x247   :  { %1281 = vperm.xlu0 %10170, %v1243_v5   ;;  %1271 = vperm.xlu1 %10171, %v1241_v6   ;;  %v1225_v12 = vld [vmem:[%s10325_s5 + $0x28] sm:$0xff]  ;;  %v1226_v13 = vld [vmem:[%s10325_s5 + $0x30] sm:$0xff]  ;;  %v1227_v14 = vld [vmem:[%s10325_s5 + $0x38] sm:$0xff] }
 0x248   :  { %1322 = vmatpush.msra.mxu0 %v1228_v7  ;;  %1363 = vmatpush.msra.mxu1 %v1229_v8  ;;  %v1220_v15 = vld [vmem:[%s10325_s5] sm:$0xff]  ;;  %v1221_v16 = vld [vmem:[%s10325_s5 + $0x8] sm:$0xff]  ;;  %v1222_v17 = vld [vmem:[%s10325_s5 + $0x10] sm:$0xff] }
 0x249   :  { %1404 = vmatpush.msra.mxu2 %v1230_v9  ;;  %1445 = vmatpush.msra.mxu3 %v1231_v10  ;;  %v1223_v18 = vld [vmem:[%s10325_s5 + $0x18] sm:$0xff]  ;;  %v1212_v19 = vld [vmem:[%s10330_s9] sm:$0xff]  ;;  %v1242_v20 = vld [vmem:[%s10335_s13 + $0x30] sm:$0xff] }
 0x24a   :  { %1323 = vmatpush.msra.mxu0 %v1224_v11  ;;  %1364 = vmatpush.msra.mxu1 %v1225_v12  ;;  %v1512_v21 = vld [vmem:[%s10340_s17 + $0x38] sm:$0xff]  ;;  %v1240_v22 = vld [vmem:[%s10335_s13 + $0x20] sm:$0xff]  ;;  %v1213_v23 = vld [vmem:[%s10330_s9 + $0x8] sm:$0xff] }
 0x24b   :  { %1405 = vmatpush.msra.mxu2 %v1226_v13  ;;  %1446 = vmatpush.msra.mxu3 %v1227_v14  ;;  %v1592_v24 = vld [vmem:[%s10345_s21 + $0x38] sm:$0xff]  ;;  %v1511_v26 = vld [vmem:[%s10340_s17 + $0x30] sm:$0xff]  ;;  %v1510_v30 = vld [vmem:[%s10340_s17 + $0x28] sm:$0xff] }
 0x24c   :  { %1324 = vmatpush.msra.mxu0 %v1220_v15  ;;  %1365 = vmatpush.msra.mxu1 %v1221_v16  ;;  %v1239_v25 = vld [vmem:[%s10335_s13 + $0x18] sm:$0xff]  ;;  %v1214_v27 = vld [vmem:[%s10330_s9 + $0x10] sm:$0xff]  ;;  %v1590_v32 = vld [vmem:[%s10345_s21 + $0x28] sm:$0xff] }
 0x24d   :  { %1406 = vmatpush.msra.mxu2 %v1222_v17  ;;  %1447 = vmatpush.msra.mxu3 %v1223_v18  ;;  %v1591_v28 = vld [vmem:[%s10345_s21 + $0x30] sm:$0xff]  ;;  %v1215_v31 = vld [vmem:[%s10330_s9 + $0x18] sm:$0xff]  ;;  %v1237_v33 = vld [vmem:[%s10335_s13 + $0x8] sm:$0xff] }
 0x24e   :  { %7443 = vmatmul.msk.f32.vlgmr.msra.gmra.mxu0 %vm1284_vm0, %v1212_v19  ;;  %7451 = vmatmul.msk.f32.vlgmr.msra.gmra.mxu1 %vm1284_vm0, %v1212_v19  ;;  %v1238_v29 = vld [vmem:[%s10335_s13 + $0x10] sm:$0xff]  ;;  %v1509_v34 = vld [vmem:[%s10340_s17 + $0x20] sm:$0xff]  ;;  %v1508_v38 = vld [vmem:[%s10340_s17 + $0x18] sm:$0xff] }
 0x24f   :  { %7459 = vmatmul.msk.f32.vlgmr.msra.gmra.mxu2 %vm1284_vm0, %v1212_v19  ;;  %7467 = vmatmul.msk.f32.vlgmr.msra.gmra.mxu3 %vm1284_vm0, %v1212_v19  ;;  %v1216_v35 = vld [vmem:[%s10330_s9 + $0x20] sm:$0xff]  ;;  %v1217_v39 = vld [vmem:[%s10330_s9 + $0x28] sm:$0xff]  ;;  %v1588_v40 = vld [vmem:[%s10345_s21 + $0x18] sm:$0xff] }
 0x250   :  { %1276 = vperm.xlu0 %10170, %v1242_v20   ;;  %1550 = vperm.xlu1 %10171, %v1512_v21   ;;  %v1589_v36 = vld [vmem:[%s10345_s21 + $0x20] sm:$0xff]  ;;  %v1506_v41 = vld [vmem:[%s10340_s17 + $0x8] sm:$0xff]  ;;  %v1507_v42 = vld [vmem:[%s10340_s17 + $0x10] sm:$0xff] }
 0x251   :  { %10172 = vset.pattern.permute.xlu2 %v10313_v2  ;;  %v1236_v37 = vld [vmem:[%s10335_s13] sm:$0xff]  ;;  %v1218_v43 = vld [vmem:[%s10330_s9 + $0x30] sm:$0xff]  ;;  %v1586_v45 = vld [vmem:[%s10345_s21 + $0x8] sm:$0xff] }
 0x252   :  { %1266 = vperm.xlu2 %10172, %v1240_v22   ;;  %v1505_v44 = vld [vmem:[%s10340_s17] sm:$0xff]  ;;  %v1587_v46 = vld [vmem:[%s10345_s21 + $0x10] sm:$0xff]  ;;  %v1219_v47 = vld [vmem:[%s10330_s9 + $0x38] sm:$0xff] }
 0x253   :  { %v1668_v48 = vld [vmem:[%s10355_s29 + $0x8] sm:$0xff]  ;;  %v1667_v49 = vld [vmem:[%s10355_s29] sm:$0xff] }
 0x254   :  { %v1585_v50 = vld [vmem:[%s10345_s21] sm:$0xff]  ;;  %v1807_v52 = vld [vmem:[%s10365_s8 + $0x8] sm:$0xff] }
 0x255   :  { %v1786_v51 = vld [vmem:[%s10360_s3] sm:$0xff]  ;;  %v1787_v53 = vld [vmem:[%s10360_s3 + $0x8] sm:$0xff] }
 0x256   :  { %7444 = vmatmul.msk.f32.gmra.mxu0 %vm1284_vm0, %v1213_v23  ;;  %7452 = vmatmul.msk.f32.gmra.mxu1 %vm1284_vm0, %v1213_v23  ;;  %v1827_v54 = vld [vmem:[%s10375_s19] sm:$0xf] }
 0x257   :  { %7460 = vmatmul.msk.f32.gmra.mxu2 %vm1284_vm0, %v1213_v23  ;;  %7468 = vmatmul.msk.f32.gmra.mxu3 %vm1284_vm0, %v1213_v23  ;;  %v1921_v55 = vld [vmem:[%s10380_s24] sm:$0xf] }
 0x258   :  { %1630 = vperm.xlu0 %10170, %v1592_v24   ;;  %1261 = vperm.xlu1 %10171, %v1239_v25   ;;  %v1806_v56 = vld [vmem:[%s10365_s8] sm:$0xff] }
 0x259   :  { %v1931_v57 = vld [vmem:[%s10385_s30] sm:$0xf] }
 0x25a   :  { %1545 = vperm.xlu2 %10172, %v1511_v26  }
 0x25e   :  { %7445 = vmatmul.msk.f32.gmra.mxu0 %vm1284_vm0, %v1214_v27  ;;  %7453 = vmatmul.msk.f32.gmra.mxu1 %vm1284_vm0, %v1214_v27 }
 0x25f   :  { %7461 = vmatmul.msk.f32.gmra.mxu2 %vm1284_vm0, %v1214_v27  ;;  %7469 = vmatmul.msk.f32.gmra.mxu3 %vm1284_vm0, %v1214_v27 }
 0x260   :  { %1625 = vperm.xlu0 %10170, %v1591_v28   ;;  %1256 = vperm.xlu1 %10171, %v1238_v29  }
 0x262   :  { %1540 = vperm.xlu2 %10172, %v1510_v30  }
 0x266   :  { %7446 = vmatmul.msk.f32.gmra.mxu0 %vm1284_vm0, %v1215_v31  ;;  %7454 = vmatmul.msk.f32.gmra.mxu1 %vm1284_vm0, %v1215_v31 }
 0x267   :  { %7462 = vmatmul.msk.f32.gmra.mxu2 %vm1284_vm0, %v1215_v31  ;;  %7470 = vmatmul.msk.f32.gmra.mxu3 %vm1284_vm0, %v1215_v31 }
 0x268   :  { %1620 = vperm.xlu0 %10170, %v1590_v32   ;;  %1251 = vperm.xlu1 %10171, %v1237_v33  }
 0x26a   :  { %1535 = vperm.xlu2 %10172, %v1509_v34  }
 0x26e   :  { %7447 = vmatmul.msk.f32.gmra.mxu0 %vm1284_vm0, %v1216_v35  ;;  %7455 = vmatmul.msk.f32.gmra.mxu1 %vm1284_vm0, %v1216_v35 }
 0x26f   :  { %7463 = vmatmul.msk.f32.gmra.mxu2 %vm1284_vm0, %v1216_v35  ;;  %7471 = vmatmul.msk.f32.gmra.mxu3 %vm1284_vm0, %v1216_v35 }
 0x270   :  { %1615 = vperm.xlu0 %10170, %v1589_v36   ;;  %1246 = vperm.xlu1 %10171, %v1236_v37  }
 0x272   :  { %1530 = vperm.xlu2 %10172, %v1508_v38  }
 0x276   :  { %7448 = vmatmul.msk.f32.gmra.mxu0 %vm1284_vm0, %v1217_v39  ;;  %7456 = vmatmul.msk.f32.gmra.mxu1 %vm1284_vm0, %v1217_v39 }
 0x277   :  { %7464 = vmatmul.msk.f32.gmra.mxu2 %vm1284_vm0, %v1217_v39  ;;  %7472 = vmatmul.msk.f32.gmra.mxu3 %vm1284_vm0, %v1217_v39 }
 0x278   :  { %1610 = vperm.xlu0 %10170, %v1588_v40   ;;  %1520 = vperm.xlu1 %10171, %v1506_v41  }
 0x27a   :  { %1525 = vperm.xlu2 %10172, %v1507_v42  }
 0x27e   :  { %7449 = vmatmul.msk.f32.gmra.mxu0 %vm1284_vm0, %v1218_v43  ;;  %7457 = vmatmul.msk.f32.gmra.mxu1 %vm1284_vm0, %v1218_v43 }
 0x27f   :  { %7465 = vmatmul.msk.f32.gmra.mxu2 %vm1284_vm0, %v1218_v43  ;;  %7473 = vmatmul.msk.f32.gmra.mxu3 %vm1284_vm0, %v1218_v43 }
 0x280   :  { %1515 = vperm.xlu0 %10170, %v1505_v44   ;;  %1600 = vperm.xlu1 %10171, %v1586_v45  }
 0x282   :  { %1605 = vperm.xlu2 %10172, %v1587_v46  }
 0x286   :  { %7450 = vmatmul.msk.f32.gmra.mxu0 %vm1284_vm0, %v1219_v47  ;;  %7458 = vmatmul.msk.f32.gmra.mxu1 %vm1284_vm0, %v1219_v47 }
 0x287   :  { %7466 = vmatmul.msk.f32.gmra.mxu2 %vm1284_vm0, %v1219_v47  ;;  %7474 = vmatmul.msk.f32.gmra.mxu3 %vm1284_vm0, %v1219_v47 }
 0x288   :  { %1676 = vperm.xlu0 %10170, %v1668_v48   ;;  %1671 = vperm.xlu1 %10171, %v1667_v49  }
 0x28a   :  { %1595 = vperm.xlu2 %10172, %v1585_v50  }
 0x290   :  { %1790 = vperm.xlu0 %10170, %v1786_v51   ;;  %1815 = vperm.xlu1 %10171, %v1807_v52  }
 0x292   :  { %1795 = vperm.xlu2 %10172, %v1787_v53  }
 0x298   :  { %1830 = vperm.xlu0 %10170, %v1827_v54   ;;  %1924 = vperm.xlu1 %10171, %v1921_v55  }
 0x29a   :  { %1810 = vperm.xlu2 %10172, %v1806_v56  }
 0x2a2   :  { %1934 = vperm.xlu2 %10172, %v1931_v57  }
 0x2ac   :  { %v11126_v58 = vpop.permute.xlu2 %1266 }
 0x2b4   :  { %v11134_v63 = vpop.permute.xlu2 %1545 }
 0x2b9   :  { %v11128_v59 = vpop.permute.xlu0 %1281  ;;  %v11130_v60 = vpop.permute.xlu1 %1271 }
 0x2bc   :  { %v11144_v7 = vpop.permute.xlu2 %1540 }
 0x2c2   :  { %v11140_v5 = vpop.permute.xlu0 %1276  ;;  %v11142_v6 = vpop.permute.xlu1 %1550 }
 0x2c4   :  { %v11150_v14 = vpop.permute.xlu2 %1535 }
 0x2ca   :  { %v11146_v12 = vpop.permute.xlu0 %1630  ;;  %v11148_v13 = vpop.permute.xlu1 %1261 }
 0x2cb   :  { %v1326_v61 = vpop.f32.mrf.mxu0  ;;  %v11132_v62 = vpop.f32.mrf.mxu1 }
 0x2cc   :  { %v11156_v23 = vpop.permute.xlu2 %1530 }
 0x2d2   :  { %v11136_v0 = vpop.f32.mrf.mxu2  ;;  %v11138_v1 = vpop.f32.mrf.mxu3 }
 0x2d3   :  { %v1329_v3 = vpop.f32.mrf.mxu0  ;;  %v1370_v4 = vpop.f32.mrf.mxu1 }
 0x2d4   :  { %v11152_v19 = vpop.permute.xlu0 %1625  ;;  %v1257_v20 = vpop.permute.xlu1 %1256 }
 0x2d5   :  { %v11164_v33 = vpop.permute.xlu2 %1525 }
 0x2da   :  { %v1411_v8 = vpop.f32.mrf.mxu2  ;;  %v1452_v9 = vpop.f32.mrf.mxu3 }
 0x2db   :  { %v1332_v10 = vpop.f32.mrf.mxu0  ;;  %v1373_v11 = vpop.f32.mrf.mxu1 }
 0x2dc   :  { %v11162_v28 = vpop.permute.xlu0 %1620  ;;  %v1252_v29 = vpop.permute.xlu1 %1251  ;;  %v1333_v32 = vadd.f32 %v1332_v10, %v1257_v20  ;;  %v1374_v34 = vadd.f32 %v1373_v11, %v1257_v20 }
 0x2dd   :  { %v11170_v39 = vadd.f32 %v1329_v3, %v1252_v29  ;;  %v11172_v40 = vadd.f32 %v1370_v4, %v1252_v29  ;;  %v11180_v49 = vadd.f32 %v1411_v8, %v1252_v29  ;;  %v11182_v50 = vadd.f32 %v1452_v9, %v1252_v29  ;;  %v11186_v53 = vpop.permute.xlu2 %1605 }
 0x2de   :  { %v1481_v35 = vmax.f32 %v1333_v32, 0.0  ;;  %v1482_v36 = vmax.f32 %v1374_v34, 0.0 }
 0x2df   :  { %v1477_v51 = vmax.f32 %v11170_v39, 0.0  ;;  %v1478_v52 = vmax.f32 %v11172_v40, 0.0 }
 0x2e0   :  { %v1561_v44 = vmul.f32 %v11164_v33, %v1481_v35  ;;  %v1562_v46 = vmul.f32 %v11164_v33, %v1482_v36 }
 0x2e2   :  { %v1414_v15 = vpop.f32.mrf.mxu2  ;;  %v1455_v16 = vpop.f32.mrf.mxu3  ;;  %v11198_v9 = vadd.f32 %v11186_v53, %v1561_v44 }
 0x2e3   :  { %v1335_v17 = vpop.f32.mrf.mxu0  ;;  %v1376_v18 = vpop.f32.mrf.mxu1  ;;  %v11188_v54 = vadd.f32 %v1414_v15, %v1257_v20  ;;  %v11193_v3 = vadd.f32 %v1455_v16, %v1257_v20 }
 0x2e4   :  { %v1336_v41 = vadd.f32 %v1335_v17, %v11148_v13  ;;  %v1247_v45 = vpop.permute.xlu1 %1246  ;;  %v11177_v47 = vpop.permute.xlu0 %1615  ;;  %v1377_v48 = vadd.f32 %v1376_v18, %v11148_v13  ;;  %v11203_v18 = vadd.f32 %v11186_v53, %v1562_v46 }
 0x2e5   :  { %v11190_v55 = vadd.f32 %v1326_v61, %v1247_v45  ;;  %v11206_v16 = vadd.f32 %v11132_v62, %v1247_v45  ;;  %v11209_v20 = vadd.f32 %v11136_v0, %v1247_v45 }
 0x2e6   :  { %v1485_v56 = vmax.f32 %v1336_v41, 0.0  ;;  %v1486_v10 = vmax.f32 %v1377_v48, 0.0 }
 0x2e7   :  { %v1473_v36 = vmax.f32 %v11190_v55, 0.0 }
 0x2ea   :  { %v1417_v21 = vpop.f32.mrf.mxu2  ;;  %v11154_v22 = vpop.f32.mrf.mxu3 }
 0x2eb   :  { %v1338_v24 = vpop.f32.mrf.mxu0  ;;  %v1379_v25 = vpop.f32.mrf.mxu1 }
 0x2ec   :  { %v1339_v57 = vadd.f32 %v1338_v24, %v11126_v58  ;;  %v11212_v24 = vadd.f32 %v11138_v1, %v1247_v45  ;;  %v1380_v29 = vadd.f32 %v1379_v25, %v11126_v58  ;;  %v1566_v1 = vmul.f32 %v11156_v23, %v1486_v10 }
 0x2ed   :  { %v11226_v45 = vadd.f32 %v11154_v22, %v11148_v13 }
 0x2ee   :  { %v1489_v32 = vmax.f32 %v1339_v57, 0.0  ;;  %v1490_v46 = vmax.f32 %v1380_v29, 0.0  ;;  %v11228_v57 = vpop.permute.xlu0 %1610 }
 0x2f2   :  { %v11158_v26 = vpop.f32.mrf.mxu2  ;;  %v11160_v27 = vpop.f32.mrf.mxu3 }
 0x2f3   :  { %v1341_v30 = vpop.f32.mrf.mxu0  ;;  %v1382_v31 = vpop.f32.mrf.mxu1 }
 0x2f4   :  { %v1342_v11 = vadd.f32 %v1341_v30, %v11130_v60  ;;  %v1383_v15 = vadd.f32 %v1382_v31, %v11130_v60  ;;  %v1483_v30 = vmax.f32 %v11188_v54, 0.0  ;;  %v1565_v31 = vmul.f32 %v11156_v23, %v1485_v56 }
 0x2f6   :  { %v1493_v25 = vmax.f32 %v1342_v11, 0.0  ;;  %v1494_v44 = vmax.f32 %v1383_v15, 0.0  ;;  %v11235_v11 = vpop.permute.xlu1 %1520 }
 0x2fa   :  { %v11166_v37 = vpop.f32.mrf.mxu2  ;;  %v11168_v38 = vpop.f32.mrf.mxu3 }
 0x2fb   :  { %v1344_v42 = vpop.f32.mrf.mxu0  ;;  %v1385_v43 = vpop.f32.mrf.mxu1 }
 0x2fc   :  { %v1345_v4 = vadd.f32 %v1344_v42, %v11140_v5  ;;  %v1386_v8 = vadd.f32 %v1385_v43, %v11140_v5  ;;  %v11222_v43 = vadd.f32 %v1417_v21, %v11148_v13 }
 0x2fe   :  { %v1497_v41 = vmax.f32 %v1345_v4, 0.0  ;;  %v1498_v62 = vmax.f32 %v1386_v8, 0.0  ;;  %v1569_v4 = vmul.f32 %v11150_v14, %v1489_v32  ;;  %v1421_v8 = vadd.f32 %v11158_v26, %v11126_v58 }
 0x2ff   :  { %v1574_v32 = vmul.f32 %v11144_v7, %v1494_v44  ;;  %v1424_v26 = vadd.f32 %v11166_v37, %v11130_v60 }
 0x300   :  { %v1577_v15 = vmul.f32 %v11134_v63, %v1497_v41  ;;  %v1578_v13 = vmul.f32 %v11134_v63, %v1498_v62 }
 0x302   :  { %v1426_v17 = vpop.f32.mrf.mxu2  ;;  %v1467_v61 = vpop.f32.mrf.mxu3 }
 0x303   :  { %v1347_v34 = vpop.f32.mrf.mxu0  ;;  %v1388_v35 = vpop.f32.mrf.mxu1  ;;  %v1427_v10 = vadd.f32 %v1426_v17, %v11140_v5  ;;  %v1468_v21 = vadd.f32 %v1467_v61, %v11140_v5  ;;  %v1465_v5 = vadd.f32 %v11168_v38, %v11130_v60  ;;  %v1657_v60 = vadd.f32 %v11152_v19, %v1577_v15 }
 0x304   :  { %v1348_v42 = vadd.f32 %v1347_v34, %v11128_v59  ;;  %v1389_v0 = vadd.f32 %v1388_v35, %v11128_v59  ;;  %v1573_v34 = vmul.f32 %v11144_v7, %v1493_v25  ;;  %v1462_v25 = vadd.f32 %v11160_v27, %v11126_v58 }
 0x305   :  { %v1499_v44 = vmax.f32 %v1427_v10, 0.0  ;;  %v1500_v37 = vmax.f32 %v1468_v21, 0.0  ;;  %v1658_v38 = vadd.f32 %v11152_v19, %v1578_v13  ;;  %v1654_v27 = vadd.f32 %v11162_v28, %v1574_v32 }
 0x306   :  { %v1501_v48 = vmax.f32 %v1348_v42, 0.0  ;;  %v1502_v56 = vmax.f32 %v1389_v0, 0.0  ;;  %v1570_v0 = vmul.f32 %v11150_v14, %v1490_v46  ;;  %v1491_v46 = vmax.f32 %v1421_v8, 0.0 }
 0x307   :  { %v1492_v10 = vmax.f32 %v1462_v25, 0.0  ;;  %v1579_v21 = vmul.f32 %v11134_v63, %v1499_v44  ;;  %v1580_v15 = vmul.f32 %v11134_v63, %v1500_v37  ;;  %v1649_v13 = vadd.f32 %v11177_v47, %v1569_v4  ;;  %v1665_v25 = vld [vmem:[%s10350_s25] sm:$0xff] }
 0x308   :  { %v1581_v22 = vmul.f32 %v11142_v6, %v1501_v48  ;;  %v1582_v29 = vmul.f32 %v11142_v6, %v1502_v56  ;;  %v1488_v32 = vmax.f32 %v11226_v45, 0.0  ;;  %v1474_v45 = vmax.f32 %v11206_v16, 0.0 }
 0x309   :  { %v1660_v39 = vadd.f32 %v11152_v19, %v1580_v15  ;;  %v1480_v44 = vmax.f32 %v11182_v50, 0.0  ;;  %v1476_v37 = vmax.f32 %v11212_v24, 0.0 }
 0x30a   :  { %v1429_v17 = vpop.f32.mrf.mxu2  ;;  %v1470_v61 = vpop.f32.mrf.mxu3  ;;  %v1661_v62 = vadd.f32 %v11146_v12, %v1581_v22  ;;  %v1662_v42 = vadd.f32 %v11146_v12, %v1582_v29  ;;  %v1653_v22 = vadd.f32 %v11162_v28, %v1573_v34  ;;  %v1645_v29 = vadd.f32 %v11228_v57, %v1565_v31 }
 0x30b   :  { %v1430_v35 = vadd.f32 %v1429_v17, %v11128_v59  ;;  %v1471_v41 = vadd.f32 %v1470_v61, %v11128_v59  ;;  %v1495_v59 = vmax.f32 %v1424_v26, 0.0  ;;  %v1496_v17 = vmax.f32 %v1465_v5, 0.0  ;;  %v11273_v26 = vpop.permute.xlu0 %1515 }
 0x30c   :  { %1694 = vmatpush.msrb.mxu0 %v1661_v62  ;;  %1717 = vmatpush.msrb.mxu1 %v1662_v42  ;;  %v1487_v34 = vmax.f32 %v11222_v43, 0.0  ;;  %v1650_v31 = vadd.f32 %v11177_v47, %v1570_v0  ;;  %v1646_v43 = vadd.f32 %v11228_v57, %v1566_v1  ;;  %v1571_v5 = vmul.f32 %v11150_v14, %v1491_v46  ;;  %v1601_v62 = vpop.permute.xlu1 %1600 }
 0x30d   :  { %v1503_v48 = vmax.f32 %v1430_v35, 0.0  ;;  %v1504_v56 = vmax.f32 %v1471_v41, 0.0  ;;  %v1575_v63 = vmul.f32 %v11144_v7, %v1495_v59  ;;  %v1576_v4 = vmul.f32 %v11144_v7, %v1496_v17  ;;  %v1666_v59 = vld [vmem:[%s10350_s25 + $0x8] sm:$0xff] }
 0x30e   :  { %1695 = vmatpush.msrb.mxu0 %v1657_v60  ;;  %1718 = vmatpush.msrb.mxu1 %v1658_v38  ;;  %v1557_v35 = vmul.f32 %v11235_v11, %v1477_v51  ;;  %v1484_v41 = vmax.f32 %v11193_v3, 0.0  ;;  %v1572_v7 = vmul.f32 %v11150_v14, %v1492_v10  ;;  %v1659_v1 = vadd.f32 %v11152_v19, %v1579_v21 }
 0x30f   :  { %v1583_v61 = vmul.f32 %v11142_v6, %v1503_v48  ;;  %v1584_v58 = vmul.f32 %v11142_v6, %v1504_v56  ;;  %v1567_v51 = vmul.f32 %v11156_v23, %v1487_v34  ;;  %v1553_v40 = vmul.f32 %v11273_v26, %v1473_v36 }
 0x310   :  { %1696 = vmatpush.msrb.mxu0 %v1653_v22  ;;  %1719 = vmatpush.msrb.mxu1 %v1654_v27  ;;  %v1568_v14 = vmul.f32 %v11156_v23, %v1488_v32  ;;  %v1655_v3 = vadd.f32 %v11162_v28, %v1575_v63  ;;  %v1656_v16 = vadd.f32 %v11162_v28, %v1576_v4  ;;  %v1596_v23 = vpop.permute.xlu2 %1595 }
 0x311   :  { %v11267_v8 = vadd.f32 %v11146_v12, %v1583_v61  ;;  %v11270_v6 = vadd.f32 %v11146_v12, %v1584_v58  ;;  %v1558_v12 = vmul.f32 %v11235_v11, %v1478_v52  ;;  %v1554_v52 = vmul.f32 %v11273_v26, %v1474_v45 }
 0x312   :  { %1697 = vmatpush.msrb.mxu0 %v1649_v13  ;;  %1720 = vmatpush.msrb.mxu1 %v1650_v31  ;;  %v1563_v19 = vmul.f32 %v11164_v33, %v1483_v30  ;;  %v1637_v55 = vadd.f32 %v1601_v62, %v1557_v35  ;;  %v1564_v42 = vmul.f32 %v11164_v33, %v1484_v41  ;;  %v1479_v33 = vmax.f32 %v11180_v49, 0.0 }
 0x313   :  { %10111 = vmatpush.msrb.mxu2 %v11267_v8  ;;  %10119 = vmatpush.msrb.mxu3 %v11270_v6  ;;  %v1638_v36 = vadd.f32 %v1601_v62, %v1558_v12  ;;  %v1651_v0 = vadd.f32 %v11177_v47, %v1571_v5  ;;  %v1652_v28 = vadd.f32 %v11177_v47, %v1572_v7  ;;  %v1475_v47 = vmax.f32 %v11209_v20, 0.0  ;;  %v1677_v22 = vpop.permute.xlu0 %1676 }
 0x314   :  { %1698 = vmatpush.msrb.mxu0 %v1645_v29  ;;  %1721 = vmatpush.msrb.mxu1 %v1646_v43  ;;  %v1633_v54 = vadd.f32 %v1596_v23, %v1553_v40  ;;  %v1634_v30 = vadd.f32 %v1596_v23, %v1554_v52  ;;  %v1643_v48 = vadd.f32 %v11186_v53, %v1563_v19  ;;  %v1672_v29 = vpop.permute.xlu1 %1671 }
 0x315   :  { %10112 = vmatpush.msrb.mxu2 %v1659_v1  ;;  %10120 = vmatpush.msrb.mxu3 %v1660_v39  ;;  %v1644_v56 = vadd.f32 %v11186_v53, %v1564_v42  ;;  %v1560_v49 = vmul.f32 %v11235_v11, %v1480_v44  ;;  %v1555_v50 = vmul.f32 %v11273_v26, %v1475_v47 }
 0x316   :  { %1699 = vmatpush.msrb.mxu0 %v11198_v9  ;;  %1722 = vmatpush.msrb.mxu1 %v11203_v18  ;;  %v1647_v9 = vadd.f32 %v11228_v57, %v1567_v51  ;;  %v1648_v18 = vadd.f32 %v11228_v57, %v1568_v14  ;;  %v1559_v57 = vmul.f32 %v11235_v11, %v1479_v33 }
 0x317   :  { %10113 = vmatpush.msrb.mxu2 %v1655_v3  ;;  %10121 = vmatpush.msrb.mxu3 %v1656_v16  ;;  %v1556_v20 = vmul.f32 %v11273_v26, %v1476_v37  ;;  %v1640_v24 = vadd.f32 %v1601_v62, %v1560_v49  ;;  %v1635_v60 = vadd.f32 %v1596_v23, %v1555_v50 }
 0x318   :  { %1700 = vmatpush.msrb.mxu0 %v1637_v55  ;;  %1723 = vmatpush.msrb.mxu1 %v1638_v36  ;;  %v1639_v53 = vadd.f32 %v1601_v62, %v1559_v57  ;;  %v1796_v58 = vpop.permute.xlu2 %1795  ;;  %v1826_v55 = vld [vmem:[%s12162_s0] sm:$0xf] }
 0x319   :  { %10114 = vmatpush.msrb.mxu2 %v1651_v0  ;;  %10122 = vmatpush.msrb.mxu3 %v1652_v28  ;;  %v1636_v38 = vadd.f32 %v1596_v23, %v1556_v20 }
 0x31a   :  { %1701 = vmatpush.msrb.mxu0 %v1633_v54  ;;  %1724 = vmatpush.msrb.mxu1 %v1634_v30 }
 0x31b   :  { %10115 = vmatpush.msrb.mxu2 %v1647_v9  ;;  %10123 = vmatpush.msrb.mxu3 %v1648_v18  ;;  %v1791_v31 = vpop.permute.xlu0 %1790 }
 0x31c   :  { %7475 = vmatmul.msk.f32.vlgmr.msrb.gmra.mxu0 %vm1679_vm1, %v1665_v25  ;;  %7477 = vmatmul.msk.f32.vlgmr.msrb.gmra.mxu1 %vm1679_vm1, %v1665_v25  ;;  %v1816_v12 = vpop.permute.xlu1 %1815 }
 0x31d   :  { %1740 = vmatpush.msra.mxu0 %v11267_v8  ;;  %1763 = vmatpush.msra.mxu1 %v11270_v6 }
 0x31e   :  { %10116 = vmatpush.msrb.mxu2 %v1643_v48  ;;  %10124 = vmatpush.msrb.mxu3 %v1644_v56 }
 0x31f   :  { %1741 = vmatpush.msra.mxu0 %v1659_v1  ;;  %1764 = vmatpush.msra.mxu1 %v1660_v39 }
 0x320   :  { %10117 = vmatpush.msrb.mxu2 %v1639_v53  ;;  %10125 = vmatpush.msrb.mxu3 %v1640_v24  ;;  %v1811_v41 = vpop.permute.xlu2 %1810 }
 0x321   :  { %1742 = vmatpush.msra.mxu0 %v1655_v3  ;;  %1765 = vmatpush.msra.mxu1 %v1656_v16 }
 0x322   :  { %10118 = vmatpush.msrb.mxu2 %v1635_v60  ;;  %10126 = vmatpush.msrb.mxu3 %v1636_v38 }
 0x323   :  { %1743 = vmatpush.msra.mxu0 %v1651_v0  ;;  %7480 = vmatmul.msk.f32.vlgmr.msrb.gmra.mxu2 %vm1679_vm1, %v1666_v59 }
 0x324   :  { %1766 = vmatpush.msra.mxu1 %v1652_v28  ;;  %7482 = vmatmul.msk.f32.vlgmr.msrb.gmra.mxu3 %vm1679_vm1, %v1666_v59  ;;  %v1925_v57 = vpop.permute.xlu1 %1924 }
 0x325   :  { %7476 = vmatmul.msk.f32.gmra.mxu0 %vm1679_vm1, %v1666_v59  ;;  %7478 = vmatmul.msk.f32.gmra.mxu1 %vm1679_vm1, %v1666_v59 }
 0x326   :  { %1744 = vmatpush.msra.mxu0 %v1647_v9  ;;  %1767 = vmatpush.msra.mxu1 %v1648_v18 }
 0x328   :  { %1745 = vmatpush.msra.mxu0 %v1643_v48  ;;  %1768 = vmatpush.msra.mxu1 %v1644_v56  ;;  %v1935_v20 = vpop.permute.xlu2 %1934 }
 0x32a   :  { %1746 = vmatpush.msra.mxu0 %v1639_v53  ;;  %1769 = vmatpush.msra.mxu1 %v1640_v24 }
 0x32c   :  { %1747 = vmatpush.msra.mxu0 %v1635_v60  ;;  %1770 = vmatpush.msra.mxu1 %v1636_v38 }
 0x32d   :  { %7479 = vmatmul.msk.f32.vlgmr.msra.gmra.mxu0 %vm1679_vm1, %v1665_v25  ;;  %7481 = vmatmul.msk.f32.vlgmr.msra.gmra.mxu1 %vm1679_vm1, %v1665_v25  ;;  %v1831_v25 = vpop.permute.xlu0 %1830 }
 0x399   :  { %v1703_v11 = vpop.f32.mrf.mxu0  ;;  %v1726_v17 = vpop.f32.mrf.mxu1 }
 0x39a   :  { %v1704_v46 = vadd.f32 %v1703_v11, %v1672_v29  ;;  %v1727_v61 = vadd.f32 %v1726_v17, %v1672_v29 }
 0x39c   :  { %v1778_v27 = vmax.f32 %v1704_v46, 0.0  ;;  %v1779_v10 = vmax.f32 %v1727_v61, 0.0 }
 0x39e   :  { %v1798_v32 = vmul.f32 %v1791_v31, %v1778_v27  ;;  %v1799_v26 = vmul.f32 %v1791_v31, %v1779_v10 }
 0x3a0   :  { %v1818_v52 = vadd.f32 %v1811_v41, %v1798_v32  ;;  %v1819_v14 = vadd.f32 %v1811_v41, %v1799_v26 }
 0x3a2   :  { %v1706_v21 = vpop.f32.mrf.mxu0  ;;  %v1729_v15 = vpop.f32.mrf.mxu1 }
 0x3a3   :  { %v1707_v13 = vadd.f32 %v1706_v21, %v1677_v22  ;;  %v1730_v34 = vadd.f32 %v1729_v15, %v1677_v22 }
 0x3a5   :  { %v1782_v8 = vmax.f32 %v1707_v13, 0.0  ;;  %v1783_v6 = vmax.f32 %v1730_v34, 0.0 }
 0x3a6   :  { %v1752_v63 = vpop.f32.mrf.mxu2 }
 0x3a7   :  { %v1802_v4 = vmul.f32 %v1796_v58, %v1782_v8  ;;  %v1803_v43 = vmul.f32 %v1796_v58, %v1783_v6  ;;  %v1753_v5 = vadd.f32 %v1752_v63, %v1677_v22  ;;  %v1775_v35 = vpop.f32.mrf.mxu3 }
 0x3a8   :  { %v1776_v45 = vadd.f32 %v1775_v35, %v1677_v22 }
 0x3a9   :  { %v1822_v7 = vadd.f32 %v1816_v12, %v1802_v4  ;;  %v1823_v62 = vadd.f32 %v1816_v12, %v1803_v43  ;;  %v1784_v1 = vmax.f32 %v1753_v5, 0.0 }
 0x3aa   :  { %v1785_v39 = vmax.f32 %v1776_v45, 0.0  ;;  %v1749_v51 = vpop.f32.mrf.mxu0  ;;  %v1772_v40 = vpop.f32.mrf.mxu1 }
 0x3ab   :  { %v1804_v3 = vmul.f32 %v1796_v58, %v1784_v1  ;;  %v1750_v16 = vadd.f32 %v1749_v51, %v1672_v29  ;;  %v1773_v19 = vadd.f32 %v1772_v40, %v1672_v29  ;;  %1851 = vmatpush.msrb.mxu0 %v1822_v7  ;;  %1871 = vmatpush.msrb.mxu1 %v1823_v62 }
 0x3ac   :  { %v1805_v36 = vmul.f32 %v1796_v58, %v1785_v39 }
 0x3ad   :  { %v1824_v42 = vadd.f32 %v1816_v12, %v1804_v3  ;;  %v1780_v23 = vmax.f32 %v1750_v16, 0.0  ;;  %v1781_v0 = vmax.f32 %v1773_v19, 0.0  ;;  %1852 = vmatpush.msrb.mxu0 %v1818_v52  ;;  %1872 = vmatpush.msrb.mxu1 %v1819_v14 }
 0x3ae   :  { %v1825_v28 = vadd.f32 %v1816_v12, %v1805_v36  ;;  %7483 = vmatmul.msk.f32.vlgmr.msrb.gmra.mxu0 %vm1833_vm2, %v1826_v55  ;;  %7484 = vmatmul.msk.f32.vlgmr.msrb.gmra.mxu1 %vm1833_vm2, %v1826_v55 }
 0x3af   :  { %v1800_v54 = vmul.f32 %v1791_v31, %v1780_v23  ;;  %v1801_v30 = vmul.f32 %v1791_v31, %v1781_v0  ;;  %1891 = vmatpush.msra.mxu2 %v1824_v42 }
 0x3b0   :  { %1911 = vmatpush.msra.mxu3 %v1825_v28 }
 0x3b1   :  { %v1820_v9 = vadd.f32 %v1811_v41, %v1800_v54  ;;  %v1821_v18 = vadd.f32 %v1811_v41, %v1801_v30 }
 0x3b3   :  { %1892 = vmatpush.msra.mxu2 %v1820_v9  ;;  %1912 = vmatpush.msra.mxu3 %v1821_v18 }
 0x3b4   :  { %7485 = vmatmul.msk.f32.vlgmr.msra.gmra.mxu2 %vm1833_vm2, %v1826_v55  ;;  %7486 = vmatmul.msk.f32.vlgmr.msra.gmra.mxu3 %vm1833_vm2, %v1826_v55 }
 0x42b   :  { %v1854_v33 = vpop.f32.mrf.mxu0  ;;  %v1874_v44 = vpop.f32.mrf.mxu1 }
 0x42c   :  { %v1855_v47 = vadd.f32 %v1854_v33, %v1831_v25  ;;  %v1875_v37 = vadd.f32 %v1874_v44, %v1831_v25 }
 0x42e   :  { %v1917_v48 = vmax.f32 %v1855_v47, 0.0  ;;  %v1918_v56 = vmax.f32 %v1875_v37, 0.0 }
 0x430   :  { %v1927_v49 = vmul.f32 %v1925_v57, %v1917_v48  ;;  %v1928_v50 = vmul.f32 %v1925_v57, %v1918_v56 }
 0x432   :  { %v11337_v53 = vadd.f32 %v1935_v20, %v1927_v49  ;;  %v11339_v24 = vadd.f32 %v1935_v20, %v1928_v50 }
 0x437   :  { %v1894_v60 = vpop.f32.mrf.mxu2  ;;  %v1914_v38 = vpop.f32.mrf.mxu3 }
 0x438   :  { %v1895_v59 = vadd.f32 %v1894_v60, %v1831_v25  ;;  %v1915_v11 = vadd.f32 %v1914_v38, %v1831_v25 }
 0x43a   :  { %v1919_v17 = vmax.f32 %v1895_v59, 0.0  ;;  %v1920_v22 = vmax.f32 %v1915_v11, 0.0 }
 0x43c   :  { %v1929_v29 = vmul.f32 %v1925_v57, %v1919_v17  ;;  %v1930_v46 = vmul.f32 %v1925_v57, %v1920_v22 }
 0x43e   :  { %v11341_v61 = vadd.f32 %v1935_v20, %v1929_v29  ;;  %v11343_v58 = vadd.f32 %v1935_v20, %v1930_v46 }
 0x43f   :  { %10266 = dma.done.wait [#allocation4], 32768 }
 0x440   :  { %10267 = vsyncadd [#allocation4], 4294934528  ;;  %v7545_v27 = vld [vmem:[#allocation2 + $0x70] sm:$0xf]  ;;  %v9614_v10 = vld [vmem:[#allocation2 + $0x74] sm:$0xf0] }
 0x441   :  { %v7609_v21 = vld [vmem:[#allocation2 + $0xf0] sm:$0xf]  ;;  %v7546_v15 = vor.u32 %v9614_v10, %v7545_v27  ;;  %v9630_v13 = vld [vmem:[#allocation2 + $0xf4] sm:$0xf0]  ;;  %v7537_v63 = vld [vmem:[#allocation2 + $0x60] sm:$0xf] }
 0x442   :  { %v7673_v34 = vld [vmem:[#allocation2 + $0x170] sm:$0xf]  ;;  %v9646_v31 = vld [vmem:[#allocation2 + $0x174] sm:$0xf0]  ;;  %v7610_v8 = vor.u32 %v9630_v13, %v7609_v21  ;;  %v9612_v43 = vld [vmem:[#allocation2 + $0x64] sm:$0xf0] }
 0x443   :  { %v7674_v6 = vor.u32 %v9646_v31, %v7673_v34  ;;  %v7737_v32 = vld [vmem:[#allocation2 + $0x1f0] sm:$0xf]  ;;  %v9662_v26 = vld [vmem:[#allocation2 + $0x1f4] sm:$0xf0]  ;;  %2335 = vmatpush.bf16.msra.mxu0 %v7546_v15  ;;  %v7601_v5 = vld [vmem:[#allocation2 + $0xe0] sm:$0xf]  ;;  %v7538_v12 = vor.u32 %v9612_v43, %v7537_v63 }
 0x444   :  { %v7738_v4 = vor.u32 %v9662_v26, %v7737_v32  ;;  %v9628_v35 = vld [vmem:[#allocation2 + $0xe4] sm:$0xf0]  ;;  %2348 = vmatpush.bf16.msra.mxu1 %v7610_v8  ;;  %v7665_v41 = vld [vmem:[#allocation2 + $0x160] sm:$0xf]  ;;  %v7529_v51 = vld [vmem:[#allocation2 + $0x50] sm:$0xf] }
 0x445   :  { %2361 = vmatpush.bf16.msrb.mxu2 %v7674_v6  ;;  %v7602_v45 = vor.u32 %v9628_v35, %v7601_v5  ;;  %v9644_v7 = vld [vmem:[#allocation2 + $0x164] sm:$0xf0]  ;;  %v7729_v62 = vld [vmem:[#allocation2 + $0x1e0] sm:$0xf]  ;;  %v9610_v40 = vld [vmem:[#allocation2 + $0x54] sm:$0xf0] }
 0x446   :  { %2374 = vmatpush.bf16.msrb.mxu3 %v7738_v4  ;;  %v7666_v1 = vor.u32 %v9644_v7, %v7665_v41  ;;  %v9660_v39 = vld [vmem:[#allocation2 + $0x1e4] sm:$0xf0]  ;;  %v7593_v14 = vld [vmem:[#allocation2 + $0xd0] sm:$0xf]  ;;  %v9626_v3 = vld [vmem:[#allocation2 + $0xd4] sm:$0xf0]  ;;  %v7530_v19 = vor.u32 %v9610_v40, %v7529_v51 }
 0x447   :  { %v7730_v52 = vor.u32 %v9660_v39, %v7729_v62  ;;  %v7657_v16 = vld [vmem:[#allocation2 + $0x150] sm:$0xf]  ;;  %2336 = vmatpush.bf16.msra.mxu0 %v7538_v12  ;;  %v9642_v55 = vld [vmem:[#allocation2 + $0x154] sm:$0xf0]  ;;  %v7594_v23 = vor.u32 %v9626_v3, %v7593_v14  ;;  %v7521_v28 = vld [vmem:[#allocation2 + $0x40] sm:$0xf] }
 0x448   :  { %v7721_v36 = vld [vmem:[#allocation2 + $0x1d0] sm:$0xf]  ;;  %v9658_v42 = vld [vmem:[#allocation2 + $0x1d4] sm:$0xf0]  ;;  %2349 = vmatpush.bf16.msra.mxu1 %v7602_v45  ;;  %v7658_v0 = vor.u32 %v9642_v55, %v7657_v16  ;;  %v9608_v54 = vld [vmem:[#allocation2 + $0x44] sm:$0xf0] }
 0x449   :  { %2362 = vmatpush.bf16.msrb.mxu2 %v7666_v1  ;;  %v7585_v30 = vld [vmem:[#allocation2 + $0xc0] sm:$0xf]  ;;  %v7722_v9 = vor.u32 %v9658_v42, %v7721_v36  ;;  %v9624_v18 = vld [vmem:[#allocation2 + $0xc4] sm:$0xf0]  ;;  %v7522_v37 = vor.u32 %v9608_v54, %v7521_v28  ;;  %v7513_v57 = vld [vmem:[#allocation2 + $0x30] sm:$0xf] }
 0x44a   :  { %2375 = vmatpush.bf16.msrb.mxu3 %v7730_v52  ;;  %v7649_v25 = vld [vmem:[#allocation2 + $0x140] sm:$0xf]  ;;  %v9640_v33 = vld [vmem:[#allocation2 + $0x144] sm:$0xf0]  ;;  %v7586_v48 = vor.u32 %v9624_v18, %v7585_v30  ;;  %v9606_v49 = vld [vmem:[#allocation2 + $0x34] sm:$0xf0] }
 0x44b   :  { %v7713_v44 = vld [vmem:[#allocation2 + $0x1c0] sm:$0xf]  ;;  %v9656_v47 = vld [vmem:[#allocation2 + $0x1c4] sm:$0xf0]  ;;  %2337 = vmatpush.bf16.msra.mxu0 %v7530_v19  ;;  %v7650_v56 = vor.u32 %v9640_v33, %v7649_v25  ;;  %v7577_v50 = vld [vmem:[#allocation2 + $0xb0] sm:$0xf]  ;;  %v7514_v22 = vor.u32 %v9606_v49, %v7513_v57 }
 0x44c   :  { %2350 = vmatpush.bf16.msra.mxu1 %v7594_v23  ;;  %v7714_v20 = vor.u32 %v9656_v47, %v7713_v44  ;;  %v9622_v60 = vld [vmem:[#allocation2 + $0xb4] sm:$0xf0]  ;;  %v7641_v38 = vld [vmem:[#allocation2 + $0x130] sm:$0xf]  ;;  %v7505_v27 = vld [vmem:[#allocation2 + $0x20] sm:$0xf] }
 0x44d   :  { %2363 = vmatpush.bf16.msrb.mxu2 %v7658_v0  ;;  %v9638_v59 = vld [vmem:[#allocation2 + $0x134] sm:$0xf0]  ;;  %v7705_v11 = vld [vmem:[#allocation2 + $0x1b0] sm:$0xf]  ;;  %v7578_v29 = vor.u32 %v9622_v60, %v7577_v50  ;;  %v9604_v10 = vld [vmem:[#allocation2 + $0x24] sm:$0xf0] }
 0x44e   :  { %2376 = vmatpush.bf16.msrb.mxu3 %v7722_v9  ;;  %v9654_v17 = vld [vmem:[#allocation2 + $0x1b4] sm:$0xf0]  ;;  %v7642_v46 = vor.u32 %v9638_v59, %v7641_v38  ;;  %v7569_v21 = vld [vmem:[#allocation2 + $0xa0] sm:$0xf]  ;;  %v9620_v13 = vld [vmem:[#allocation2 + $0xa4] sm:$0xf0]  ;;  %v7506_v32 = vor.u32 %v9604_v10, %v7505_v27  ;;  %v11355_v27 = vpack.c.bf16 %v11337_v53, %v11337_v53 }
 0x44f   :  { %2338 = vmatpush.bf16.msra.mxu0 %v7522_v37  ;;  %v7706_v15 = vor.u32 %v9654_v17, %v7705_v11  ;;  %v7633_v34 = vld [vmem:[#allocation2 + $0x120] sm:$0xf]  ;;  %v9636_v31 = vld [vmem:[#allocation2 + $0x124] sm:$0xf0]  ;;  %v7570_v26 = vor.u32 %v9620_v13, %v7569_v21  ;;  %v7497_v4 = vld [vmem:[#allocation2 + $0x10] sm:$0xf]  ;;  %v11347_v17 = vpack.c.bf16 %v11341_v61, %v11341_v61  ;;  %v11359_v21 = vpack.c.bf16 %v11339_v24, %v11339_v24 }
 0x450   :  { %2351 = vmatpush.bf16.msra.mxu1 %v7586_v48  ;;  %v7697_v8 = vld [vmem:[#allocation2 + $0x1a0] sm:$0xf]  ;;  %v9652_v6 = vld [vmem:[#allocation2 + $0x1a4] sm:$0xf0]  ;;  %v7634_v63 = vor.u32 %v9636_v31, %v7633_v34  ;;  %v9602_v43 = vld [vmem:[#allocation2 + $0x14] sm:$0xf0] }
 0x451   :  { %2364 = vmatpush.bf16.msrb.mxu2 %v7650_v56  ;;  %v7561_v5 = vld [vmem:[#allocation2 + $0x90] sm:$0xf]  ;;  %v7698_v35 = vor.u32 %v9652_v6, %v7697_v8  ;;  %v9618_v12 = vld [vmem:[#allocation2 + $0x94] sm:$0xf0]  ;;  %v7498_v1 = vor.u32 %v9602_v43, %v7497_v4  ;;  %v7489_v39 = vld [vmem:[#allocation2] sm:$0xf] }
 0x452   :  { %2377 = vmatpush.bf16.msrb.mxu3 %v7714_v20  ;;  %v7625_v45 = vld [vmem:[#allocation2 + $0x110] sm:$0xf]  ;;  %v9634_v41 = vld [vmem:[#allocation2 + $0x114] sm:$0xf0]  ;;  %v9600_v51 = vld [vmem:[#allocation2 + $0x4] sm:$0xf0]  ;;  %v7562_v40 = vor.u32 %v9618_v12, %v7561_v5 }
 0x453   :  { %2339 = vmatpush.bf16.msra.mxu0 %v7514_v22  ;;  %v7689_v7 = vld [vmem:[#allocation2 + $0x190] sm:$0xf]  ;;  %v9650_v62 = vld [vmem:[#allocation2 + $0x194] sm:$0xf0]  ;;  %v7626_v52 = vor.u32 %v9634_v41, %v7625_v45  ;;  %v7553_v14 = vld [vmem:[#allocation2 + $0x80] sm:$0xf]  ;;  %v7490_v54 = vor.u32 %v9600_v51, %v7489_v39 }
 0x454   :  { %2352 = vmatpush.bf16.msra.mxu1 %v7578_v29  ;;  %v9616_v3 = vld [vmem:[#allocation2 + $0x84] sm:$0xf0]  ;;  %v7617_v16 = vld [vmem:[#allocation2 + $0x100] sm:$0xf]  ;;  %v7690_v19 = vor.u32 %v9650_v62, %v7689_v7  ;;  %v9613_v23 = vld [vmem:[#allocation2 + $0x74] sm:$0xf] }
 0x455   :  { %2365 = vmatpush.bf16.msrb.mxu2 %v7642_v46  ;;  %v9632_v55 = vld [vmem:[#allocation2 + $0x104] sm:$0xf0]  ;;  %v7681_v36 = vld [vmem:[#allocation2 + $0x180] sm:$0xf]  ;;  %v7547_v0 = vld [vmem:[#allocation2 + $0x78] sm:$0xf0]  ;;  %v7554_v25 = vor.u32 %v9616_v3, %v7553_v14  ;;  %v11351_v46 = vpack.c.bf16 %v11343_v58, %v11343_v58 }
 0x456   :  { %2378 = vmatpush.bf16.msrb.mxu3 %v7706_v15  ;;  %v9648_v42 = vld [vmem:[#allocation2 + $0x184] sm:$0xf0]  ;;  %v9629_v28 = vld [vmem:[#allocation2 + $0xf4] sm:$0xf]  ;;  %v7611_v30 = vld [vmem:[#allocation2 + $0xf8] sm:$0xf0]  ;;  %v7618_v33 = vor.u32 %v9632_v55, %v7617_v16  ;;  %v7550_v48 = vor.u32 %v9613_v23, %v7547_v0 }
 0x457   :  { %2340 = vmatpush.bf16.msra.mxu0 %v7506_v32  ;;  %v9645_v9 = vld [vmem:[#allocation2 + $0x174] sm:$0xf]  ;;  %v7675_v18 = vld [vmem:[#allocation2 + $0x178] sm:$0xf0]  ;;  %v7682_v37 = vor.u32 %v9648_v42, %v7681_v36  ;;  %v7614_v56 = vor.u32 %v9629_v28, %v7611_v30  ;;  %v9611_v49 = vld [vmem:[#allocation2 + $0x64] sm:$0xf] }
 0x458   :  { %2353 = vmatpush.bf16.msra.mxu1 %v7570_v26  ;;  %v9661_v44 = vld [vmem:[#allocation2 + $0x1f4] sm:$0xf]  ;;  %v7739_v47 = vld [vmem:[#allocation2 + $0x1f8] sm:$0xf0]  ;;  %v7678_v57 = vor.u32 %v9645_v9, %v7675_v18  ;;  %v7539_v50 = vld [vmem:[#allocation2 + $0x68] sm:$0xf0] }
 0x459   :  { %2366 = vmatpush.bf16.msrb.mxu2 %v7634_v63  ;;  %v9627_v20 = vld [vmem:[#allocation2 + $0xe4] sm:$0xf]  ;;  %v7742_v60 = vor.u32 %v9661_v44, %v7739_v47  ;;  %v7603_v38 = vld [vmem:[#allocation2 + $0xe8] sm:$0xf0]  ;;  %v7542_v10 = vor.u32 %v9611_v49, %v7539_v50  ;;  %v9609_v13 = vld [vmem:[#allocation2 + $0x54] sm:$0xf] }
 0x45a   :  { %2379 = vmatpush.bf16.msrb.mxu3 %v7698_v35  ;;  %v9643_v59 = vld [vmem:[#allocation2 + $0x164] sm:$0xf]  ;;  %v7667_v11 = vld [vmem:[#allocation2 + $0x168] sm:$0xf0]  ;;  %v7606_v61 = vor.u32 %v9627_v20, %v7603_v38  ;;  %v7531_v34 = vld [vmem:[#allocation2 + $0x58] sm:$0xf0] }
 0x45b   :  { %2341 = vmatpush.bf16.msra.mxu0 %v7498_v1  ;;  %v9659_v22 = vld [vmem:[#allocation2 + $0x1e4] sm:$0xf]  ;;  %v7731_v29 = vld [vmem:[#allocation2 + $0x1e8] sm:$0xf0]  ;;  %v7670_v15 = vor.u32 %v9643_v59, %v7667_v11  ;;  %v9625_v31 = vld [vmem:[#allocation2 + $0xd4] sm:$0xf]  ;;  %v7534_v24 = vor.u32 %v9609_v13, %v7531_v34 }
 0x45c   :  { %2354 = vmatpush.bf16.msra.mxu1 %v7562_v40  ;;  %v7734_v58 = vor.u32 %v9659_v22, %v7731_v29  ;;  %v7595_v8 = vld [vmem:[#allocation2 + $0xd8] sm:$0xf0]  ;;  %v9641_v6 = vld [vmem:[#allocation2 + $0x154] sm:$0xf]  ;;  %v9607_v43 = vld [vmem:[#allocation2 + $0x44] sm:$0xf] }
 0x45d   :  { %2367 = vmatpush.bf16.msrb.mxu2 %v7626_v52  ;;  %v7659_v53 = vld [vmem:[#allocation2 + $0x158] sm:$0xf0]  ;;  %v9657_v32 = vld [vmem:[#allocation2 + $0x1d4] sm:$0xf]  ;;  %v7598_v63 = vor.u32 %v9625_v31, %v7595_v8  ;;  %v7523_v5 = vld [vmem:[#allocation2 + $0x48] sm:$0xf0] }
 0x45e   :  { %2380 = vmatpush.bf16.msrb.mxu3 %v7690_v19  ;;  %v7723_v26 = vld [vmem:[#allocation2 + $0x1d8] sm:$0xf0]  ;;  %v7662_v4 = vor.u32 %v9641_v6, %v7659_v53  ;;  %v9623_v35 = vld [vmem:[#allocation2 + $0xc4] sm:$0xf]  ;;  %v7587_v45 = vld [vmem:[#allocation2 + $0xc8] sm:$0xf0]  ;;  %v7526_v39 = vor.u32 %v9607_v43, %v7523_v5 }
 0x45f   :  { %2342 = vmatpush.bf16.msra.mxu0 %v7490_v54  ;;  %v7726_v12 = vor.u32 %v9657_v32, %v7723_v26  ;;  %v9639_v41 = vld [vmem:[#allocation2 + $0x144] sm:$0xf]  ;;  %v7651_v7 = vld [vmem:[#allocation2 + $0x148] sm:$0xf0]  ;;  %v7590_v51 = vor.u32 %v9623_v35, %v7587_v45  ;;  %v9605_v52 = vld [vmem:[#allocation2 + $0x34] sm:$0xf] }
 0x460   :  { %2355 = vmatpush.bf16.msra.mxu1 %v7554_v25  ;;  %v9655_v62 = vld [vmem:[#allocation2 + $0x1c4] sm:$0xf]  ;;  %v7715_v1 = vld [vmem:[#allocation2 + $0x1c8] sm:$0xf0]  ;;  %v7654_v40 = vor.u32 %v9639_v41, %v7651_v7  ;;  %v7515_v14 = vld [vmem:[#allocation2 + $0x38] sm:$0xf0] }
 0x461   :  { %2368 = vmatpush.bf16.msrb.mxu2 %v7618_v33  ;;  %v9621_v3 = vld [vmem:[#allocation2 + $0xb4] sm:$0xf]  ;;  %v7718_v16 = vor.u32 %v9655_v62, %v7715_v1  ;;  %v7579_v19 = vld [vmem:[#allocation2 + $0xb8] sm:$0xf0]  ;;  %v7518_v0 = vor.u32 %v9605_v52, %v7515_v14  ;;  %v9603_v30 = vld [vmem:[#allocation2 + $0x24] sm:$0xf] }
 0x462   :  { %2381 = vmatpush.bf16.msrb.mxu3 %v7682_v37  ;;  %2343 = vmatmul.bf16.vlgmr.msra.gmra.mxu0 %v11355_v27  ;;  %v9637_v55 = vld [vmem:[#allocation2 + $0x134] sm:$0xf]  ;;  %v7643_v36 = vld [vmem:[#allocation2 + $0x138] sm:$0xf0]  ;;  %v7582_v28 = vor.u32 %v9621_v3, %v7579_v19  ;;  %v7507_v9 = vld [vmem:[#allocation2 + $0x28] sm:$0xf0] }
 0x463   :  { %2387 = vmatpush.bf16.msrb.mxu0 %v7550_v48  ;;  %2356 = vmatmul.bf16.vlgmr.msra.gmra.mxu1 %v11359_v21  ;;  %v9653_v42 = vld [vmem:[#allocation2 + $0x1b4] sm:$0xf]  ;;  %v7707_v23 = vld [vmem:[#allocation2 + $0x1b8] sm:$0xf0]  ;;  %v7646_v54 = vor.u32 %v9637_v55, %v7643_v36  ;;  %v9619_v18 = vld [vmem:[#allocation2 + $0xa4] sm:$0xf] }
 0x464   :  { %2400 = vmatpush.bf16.msrb.mxu1 %v7614_v56  ;;  %2369 = vmatmul.bf16.vlgmr.msrb.gmra.mxu2 %v11347_v17  ;;  %v7710_v25 = vor.u32 %v9653_v42, %v7707_v23  ;;  %v7571_v33 = vld [vmem:[#allocation2 + $0xa8] sm:$0xf0]  ;;  %v9635_v44 = vld [vmem:[#allocation2 + $0x124] sm:$0xf]  ;;  %v7510_v56 = vor.u32 %v9603_v30, %v7507_v9  ;;  %v9601_v50 = vld [vmem:[#allocation2 + $0x14] sm:$0xf] }
 0x465   :  { %2413 = vmatpush.bf16.msra.mxu2 %v7678_v57  ;;  %2382 = vmatmul.bf16.vlgmr.msrb.gmra.mxu3 %v11351_v46  ;;  %v7635_v47 = vld [vmem:[#allocation2 + $0x128] sm:$0xf0]  ;;  %v9651_v37 = vld [vmem:[#allocation2 + $0x1a4] sm:$0xf]  ;;  %v7574_v57 = vor.u32 %v9619_v18, %v7571_v33  ;;  %v7499_v20 = vld [vmem:[#allocation2 + $0x18] sm:$0xf0] }
 0x466   :  { %2426 = vmatpush.bf16.msra.mxu3 %v7742_v60  ;;  %v7699_v48 = vld [vmem:[#allocation2 + $0x1a8] sm:$0xf0]  ;;  %v7638_v49 = vor.u32 %v9635_v44, %v7635_v47  ;;  %v9617_v60 = vld [vmem:[#allocation2 + $0x94] sm:$0xf]  ;;  %v7563_v59 = vld [vmem:[#allocation2 + $0x98] sm:$0xf0] }
 0x467   :  { %2388 = vmatpush.bf16.msrb.mxu0 %v7542_v10  ;;  %v7702_v38 = vor.u32 %v9651_v37, %v7699_v48  ;;  %v9633_v11 = vld [vmem:[#allocation2 + $0x114] sm:$0xf]  ;;  %v7627_v22 = vld [vmem:[#allocation2 + $0x118] sm:$0xf0]  ;;  %v7491_v13 = vld [vmem:[#allocation2 + $0x8] sm:$0xf0]  ;;  %v7566_v34 = vor.u32 %v9617_v60, %v7563_v59 }
 0x468   :  { %2401 = vmatpush.bf16.msrb.mxu1 %v7606_v61  ;;  %v9649_v29 = vld [vmem:[#allocation2 + $0x194] sm:$0xf]  ;;  %v7691_v10 = vld [vmem:[#allocation2 + $0x198] sm:$0xf0]  ;;  %v7502_v61 = vor.u32 %v9601_v50, %v7499_v20  ;;  %v7630_v31 = vor.u32 %v9633_v11, %v7627_v22  ;;  %v7555_v8 = vld [vmem:[#allocation2 + $0x88] sm:$0xf0] }
 0x469   :  { %2414 = vmatpush.bf16.msra.mxu2 %v7670_v15  ;;  %v9599_v15 = vld [vmem:[#allocation2 + $0x4] sm:$0xf]  ;;  %v7694_v53 = vor.u32 %v9649_v29, %v7691_v10  ;;  %v7619_v32 = vld [vmem:[#allocation2 + $0x108] sm:$0xf0]  ;;  %v7865_v43 = vld [vmem:[#allocation2 + $0x2f0] sm:$0xf] }
 0x46a   :  { %2427 = vmatpush.bf16.msra.mxu3 %v7734_v58  ;;  %v9615_v58 = vld [vmem:[#allocation2 + $0x84] sm:$0xf]  ;;  %v7494_v5 = vor.u32 %v9599_v15, %v7491_v13  ;;  %v9694_v35 = vld [vmem:[#allocation2 + $0x2f4] sm:$0xf0]  ;;  %v7993_v62 = vld [vmem:[#allocation2 + $0x3f0] sm:$0xf] }
 0x46b   :  { %2389 = vmatpush.bf16.msrb.mxu0 %v7534_v24  ;;  %v9631_v6 = vld [vmem:[#allocation2 + $0x104] sm:$0xf]  ;;  %v7683_v24 = vld [vmem:[#allocation2 + $0x188] sm:$0xf0]  ;;  %v9710_v45 = vld [vmem:[#allocation2 + $0x374] sm:$0xf0]  ;;  %v7558_v41 = vor.u32 %v9615_v58, %v7555_v8 }
 0x46c   :  { %2402 = vmatpush.bf16.msrb.mxu1 %v7598_v63  ;;  %v9647_v26 = vld [vmem:[#allocation2 + $0x184] sm:$0xf]  ;;  %v7801_v63 = vld [vmem:[#allocation2 + $0x270] sm:$0xf]  ;;  %v7622_v7 = vor.u32 %v9631_v6, %v7619_v32  ;;  %v9726_v1 = vld [vmem:[#allocation2 + $0x3f4] sm:$0xf0] }
 0x46d   :  { %2415 = vmatpush.bf16.msra.mxu2 %v7662_v4  ;;  %v9678_v4 = vld [vmem:[#allocation2 + $0x274] sm:$0xf0]  ;;  %v7793_v14 = vld [vmem:[#allocation2 + $0x260] sm:$0xf]  ;;  %v9676_v3 = vld [vmem:[#allocation2 + $0x264] sm:$0xf0]  ;;  %v7994_v19 = vor.u32 %v9726_v1, %v7993_v62 }
 0x46e   :  { %2428 = vmatpush.bf16.msra.mxu3 %v7726_v12  ;;  %v7929_v12 = vld [vmem:[#allocation2 + $0x370] sm:$0xf]  ;;  %v9692_v55 = vld [vmem:[#allocation2 + $0x2e4] sm:$0xf0]  ;;  %v7921_v36 = vld [vmem:[#allocation2 + $0x360] sm:$0xf] }
 0x46f   :  { %2390 = vmatpush.bf16.msrb.mxu0 %v7526_v39  ;;  %v7686_v39 = vor.u32 %v9647_v26, %v7683_v24  ;;  %v7930_v52 = vor.u32 %v9710_v45, %v7929_v12  ;;  %v9708_v42 = vld [vmem:[#allocation2 + $0x364] sm:$0xf0]  ;;  %v7985_v23 = vld [vmem:[#allocation2 + $0x3e0] sm:$0xf]  ;;  %v7785_v9 = vld [vmem:[#allocation2 + $0x250] sm:$0xf] }
 0x470   :  { %2403 = vmatpush.bf16.msrb.mxu1 %v7590_v51  ;;  %v7802_v51 = vor.u32 %v9678_v4, %v7801_v63  ;;  %v7922_v30 = vor.u32 %v9708_v42, %v7921_v36  ;;  %v9674_v18 = vld [vmem:[#allocation2 + $0x254] sm:$0xf0]  ;;  %v7913_v47 = vld [vmem:[#allocation2 + $0x350] sm:$0xf]  ;;  %v7777_v20 = vld [vmem:[#allocation2 + $0x240] sm:$0xf] }
 0x471   :  { %2416 = vmatpush.bf16.msra.mxu2 %v7654_v40  ;;  %v7866_v40 = vor.u32 %v9694_v35, %v7865_v43  ;;  %v9690_v44 = vld [vmem:[#allocation2 + $0x2d4] sm:$0xf0]  ;;  %v7977_v48 = vld [vmem:[#allocation2 + $0x3d0] sm:$0xf]  ;;  %v9672_v60 = vld [vmem:[#allocation2 + $0x244] sm:$0xf0] }
 0x472   :  { %2429 = vmatpush.bf16.msra.mxu3 %v7718_v16  ;;  %v7857_v16 = vld [vmem:[#allocation2 + $0x2e0] sm:$0xf]  ;;  %v9706_v37 = vld [vmem:[#allocation2 + $0x354] sm:$0xf0]  ;;  %v9688_v11 = vld [vmem:[#allocation2 + $0x2c4] sm:$0xf0]  ;;  %v7778_v15 = vor.u32 %v9672_v60, %v7777_v20 }
 0x473   :  { %2391 = vmatpush.bf16.msrb.mxu0 %v7518_v0  ;;  %v9724_v0 = vld [vmem:[#allocation2 + $0x3e4] sm:$0xf0]  ;;  %v7914_v50 = vor.u32 %v9706_v37, %v7913_v47  ;;  %v7905_v22 = vld [vmem:[#allocation2 + $0x340] sm:$0xf]  ;;  %v9670_v58 = vld [vmem:[#allocation2 + $0x234] sm:$0xf0] }
 0x474   :  { %2404 = vmatpush.bf16.msrb.mxu1 %v7582_v28  ;;  %v7794_v28 = vor.u32 %v9676_v3, %v7793_v14  ;;  %v7986_v33 = vor.u32 %v9724_v0, %v7985_v23  ;;  %v9704_v29 = vld [vmem:[#allocation2 + $0x344] sm:$0xf0]  ;;  %v7969_v10 = vld [vmem:[#allocation2 + $0x3c0] sm:$0xf]  ;;  %v7833_v8 = vld [vmem:[#allocation2 + $0x2b0] sm:$0xf] }
 0x475   :  { %2417 = vmatpush.bf16.msra.mxu2 %v7646_v54  ;;  %v7858_v54 = vor.u32 %v9692_v55, %v7857_v16  ;;  %v7897_v32 = vld [vmem:[#allocation2 + $0x330] sm:$0xf]  ;;  %v9702_v26 = vld [vmem:[#allocation2 + $0x334] sm:$0xf0]  ;;  %v7761_v35 = vld [vmem:[#allocation2 + $0x220] sm:$0xf] }
 0x476   :  { %2430 = vmatpush.bf16.msra.mxu3 %v7710_v25  ;;  %v7849_v25 = vld [vmem:[#allocation2 + $0x2d0] sm:$0xf]  ;;  %v9718_v63 = vld [vmem:[#allocation2 + $0x3b4] sm:$0xf0]  ;;  %v9668_v12 = vld [vmem:[#allocation2 + $0x224] sm:$0xf0] }
 0x477   :  { %2392 = vmatpush.bf16.msrb.mxu0 %v7510_v56  ;;  %v9722_v56 = vld [vmem:[#allocation2 + $0x3d4] sm:$0xf0]  ;;  %v7961_v24 = vld [vmem:[#allocation2 + $0x3b0] sm:$0xf]  ;;  %v7825_v45 = vld [vmem:[#allocation2 + $0x2a0] sm:$0xf] }
 0x478   :  { %2405 = vmatpush.bf16.msrb.mxu1 %v7574_v57  ;;  %v7786_v57 = vor.u32 %v9674_v18, %v7785_v9  ;;  %v7978_v59 = vor.u32 %v9722_v56, %v7977_v48  ;;  %v7889_v62 = vld [vmem:[#allocation2 + $0x320] sm:$0xf]  ;;  %v9700_v1 = vld [vmem:[#allocation2 + $0x324] sm:$0xf0]  ;;  %v7753_v3 = vld [vmem:[#allocation2 + $0x210] sm:$0xf] }
 0x479   :  { %2418 = vmatpush.bf16.msra.mxu2 %v7638_v49  ;;  %v7850_v49 = vor.u32 %v9690_v44, %v7849_v25  ;;  %v7890_v14 = vor.u32 %v9700_v1, %v7889_v62  ;;  %v9666_v16 = vld [vmem:[#allocation2 + $0x214] sm:$0xf0]  ;;  %v7881_v42 = vld [vmem:[#allocation2 + $0x310] sm:$0xf]  ;;  %v9664_v9 = vld [vmem:[#allocation2 + $0x204] sm:$0xf0] }
 0x47a   :  { %2431 = vmatpush.bf16.msra.mxu3 %v7702_v38  ;;  %v7841_v38 = vld [vmem:[#allocation2 + $0x2c0] sm:$0xf]  ;;  %v9682_v36 = vld [vmem:[#allocation2 + $0x294] sm:$0xf0]  ;;  %v7945_v0 = vld [vmem:[#allocation2 + $0x390] sm:$0xf] }
 0x47b   :  { %2393 = vmatpush.bf16.msrb.mxu0 %v7502_v61  ;;  %v9720_v61 = vld [vmem:[#allocation2 + $0x3c4] sm:$0xf0]  ;;  %v7842_v13 = vor.u32 %v9688_v11, %v7841_v38  ;;  %v9698_v23 = vld [vmem:[#allocation2 + $0x314] sm:$0xf0]  ;;  %v7873_v47 = vld [vmem:[#allocation2 + $0x300] sm:$0xf] }
 0x47c   :  { %2406 = vmatpush.bf16.msrb.mxu1 %v7566_v34  ;;  %v7906_v34 = vor.u32 %v9704_v29, %v7905_v22  ;;  %v7970_v6 = vor.u32 %v9720_v61, %v7969_v10  ;;  %v7882_v25 = vor.u32 %v9698_v23, %v7881_v42  ;;  %v9680_v44 = vld [vmem:[#allocation2 + $0x284] sm:$0xf0]  ;;  %v7937_v56 = vld [vmem:[#allocation2 + $0x380] sm:$0xf]  ;;  %v9693_v20 = vld [vmem:[#allocation2 + $0x2f4] sm:$0xf] }
 0x47d   :  { %2419 = vmatpush.bf16.msra.mxu2 %v7630_v31  ;;  %v7769_v31 = vld [vmem:[#allocation2 + $0x230] sm:$0xf]  ;;  %v9696_v48 = vld [vmem:[#allocation2 + $0x304] sm:$0xf0]  ;;  %v7867_v38 = vld [vmem:[#allocation2 + $0x2f8] sm:$0xf0] }
 0x47e   :  { %2432 = vmatpush.bf16.msra.mxu3 %v7694_v53  ;;  %v9686_v53 = vld [vmem:[#allocation2 + $0x2b4] sm:$0xf0]  ;;  %v7770_v4 = vor.u32 %v9670_v58, %v7769_v31  ;;  %v7931_v11 = vld [vmem:[#allocation2 + $0x378] sm:$0xf0]  ;;  %v7874_v29 = vor.u32 %v9696_v48, %v7873_v47  ;;  %v9725_v10 = vld [vmem:[#allocation2 + $0x3f4] sm:$0xf]  ;;  %v7870_v31 = vor.u32 %v9693_v20, %v7867_v38 }
 0x47f   :  { %2394 = vmatpush.bf16.msrb.mxu0 %v7494_v5  ;;  %v7834_v43 = vor.u32 %v9686_v53, %v7833_v8  ;;  %v7898_v5 = vor.u32 %v9702_v26, %v7897_v32  ;;  %v7995_v61 = vld [vmem:[#allocation2 + $0x3f8] sm:$0xf0]  ;;  %v7795_v8 = vld [vmem:[#allocation2 + $0x268] sm:$0xf0]  ;;  %v9707_v26 = vld [vmem:[#allocation2 + $0x364] sm:$0xf] }
 0x480   :  { %2407 = vmatpush.bf16.msrb.mxu1 %v7558_v41  ;;  %v7962_v41 = vor.u32 %v9718_v63, %v7961_v24  ;;  %v7859_v53 = vld [vmem:[#allocation2 + $0x2e8] sm:$0xf0]  ;;  %v7998_v32 = vor.u32 %v9725_v10, %v7995_v61  ;;  %v11370_v63 = vshrl.u32 %v11347_v17, 16  ;;  %v9673_v62 = vld [vmem:[#allocation2 + $0x254] sm:$0xf]  ;;  %vm2442_vm3 = vcmask 1040384  }
 0x481   :  { %2420 = vmatpush.bf16.msra.mxu2 %v7622_v7  ;;  %v9684_v7 = vld [vmem:[#allocation2 + $0x2a4] sm:$0xf0]  ;;  %v7923_v24 = vld [vmem:[#allocation2 + $0x368] sm:$0xf0]  ;;  %v7787_v1 = vld [vmem:[#allocation2 + $0x258] sm:$0xf0] }
 0x482   :  { %2433 = vmatpush.bf16.msra.mxu3 %v7686_v39  ;;  %2395 = vmatmul.bf16.vlgmr.msrb.gmra.mxu0 %v11355_v27  ;;  %v7953_v39 = vld [vmem:[#allocation2 + $0x3a0] sm:$0xf]  ;;  %v9671_v42 = vld [vmem:[#allocation2 + $0x244] sm:$0xf]  ;;  %v7779_v23 = vld [vmem:[#allocation2 + $0x248] sm:$0xf0] }
 0x483   :  { %2847 = vmatpush.bf16.msra.mxu0 %v7802_v51  ;;  %2408 = vmatmul.bf16.vlgmr.msrb.gmra.mxu1 %v11359_v21  ;;  %v9716_v51 = vld [vmem:[#allocation2 + $0x3a4] sm:$0xf0]  ;;  %v7771_v48 = vld [vmem:[#allocation2 + $0x238] sm:$0xf0]  ;;  %v7763_v10 = vld [vmem:[#allocation2 + $0x228] sm:$0xf0] }
 0x484   :  { %2860 = vmatpush.bf16.msra.mxu1 %v7866_v40  ;;  %2421 = vmatmul.bf16.vlgmr.msra.gmra.mxu2 %v11347_v17  ;;  %v7762_v40 = vor.u32 %v9668_v12, %v7761_v35  ;;  %v7954_v55 = vor.u32 %v9716_v51, %v7953_v39  ;;  %v11376_v35 = vshrl.u32 %v11355_v27, 16  ;;  %v9689_v39 = vld [vmem:[#allocation2 + $0x2d4] sm:$0xf]  ;;  %v7899_v20 = vld [vmem:[#allocation2 + $0x338] sm:$0xf0]  ;;  %s12163_s5 = sld [smem:[#allocation18_spill]] }
 0x485   :  { %2873 = vmatpush.bf16.msrb.mxu2 %v7930_v52  ;;  %2434 = vmatmul.bf16.vlgmr.msra.gmra.mxu3 %v11351_v46  ;;  %v7826_v52 = vor.u32 %v9684_v7, %v7825_v45  ;;  %v11379_v45 = vshrl.u32 %v11359_v21, 16  ;;  %v7926_v7 = vor.u32 %v9707_v26, %v7923_v24  ;;  %v7963_v38 = vld [vmem:[#allocation2 + $0x3b8] sm:$0xf0]  ;;  %v9683_v61 = vld [vmem:[#allocation2 + $0x2a4] sm:$0xf]  ;;  %s12164_s9 = sld [smem:[#allocation19_spill]] }
 0x486   :  { %2886 = vmatpush.bf16.msrb.mxu3 %v7994_v19  ;;  %v7817_v19 = vld [vmem:[#allocation2 + $0x290] sm:$0xf]  ;;  %v9665_v26 = vld [vmem:[#allocation2 + $0x214] sm:$0xf]  ;;  %v7755_v24 = vld [vmem:[#allocation2 + $0x218] sm:$0xf0] }
 0x487   :  { %2848 = vmatpush.bf16.msra.mxu0 %v7794_v28  ;;  %v9714_v28 = vld [vmem:[#allocation2 + $0x394] sm:$0xf0]  ;;  %v7818_v18 = vor.u32 %v9682_v36, %v7817_v19  ;;  %v7790_v19 = vor.u32 %v9673_v62, %v7787_v1  ;;  %v9713_v62 = vld [vmem:[#allocation2 + $0x394] sm:$0xf]  ;;  %v7947_v1 = vld [vmem:[#allocation2 + $0x398] sm:$0xf0] }
 0x488   :  { %2861 = vmatpush.bf16.msra.mxu1 %v7858_v54  ;;  %v7754_v54 = vor.u32 %v9666_v16, %v7753_v3  ;;  %v7946_v37 = vor.u32 %v9714_v28, %v7945_v0  ;;  %v9721_v3 = vld [vmem:[#allocation2 + $0x3d4] sm:$0xf]  ;;  %v7979_v16 = vld [vmem:[#allocation2 + $0x3d8] sm:$0xf0]  ;;  %v9687_v0 = vld [vmem:[#allocation2 + $0x2c4] sm:$0xf] }
 0x489   :  { %2874 = vmatpush.bf16.msrb.mxu2 %v7922_v30  ;;  %v7745_v30 = vld [vmem:[#allocation2 + $0x200] sm:$0xf]  ;;  %v7982_v28 = vor.u32 %v9721_v3, %v7979_v16  ;;  %v9679_v3 = vld [vmem:[#allocation2 + $0x284] sm:$0xf]  ;;  %v7811_v16 = vld [vmem:[#allocation2 + $0x288] sm:$0xf0] }
 0x48a   :  { %2887 = vmatpush.bf16.msrb.mxu3 %v7986_v33  ;;  %v7809_v33 = vld [vmem:[#allocation2 + $0x280] sm:$0xf]  ;;  %v7746_v60 = vor.u32 %v9664_v9, %v7745_v30  ;;  %v9703_v30 = vld [vmem:[#allocation2 + $0x344] sm:$0xf]  ;;  %v7907_v9 = vld [vmem:[#allocation2 + $0x348] sm:$0xf0] }
 0x48b   :  { %2849 = vmatpush.bf16.msra.mxu0 %v7786_v57  ;;  %v9712_v57 = vld [vmem:[#allocation2 + $0x384] sm:$0xf0]  ;;  %v7810_v22 = vor.u32 %v9680_v44, %v7809_v33  ;;  %v7782_v33 = vor.u32 %v9671_v42, %v7779_v23  ;;  %v7910_v47 = vor.u32 %v9703_v30, %v7907_v9  ;;  %v9711_v42 = vld [vmem:[#allocation2 + $0x384] sm:$0xf]  ;;  %v7939_v23 = vld [vmem:[#allocation2 + $0x388] sm:$0xf0] }
 0x48c   :  { %2862 = vmatpush.bf16.msra.mxu1 %v7850_v49  ;;  %v9677_v49 = vld [vmem:[#allocation2 + $0x274] sm:$0xf]  ;;  %v9758_v9 = vld [vmem:[#allocation2 + $0x4f4] sm:$0xf0]  ;;  %s12165_s13 = sld [smem:[#allocation21_spill]]  ;;  %vm4125_vm4 = vcmask 516096  }
 0x48d   :  { %2875 = vmatpush.bf16.msrb.mxu2 %v7914_v50  ;;  %v7803_v50 = vld [vmem:[#allocation2 + $0x278] sm:$0xf0]  ;;  %s12166_s17 = sld [smem:[#allocation23_spill]] }
 0x48e   :  { %2888 = vmatpush.bf16.msrb.mxu3 %v7978_v59  ;;  %v9709_v59 = vld [vmem:[#allocation2 + $0x374] sm:$0xf]  ;;  %s12167_s21 = sld [smem:[#allocation20_spill]] }
 0x48f   :  { %2850 = vmatpush.bf16.msra.mxu0 %v7778_v15  ;;  %v7938_v15 = vor.u32 %v9712_v57, %v7937_v56  ;;  %v7934_v58 = vor.u32 %v9709_v59, %v7931_v11  ;;  %v9685_v56 = vld [vmem:[#allocation2 + $0x2b4] sm:$0xf]  ;;  %s12168_s25 = sld [smem:[#allocation22_spill]] }
 0x490   :  { %2863 = vmatpush.bf16.msra.mxu1 %v7842_v13  ;;  %v7806_v13 = vor.u32 %v9677_v49, %v7803_v50  ;;  %v7835_v49 = vld [vmem:[#allocation2 + $0x2b8] sm:$0xf0]  ;;  %v9701_v50 = vld [vmem:[#allocation2 + $0x334] sm:$0xf]  ;;  %s12169_s29 = sld [smem:[#allocation17_spill]] }
 0x491   :  { %2876 = vmatpush.bf16.msrb.mxu2 %v7906_v34  ;;  %v9675_v34 = vld [vmem:[#allocation2 + $0x264] sm:$0xf]  ;;  %v7838_v11 = vor.u32 %v9685_v56, %v7835_v49  ;;  %s12170_s3 = sld [smem:[#allocation24_spill]] }
 0x492   :  { %2889 = vmatpush.bf16.msrb.mxu3 %v7970_v6  ;;  %v9691_v6 = vld [vmem:[#allocation2 + $0x2e4] sm:$0xf]  ;;  %v7798_v12 = vor.u32 %v9675_v34, %v7795_v8  ;;  %v7955_v8 = vld [vmem:[#allocation2 + $0x3a8] sm:$0xf0] }
 0x493   :  { %2851 = vmatpush.bf16.msra.mxu0 %v7770_v4  ;;  %v9723_v4 = vld [vmem:[#allocation2 + $0x3e4] sm:$0xf] }
 0x494   :  { %2864 = vmatpush.bf16.msra.mxu1 %v7834_v43  ;;  %v7987_v43 = vld [vmem:[#allocation2 + $0x3e8] sm:$0xf0]  ;;  %v9699_v34 = vld [vmem:[#allocation2 + $0x324] sm:$0xf] }
 0x495   :  { %2877 = vmatpush.bf16.msrb.mxu2 %v7898_v5  ;;  %v11373_v5 = vshrl.u32 %v11351_v46, 16  ;;  %v7990_v51 = vor.u32 %v9723_v4, %v7987_v43  ;;  %v9681_v4 = vld [vmem:[#allocation2 + $0x294] sm:$0xf] }
 0x496   :  { %2890 = vmatpush.bf16.msrb.mxu3 %v7962_v41  ;;  %v7862_v41 = vor.u32 %v9691_v6, %v7859_v53 }
 0x497   :  { %2852 = vmatpush.bf16.msra.mxu0 %v7762_v40  ;;  %v7851_v40 = vld [vmem:[#allocation2 + $0x2d8] sm:$0xf0] }
 0x498   :  { %2865 = vmatpush.bf16.msra.mxu1 %v7826_v52  ;;  %v9705_v52 = vld [vmem:[#allocation2 + $0x354] sm:$0xf] }
 0x499   :  { %2878 = vmatpush.bf16.msrb.mxu2 %v7890_v14  ;;  %v7915_v14 = vld [vmem:[#allocation2 + $0x358] sm:$0xf0] }
 0x49a   :  { %2891 = vmatpush.bf16.msrb.mxu3 %v7954_v55  ;;  %v7854_v55 = vor.u32 %v9689_v39, %v7851_v40  ;;  %v7918_v36 = vor.u32 %v9705_v52, %v7915_v14  ;;  %v7758_v39 = vor.u32 %v9665_v26, %v7755_v24  ;;  %v7747_v40 = vld [vmem:[#allocation2 + $0x208] sm:$0xf0]  ;;  %v8233_v26 = vld [vmem:[#allocation2 + $0x5d0] sm:$0xf]  ;;  %v9786_v24 = vld [vmem:[#allocation2 + $0x5d4] sm:$0xf0] }
 0x49b   :  { %2853 = vmatpush.bf16.msra.mxu0 %v7754_v54  ;;  %v7843_v54 = vld [vmem:[#allocation2 + $0x2c8] sm:$0xf0] }
 0x49c   :  { %2866 = vmatpush.bf16.msra.mxu1 %v7818_v18  ;;  %v9719_v18 = vld [vmem:[#allocation2 + $0x3c4] sm:$0xf]  ;;  %v7846_v44 = vor.u32 %v9687_v0, %v7843_v54  ;;  %v8057_v0 = vld [vmem:[#allocation2 + $0x470] sm:$0xf] }
 0x49d   :  { %2879 = vmatpush.bf16.msrb.mxu2 %v7882_v25  ;;  %v7971_v25 = vld [vmem:[#allocation2 + $0x3c8] sm:$0xf0]  ;;  %v8121_v54 = vld [vmem:[#allocation2 + $0x4f0] sm:$0xf] }
 0x49e   :  { %2892 = vmatpush.bf16.msrb.mxu3 %v7946_v37  ;;  %v9669_v37 = vld [vmem:[#allocation2 + $0x234] sm:$0xf]  ;;  %v7974_v57 = vor.u32 %v9719_v18, %v7971_v25  ;;  %v8185_v18 = vld [vmem:[#allocation2 + $0x570] sm:$0xf]  ;;  %v9774_v25 = vld [vmem:[#allocation2 + $0x574] sm:$0xf0] }
 0x49f   :  { %2854 = vmatpush.bf16.msra.mxu0 %v7746_v60  ;;  %v9717_v60 = vld [vmem:[#allocation2 + $0x3b4] sm:$0xf]  ;;  %v7774_v59 = vor.u32 %v9669_v37, %v7771_v48  ;;  %v9790_v37 = vld [vmem:[#allocation2 + $0x5f4] sm:$0xf0]  ;;  %v7942_v48 = vor.u32 %v9711_v42, %v7939_v23  ;;  %v8186_v49 = vor.u32 %v9774_v25, %v8185_v18  ;;  %v8089_v42 = vld [vmem:[#allocation2 + $0x4b0] sm:$0xf] }
 0x4a0   :  { %2867 = vmatpush.bf16.msra.mxu1 %v7810_v22  ;;  %v7902_v22 = vor.u32 %v9701_v50, %v7899_v20  ;;  %v8049_v50 = vld [vmem:[#allocation2 + $0x460] sm:$0xf]  ;;  %v9740_v20 = vld [vmem:[#allocation2 + $0x464] sm:$0xf0] }
 0x4a1   :  { %2880 = vmatpush.bf16.msrb.mxu2 %v7874_v29  ;;  %v9667_v29 = vld [vmem:[#allocation2 + $0x224] sm:$0xf] }
 0x4a2   :  { %2893 = vmatpush.bf16.msrb.mxu3 %v7938_v15  ;;  %2855 = vmatmul.bf16.vlgmr.msra.gmra.mxu0 %v11376_v35  ;;  %v7966_v15 = vor.u32 %v9717_v60, %v7963_v38  ;;  %v7766_v6 = vor.u32 %v9667_v29, %v7763_v10  ;;  %v8113_v60 = vld [vmem:[#allocation2 + $0x4e0] sm:$0xf]  ;;  %v9788_v10 = vld [vmem:[#allocation2 + $0x5e4] sm:$0xf0] }
 0x4a3   :  { %2899 = vmatpush.bf16.msrb.mxu0 %v7806_v13  ;;  %2868 = vmatmul.bf16.vlgmr.msra.gmra.mxu1 %v11379_v45  ;;  %v7827_v13 = vld [vmem:[#allocation2 + $0x2a8] sm:$0xf0]  ;;  %v8241_v29 = vld [vmem:[#allocation2 + $0x5e0] sm:$0xf] }
 0x4a4   :  { %2912 = vmatpush.bf16.msrb.mxu1 %v7870_v31  ;;  %2881 = vmatmul.bf16.vlgmr.msrb.gmra.mxu2 %v11370_v63  ;;  %v7891_v31 = vld [vmem:[#allocation2 + $0x328] sm:$0xf0]  ;;  %v7830_v53 = vor.u32 %v9683_v61, %v7827_v13  ;;  %v8050_v61 = vor.u32 %v9740_v20, %v8049_v50  ;;  %v8209_v50 = vld [vmem:[#allocation2 + $0x5a0] sm:$0xf]  ;;  %v9780_v20 = vld [vmem:[#allocation2 + $0x5a4] sm:$0xf0] }
 0x4a5   :  { %2925 = vmatpush.bf16.msra.mxu2 %v7934_v58  ;;  %2894 = vmatmul.bf16.vlgmr.msrb.gmra.mxu3 %v11373_v5  ;;  %v9715_v58 = vld [vmem:[#allocation2 + $0x3a4] sm:$0xf] }
 0x4a6   :  { %2938 = vmatpush.bf16.msra.mxu3 %v7998_v32  ;;  %v7894_v32 = vor.u32 %v9699_v34, %v7891_v31  ;;  %v7958_v43 = vor.u32 %v9715_v58, %v7955_v8  ;;  %v8041_v34 = vld [vmem:[#allocation2 + $0x450] sm:$0xf]  ;;  %v9738_v31 = vld [vmem:[#allocation2 + $0x454] sm:$0xf0]  ;;  %v8242_v8 = vor.u32 %v9788_v10, %v8241_v29  ;;  %v8210_v10 = vor.u32 %v9780_v20, %v8209_v50 }
 0x4a7   :  { %2900 = vmatpush.bf16.msrb.mxu0 %v7798_v12  ;;  %v7819_v12 = vld [vmem:[#allocation2 + $0x298] sm:$0xf0]  ;;  %v8105_v58 = vld [vmem:[#allocation2 + $0x4d0] sm:$0xf] }
 0x4a8   :  { %2913 = vmatpush.bf16.msrb.mxu1 %v7862_v41  ;;  %v9697_v41 = vld [vmem:[#allocation2 + $0x314] sm:$0xf]  ;;  %v7822_v52 = vor.u32 %v9681_v4, %v7819_v12  ;;  %v8042_v4 = vor.u32 %v9738_v31, %v8041_v34  ;;  %v8073_v29 = vld [vmem:[#allocation2 + $0x490] sm:$0xf]  ;;  %v9778_v31 = vld [vmem:[#allocation2 + $0x594] sm:$0xf0] }
 0x4a9   :  { %2926 = vmatpush.bf16.msra.mxu2 %v7926_v7  ;;  %v7883_v7 = vld [vmem:[#allocation2 + $0x318] sm:$0xf0]  ;;  %v8201_v34 = vld [vmem:[#allocation2 + $0x590] sm:$0xf] }
 0x4aa   :  { %2939 = vmatpush.bf16.msra.mxu3 %v7990_v51  ;;  %v9663_v51 = vld [vmem:[#allocation2 + $0x204] sm:$0xf]  ;;  %v7886_v14 = vor.u32 %v9697_v41, %v7883_v7  ;;  %v8033_v41 = vld [vmem:[#allocation2 + $0x440] sm:$0xf]  ;;  %v9736_v7 = vld [vmem:[#allocation2 + $0x444] sm:$0xf0] }
 0x4ab   :  { %2901 = vmatpush.bf16.msrb.mxu0 %v7790_v19  ;;  %v9695_v19 = vld [vmem:[#allocation2 + $0x304] sm:$0xf]  ;;  %v7750_v30 = vor.u32 %v9663_v51, %v7747_v40  ;;  %v8161_v51 = vld [vmem:[#allocation2 + $0x540] sm:$0xf]  ;;  %v9768_v40 = vld [vmem:[#allocation2 + $0x544] sm:$0xf0] }
 0x4ac   :  { %2914 = vmatpush.bf16.msrb.mxu1 %v7854_v55  ;;  %v7950_v55 = vor.u32 %v9713_v62, %v7947_v1  ;;  %v8097_v62 = vld [vmem:[#allocation2 + $0x4c0] sm:$0xf]  ;;  %v8234_v1 = vor.u32 %v9786_v24, %v8233_v26  ;;  %v9744_v24 = vld [vmem:[#allocation2 + $0x484] sm:$0xf0] }
 0x4ad   :  { %2927 = vmatpush.bf16.msra.mxu2 %v7918_v36  ;;  %v7875_v36 = vld [vmem:[#allocation2 + $0x308] sm:$0xf0]  ;;  %v8065_v26 = vld [vmem:[#allocation2 + $0x480] sm:$0xf] }
 0x4ae   :  { %2940 = vmatpush.bf16.msra.mxu3 %v7982_v28  ;;  %v9742_v28 = vld [vmem:[#allocation2 + $0x474] sm:$0xf0] }
 0x4af   :  { %2902 = vmatpush.bf16.msrb.mxu0 %v7782_v33  ;;  %v7814_v33 = vor.u32 %v9679_v3, %v7811_v16  ;;  %v8058_v56 = vor.u32 %v9742_v28, %v8057_v0  ;;  %v8034_v3 = vor.u32 %v9736_v7, %v8033_v41  ;;  %v9750_v0 = vld [vmem:[#allocation2 + $0x4b4] sm:$0xf0]  ;;  %v8153_v28 = vld [vmem:[#allocation2 + $0x530] sm:$0xf]  ;;  %v8193_v41 = vld [vmem:[#allocation2 + $0x580] sm:$0xf] }
 0x4b0   :  { %2915 = vmatpush.bf16.msrb.mxu1 %v7846_v44  ;;  %v7878_v44 = vor.u32 %v9695_v19, %v7875_v36  ;;  %v8162_v19 = vor.u32 %v9768_v40, %v8161_v51  ;;  %v9734_v36 = vld [vmem:[#allocation2 + $0x434] sm:$0xf0]  ;;  %v8090_v25 = vor.u32 %v9750_v0, %v8089_v42  ;;  %v9776_v7 = vld [vmem:[#allocation2 + $0x584] sm:$0xf0]  ;;  %v8123_v40 = vld [vmem:[#allocation2 + $0x4f8] sm:$0xf0] }
 0x4b1   :  { %2928 = vmatpush.bf16.msra.mxu2 %v7910_v47  ;;  %v8249_v47 = vld [vmem:[#allocation2 + $0x5f0] sm:$0xf] }
 0x4b2   :  { %2941 = vmatpush.bf16.msra.mxu3 %v7974_v57  ;;  %v8122_v57 = vor.u32 %v9758_v9, %v8121_v54  ;;  %v8250_v38 = vor.u32 %v9790_v37, %v8249_v47  ;;  %v9766_v54 = vld [vmem:[#allocation2 + $0x534] sm:$0xf0]  ;;  %v9732_v47 = vld [vmem:[#allocation2 + $0x424] sm:$0xf0]  ;;  %v8081_v37 = vld [vmem:[#allocation2 + $0x4a0] sm:$0xf] }
 0x4b3   :  { %2903 = vmatpush.bf16.msrb.mxu0 %v7774_v59  ;;  %v9756_v59 = vld [vmem:[#allocation2 + $0x4e4] sm:$0xf0]  ;;  %v9782_v9 = vld [vmem:[#allocation2 + $0x5b4] sm:$0xf0] }
 0x4b4   :  { %2916 = vmatpush.bf16.msrb.mxu1 %v7838_v11  ;;  %v8177_v11 = vld [vmem:[#allocation2 + $0x560] sm:$0xf] }
 0x4b5   :  { %2929 = vmatpush.bf16.msra.mxu2 %v7902_v22  ;;  %v9772_v22 = vld [vmem:[#allocation2 + $0x564] sm:$0xf0] }
 0x4b6   :  { %2942 = vmatpush.bf16.msra.mxu3 %v7966_v15  ;;  %v8114_v15 = vor.u32 %v9756_v59, %v8113_v60  ;;  %v8178_v13 = vor.u32 %v9772_v22, %v8177_v11  ;;  %v8009_v11 = vld [vmem:[#allocation2 + $0x410] sm:$0xf]  ;;  %v9730_v22 = vld [vmem:[#allocation2 + $0x414] sm:$0xf0] }
 0x4b7   :  { %2904 = vmatpush.bf16.msrb.mxu0 %v7766_v6  ;;  %v9754_v6 = vld [vmem:[#allocation2 + $0x4d4] sm:$0xf0] }
 0x4b8   :  { %2917 = vmatpush.bf16.msrb.mxu1 %v7830_v53  ;;  %v8169_v53 = vld [vmem:[#allocation2 + $0x550] sm:$0xf] }
 0x4b9   :  { %2930 = vmatpush.bf16.msra.mxu2 %v7894_v32  ;;  %v9770_v32 = vld [vmem:[#allocation2 + $0x554] sm:$0xf0] }
 0x4ba   :  { %2943 = vmatpush.bf16.msra.mxu3 %v7958_v43  ;;  %v8106_v43 = vor.u32 %v9754_v6, %v8105_v58  ;;  %v8170_v12 = vor.u32 %v9770_v32, %v8169_v53  ;;  %v8010_v58 = vor.u32 %v9730_v22, %v8009_v11  ;;  %v9728_v6 = vld [vmem:[#allocation2 + $0x404] sm:$0xf0]  ;;  %v8107_v22 = vld [vmem:[#allocation2 + $0x4d8] sm:$0xf0] }
 0x4bb   :  { %2905 = vmatpush.bf16.msrb.mxu0 %v7758_v39  ;;  %v9752_v39 = vld [vmem:[#allocation2 + $0x4c4] sm:$0xf0] }
 0x4bc   :  { %2918 = vmatpush.bf16.msrb.mxu1 %v7822_v52  ;;  %v8225_v52 = vld [vmem:[#allocation2 + $0x5c0] sm:$0xf]  ;;  %v8098_v16 = vor.u32 %v9752_v39, %v8097_v62  ;;  %v9741_v62 = vld [vmem:[#allocation2 + $0x474] sm:$0xf] }
 0x4bd   :  { %2931 = vmatpush.bf16.msra.mxu2 %v7886_v14  ;;  %v9784_v14 = vld [vmem:[#allocation2 + $0x5c4] sm:$0xf0]  ;;  %v9757_v39 = vld [vmem:[#allocation2 + $0x4f4] sm:$0xf] }
 0x4be   :  { %2944 = vmatpush.bf16.msra.mxu3 %v7950_v55  ;;  %v8025_v55 = vld [vmem:[#allocation2 + $0x430] sm:$0xf]  ;;  %v8226_v23 = vor.u32 %v9784_v14, %v8225_v52  ;;  %v9773_v52 = vld [vmem:[#allocation2 + $0x574] sm:$0xf]  ;;  %v8187_v14 = vld [vmem:[#allocation2 + $0x578] sm:$0xf0]  ;;  %v8126_v0 = vor.u32 %v9757_v39, %v8123_v40 }
 0x4bf   :  { %2906 = vmatpush.bf16.msrb.mxu0 %v7750_v30  ;;  %v8217_v30 = vld [vmem:[#allocation2 + $0x5b0] sm:$0xf]  ;;  %v8026_v18 = vor.u32 %v9734_v36, %v8025_v55  ;;  %v8251_v55 = vld [vmem:[#allocation2 + $0x5f8] sm:$0xf0]  ;;  %v8194_v36 = vor.u32 %v9776_v7, %v8193_v41 }
 0x4c0   :  { %2919 = vmatpush.bf16.msrb.mxu1 %v7814_v33  ;;  %v8154_v33 = vor.u32 %v9766_v54, %v8153_v28  ;;  %v8190_v28 = vor.u32 %v9773_v52, %v8187_v14  ;;  %v8051_v54 = vld [vmem:[#allocation2 + $0x468] sm:$0xf0]  ;;  %v8027_v39 = vld [vmem:[#allocation2 + $0x438] sm:$0xf0] }
 0x4c1   :  { %2932 = vmatpush.bf16.msra.mxu2 %v7878_v44  ;;  %v8017_v44 = vld [vmem:[#allocation2 + $0x420] sm:$0xf]  ;;  %v8091_v14 = vld [vmem:[#allocation2 + $0x4b8] sm:$0xf0] }
 0x4c2   :  { %2945 = vmatpush.bf16.msra.mxu3 %v7942_v48  ;;  %2907 = vmatmul.bf16.vlgmr.msrb.gmra.mxu0 %v11376_v35  ;;  %v8218_v48 = vor.u32 %v9782_v9, %v8217_v30  ;;  %v8018_v60 = vor.u32 %v9732_v47, %v8017_v44  ;;  %v9755_v30 = vld [vmem:[#allocation2 + $0x4e4] sm:$0xf]  ;;  %v8115_v9 = vld [vmem:[#allocation2 + $0x4e8] sm:$0xf0]  ;;  %v3028_v44 = vrot.slane %v11347_v17, 1 }
 0x4c3   :  { %3354 = vmatpush.bf16.msra.mxu0 %v8058_v56  ;;  %2920 = vmatmul.bf16.vlgmr.msrb.gmra.mxu1 %v11379_v45  ;;  %v9748_v56 = vld [vmem:[#allocation2 + $0x4a4] sm:$0xf0]  ;;  %v9787_v47 = vld [vmem:[#allocation2 + $0x5e4] sm:$0xf]  ;;  %v8118_v50 = vor.u32 %v9755_v30, %v8115_v9 }
 0x4c4   :  { %3367 = vmatpush.bf16.msra.mxu1 %v8122_v57  ;;  %2933 = vmatmul.bf16.vlgmr.msra.gmra.mxu2 %v11370_v63  ;;  %v8145_v57 = vld [vmem:[#allocation2 + $0x520] sm:$0xf]  ;;  %v9747_v30 = vld [vmem:[#allocation2 + $0x4a4] sm:$0xf] }
 0x4c5   :  { %3380 = vmatpush.bf16.msrb.mxu2 %v8186_v49  ;;  %2946 = vmatmul.bf16.vlgmr.msra.gmra.mxu3 %v11373_v5  ;;  %v9764_v49 = vld [vmem:[#allocation2 + $0x524] sm:$0xf0] }
 0x4c6   :  { %3393 = vmatpush.bf16.msrb.mxu3 %v8250_v38  ;;  %v8082_v38 = vor.u32 %v9748_v56, %v8081_v37  ;;  %v8146_v59 = vor.u32 %v9764_v49, %v8145_v57  ;;  %v8243_v37 = vld [vmem:[#allocation2 + $0x5e8] sm:$0xf0]  ;;  %v3026_v56 = vrot.slane %v11355_v27, 1  ;;  %v3027_v49 = vrot.slane %v11359_v21, 1  ;;  %v9832_v27 = vld [vmem:[#allocation2 + $0x744] sm:$0xf0] }
 0x4c7   :  { %3355 = vmatpush.bf16.msra.mxu0 %v8050_v61  ;;  %v9746_v61 = vld [vmem:[#allocation2 + $0x494] sm:$0xf0]  ;;  %v8246_v11 = vor.u32 %v9787_v47, %v8243_v37  ;;  %v8147_v47 = vld [vmem:[#allocation2 + $0x528] sm:$0xf0] }
 0x4c8   :  { %3368 = vmatpush.bf16.msra.mxu1 %v8114_v15  ;;  %v8137_v15 = vld [vmem:[#allocation2 + $0x510] sm:$0xf]  ;;  %v8074_v53 = vor.u32 %v9746_v61, %v8073_v29  ;;  %v9769_v29 = vld [vmem:[#allocation2 + $0x554] sm:$0xf] }
 0x4c9   :  { %3381 = vmatpush.bf16.msrb.mxu2 %v8178_v13  ;;  %v9762_v13 = vld [vmem:[#allocation2 + $0x514] sm:$0xf0]  ;;  %v9785_v61 = vld [vmem:[#allocation2 + $0x5d4] sm:$0xf] }
 0x4ca   :  { %3394 = vmatpush.bf16.msrb.mxu3 %v8242_v8  ;;  %v8001_v8 = vld [vmem:[#allocation2 + $0x400] sm:$0xf]  ;;  %v8138_v32 = vor.u32 %v9762_v13, %v8137_v15  ;;  %v8235_v15 = vld [vmem:[#allocation2 + $0x5d8] sm:$0xf0] }
 0x4cb   :  { %3356 = vmatpush.bf16.msra.mxu0 %v8042_v4  ;;  %v8129_v4 = vld [vmem:[#allocation2 + $0x500] sm:$0xf]  ;;  %v8002_v51 = vor.u32 %v9728_v6, %v8001_v8  ;;  %v8035_v8 = vld [vmem:[#allocation2 + $0x448] sm:$0xf0]  ;;  %v9751_v6 = vld [vmem:[#allocation2 + $0x4c4] sm:$0xf] }
 0x4cc   :  { %3369 = vmatpush.bf16.msra.mxu1 %v8106_v43  ;;  %v8202_v43 = vor.u32 %v9778_v31, %v8201_v34 }
 0x4cd   :  { %3382 = vmatpush.bf16.msrb.mxu2 %v8170_v12  ;;  %v9760_v12 = vld [vmem:[#allocation2 + $0x504] sm:$0xf0] }
 0x4ce   :  { %3395 = vmatpush.bf16.msrb.mxu3 %v8234_v1  ;;  %v8059_v1 = vld [vmem:[#allocation2 + $0x478] sm:$0xf0] }
 0x4cf   :  { %3357 = vmatpush.bf16.msra.mxu0 %v8034_v3  ;;  %v8066_v3 = vor.u32 %v9744_v24, %v8065_v26  ;;  %v8062_v42 = vor.u32 %v9741_v62, %v8059_v1  ;;  %v9767_v26 = vld [vmem:[#allocation2 + $0x544] sm:$0xf]  ;;  %v8163_v24 = vld [vmem:[#allocation2 + $0x548] sm:$0xf0]  ;;  %v9733_v1 = vld [vmem:[#allocation2 + $0x434] sm:$0xf] }
 0x4d0   :  { %3370 = vmatpush.bf16.msra.mxu1 %v8098_v16  ;;  %v8130_v16 = vor.u32 %v9760_v12, %v8129_v4  ;;  %v9783_v4 = vld [vmem:[#allocation2 + $0x5c4] sm:$0xf]  ;;  %v8166_v62 = vor.u32 %v9767_v26, %v8163_v24  ;;  %v8003_v26 = vld [vmem:[#allocation2 + $0x408] sm:$0xf0] }
 0x4d1   :  { %3383 = vmatpush.bf16.msrb.mxu2 %v8162_v19  ;;  %v9789_v19 = vld [vmem:[#allocation2 + $0x5f4] sm:$0xf] }
 0x4d2   :  { %3396 = vmatpush.bf16.msrb.mxu3 %v8226_v23  ;;  %v9739_v23 = vld [vmem:[#allocation2 + $0x464] sm:$0xf] }
 0x4d3   :  { %3358 = vmatpush.bf16.msra.mxu0 %v8026_v18  ;;  %v8254_v18 = vor.u32 %v9789_v19, %v8251_v55  ;;  %v8054_v57 = vor.u32 %v9739_v23, %v8051_v54  ;;  %v9781_v55 = vld [vmem:[#allocation2 + $0x5b4] sm:$0xf]  ;;  %v8019_v54 = vld [vmem:[#allocation2 + $0x428] sm:$0xf0] }
 0x4d4   :  { %3371 = vmatpush.bf16.msra.mxu1 %v8090_v25  ;;  %v9771_v25 = vld [vmem:[#allocation2 + $0x564] sm:$0xf] }
 0x4d5   :  { %3384 = vmatpush.bf16.msrb.mxu2 %v8154_v33  ;;  %v8179_v33 = vld [vmem:[#allocation2 + $0x568] sm:$0xf0] }
 0x4d6   :  { %3397 = vmatpush.bf16.msrb.mxu3 %v8218_v48  ;;  %v3029_v48 = vrot.slane %v11351_v46, 1  ;;  %v8182_v20 = vor.u32 %v9771_v25, %v8179_v33  ;;  %v8083_v25 = vld [vmem:[#allocation2 + $0x4a8] sm:$0xf0]  ;;  %v9763_v33 = vld [vmem:[#allocation2 + $0x524] sm:$0xf] }
 0x4d7   :  { %3359 = vmatpush.bf16.msra.mxu0 %v8018_v60  ;;  %v9737_v60 = vld [vmem:[#allocation2 + $0x454] sm:$0xf] }
 0x4d8   :  { %3372 = vmatpush.bf16.msra.mxu1 %v8082_v38  ;;  %v8043_v38 = vld [vmem:[#allocation2 + $0x458] sm:$0xf0] }
 0x4d9   :  { %3385 = vmatpush.bf16.msrb.mxu2 %v8146_v59  ;;  %v9753_v59 = vld [vmem:[#allocation2 + $0x4d4] sm:$0xf]  ;;  %v8046_v13 = vor.u32 %v9737_v60, %v8043_v38 }
 0x4da   :  { %3398 = vmatpush.bf16.msrb.mxu3 %v8210_v10  ;;  %v8171_v10 = vld [vmem:[#allocation2 + $0x558] sm:$0xf0]  ;;  %v8110_v34 = vor.u32 %v9753_v59, %v8107_v22  ;;  %v8150_v22 = vor.u32 %v9763_v33, %v8147_v47  ;;  %v9804_v33 = vld [vmem:[#allocation2 + $0x664] sm:$0xf0]  ;;  %v8369_v47 = vld [vmem:[#allocation2 + $0x6e0] sm:$0xf] }
 0x4db   :  { %3360 = vmatpush.bf16.msra.mxu0 %v8010_v58  ;;  %v8174_v31 = vor.u32 %v9769_v29, %v8171_v10  ;;  %v9735_v58 = vld [vmem:[#allocation2 + $0x444] sm:$0xf]  ;;  %v9729_v29 = vld [vmem:[#allocation2 + $0x414] sm:$0xf]  ;;  %v8011_v10 = vld [vmem:[#allocation2 + $0x418] sm:$0xf0] }
 0x4dc   :  { %3373 = vmatpush.bf16.msra.mxu1 %v8074_v53  ;;  %v8238_v53 = vor.u32 %v9785_v61, %v8235_v15  ;;  %v8038_v12 = vor.u32 %v9735_v58, %v8035_v8  ;;  %v9745_v61 = vld [vmem:[#allocation2 + $0x494] sm:$0xf]  ;;  %v8139_v58 = vld [vmem:[#allocation2 + $0x518] sm:$0xf0] }
 0x4dd   :  { %3386 = vmatpush.bf16.msrb.mxu2 %v8138_v32  ;;  %v8099_v32 = vld [vmem:[#allocation2 + $0x4c8] sm:$0xf0]  ;;  %v9777_v8 = vld [vmem:[#allocation2 + $0x594] sm:$0xf] }
 0x4de   :  { %3399 = vmatpush.bf16.msrb.mxu3 %v8202_v43  ;;  %v8227_v43 = vld [vmem:[#allocation2 + $0x5c8] sm:$0xf0]  ;;  %v8102_v7 = vor.u32 %v9751_v6, %v8099_v32  ;;  %v8203_v6 = vld [vmem:[#allocation2 + $0x598] sm:$0xf0]  ;;  %v9727_v32 = vld [vmem:[#allocation2 + $0x404] sm:$0xf] }
 0x4df   :  { %3361 = vmatpush.bf16.msra.mxu0 %v8002_v51  ;;  %v2344_v41 = vpop.f32.mrf.mxu0  ;;  %v9749_v51 = vld [vmem:[#allocation2 + $0x4b4] sm:$0xf]  ;;  %v8230_v52 = vor.u32 %v9783_v4, %v8227_v43  ;;  %v9743_v43 = vld [vmem:[#allocation2 + $0x484] sm:$0xf] }
 0x4e0   :  { %3374 = vmatpush.bf16.msra.mxu1 %v8066_v3  ;;  %v2357_v40 = vpop.f32.mrf.mxu1  ;;  %v9765_v3 = vld [vmem:[#allocation2 + $0x534] sm:$0xf]  ;;  %v8094_v23 = vor.u32 %v9749_v51, %v8091_v14  ;;  %v8195_v51 = vld [vmem:[#allocation2 + $0x588] sm:$0xf0]  ;;  %v9806_v14 = vld [vmem:[#allocation2 + $0x674] sm:$0xf0] }
 0x4e1   :  { %3387 = vmatpush.bf16.msrb.mxu2 %v8130_v16  ;;  %v8155_v16 = vld [vmem:[#allocation2 + $0x538] sm:$0xf0]  ;;  %v2358_v19 = vadd.f32 %v2357_v40, %v2344_v41  ;;  %v9759_v41 = vld [vmem:[#allocation2 + $0x504] sm:$0xf] }
 0x4e2   :  { %3400 = vmatpush.bf16.msrb.mxu3 %v8194_v36  ;;  %3362 = vmatmul.bf16.vlgmr.msra.gmra.mxu0 %v3026_v56  ;;  %v8219_v36 = vld [vmem:[#allocation2 + $0x5b8] sm:$0xf0] }
 0x4e3   :  { %3406 = vmatpush.bf16.msrb.mxu0 %v8062_v42  ;;  %3375 = vmatmul.bf16.vlgmr.msra.gmra.mxu1 %v3027_v49  ;;  %v8030_v42 = vor.u32 %v9733_v1, %v8027_v39  ;;  %v8131_v1 = vld [vmem:[#allocation2 + $0x508] sm:$0xf0]  ;;  %v9775_v39 = vld [vmem:[#allocation2 + $0x584] sm:$0xf] }
 0x4e4   :  { %3419 = vmatpush.bf16.msrb.mxu1 %v8126_v0  ;;  %3388 = vmatmul.bf16.vlgmr.msrb.gmra.mxu2 %v3028_v44  ;;  %v8158_v0 = vor.u32 %v9765_v3, %v8155_v16  ;;  %v8377_v3 = vld [vmem:[#allocation2 + $0x6f0] sm:$0xf]  ;;  %v8006_v16 = vor.u32 %v9727_v32, %v8003_v26  ;;  %v8289_v32 = vld [vmem:[#allocation2 + $0x640] sm:$0xf]  ;;  %v9800_v26 = vld [vmem:[#allocation2 + $0x644] sm:$0xf0] }
 0x4e5   :  { %3432 = vmatpush.bf16.msra.mxu2 %v8190_v28  ;;  %3401 = vmatmul.bf16.vlgmr.msrb.gmra.mxu3 %v3029_v48  ;;  %v9731_v28 = vld [vmem:[#allocation2 + $0x424] sm:$0xf] }
 0x4e6   :  { %3445 = vmatpush.bf16.msra.mxu3 %v8254_v18  ;;  %v8222_v18 = vor.u32 %v9781_v55, %v8219_v36  ;;  %v8022_v60 = vor.u32 %v9731_v28, %v8019_v54  ;;  %v8441_v55 = vld [vmem:[#allocation2 + $0x770] sm:$0xf]  ;;  %v9838_v36 = vld [vmem:[#allocation2 + $0x774] sm:$0xf0]  ;;  %v8198_v54 = vor.u32 %v9775_v39, %v8195_v51 }
 0x4e7   :  { %3407 = vmatpush.bf16.msrb.mxu0 %v8054_v57  ;;  %v2370_v9 = vpop.f32.mrf.mxu2  ;;  %v2346_v59 = vpop.f32.mrf.mxu0  ;;  %v9854_v28 = vld [vmem:[#allocation2 + $0x7f4] sm:$0xf0]  ;;  %v8345_v39 = vld [vmem:[#allocation2 + $0x6b0] sm:$0xf] }
 0x4e8   :  { %3420 = vmatpush.bf16.msrb.mxu1 %v8118_v50  ;;  %v2371_v37 = vadd.f32 %v2370_v9, %v2358_v19  ;;  %v2383_v57 = vpop.f32.mrf.mxu3  ;;  %v9779_v50 = vld [vmem:[#allocation2 + $0x5a4] sm:$0xf]  ;;  %v2359_v15 = vpop.f32.mrf.mxu1  ;;  %v9822_v19 = vld [vmem:[#allocation2 + $0x6f4] sm:$0xf0]  ;;  %v9852_v59 = vld [vmem:[#allocation2 + $0x7e4] sm:$0xf0] }
 0x4e9   :  { %3433 = vmatpush.bf16.msra.mxu2 %v8182_v20  ;;  %v8211_v20 = vld [vmem:[#allocation2 + $0x5a8] sm:$0xf0]  ;;  %v8378_v9 = vor.u32 %v9822_v19, %v8377_v3  ;;  %v8361_v15 = vld [vmem:[#allocation2 + $0x6d0] sm:$0xf]  ;;  %v9830_v3 = vld [vmem:[#allocation2 + $0x734] sm:$0xf0] }
 0x4ea   :  { %3446 = vmatpush.bf16.msra.mxu3 %v8246_v11  ;;  %v11401_v38 = vadd.f32 %v2383_v57, %v2371_v37  ;;  %v8086_v11 = vor.u32 %v9747_v30, %v8083_v25  ;;  %v8305_v25 = vld [vmem:[#allocation2 + $0x660] sm:$0xf]  ;;  %v9820_v57 = vld [vmem:[#allocation2 + $0x6e4] sm:$0xf0]  ;;  %v9846_v19 = vld [vmem:[#allocation2 + $0x7b4] sm:$0xf0] }
 0x4eb   :  { %3408 = vmatpush.bf16.msrb.mxu0 %v8046_v13  ;;  %v8214_v13 = vor.u32 %v9779_v50, %v8211_v20  ;;  %v8433_v50 = vld [vmem:[#allocation2 + $0x760] sm:$0xf]  ;;  %v9836_v20 = vld [vmem:[#allocation2 + $0x764] sm:$0xf0] }
 0x4ec   :  { %3421 = vmatpush.bf16.msrb.mxu1 %v8110_v34  ;;  %v8075_v34 = vld [vmem:[#allocation2 + $0x498] sm:$0xf0] }
 0x4ed   :  { %3434 = vmatpush.bf16.msra.mxu2 %v8174_v31  ;;  %v9761_v31 = vld [vmem:[#allocation2 + $0x514] sm:$0xf]  ;;  %v8078_v24 = vor.u32 %v9745_v61, %v8075_v34  ;;  %v9802_v61 = vld [vmem:[#allocation2 + $0x654] sm:$0xf0] }
 0x4ee   :  { %3447 = vmatpush.bf16.msra.mxu3 %v8238_v53  ;;  %v8014_v53 = vor.u32 %v9729_v29, %v8011_v10  ;;  %v8142_v4 = vor.u32 %v9761_v31, %v8139_v58  ;;  %v8434_v29 = vor.u32 %v9836_v20, %v8433_v50  ;;  %v8297_v10 = vld [vmem:[#allocation2 + $0x650] sm:$0xf]  ;;  %v9818_v34 = vld [vmem:[#allocation2 + $0x6d4] sm:$0xf0] }
 0x4ef   :  { %3409 = vmatpush.bf16.msrb.mxu0 %v8038_v12  ;;  %v8067_v12 = vld [vmem:[#allocation2 + $0x488] sm:$0xf0]  ;;  %v8425_v31 = vld [vmem:[#allocation2 + $0x750] sm:$0xf]  ;;  %v9834_v58 = vld [vmem:[#allocation2 + $0x754] sm:$0xf0]  ;;  %v8362_v17 = vor.u32 %v9818_v34, %v8361_v15 }
 0x4f0   :  { %3422 = vmatpush.bf16.msrb.mxu1 %v8102_v7  ;;  %v2372_v7 = vpop.f32.mrf.mxu2  ;;  %v2385_v40 = vpop.f32.mrf.mxu3 }
 0x4f1   :  { %3435 = vmatpush.bf16.msra.mxu2 %v8166_v62  ;;  %v8206_v62 = vor.u32 %v9777_v8, %v8203_v6  ;;  %v8489_v8 = vld [vmem:[#allocation2 + $0x7d0] sm:$0xf]  ;;  %v9850_v6 = vld [vmem:[#allocation2 + $0x7d4] sm:$0xf0] }
 0x4f2   :  { %3448 = vmatpush.bf16.msra.mxu3 %v8230_v52  ;;  %v8313_v52 = vld [vmem:[#allocation2 + $0x670] sm:$0xf]  ;;  %v8490_v46 = vor.u32 %v9850_v6, %v8489_v8  ;;  %v9842_v6 = vld [vmem:[#allocation2 + $0x794] sm:$0xf0] }
 0x4f3   :  { %3410 = vmatpush.bf16.msrb.mxu0 %v8030_v42  ;;  %v8070_v42 = vor.u32 %v9743_v43, %v8067_v12  ;;  %v8314_v30 = vor.u32 %v9806_v14, %v8313_v52  ;;  %v9848_v43 = vld [vmem:[#allocation2 + $0x7c4] sm:$0xf0]  ;;  %v8290_v12 = vor.u32 %v9800_v26, %v8289_v32  ;;  %v9814_v52 = vld [vmem:[#allocation2 + $0x6b4] sm:$0xf0]  ;;  %v8409_v14 = vld [vmem:[#allocation2 + $0x730] sm:$0xf] }
 0x4f4   :  { %3423 = vmatpush.bf16.msrb.mxu1 %v8094_v23  ;;  %v8134_v23 = vor.u32 %v9759_v41, %v8131_v1  ;;  %v9798_v1 = vld [vmem:[#allocation2 + $0x634] sm:$0xf0]  ;;  %v8457_v8 = vld [vmem:[#allocation2 + $0x790] sm:$0xf]  ;;  %v9792_v32 = vld [vmem:[#allocation2 + $0x604] sm:$0xf0] }
 0x4f5   :  { %3436 = vmatpush.bf16.msra.mxu2 %v8158_v0  ;;  %v8505_v0 = vld [vmem:[#allocation2 + $0x7f0] sm:$0xf] }
 0x4f6   :  { %3449 = vmatpush.bf16.msra.mxu3 %v8222_v18  ;;  %v8442_v18 = vor.u32 %v9838_v36, %v8441_v55  ;;  %v8506_v37 = vor.u32 %v9854_v28, %v8505_v0  ;;  %v8346_v36 = vor.u32 %v9814_v52, %v8345_v39  ;;  %v8273_v0 = vld [vmem:[#allocation2 + $0x620] sm:$0xf]  ;;  %v9796_v28 = vld [vmem:[#allocation2 + $0x624] sm:$0xf0]  ;;  %v9837_v39 = vld [vmem:[#allocation2 + $0x774] sm:$0xf] }
 0x4f7   :  { %3411 = vmatpush.bf16.msrb.mxu0 %v8022_v60  ;;  %v8497_v60 = vld [vmem:[#allocation2 + $0x7e0] sm:$0xf]  ;;  %v8274_v20 = vor.u32 %v9796_v28, %v8273_v0  ;;  %v9819_v0 = vld [vmem:[#allocation2 + $0x6e4] sm:$0xf]  ;;  %v8371_v28 = vld [vmem:[#allocation2 + $0x6e8] sm:$0xf0] }
 0x4f8   :  { %3424 = vmatpush.bf16.msrb.mxu1 %v8086_v11  ;;  %v8306_v11 = vor.u32 %v9804_v33, %v8305_v25  ;;  %v9812_v25 = vld [vmem:[#allocation2 + $0x6a4] sm:$0xf0]  ;;  %v8401_v33 = vld [vmem:[#allocation2 + $0x720] sm:$0xf] }
 0x4f9   :  { %3437 = vmatpush.bf16.msra.mxu2 %v8150_v22  ;;  %v8370_v22 = vor.u32 %v9820_v57, %v8369_v47  ;;  %v9828_v47 = vld [vmem:[#allocation2 + $0x724] sm:$0xf0] }
 0x4fa   :  { %3450 = vmatpush.bf16.msra.mxu3 %v8214_v13  ;;  %v8498_v13 = vor.u32 %v9852_v59, %v8497_v60  ;;  %v9844_v57 = vld [vmem:[#allocation2 + $0x7a4] sm:$0xf0]  ;;  %v8265_v60 = vld [vmem:[#allocation2 + $0x610] sm:$0xf] }
 0x4fb   :  { %3412 = vmatpush.bf16.msrb.mxu0 %v8014_v53  ;;  %v8298_v53 = vor.u32 %v9802_v61, %v8297_v10  ;;  %v8329_v10 = vld [vmem:[#allocation2 + $0x690] sm:$0xf]  ;;  %v9810_v61 = vld [vmem:[#allocation2 + $0x694] sm:$0xf0] }
 0x4fc   :  { %3425 = vmatpush.bf16.msrb.mxu1 %v8078_v24  ;;  %v8353_v24 = vld [vmem:[#allocation2 + $0x6c0] sm:$0xf]  ;;  %v8330_v26 = vor.u32 %v9810_v61, %v8329_v10  ;;  %v8363_v10 = vld [vmem:[#allocation2 + $0x6d8] sm:$0xf0]  ;;  %v9833_v61 = vld [vmem:[#allocation2 + $0x754] sm:$0xf] }
 0x4fd   :  { %3438 = vmatpush.bf16.msra.mxu2 %v8142_v4  ;;  %v8417_v4 = vld [vmem:[#allocation2 + $0x740] sm:$0xf] }
 0x4fe   :  { %3451 = vmatpush.bf16.msra.mxu3 %v8206_v62  ;;  %v8281_v62 = vld [vmem:[#allocation2 + $0x630] sm:$0xf] }
 0x4ff   :  { %3413 = vmatpush.bf16.msrb.mxu0 %v8006_v16  ;;  %v2396_v41 = vpop.f32.mrf.mxu0  ;;  %v8473_v16 = vld [vmem:[#allocation2 + $0x7b0] sm:$0xf]  ;;  %v8282_v55 = vor.u32 %v9798_v1, %v8281_v62  ;;  %v8379_v1 = vld [vmem:[#allocation2 + $0x6f8] sm:$0xf0] }
 0x500   :  { %3426 = vmatpush.bf16.msrb.mxu1 %v8070_v42  ;;  %v2409_v7 = vpop.f32.mrf.mxu1  ;;  %v8410_v42 = vor.u32 %v9830_v3, %v8409_v14  ;;  %v9853_v14 = vld [vmem:[#allocation2 + $0x7f4] sm:$0xf]  ;;  %v8507_v3 = vld [vmem:[#allocation2 + $0x7f8] sm:$0xf0] }
 0x501   :  { %3439 = vmatpush.bf16.msra.mxu2 %v8134_v23  ;;  %v2410_v40 = vadd.f32 %v2409_v7, %v2396_v41  ;;  %v9840_v41 = vld [vmem:[#allocation2 + $0x784] sm:$0xf0]  ;;  %v9821_v7 = vld [vmem:[#allocation2 + $0x6f4] sm:$0xf] }
 0x502   :  { %3452 = vmatpush.bf16.msra.mxu3 %v8198_v54  ;;  %3414 = vmatmul.bf16.vlgmr.msrb.gmra.mxu0 %v3026_v56  ;;  %v8481_v56 = vld [vmem:[#allocation2 + $0x7c0] sm:$0xf] }
 0x503   :  { %3857 = vmatpush.bf16.msra.mxu0 %v8314_v30  ;;  %3427 = vmatmul.bf16.vlgmr.msrb.gmra.mxu1 %v3027_v49  ;;  %v8418_v49 = vor.u32 %v9832_v27, %v8417_v4  ;;  %v8482_v51 = vor.u32 %v9848_v43, %v8481_v56  ;;  %v8337_v54 = vld [vmem:[#allocation2 + $0x6a0] sm:$0xf]  ;;  %v8474_v30 = vor.u32 %v9846_v19, %v8473_v16  ;;  %v9824_v43 = vld [vmem:[#allocation2 + $0x704] sm:$0xf0] }
 0x504   :  { %3870 = vmatpush.bf16.msra.mxu1 %v8378_v9  ;;  %3440 = vmatmul.bf16.vlgmr.msra.gmra.mxu2 %v3028_v44  ;;  %v8426_v44 = vor.u32 %v9834_v58, %v8425_v31  ;;  %v8393_v31 = vld [vmem:[#allocation2 + $0x710] sm:$0xf]  ;;  %v9826_v58 = vld [vmem:[#allocation2 + $0x714] sm:$0xf0]  ;;  %v8385_v4 = vld [vmem:[#allocation2 + $0x700] sm:$0xf]  ;;  %v8458_v56 = vor.u32 %v9842_v6, %v8457_v8 }
 0x505   :  { %3883 = vmatpush.bf16.msrb.mxu2 %v8442_v18  ;;  %3453 = vmatmul.bf16.vlgmr.msra.gmra.mxu3 %v3029_v48  ;;  %v9816_v48 = vld [vmem:[#allocation2 + $0x6c4] sm:$0xf0]  ;;  %v8386_v52 = vor.u32 %v9824_v43, %v8385_v4  ;;  %v9799_v6 = vld [vmem:[#allocation2 + $0x644] sm:$0xf]  ;;  %v8483_v4 = vld [vmem:[#allocation2 + $0x7c8] sm:$0xf0] }
 0x506   :  { %3896 = vmatpush.bf16.msrb.mxu3 %v8506_v37  ;;  %v8354_v21 = vor.u32 %v9816_v48, %v8353_v24  ;;  %v8465_v37 = vld [vmem:[#allocation2 + $0x7a0] sm:$0xf]  ;;  %v8394_v24 = vor.u32 %v9826_v58, %v8393_v31  ;;  %v9808_v48 = vld [vmem:[#allocation2 + $0x684] sm:$0xf0] }
 0x507   :  { %3858 = vmatpush.bf16.msra.mxu0 %v8306_v11  ;;  %v2422_v23 = vpop.f32.mrf.mxu2  ;;  %v2398_v59 = vpop.f32.mrf.mxu0  ;;  %v8338_v11 = vor.u32 %v9812_v25, %v8337_v54  ;;  %v8466_v34 = vor.u32 %v9844_v57, %v8465_v37  ;;  %v8510_v54 = vor.u32 %v9853_v14, %v8507_v3  ;;  %v9851_v25 = vld [vmem:[#allocation2 + $0x7e4] sm:$0xf]  ;;  %v3529_v37 = vrot.slane %v11376_v35, 1 }
 0x508   :  { %3871 = vmatpush.bf16.msra.mxu1 %v8370_v22  ;;  %v2423_v9 = vadd.f32 %v2422_v23, %v2410_v40  ;;  %v2435_v18 = vpop.f32.mrf.mxu3  ;;  %v8402_v22 = vor.u32 %v9828_v47, %v8401_v33  ;;  %v2411_v15 = vpop.f32.mrf.mxu1  ;;  %v8307_v23 = vld [vmem:[#allocation2 + $0x668] sm:$0xf0]  ;;  %v3532_v47 = vrot.slane %v11373_v5, 1  ;;  %v9801_v59 = vld [vmem:[#allocation2 + $0x654] sm:$0xf] }
 0x509   :  { %3884 = vmatpush.bf16.msrb.mxu2 %v8434_v29  ;;  %v9794_v29 = vld [vmem:[#allocation2 + $0x614] sm:$0xf0]  ;;  %v8499_v33 = vld [vmem:[#allocation2 + $0x7e8] sm:$0xf0]  ;;  %v8427_v15 = vld [vmem:[#allocation2 + $0x758] sm:$0xf0] }
 0x50a   :  { %3897 = vmatpush.bf16.msrb.mxu3 %v8498_v13  ;;  %v2436_v50 = vadd.f32 %v2435_v18, %v2423_v9  ;;  %v8435_v9 = vld [vmem:[#allocation2 + $0x768] sm:$0xf0]  ;;  %v3531_v18 = vrot.slane %v11370_v63, 1  ;;  %v8430_v8 = vor.u32 %v9833_v61, %v8427_v15 }
 0x50b   :  { %3859 = vmatpush.bf16.msra.mxu0 %v8298_v53 }
 0x50c   :  { %3872 = vmatpush.bf16.msra.mxu1 %v8362_v17  ;;  %v2441_v13 = vrot.slane %v2436_v50, 7  ;;  %v8266_v17 = vor.u32 %v9794_v29, %v8265_v60  ;;  %v3530_v50 = vrot.slane %v11379_v45, 1  ;;  %v8502_v29 = vor.u32 %v9851_v25, %v8499_v33  ;;  %v9843_v25 = vld [vmem:[#allocation2 + $0x7a4] sm:$0xf]  ;;  %v8467_v33 = vld [vmem:[#allocation2 + $0x7a8] sm:$0xf0] }
 0x50d   :  { %3885 = vmatpush.bf16.msrb.mxu2 %v8426_v44  ;;  %v8257_v44 = vld [vmem:[#allocation2 + $0x600] sm:$0xf]  ;;  %v8470_v15 = vor.u32 %v9843_v25, %v8467_v33 }
 0x50e   :  { %3898 = vmatpush.bf16.msrb.mxu3 %v8490_v46  ;;  %v11413_v53 = vsel %vm2442_vm3, %v11401_v38, %v2441_v13  ;;  %v8321_v46 = vld [vmem:[#allocation2 + $0x680] sm:$0xf]  ;;  %v9805_v38 = vld [vmem:[#allocation2 + $0x674] sm:$0xf]  ;;  %v8258_v62 = vor.u32 %v9792_v32, %v8257_v44  ;;  %v9815_v44 = vld [vmem:[#allocation2 + $0x6c4] sm:$0xf] }
 0x50f   :  { %3860 = vmatpush.bf16.msra.mxu0 %v8290_v12  ;;  %v2424_v27 = vpop.f32.mrf.mxu2  ;;  %v8449_v12 = vld [vmem:[#allocation2 + $0x780] sm:$0xf]  ;;  %v8322_v40 = vor.u32 %v9808_v48, %v8321_v46  ;;  %v9849_v13 = vld [vmem:[#allocation2 + $0x7d4] sm:$0xf]  ;;  %v8419_v46 = vld [vmem:[#allocation2 + $0x748] sm:$0xf0] }
 0x510   :  { %3873 = vmatpush.bf16.msra.mxu1 %v8354_v21  ;;  %v2437_v21 = vpop.f32.mrf.mxu3  ;;  %v8450_v16 = vor.u32 %v9840_v41, %v8449_v12  ;;  %v9847_v48 = vld [vmem:[#allocation2 + $0x7c4] sm:$0xf]  ;;  %v9797_v41 = vld [vmem:[#allocation2 + $0x634] sm:$0xf] }
 0x511   :  { %3886 = vmatpush.bf16.msrb.mxu2 %v8418_v49  ;;  %v8315_v49 = vld [vmem:[#allocation2 + $0x678] sm:$0xf0] }
 0x512   :  { %3899 = vmatpush.bf16.msrb.mxu3 %v8482_v51  ;;  %v8443_v51 = vld [vmem:[#allocation2 + $0x778] sm:$0xf0]  ;;  %v8318_v19 = vor.u32 %v9805_v38, %v8315_v49  ;;  %v9813_v38 = vld [vmem:[#allocation2 + $0x6b4] sm:$0xf] }
 0x513   :  { %3861 = vmatpush.bf16.msra.mxu0 %v8282_v55  ;;  %v9803_v55 = vld [vmem:[#allocation2 + $0x664] sm:$0xf]  ;;  %v8283_v21 = vld [vmem:[#allocation2 + $0x638] sm:$0xf0] }
 0x514   :  { %3874 = vmatpush.bf16.msra.mxu1 %v8346_v36  ;;  %v8382_v36 = vor.u32 %v9821_v7, %v8379_v1  ;;  %v8310_v57 = vor.u32 %v9803_v55, %v8307_v23  ;;  %v8486_v7 = vor.u32 %v9847_v48, %v8483_v4  ;;  %v9829_v1 = vld [vmem:[#allocation2 + $0x734] sm:$0xf]  ;;  %v8286_v14 = vor.u32 %v9797_v41, %v8283_v21  ;;  %v8275_v55 = vld [vmem:[#allocation2 + $0x628] sm:$0xf0] }
 0x515   :  { %3887 = vmatpush.bf16.msrb.mxu2 %v8410_v42  ;;  %v8446_v42 = vor.u32 %v9837_v39, %v8443_v51  ;;  %v8411_v39 = vld [vmem:[#allocation2 + $0x738] sm:$0xf0]  ;;  %v8323_v4 = vld [vmem:[#allocation2 + $0x688] sm:$0xf0] }
 0x516   :  { %3900 = vmatpush.bf16.msrb.mxu3 %v8474_v30  ;;  %v9835_v30 = vld [vmem:[#allocation2 + $0x764] sm:$0xf]  ;;  %v8451_v41 = vld [vmem:[#allocation2 + $0x788] sm:$0xf0] }
 0x517   :  { %3862 = vmatpush.bf16.msra.mxu0 %v8274_v20  ;;  %v8374_v20 = vor.u32 %v9819_v0, %v8371_v28  ;;  %v8438_v60 = vor.u32 %v9835_v30, %v8435_v9  ;;  %v8339_v0 = vld [vmem:[#allocation2 + $0x6a8] sm:$0xf0]  ;;  %v9827_v28 = vld [vmem:[#allocation2 + $0x724] sm:$0xf] }
 0x518   :  { %3875 = vmatpush.bf16.msra.mxu1 %v8338_v11  ;;  %v8299_v11 = vld [vmem:[#allocation2 + $0x658] sm:$0xf0] }
 0x519   :  { %3888 = vmatpush.bf16.msrb.mxu2 %v8402_v22  ;;  %v9817_v22 = vld [vmem:[#allocation2 + $0x6d4] sm:$0xf]  ;;  %v8302_v31 = vor.u32 %v9801_v59, %v8299_v11 }
 0x51a   :  { %3901 = vmatpush.bf16.msrb.mxu3 %v8466_v34  ;;  %v8491_v34 = vld [vmem:[#allocation2 + $0x7d8] sm:$0xf0]  ;;  %v8366_v58 = vor.u32 %v9817_v22, %v8363_v10  ;;  %v9793_v22 = vld [vmem:[#allocation2 + $0x614] sm:$0xf] }
 0x51b   :  { %3863 = vmatpush.bf16.msra.mxu0 %v8266_v17  ;;  %v8291_v17 = vld [vmem:[#allocation2 + $0x648] sm:$0xf0]  ;;  %v8494_v32 = vor.u32 %v9849_v13, %v8491_v34  ;;  %v9809_v10 = vld [vmem:[#allocation2 + $0x694] sm:$0xf]  ;;  %v8331_v13 = vld [vmem:[#allocation2 + $0x698] sm:$0xf0] }
 0x51c   :  { %3876 = vmatpush.bf16.msra.mxu1 %v8330_v26  ;;  %v8355_v26 = vld [vmem:[#allocation2 + $0x6c8] sm:$0xf0]  ;;  %v8294_v27 = vor.u32 %v9799_v6, %v8291_v17  ;;  %v9825_v34 = vld [vmem:[#allocation2 + $0x714] sm:$0xf]  ;;  %v8334_v17 = vor.u32 %v9809_v10, %v8331_v13 }
 0x51d   :  { %3889 = vmatpush.bf16.msrb.mxu2 %v8394_v24  ;;  %v9831_v24 = vld [vmem:[#allocation2 + $0x744] sm:$0xf]  ;;  %v8358_v43 = vor.u32 %v9815_v44, %v8355_v26  ;;  %v8259_v26 = vld [vmem:[#allocation2 + $0x608] sm:$0xf0] }
 0x51e   :  { %3902 = vmatpush.bf16.msrb.mxu3 %v8458_v56  ;;  %v8422_v12 = vor.u32 %v9831_v24, %v8419_v46  ;;  %v9807_v24 = vld [vmem:[#allocation2 + $0x684] sm:$0xf] }
 0x51f   :  { %3864 = vmatpush.bf16.msra.mxu0 %v8258_v62  ;;  %v2856_v56 = vpop.f32.mrf.mxu0  ;;  %v8347_v62 = vld [vmem:[#allocation2 + $0x6b8] sm:$0xf0] }
 0x520   :  { %3877 = vmatpush.bf16.msra.mxu1 %v8322_v40  ;;  %v2869_v49 = vpop.f32.mrf.mxu1  ;;  %v9845_v40 = vld [vmem:[#allocation2 + $0x7b4] sm:$0xf]  ;;  %v8350_v3 = vor.u32 %v9813_v38, %v8347_v62  ;;  %v8326_v38 = vor.u32 %v9807_v24, %v8323_v4  ;;  %v4059_v24 = vld [vmem:[%s12165_s13 + $0x68] sm:$0xff] }
 0x521   :  { %3890 = vmatpush.bf16.msrb.mxu2 %v8386_v52  ;;  %v2870_v51 = vadd.f32 %v2869_v49, %v2856_v56  ;;  %v8475_v52 = vld [vmem:[#allocation2 + $0x7b8] sm:$0xf0]  ;;  %v8387_v56 = vld [vmem:[#allocation2 + $0x708] sm:$0xf0] }
 0x522   :  { %3903 = vmatpush.bf16.msrb.mxu3 %v8450_v16  ;;  %3865 = vmatmul.bf16.vlgmr.msra.gmra.mxu0 %v3529_v37  ;;  %v8414_v16 = vor.u32 %v9829_v1, %v8411_v39  ;;  %v8478_v23 = vor.u32 %v9845_v40, %v8475_v52 }
 0x523   :  { %3909 = vmatpush.bf16.msrb.mxu0 %v8318_v19  ;;  %3878 = vmatmul.bf16.vlgmr.msra.gmra.mxu1 %v3530_v50  ;;  %v9795_v19 = vld [vmem:[#allocation2 + $0x624] sm:$0xf] }
 0x524   :  { %3922 = vmatpush.bf16.msrb.mxu1 %v8382_v36  ;;  %3891 = vmatmul.bf16.vlgmr.msrb.gmra.mxu2 %v3531_v18  ;;  %v9811_v36 = vld [vmem:[#allocation2 + $0x6a4] sm:$0xf] }
 0x525   :  { %3935 = vmatpush.bf16.msra.mxu2 %v8446_v42  ;;  %3904 = vmatmul.bf16.vlgmr.msrb.gmra.mxu3 %v3532_v47  ;;  %v8342_v59 = vor.u32 %v9811_v36, %v8339_v0 }
 0x526   :  { %3948 = vmatpush.bf16.msra.mxu3 %v8510_v54  ;;  %v8403_v54 = vld [vmem:[#allocation2 + $0x728] sm:$0xf0] }
 0x527   :  { %3910 = vmatpush.bf16.msrb.mxu0 %v8310_v57  ;;  %v2882_v42 = vpop.f32.mrf.mxu2  ;;  %v8278_v57 = vor.u32 %v9795_v19, %v8275_v55  ;;  %v8406_v11 = vor.u32 %v9827_v28, %v8403_v54 }
 0x528   :  { %3923 = vmatpush.bf16.msrb.mxu1 %v8374_v20  ;;  %v2883_v30 = vadd.f32 %v2882_v42, %v2870_v51  ;;  %v2895_v9 = vpop.f32.mrf.mxu3  ;;  %v2871_v61 = vpop.f32.mrf.mxu1 }
 0x529   :  { %3936 = vmatpush.bf16.msra.mxu2 %v8438_v60  ;;  %v2858_v60 = vpop.f32.mrf.mxu0  ;;  %v4077_v61 = vld [vmem:[%s12165_s13 + $0xf8] sm:$0xff] }
 0x52a   :  { %3949 = vmatpush.bf16.msra.mxu3 %v8502_v29  ;;  %v11427_v20 = vadd.f32 %v2895_v9, %v2883_v30  ;;  %v8267_v29 = vld [vmem:[#allocation2 + $0x618] sm:$0xf0] }
 0x52b   :  { %3911 = vmatpush.bf16.msrb.mxu0 %v8302_v31  ;;  %v8395_v31 = vld [vmem:[#allocation2 + $0x718] sm:$0xf0]  ;;  %v8270_v6 = vor.u32 %v9793_v22, %v8267_v29 }
 0x52c   :  { %3924 = vmatpush.bf16.msrb.mxu1 %v8366_v58  ;;  %v9841_v58 = vld [vmem:[#allocation2 + $0x794] sm:$0xf]  ;;  %v8398_v44 = vor.u32 %v9825_v34, %v8395_v31  ;;  %v4061_v22 = vld [vmem:[%s12165_s13 + $0x78] sm:$0xff] }
 0x52d   :  { %3937 = vmatpush.bf16.msra.mxu2 %v8430_v8  ;;  %v8459_v8 = vld [vmem:[#allocation2 + $0x798] sm:$0xf0]  ;;  %v3982_v34 = vld [vmem:[%s12164_s9 + $0x70] sm:$0xff] }
 0x52e   :  { %3950 = vmatpush.bf16.msra.mxu3 %v8494_v32  ;;  %v9791_v32 = vld [vmem:[#allocation2 + $0x604] sm:$0xf]  ;;  %v8462_v48 = vor.u32 %v9841_v58, %v8459_v8  ;;  %v3998_v31 = vld [vmem:[%s12164_s9 + $0xf0] sm:$0xff] }
 0x52f   :  { %3912 = vmatpush.bf16.msrb.mxu0 %v8294_v27  ;;  %v2884_v46 = vpop.f32.mrf.mxu2  ;;  %v9823_v27 = vld [vmem:[#allocation2 + $0x704] sm:$0xf]  ;;  %v8262_v21 = vor.u32 %v9791_v32, %v8259_v26  ;;  %v4060_v58 = vld [vmem:[%s12165_s13 + $0x70] sm:$0xff] }
 0x530   :  { %3925 = vmatpush.bf16.msrb.mxu1 %v8358_v43  ;;  %v2897_v43 = vpop.f32.mrf.mxu3  ;;  %v8390_v49 = vor.u32 %v9823_v27, %v8387_v56  ;;  %v4075_v46 = vld [vmem:[%s12165_s13 + $0xe8] sm:$0xff]  ;;  %v3996_v27 = vld [vmem:[%s12164_s9 + $0xe0] sm:$0xff] }
 0x531   :  { %3938 = vmatpush.bf16.msra.mxu2 %v8422_v12  ;;  %v9839_v12 = vld [vmem:[#allocation2 + $0x784] sm:$0xf] }
 0x532   :  { %3951 = vmatpush.bf16.msra.mxu3 %v8486_v7  ;;  %v8454_v7 = vor.u32 %v9839_v12, %v8451_v41  ;;  %v4058_v56 = vld [vmem:[%s12165_s13 + $0x60] sm:$0xff]  ;;  %v3979_v12 = vld [vmem:[%s12164_s9 + $0x58] sm:$0xff] }
 0x533   :  { %3913 = vmatpush.bf16.msrb.mxu0 %v8286_v14  ;;  %v1946_v14 = vld [vmem:[%s12163_s5] sm:$0x3]  ;;  %v3995_v41 = vld [vmem:[%s12164_s9 + $0xd8] sm:$0xff] }
 0x534   :  { %3926 = vmatpush.bf16.msrb.mxu1 %v8350_v3  ;;  %v2445_v45 = vadd.f32 %v11413_v53, %v1946_v14  ;;  %v4074_v43 = vld [vmem:[%s12165_s13 + $0xe0] sm:$0xff] }
 0x535   :  { %3939 = vmatpush.bf16.msra.mxu2 %v8414_v16  ;;  %v3976_v14 = vld [vmem:[%s12164_s9 + $0x40] sm:$0xff] }
 0x536   :  { %3952 = vmatpush.bf16.msra.mxu3 %v8478_v23 }
 0x537   :  { %3914 = vmatpush.bf16.msrb.mxu0 %v8278_v57 }
 0x538   :  { %3927 = vmatpush.bf16.msrb.mxu1 %v8342_v59  ;;  %v3983_v59 = vld [vmem:[%s12164_s9 + $0x78] sm:$0xff] }
 0x539   :  { %3940 = vmatpush.bf16.msra.mxu2 %v8406_v11  ;;  %v3999_v11 = vld [vmem:[%s12164_s9 + $0xf8] sm:$0xff] }
 0x53a   :  { %3953 = vmatpush.bf16.msra.mxu3 %v8470_v15 }
 0x53b   :  { %3915 = vmatpush.bf16.msrb.mxu0 %v8270_v6  ;;  %v4076_v6 = vld [vmem:[%s12165_s13 + $0xf0] sm:$0xff] }
 0x53c   :  { %3928 = vmatpush.bf16.msrb.mxu1 %v8334_v17  ;;  %v3981_v17 = vld [vmem:[%s12164_s9 + $0x68] sm:$0xff] }
 0x53d   :  { %3941 = vmatpush.bf16.msra.mxu2 %v8398_v44  ;;  %v3997_v44 = vld [vmem:[%s12164_s9 + $0xe8] sm:$0xff] }
 0x53e   :  { %3954 = vmatpush.bf16.msra.mxu3 %v8462_v48  ;;  %v3980_v48 = vld [vmem:[%s12164_s9 + $0x60] sm:$0xff] }
 0x53f   :  { %3916 = vmatpush.bf16.msrb.mxu0 %v8262_v21  ;;  %v2908_v62 = vpop.f32.mrf.mxu0  ;;  %v4057_v21 = vld [vmem:[%s12165_s13 + $0x58] sm:$0xff] }
 0x540   :  { %3929 = vmatpush.bf16.msrb.mxu1 %v8326_v38  ;;  %v2921_v1 = vpop.f32.mrf.mxu1  ;;  %v4073_v38 = vld [vmem:[%s12165_s13 + $0xd8] sm:$0xff] }
 0x541   :  { %3942 = vmatpush.bf16.msra.mxu2 %v8390_v49  ;;  %v2922_v39 = vadd.f32 %v2921_v1, %v2908_v62  ;;  %v3978_v49 = vld [vmem:[%s12164_s9 + $0x50] sm:$0xff] }
 0x542   :  { %3955 = vmatpush.bf16.msra.mxu3 %v8454_v7  ;;  %3917 = vmatmul.bf16.vlgmr.msrb.gmra.mxu0 %v3529_v37  ;;  %v3994_v7 = vld [vmem:[%s12164_s9 + $0xd0] sm:$0xff] }
 0x543   :  { %3930 = vmatmul.bf16.vlgmr.msrb.gmra.mxu1 %v3530_v50  ;;  %4006 = vmatpush.msra.mxu0 %v3983_v59  ;;  %v4056_v62 = vld [vmem:[%s12165_s13 + $0x50] sm:$0xff]  ;;  %v3987_v59 = vld [vmem:[%s12164_s9 + $0x98] sm:$0xff] }
 0x544   :  { %3943 = vmatmul.bf16.vlgmr.msra.gmra.mxu2 %v3531_v18  ;;  %4026 = vmatpush.msra.mxu1 %v3999_v11  ;;  %v4072_v1 = vld [vmem:[%s12165_s13 + $0xd0] sm:$0xff]  ;;  %v4049_v11 = vld [vmem:[%s12165_s13 + $0x18] sm:$0xff] }
 0x545   :  { %3956 = vmatmul.bf16.vlgmr.msra.gmra.mxu3 %v3532_v47  ;;  %4079 = vmatpush.msrb.mxu2 %v4061_v22  ;;  %v4065_v22 = vld [vmem:[%s12165_s13 + $0x98] sm:$0xff] }
 0x546   :  { %4099 = vmatpush.msrb.mxu3 %v4077_v61  ;;  %4007 = vmatpush.msra.mxu0 %v3982_v34  ;;  %v4048_v61 = vld [vmem:[%s12165_s13 + $0x10] sm:$0xff]  ;;  %v3969_v34 = vld [vmem:[%s12164_s9 + $0x8] sm:$0xff] }
 0x547   :  { %v2934_v51 = vpop.f32.mrf.mxu2  ;;  %v2910_v16 = vpop.f32.mrf.mxu0  ;;  %4027 = vmatpush.msra.mxu1 %v3998_v31  ;;  %4080 = vmatpush.msrb.mxu2 %v4060_v58  ;;  %v3985_v31 = vld [vmem:[%s12164_s9 + $0x88] sm:$0xff] }
 0x548   :  { %v2935_v40 = vadd.f32 %v2934_v51, %v2922_v39  ;;  %v2947_v52 = vpop.f32.mrf.mxu3  ;;  %v2923_v35 = vpop.f32.mrf.mxu1  ;;  %4100 = vmatpush.msrb.mxu3 %v4076_v6  ;;  %4008 = vmatpush.msra.mxu0 %v3981_v17  ;;  %v3977_v39 = vld [vmem:[%s12164_s9 + $0x48] sm:$0xff]  ;;  %v3968_v17 = vld [vmem:[%s12164_s9] sm:$0xff] }
 0x549   :  { %4028 = vmatpush.msra.mxu1 %v3997_v44  ;;  %4081 = vmatpush.msrb.mxu2 %v4059_v24  ;;  %v3993_v51 = vld [vmem:[%s12164_s9 + $0xc8] sm:$0xff]  ;;  %v4054_v35 = vld [vmem:[%s12165_s13 + $0x40] sm:$0xff] }
 0x54a   :  { %v2948_v3 = vadd.f32 %v2947_v52, %v2935_v40  ;;  %4101 = vmatpush.msrb.mxu3 %v4075_v46  ;;  %4009 = vmatpush.msra.mxu0 %v3980_v48  ;;  %v4055_v40 = vld [vmem:[%s12165_s13 + $0x48] sm:$0xff]  ;;  %v3984_v44 = vld [vmem:[%s12164_s9 + $0x80] sm:$0xff] }
 0x54b   :  { %4029 = vmatpush.msra.mxu1 %v3996_v27  ;;  %4082 = vmatpush.msrb.mxu2 %v4058_v56  ;;  %v4071_v52 = vld [vmem:[%s12165_s13 + $0xc8] sm:$0xff]  ;;  %v4062_v24 = vld [vmem:[%s12165_s13 + $0x80] sm:$0xff] }
 0x54c   :  { %v2953_v37 = vrot.slane %v2948_v3, 7  ;;  %4102 = vmatpush.msrb.mxu3 %v4074_v43  ;;  %4010 = vmatpush.msra.mxu0 %v3979_v12  ;;  %v3992_v3 = vld [vmem:[%s12164_s9 + $0xc0] sm:$0xff]  ;;  %v4063_v6 = vld [vmem:[%s12165_s13 + $0x88] sm:$0xff] }
 0x54d   :  { %4030 = vmatpush.msra.mxu1 %v3995_v41  ;;  %4083 = vmatpush.msrb.mxu2 %v4057_v21 }
 0x54e   :  { %v2954_v63 = vsel %vm2442_vm3, %v11427_v20, %v2953_v37  ;;  %4103 = vmatpush.msrb.mxu3 %v4073_v38  ;;  %4011 = vmatpush.msra.mxu0 %v3978_v49  ;;  %v4070_v37 = vld [vmem:[%s12165_s13 + $0xc0] sm:$0xff] }
 0x54f   :  { %v2956_v18 = vadd.f32 %v2954_v63, %v2445_v45  ;;  %v2936_v50 = vpop.f32.mrf.mxu2  ;;  %4031 = vmatpush.msra.mxu1 %v3994_v7  ;;  %4084 = vmatpush.msrb.mxu2 %v4056_v62  ;;  %v3975_v45 = vld [vmem:[%s12164_s9 + $0x38] sm:$0xff] }
 0x550   :  { %v2949_v5 = vpop.f32.mrf.mxu3  ;;  %4104 = vmatpush.msrb.mxu3 %v4072_v1  ;;  %4012 = vmatpush.msra.mxu0 %v3977_v39  ;;  %v4053_v50 = vld [vmem:[%s12165_s13 + $0x38] sm:$0xff] }
 0x551   :  { %4032 = vmatpush.msra.mxu1 %v3993_v51  ;;  %4085 = vmatpush.msrb.mxu2 %v4055_v40  ;;  %v4069_v5 = vld [vmem:[%s12165_s13 + $0xb8] sm:$0xff] }
 0x552   :  { %4105 = vmatpush.msrb.mxu3 %v4071_v52  ;;  %4013 = vmatpush.msra.mxu0 %v3976_v14 }
 0x553   :  { %4033 = vmatpush.msra.mxu1 %v3992_v3  ;;  %4086 = vmatpush.msrb.mxu2 %v4054_v35  ;;  %v4144_v35 = vld [vmem:[%s12166_s17 + $0x78] sm:$0xff] }
 0x554   :  { %4106 = vmatpush.msrb.mxu3 %v4070_v37  ;;  %4014 = vmatpush.msra.mxu0 %v3975_v45  ;;  %v4142_v37 = vld [vmem:[%s12166_s17 + $0x68] sm:$0xff]  ;;  %v4139_v45 = vld [vmem:[%s12166_s17 + $0x50] sm:$0xff] }
 0x555   :  { %4087 = vmatpush.msrb.mxu2 %v4053_v50  ;;  %v4138_v50 = vld [vmem:[%s12166_s17 + $0x48] sm:$0xff] }
 0x556   :  { %4107 = vmatpush.msrb.mxu3 %v4069_v5  ;;  %v4135_v5 = vld [vmem:[%s12166_s17 + $0x30] sm:$0xff] }
 0x55f   :  { %v3363_v47 = vpop.f32.mrf.mxu0 }
 0x560   :  { %v3376_v19 = vpop.f32.mrf.mxu1 }
 0x561   :  { %v3377_v55 = vadd.f32 %v3376_v19, %v3363_v47  ;;  %v3974_v47 = vld [vmem:[%s12164_s9 + $0x30] sm:$0xff] }
 0x562   :  { %v3990_v19 = vld [vmem:[%s12164_s9 + $0xb0] sm:$0xff]  ;;  %4015 = vmatpush.msra.mxu0 %v3974_v47  ;;  %v4136_v47 = vld [vmem:[%s12166_s17 + $0x38] sm:$0xff] }
 0x567   :  { %v3389_v36 = vpop.f32.mrf.mxu2  ;;  %v3365_v28 = vpop.f32.mrf.mxu0 }
 0x568   :  { %v3390_v42 = vadd.f32 %v3389_v36, %v3377_v55  ;;  %v3402_v23 = vpop.f32.mrf.mxu3  ;;  %v3378_v54 = vpop.f32.mrf.mxu1  ;;  %v4052_v55 = vld [vmem:[%s12165_s13 + $0x30] sm:$0xff]  ;;  %v3989_v28 = vld [vmem:[%s12164_s9 + $0xa8] sm:$0xff] }
 0x569   :  { %4088 = vmatpush.msrb.mxu2 %v4052_v55  ;;  %v4051_v54 = vld [vmem:[%s12165_s13 + $0x28] sm:$0xff] }
 0x56a   :  { %v3403_v0 = vadd.f32 %v3402_v23, %v3390_v42  ;;  %v4068_v42 = vld [vmem:[%s12165_s13 + $0xb0] sm:$0xff]  ;;  %v4134_v55 = vld [vmem:[%s12166_s17 + $0x28] sm:$0xff] }
 0x56b   :  { %4108 = vmatpush.msrb.mxu3 %v4068_v42  ;;  %4089 = vmatpush.msrb.mxu2 %v4051_v54  ;;  %v4132_v42 = vld [vmem:[%s12166_s17 + $0x18] sm:$0xff] }
 0x56f   :  { %v3391_v53 = vpop.f32.mrf.mxu2 }
 0x570   :  { %v3404_v30 = vpop.f32.mrf.mxu3  ;;  %v4067_v53 = vld [vmem:[%s12165_s13 + $0xa8] sm:$0xff] }
 0x571   :  { %4109 = vmatpush.msrb.mxu3 %v4067_v53 }
 0x57f   :  { %v3415_v9 = vpop.f32.mrf.mxu0 }
 0x580   :  { %v3428_v25 = vpop.f32.mrf.mxu1 }
 0x581   :  { %v3429_v33 = vadd.f32 %v3428_v25, %v3415_v9  ;;  %v3972_v9 = vld [vmem:[%s12164_s9 + $0x20] sm:$0xff] }
 0x582   :  { %v3988_v25 = vld [vmem:[%s12164_s9 + $0xa0] sm:$0xff] }
 0x587   :  { %v3441_v57 = vpop.f32.mrf.mxu2  ;;  %v3417_v10 = vpop.f32.mrf.mxu0 }
 0x588   :  { %v3442_v20 = vadd.f32 %v3441_v57, %v3429_v33  ;;  %v3454_v60 = vpop.f32.mrf.mxu3  ;;  %v3430_v15 = vpop.f32.mrf.mxu1  ;;  %v4050_v33 = vld [vmem:[%s12165_s13 + $0x20] sm:$0xff]  ;;  %v3986_v10 = vld [vmem:[%s12164_s9 + $0x90] sm:$0xff] }
 0x589   :  { %4090 = vmatpush.msrb.mxu2 %v4050_v33 }
 0x58a   :  { %v3455_v29 = vadd.f32 %v3454_v60, %v3442_v20  ;;  %v4066_v20 = vld [vmem:[%s12165_s13 + $0xa0] sm:$0xff]  ;;  %v3971_v60 = vld [vmem:[%s12164_s9 + $0x18] sm:$0xff] }
 0x58b   :  { %4110 = vmatpush.msrb.mxu3 %v4066_v20  ;;  %4091 = vmatpush.msrb.mxu2 %v4049_v11 }
 0x58c   :  { %v3460_v13 = vrot.slane %v3455_v29, 7  ;;  %v3970_v29 = vld [vmem:[%s12164_s9 + $0x10] sm:$0xff] }
 0x58d   :  { %4111 = vmatpush.msrb.mxu3 %v4065_v22  ;;  %4092 = vmatpush.msrb.mxu2 %v4048_v61  ;;  %v4119_v22 = vld [vmem:[%s12169_s29] sm:$0x1] }
 0x58e   :  { %v3461_v8 = vsel %vm2442_vm3, %v3403_v0, %v3460_v13  ;;  %v3973_v0 = vld [vmem:[%s12164_s9 + $0x28] sm:$0xff]  ;;  %v4064_v13 = vld [vmem:[%s12165_s13 + $0x90] sm:$0xff] }
 0x58f   :  { %v11452_v32 = vadd.f32 %v3461_v8, %v2956_v18  ;;  %v3443_v26 = vpop.f32.mrf.mxu2  ;;  %v3991_v18 = vld [vmem:[%s12164_s9 + $0xb8] sm:$0xff]  ;;  %4016 = vmatpush.msra.mxu0 %v3973_v0  ;;  %4112 = vmatpush.msrb.mxu3 %v4064_v13  ;;  %v4047_v8 = vld [vmem:[%s12165_s13 + $0x8] sm:$0xff] }
 0x590   :  { %v3456_v4 = vpop.f32.mrf.mxu3  ;;  %4034 = vmatpush.msra.mxu1 %v3991_v18  ;;  %v4046_v26 = vld [vmem:[%s12165_s13] sm:$0xff]  ;;  %4093 = vmatpush.msrb.mxu2 %v4047_v8  ;;  %v4130_v0 = vld [vmem:[%s12166_s17 + $0x8] sm:$0xff] }
 0x591   :  { %4017 = vmatpush.msra.mxu0 %v3972_v9  ;;  %4113 = vmatpush.msrb.mxu3 %v4063_v6  ;;  %v4137_v18 = vld [vmem:[%s12166_s17 + $0x40] sm:$0xff] }
 0x592   :  { %4035 = vmatpush.msra.mxu1 %v3990_v19  ;;  %4094 = vmatpush.msrb.mxu2 %v4046_v26  ;;  %v4133_v19 = vld [vmem:[%s12166_s17 + $0x20] sm:$0xff] }
 0x593   :  { %4018 = vmatpush.msra.mxu0 %v3971_v60  ;;  %4114 = vmatpush.msrb.mxu3 %v4062_v24 }
 0x594   :  { %4036 = vmatpush.msra.mxu1 %v3989_v28  ;;  %v4000_v28 = vld [vmem:[%s12167_s21] sm:$0x1] }
 0x595   :  { %4019 = vmatpush.msra.mxu0 %v3970_v29 }
 0x596   :  { %4037 = vmatpush.msra.mxu1 %v3988_v25  ;;  %v4078_v25 = vld [vmem:[%s12168_s25] sm:$0x1] }
 0x597   :  { %4020 = vmatpush.msra.mxu0 %v3969_v34 }
 0x598   :  { %4038 = vmatpush.msra.mxu1 %v3987_v59 }
 0x599   :  { %4021 = vmatpush.msra.mxu0 %v3968_v17 }
 0x59a   :  { %4039 = vmatpush.msra.mxu1 %v3986_v10 }
 0x59c   :  { %4040 = vmatpush.msra.mxu1 %v3985_v31 }
 0x59e   :  { %4041 = vmatpush.msra.mxu1 %v3984_v44 }
 0x59f   :  { %v11474_v16 = vpop.f32.mrf.mxu0 }
 0x5a0   :  { %v11479_v63 = vpop.f32.mrf.mxu1  ;;  %4182 = vmatpush.msrb.mxu1 %v4144_v35 }
 0x5a1   :  { %v3880_v4 = vadd.f32 %v11479_v63, %v11474_v16  ;;  %v4143_v16 = vld [vmem:[%s12166_s17 + $0x70] sm:$0xff]  ;;  %v4140_v63 = vld [vmem:[%s12166_s17 + $0x58] sm:$0xff] }
 0x5a2   :  { %4162 = vmatpush.msrb.mxu0 %v4143_v16  ;;  %4183 = vmatpush.msrb.mxu1 %v4142_v37 }
 0x5a4   :  { %4184 = vmatpush.msrb.mxu1 %v4140_v63 }
 0x5a6   :  { %4185 = vmatpush.msrb.mxu1 %v4138_v50 }
 0x5a7   :  { %v11487_v36 = vpop.f32.mrf.mxu2  ;;  %v3868_v30 = vpop.f32.mrf.mxu0 }
 0x5a8   :  { %v11490_v23 = vpop.f32.mrf.mxu3  ;;  %v3881_v57 = vpop.f32.mrf.mxu1  ;;  %v3893_v43 = vadd.f32 %v11487_v36, %v3880_v4  ;;  %4186 = vmatpush.msrb.mxu1 %v4136_v47  ;;  %v4131_v36 = vld [vmem:[%s12166_s17 + $0x10] sm:$0xff] }
 0x5aa   :  { %v3906_v7 = vadd.f32 %v11490_v23, %v3893_v43  ;;  %4187 = vmatpush.msrb.mxu1 %v4134_v55  ;;  %v4129_v23 = vld [vmem:[%s12166_s17] sm:$0xff] }
 0x5ac   :  { %4188 = vmatpush.msrb.mxu1 %v4132_v42 }
 0x5ae   :  { %4189 = vmatpush.msrb.mxu1 %v4130_v0 }
 0x5af   :  { %v3894_v15 = vpop.f32.mrf.mxu2 }
 0x5b0   :  { %v3907_v58 = vpop.f32.mrf.mxu3  ;;  %v4145_v15 = vld [vmem:[%s12170_s3] sm:$0x3] }
 0x5b1   :  { %v4147_v13 = vperm.slane %v4145_v15, 0  ;;  %v4148_v34 = vperm.slane %v4145_v15, 1 }
 0x5bf   :  { %v3918_v46 = vpop.f32.mrf.mxu0 }
 0x5c0   :  { %v3931_v48 = vpop.f32.mrf.mxu1 }
 0x5c1   :  { %v3932_v27 = vadd.f32 %v3931_v48, %v3918_v46 }
 0x5c7   :  { %v3944_v56 = vpop.f32.mrf.mxu2  ;;  %v3920_v21 = vpop.f32.mrf.mxu0 }
 0x5c8   :  { %v3945_v12 = vadd.f32 %v3944_v56, %v3932_v27  ;;  %v3957_v41 = vpop.f32.mrf.mxu3  ;;  %v3933_v38 = vpop.f32.mrf.mxu1 }
 0x5ca   :  { %v3958_v49 = vadd.f32 %v3957_v41, %v3945_v12 }
 0x5cc   :  { %v3963_v62 = vrot.slane %v3958_v49, 7 }
 0x5ce   :  { %v3964_v1 = vsel %vm2442_vm3, %v3906_v7, %v3963_v62 }
 0x5cf   :  { %v3966_v39 = vadd.f32 %v3964_v1, %v11452_v32  ;;  %v3946_v51 = vpop.f32.mrf.mxu2  ;;  %v4141_v32 = vld [vmem:[%s12166_s17 + $0x60] sm:$0xff] }
 0x5d0   :  { %v3959_v40 = vpop.f32.mrf.mxu3  ;;  %4163 = vmatpush.msrb.mxu0 %v4141_v32 }
 0x5d1   :  { %v3967_v52 = vmax.f32 %v3966_v39, 0.0 }
 0x5d2   :  { %4164 = vmatpush.msrb.mxu0 %v4139_v45 }
 0x5d3   :  { %v4002_v14 = vperm.slane %v3967_v52, 0  ;;  %v4003_v3 = vperm.slane %v3967_v52, 1 }
 0x5d4   :  { %4165 = vmatpush.msrb.mxu0 %v4137_v18 }
 0x5d5   :  { %4022 = vmatmul.f32.vlgmr.msra.gmra.mxu0 %v4002_v14  ;;  %4042 = vmatmul.f32.vlgmr.msra.gmra.mxu1 %v4003_v3 }
 0x5d6   :  { %4095 = vmatmul.f32.vlgmr.msrb.gmra.mxu2 %v4002_v14  ;;  %4115 = vmatmul.f32.vlgmr.msrb.gmra.mxu3 %v4003_v3 }
 0x5d7   :  { %4166 = vmatpush.msrb.mxu0 %v4135_v5 }
 0x5d9   :  { %4167 = vmatpush.msrb.mxu0 %v4133_v19 }
 0x5db   :  { %4168 = vmatpush.msrb.mxu0 %v4131_v36 }
 0x5dd   :  { %4169 = vmatpush.msrb.mxu0 %v4129_v23 }
 0x652   :  { %v4023_v54 = vpop.f32.mrf.mxu0  ;;  %v4043_v30 = vpop.f32.mrf.mxu1 }
 0x653   :  { %v4024_v53 = vadd.f32 %v4023_v54, %v4000_v28 }
 0x655   :  { %v4044_v9 = vadd.f32 %v4043_v30, %v4024_v53 }
 0x657   :  { %4127 = vst.msk [vmem:[#allocation7] sm:$0x1] %vm4125_vm4, %v4044_v9 }
 0x659   :  { %v4096_v33 = vpop.f32.mrf.mxu2  ;;  %v4116_v20 = vpop.f32.mrf.mxu3 }
 0x65a   :  { %v4097_v57 = vadd.f32 %v4096_v33, %v4078_v25 }
 0x65c   :  { %v4117_v60 = vadd.f32 %v4116_v20, %v4097_v57 }
 0x65e   :  { %v4120_v59 = vmul.f32 0.5, %v4117_v60  ;;  %4128 = vst.msk [vmem:[#allocation9] sm:$0x1] %vm4125_vm4, %v4117_v60 }
 0x660   :  { %v4121_v11 = vmul.f32 1.442695, %v4120_v59 }
 0x662   :  { %10173 = vpow2.f32 %v4121_v11 }
 0x668   :  { %v10174_v29 = vpop.eup %10173 }
 0x669   :  { %v4123_v10 = vmul.f32 %v10174_v29, %v4119_v22 }
 0x66b   :  { %v4124_v61 = vadd.f32 %v4123_v10, %v4044_v9 }
 0x66d   :  { %4126 = vst.msk [vmem:[#allocation5] sm:$0x1] %vm4125_vm4, %v4124_v61  ;;  %8511 = vmatmul.msk.f32.vlgmr.msrb.gmra.mxu0 %vm1679_vm1, %v4124_v61  ;;  %8512 = vmatmul.msk.f32.vlgmr.msrb.gmra.mxu1 %vm1679_vm1, %v4124_v61 }
 0x6ea   :  { %v4171_v31 = vpop.f32.mrf.mxu0  ;;  %v4191_v58 = vpop.f32.mrf.mxu1 }
 0x6eb   :  { %v11547_v8 = vadd.f32 %v4171_v31, %v4147_v13  ;;  %v11549_v6 = vadd.f32 %v4191_v58, %v4148_v34 }
 0x6ec   :  { %10268 = dma.done.wait [#allocation4 + $0x1], 32768 }
 0x6ed   :  { %10269 = vsyncadd [#allocation4 + $0x1], 4294934528  ;;  %10175 = vset.pattern.permute.xlu0 %v10313_v2  ;;  %10176 = vset.pattern.permute.xlu1 %v10313_v2  ;;  %v8571_v17 = vld [vmem:[#allocation3 + $0x70] sm:$0xf]  ;;  %v9870_v44 = vld [vmem:[#allocation3 + $0x74] sm:$0xf0] }
 0x6ee   :  { %10177 = vset.pattern.permute.xlu2 %v10313_v2  ;;  %v8635_v26 = vld [vmem:[#allocation3 + $0xf0] sm:$0xf]  ;;  %v8572_v24 = vor.u32 %v9870_v44, %v8571_v17  ;;  %v9886_v46 = vld [vmem:[#allocation3 + $0xf4] sm:$0xf0]  ;;  %v9869_v48 = vld [vmem:[#allocation3 + $0x74] sm:$0xf] }
 0x6ef   :  { %v8573_v4 = vld [vmem:[#allocation3 + $0x78] sm:$0xf0]  ;;  %v8636_v27 = vor.u32 %v9886_v46, %v8635_v26  ;;  %v9885_v43 = vld [vmem:[#allocation3 + $0xf4] sm:$0xf]  ;;  %v8563_v41 = vld [vmem:[#allocation3 + $0x60] sm:$0xf] }
 0x6f0   :  { %v8576_v56 = vor.u32 %v9869_v48, %v8573_v4  ;;  %v8637_v12 = vld [vmem:[#allocation3 + $0xf8] sm:$0xf0]  ;;  %4399 = vmatpush.bf16.msra.mxu2 %v8572_v24  ;;  %v9868_v38 = vld [vmem:[#allocation3 + $0x64] sm:$0xf0]  ;;  %v8627_v49 = vld [vmem:[#allocation3 + $0xe0] sm:$0xf] }
 0x6f1   :  { %v8640_v21 = vor.u32 %v9885_v43, %v8637_v12  ;;  %v9884_v7 = vld [vmem:[#allocation3 + $0xe4] sm:$0xf0]  ;;  %4412 = vmatpush.bf16.msra.mxu3 %v8636_v27  ;;  %v8564_v2 = vor.u32 %v9868_v38, %v8563_v41  ;;  %v9867_v1 = vld [vmem:[#allocation3 + $0x64] sm:$0xf]  ;;  %v8565_v39 = vld [vmem:[#allocation3 + $0x68] sm:$0xf0] }
 0x6f2   :  { %4425 = vmatpush.bf16.msra.mxu0 %v8576_v56  ;;  %v8628_v62 = vor.u32 %v9884_v7, %v8627_v49  ;;  %v9883_v51 = vld [vmem:[#allocation3 + $0xe4] sm:$0xf]  ;;  %v8568_v40 = vor.u32 %v9867_v1, %v8565_v39  ;;  %v8629_v52 = vld [vmem:[#allocation3 + $0xe8] sm:$0xf0]  ;;  %v8555_v14 = vld [vmem:[#allocation3 + $0x50] sm:$0xf] }
 0x6f3   :  { %4438 = vmatpush.bf16.msra.mxu1 %v8640_v21  ;;  %v9866_v3 = vld [vmem:[#allocation3 + $0x54] sm:$0xf0]  ;;  %v8632_v16 = vor.u32 %v9883_v51, %v8629_v52  ;;  %v8619_v35 = vld [vmem:[#allocation3 + $0xd0] sm:$0xf]  ;;  %v9865_v37 = vld [vmem:[#allocation3 + $0x54] sm:$0xf] }
 0x6f4   :  { %v9882_v32 = vld [vmem:[#allocation3 + $0xd4] sm:$0xf0]  ;;  %4400 = vmatpush.bf16.msra.mxu2 %v8564_v2  ;;  %v8556_v45 = vor.u32 %v9866_v3, %v8555_v14  ;;  %v8557_v63 = vld [vmem:[#allocation3 + $0x58] sm:$0xf0]  ;;  %v9881_v18 = vld [vmem:[#allocation3 + $0xd4] sm:$0xf] }
 0x6f5   :  { %v8621_v50 = vld [vmem:[#allocation3 + $0xd8] sm:$0xf0]  ;;  %4413 = vmatpush.bf16.msra.mxu3 %v8628_v62  ;;  %v8620_v5 = vor.u32 %v9882_v32, %v8619_v35  ;;  %v8560_v47 = vor.u32 %v9865_v37, %v8557_v63  ;;  %v8547_v19 = vld [vmem:[#allocation3 + $0x40] sm:$0xf]  ;;  %v9864_v55 = vld [vmem:[#allocation3 + $0x44] sm:$0xf0] }
 0x6f6   :  { %4426 = vmatpush.bf16.msra.mxu0 %v8568_v40  ;;  %v8611_v36 = vld [vmem:[#allocation3 + $0xc0] sm:$0xf]  ;;  %v8624_v42 = vor.u32 %v9881_v18, %v8621_v50  ;;  %v9880_v23 = vld [vmem:[#allocation3 + $0xc4] sm:$0xf0]  ;;  %v9863_v0 = vld [vmem:[#allocation3 + $0x44] sm:$0xf]  ;;  %v8548_v30 = vor.u32 %v9864_v55, %v8547_v19 }
 0x6f7   :  { %4439 = vmatpush.bf16.msra.mxu1 %v8632_v16  ;;  %v8549_v28 = vld [vmem:[#allocation3 + $0x48] sm:$0xf0]  ;;  %v9879_v54 = vld [vmem:[#allocation3 + $0xc4] sm:$0xf]  ;;  %v8612_v9 = vor.u32 %v9880_v23, %v8611_v36  ;;  %v8539_v33 = vld [vmem:[#allocation3 + $0x30] sm:$0xf] }
 0x6f8   :  { %v8613_v53 = vld [vmem:[#allocation3 + $0xc8] sm:$0xf0]  ;;  %4401 = vmatpush.bf16.msra.mxu2 %v8556_v45  ;;  %v8552_v25 = vor.u32 %v9863_v0, %v8549_v28  ;;  %v9862_v57 = vld [vmem:[#allocation3 + $0x34] sm:$0xf0]  ;;  %v8603_v20 = vld [vmem:[#allocation3 + $0xb0] sm:$0xf] }
 0x6f9   :  { %4414 = vmatpush.bf16.msra.mxu3 %v8620_v5  ;;  %v8616_v60 = vor.u32 %v9879_v54, %v8613_v53  ;;  %v9878_v59 = vld [vmem:[#allocation3 + $0xb4] sm:$0xf0]  ;;  %v9861_v11 = vld [vmem:[#allocation3 + $0x34] sm:$0xf]  ;;  %v8541_v22 = vld [vmem:[#allocation3 + $0x38] sm:$0xf0]  ;;  %v8540_v61 = vor.u32 %v9862_v57, %v8539_v33 }
 0x6fa   :  { %4427 = vmatpush.bf16.msra.mxu0 %v8560_v47  ;;  %v9877_v29 = vld [vmem:[#allocation3 + $0xb4] sm:$0xf]  ;;  %v8605_v10 = vld [vmem:[#allocation3 + $0xb8] sm:$0xf0]  ;;  %v8604_v15 = vor.u32 %v9878_v59, %v8603_v20  ;;  %v8544_v13 = vor.u32 %v9861_v11, %v8541_v22  ;;  %v8531_v34 = vld [vmem:[#allocation3 + $0x20] sm:$0xf]  ;;  %v11556_v11 = vpack.c.bf16 %v11547_v8, %v11547_v8 }
 0x6fb   :  { %4440 = vmatpush.bf16.msra.mxu1 %v8624_v42  ;;  %v9860_v31 = vld [vmem:[#allocation3 + $0x24] sm:$0xf0]  ;;  %v8595_v58 = vld [vmem:[#allocation3 + $0xa0] sm:$0xf]  ;;  %v8608_v17 = vor.u32 %v9877_v29, %v8605_v10  ;;  %v9859_v26 = vld [vmem:[#allocation3 + $0x24] sm:$0xf]  ;;  %v11560_v10 = vpack.c.bf16 %v11549_v6, %v11549_v6 }
 0x6fc   :  { %4402 = vmatpush.bf16.msra.mxu2 %v8548_v30  ;;  %v9876_v44 = vld [vmem:[#allocation3 + $0xa4] sm:$0xf0]  ;;  %v8533_v24 = vld [vmem:[#allocation3 + $0x28] sm:$0xf0]  ;;  %v9875_v46 = vld [vmem:[#allocation3 + $0xa4] sm:$0xf]  ;;  %v8532_v4 = vor.u32 %v9860_v31, %v8531_v34 }
 0x6fd   :  { %4415 = vmatpush.bf16.msra.mxu3 %v8612_v9  ;;  %v8597_v48 = vld [vmem:[#allocation3 + $0xa8] sm:$0xf0]  ;;  %v8596_v27 = vor.u32 %v9876_v44, %v8595_v58  ;;  %v8536_v56 = vor.u32 %v9859_v26, %v8533_v24  ;;  %v8523_v43 = vld [vmem:[#allocation3 + $0x10] sm:$0xf]  ;;  %v9858_v12 = vld [vmem:[#allocation3 + $0x14] sm:$0xf0] }
 0x6fe   :  { %4428 = vmatpush.bf16.msra.mxu0 %v8552_v25  ;;  %v8587_v41 = vld [vmem:[#allocation3 + $0x90] sm:$0xf]  ;;  %v8600_v21 = vor.u32 %v9875_v46, %v8597_v48  ;;  %v9874_v38 = vld [vmem:[#allocation3 + $0x94] sm:$0xf0]  ;;  %v9857_v49 = vld [vmem:[#allocation3 + $0x14] sm:$0xf]  ;;  %v8524_v1 = vor.u32 %v9858_v12, %v8523_v43 }
 0x6ff   :  { %4441 = vmatpush.bf16.msra.mxu1 %v8616_v60  ;;  %v8525_v7 = vld [vmem:[#allocation3 + $0x18] sm:$0xf0]  ;;  %v9873_v2 = vld [vmem:[#allocation3 + $0x94] sm:$0xf]  ;;  %v8515_v39 = vld [vmem:[#allocation3] sm:$0xf]  ;;  %v8588_v40 = vor.u32 %v9874_v38, %v8587_v41 }
 0x700   :  { %4403 = vmatpush.bf16.msra.mxu2 %v8540_v61  ;;  %v8589_v62 = vld [vmem:[#allocation3 + $0x98] sm:$0xf0]  ;;  %v9856_v51 = vld [vmem:[#allocation3 + $0x4] sm:$0xf0]  ;;  %v8528_v52 = vor.u32 %v9857_v49, %v8525_v7  ;;  %v8579_v14 = vld [vmem:[#allocation3 + $0x80] sm:$0xf] }
 0x701   :  { %4416 = vmatpush.bf16.msra.mxu3 %v8604_v15  ;;  %v9872_v3 = vld [vmem:[#allocation3 + $0x84] sm:$0xf0]  ;;  %v9855_v16 = vld [vmem:[#allocation3 + $0x4] sm:$0xf]  ;;  %v8592_v35 = vor.u32 %v9873_v2, %v8589_v62  ;;  %v8517_v32 = vld [vmem:[#allocation3 + $0x8] sm:$0xf0]  ;;  %v8516_v5 = vor.u32 %v9856_v51, %v8515_v39 }
 0x702   :  { %4429 = vmatpush.bf16.msra.mxu0 %v8544_v13  ;;  %v9871_v37 = vld [vmem:[#allocation3 + $0x84] sm:$0xf]  ;;  %v8581_v45 = vld [vmem:[#allocation3 + $0x88] sm:$0xf0]  ;;  %v8700_v63 = vld [vmem:[#allocation3 + $0x170] sm:$0xf]  ;;  %v8580_v36 = vor.u32 %v9872_v3, %v8579_v14  ;;  %v8520_v42 = vor.u32 %v9855_v16, %v8517_v32 }
 0x703   :  { %4442 = vmatpush.bf16.msra.mxu1 %v8608_v17  ;;  %v9902_v18 = vld [vmem:[#allocation3 + $0x174] sm:$0xf0]  ;;  %v8764_v50 = vld [vmem:[#allocation3 + $0x1f0] sm:$0xf]  ;;  %v9901_v19 = vld [vmem:[#allocation3 + $0x174] sm:$0xf]  ;;  %v8584_v28 = vor.u32 %v9871_v37, %v8581_v45 }
 0x704   :  { %4404 = vmatpush.bf16.msra.mxu2 %v8532_v4  ;;  %v9918_v47 = vld [vmem:[#allocation3 + $0x1f4] sm:$0xf0]  ;;  %v8702_v55 = vld [vmem:[#allocation3 + $0x178] sm:$0xf0]  ;;  %v9917_v23 = vld [vmem:[#allocation3 + $0x1f4] sm:$0xf]  ;;  %v8701_v54 = vor.u32 %v9902_v18, %v8700_v63 }
 0x705   :  { %4417 = vmatpush.bf16.msra.mxu3 %v8596_v27  ;;  %v8766_v0 = vld [vmem:[#allocation3 + $0x1f8] sm:$0xf0]  ;;  %v8765_v53 = vor.u32 %v9918_v47, %v8764_v50  ;;  %v8705_v30 = vor.u32 %v9901_v19, %v8702_v55  ;;  %v8692_v9 = vld [vmem:[#allocation3 + $0x160] sm:$0xf]  ;;  %v9900_v25 = vld [vmem:[#allocation3 + $0x164] sm:$0xf0] }
 0x706   :  { %4430 = vmatpush.bf16.msra.mxu0 %v8536_v56  ;;  %v8756_v33 = vld [vmem:[#allocation3 + $0x1e0] sm:$0xf]  ;;  %v8769_v57 = vor.u32 %v9917_v23, %v8766_v0  ;;  %v9916_v20 = vld [vmem:[#allocation3 + $0x1e4] sm:$0xf0]  ;;  %v9899_v60 = vld [vmem:[#allocation3 + $0x164] sm:$0xf]  ;;  %v8693_v61 = vor.u32 %v9900_v25, %v8692_v9 }
 0x707   :  { %4443 = vmatpush.bf16.msra.mxu1 %v8600_v21  ;;  %v8694_v59 = vld [vmem:[#allocation3 + $0x168] sm:$0xf0]  ;;  %v9915_v22 = vld [vmem:[#allocation3 + $0x1e4] sm:$0xf]  ;;  %v8757_v15 = vor.u32 %v9916_v20, %v8756_v33  ;;  %v8684_v34 = vld [vmem:[#allocation3 + $0x150] sm:$0xf] }
 0x708   :  { %4405 = vmatpush.bf16.msra.mxu2 %v8524_v1  ;;  %v8758_v29 = vld [vmem:[#allocation3 + $0x1e8] sm:$0xf0]  ;;  %v8697_v13 = vor.u32 %v9899_v60, %v8694_v59  ;;  %v9898_v31 = vld [vmem:[#allocation3 + $0x154] sm:$0xf0]  ;;  %v8748_v58 = vld [vmem:[#allocation3 + $0x1d0] sm:$0xf] }
 0x709   :  { %4418 = vmatpush.bf16.msra.mxu3 %v8588_v40  ;;  %v8761_v8 = vor.u32 %v9915_v22, %v8758_v29  ;;  %v9914_v17 = vld [vmem:[#allocation3 + $0x1d4] sm:$0xf0]  ;;  %v9897_v44 = vld [vmem:[#allocation3 + $0x154] sm:$0xf]  ;;  %v8686_v26 = vld [vmem:[#allocation3 + $0x158] sm:$0xf0]  ;;  %v8685_v46 = vor.u32 %v9898_v31, %v8684_v34 }
 0x70a   :  { %4431 = vmatpush.bf16.msra.mxu0 %v8528_v52  ;;  %v9913_v24 = vld [vmem:[#allocation3 + $0x1d4] sm:$0xf]  ;;  %v8750_v6 = vld [vmem:[#allocation3 + $0x1d8] sm:$0xf0]  ;;  %v8749_v48 = vor.u32 %v9914_v17, %v8748_v58  ;;  %v8689_v4 = vor.u32 %v9897_v44, %v8686_v26  ;;  %v8676_v27 = vld [vmem:[#allocation3 + $0x140] sm:$0xf] }
 0x70b   :  { %4444 = vmatpush.bf16.msra.mxu1 %v8592_v35  ;;  %v9896_v56 = vld [vmem:[#allocation3 + $0x144] sm:$0xf0]  ;;  %v8740_v43 = vld [vmem:[#allocation3 + $0x1c0] sm:$0xf]  ;;  %v8753_v12 = vor.u32 %v9913_v24, %v8750_v6  ;;  %v9895_v21 = vld [vmem:[#allocation3 + $0x144] sm:$0xf] }
 0x70c   :  { %4406 = vmatpush.bf16.msra.mxu2 %v8516_v5  ;;  %v9912_v41 = vld [vmem:[#allocation3 + $0x1c4] sm:$0xf0]  ;;  %v8678_v38 = vld [vmem:[#allocation3 + $0x148] sm:$0xf0]  ;;  %v9911_v49 = vld [vmem:[#allocation3 + $0x1c4] sm:$0xf]  ;;  %v8677_v2 = vor.u32 %v9896_v56, %v8676_v27 }
 0x70d   :  { %4419 = vmatpush.bf16.msra.mxu3 %v8580_v36  ;;  %v8742_v7 = vld [vmem:[#allocation3 + $0x1c8] sm:$0xf0]  ;;  %v8741_v62 = vor.u32 %v9912_v41, %v8740_v43  ;;  %v8681_v1 = vor.u32 %v9895_v21, %v8678_v38  ;;  %v8668_v39 = vld [vmem:[#allocation3 + $0x130] sm:$0xf]  ;;  %v9894_v51 = vld [vmem:[#allocation3 + $0x134] sm:$0xf0] }
 0x70e   :  { %4432 = vmatpush.bf16.msra.mxu0 %v8520_v42  ;;  %v8732_v40 = vld [vmem:[#allocation3 + $0x1b0] sm:$0xf]  ;;  %v8745_v52 = vor.u32 %v9911_v49, %v8742_v7  ;;  %v9910_v14 = vld [vmem:[#allocation3 + $0x1b4] sm:$0xf0]  ;;  %v9893_v3 = vld [vmem:[#allocation3 + $0x134] sm:$0xf]  ;;  %v8669_v37 = vor.u32 %v9894_v51, %v8668_v39 }
 0x70f   :  { %4445 = vmatpush.bf16.msra.mxu1 %v8584_v28  ;;  %4407 = vmatmul.bf16.vlgmr.msra.gmra.mxu2 %v11556_v11  ;;  %v8670_v16 = vld [vmem:[#allocation3 + $0x138] sm:$0xf0]  ;;  %v9909_v35 = vld [vmem:[#allocation3 + $0x1b4] sm:$0xf]  ;;  %v8733_v45 = vor.u32 %v9910_v14, %v8732_v40  ;;  %v8660_v18 = vld [vmem:[#allocation3 + $0x120] sm:$0xf] }
 0x710   :  { %4653 = vmatpush.bf16.msrb.mxu2 %v8701_v54  ;;  %4420 = vmatmul.bf16.vlgmr.msra.gmra.mxu3 %v11560_v10  ;;  %v8734_v32 = vld [vmem:[#allocation3 + $0x1b8] sm:$0xf0]  ;;  %v8673_v63 = vor.u32 %v9893_v3, %v8670_v16  ;;  %v9892_v50 = vld [vmem:[#allocation3 + $0x124] sm:$0xf0]  ;;  %v8724_v5 = vld [vmem:[#allocation3 + $0x1a0] sm:$0xf] }
 0x711   :  { %4666 = vmatpush.bf16.msrb.mxu3 %v8765_v53  ;;  %4433 = vmatmul.bf16.vlgmr.msra.gmra.mxu0 %v11556_v11  ;;  %v8737_v47 = vor.u32 %v9909_v35, %v8734_v32  ;;  %v9908_v19 = vld [vmem:[#allocation3 + $0x1a4] sm:$0xf0]  ;;  %v9891_v55 = vld [vmem:[#allocation3 + $0x124] sm:$0xf]  ;;  %v8662_v36 = vld [vmem:[#allocation3 + $0x128] sm:$0xf0]  ;;  %v8661_v0 = vor.u32 %v9892_v50, %v8660_v18 }
 0x712   :  { %4679 = vmatpush.bf16.msrb.mxu0 %v8705_v30  ;;  %4446 = vmatmul.bf16.vlgmr.msra.gmra.mxu1 %v11560_v10  ;;  %v9907_v42 = vld [vmem:[#allocation3 + $0x1a4] sm:$0xf]  ;;  %v8726_v23 = vld [vmem:[#allocation3 + $0x1a8] sm:$0xf0]  ;;  %v8725_v28 = vor.u32 %v9908_v19, %v8724_v5  ;;  %v8665_v54 = vor.u32 %v9891_v55, %v8662_v36  ;;  %v8652_v53 = vld [vmem:[#allocation3 + $0x110] sm:$0xf] }
 0x713   :  { %4692 = vmatpush.bf16.msrb.mxu1 %v8769_v57  ;;  %v9890_v30 = vld [vmem:[#allocation3 + $0x114] sm:$0xf0]  ;;  %v8716_v9 = vld [vmem:[#allocation3 + $0x190] sm:$0xf]  ;;  %v8729_v25 = vor.u32 %v9907_v42, %v8726_v23  ;;  %v9889_v57 = vld [vmem:[#allocation3 + $0x114] sm:$0xf] }
 0x714   :  { %4654 = vmatpush.bf16.msrb.mxu2 %v8693_v61  ;;  %v9906_v33 = vld [vmem:[#allocation3 + $0x194] sm:$0xf0]  ;;  %v8654_v20 = vld [vmem:[#allocation3 + $0x118] sm:$0xf0]  ;;  %v9905_v60 = vld [vmem:[#allocation3 + $0x194] sm:$0xf]  ;;  %v8653_v22 = vor.u32 %v9890_v30, %v8652_v53 }
 0x715   :  { %4667 = vmatpush.bf16.msrb.mxu3 %v8757_v15  ;;  %v8718_v59 = vld [vmem:[#allocation3 + $0x198] sm:$0xf0]  ;;  %v8644_v29 = vld [vmem:[#allocation3 + $0x100] sm:$0xf]  ;;  %v9888_v61 = vld [vmem:[#allocation3 + $0x104] sm:$0xf0]  ;;  %v8717_v15 = vor.u32 %v9906_v33, %v8716_v9 }
 0x716   :  { %4680 = vmatpush.bf16.msrb.mxu0 %v8697_v13  ;;  %v8657_v13 = vor.u32 %v9889_v57, %v8654_v20  ;;  %v8708_v34 = vld [vmem:[#allocation3 + $0x180] sm:$0xf]  ;;  %v9904_v31 = vld [vmem:[#allocation3 + $0x184] sm:$0xf0]  ;;  %v9887_v58 = vld [vmem:[#allocation3 + $0x104] sm:$0xf] }
 0x717   :  { %4693 = vmatpush.bf16.msrb.mxu1 %v8761_v8  ;;  %v8721_v8 = vor.u32 %v9905_v60, %v8718_v59  ;;  %v8646_v17 = vld [vmem:[#allocation3 + $0x108] sm:$0xf0]  ;;  %v9903_v44 = vld [vmem:[#allocation3 + $0x184] sm:$0xf]  ;;  %v8829_v24 = vld [vmem:[#allocation3 + $0x270] sm:$0xf]  ;;  %v8709_v43 = vor.u32 %v9904_v31, %v8708_v34 }
 0x718   :  { %4655 = vmatpush.bf16.msrb.mxu2 %v8685_v46  ;;  %v8710_v26 = vld [vmem:[#allocation3 + $0x188] sm:$0xf0]  ;;  %v9934_v6 = vld [vmem:[#allocation3 + $0x274] sm:$0xf0]  ;;  %v8893_v46 = vld [vmem:[#allocation3 + $0x2f0] sm:$0xf] }
 0x719   :  { %4668 = vmatpush.bf16.msrb.mxu3 %v8749_v48  ;;  %v8645_v48 = vor.u32 %v9888_v61, %v8644_v29  ;;  %v9933_v27 = vld [vmem:[#allocation3 + $0x274] sm:$0xf]  ;;  %v8831_v56 = vld [vmem:[#allocation3 + $0x278] sm:$0xf0]  ;;  %v8713_v38 = vor.u32 %v9903_v44, %v8710_v26  ;;  %v8830_v49 = vor.u32 %v9934_v6, %v8829_v24  ;;  %v8885_v39 = vld [vmem:[#allocation3 + $0x2e0] sm:$0xf] }
 0x71a   :  { %4681 = vmatpush.bf16.msrb.mxu0 %v8689_v4  ;;  %v9950_v4 = vld [vmem:[#allocation3 + $0x2f4] sm:$0xf0]  ;;  %v9949_v41 = vld [vmem:[#allocation3 + $0x2f4] sm:$0xf]  ;;  %v8895_v21 = vld [vmem:[#allocation3 + $0x2f8] sm:$0xf0] }
 0x71b   :  { %4694 = vmatpush.bf16.msrb.mxu1 %v8753_v12  ;;  %v8649_v12 = vor.u32 %v9887_v58, %v8646_v17  ;;  %v8894_v7 = vor.u32 %v9950_v4, %v8893_v46  ;;  %v8898_v51 = vor.u32 %v9949_v41, %v8895_v21  ;;  %v9948_v40 = vld [vmem:[#allocation3 + $0x2e4] sm:$0xf0]  ;;  %v8823_v14 = vld [vmem:[#allocation3 + $0x268] sm:$0xf0]  ;;  %v9947_v3 = vld [vmem:[#allocation3 + $0x2e4] sm:$0xf] }
 0x71c   :  { %4656 = vmatpush.bf16.msrb.mxu2 %v8677_v2  ;;  %v8834_v2 = vor.u32 %v9933_v27, %v8831_v56  ;;  %v8887_v16 = vld [vmem:[#allocation3 + $0x2e8] sm:$0xf0]  ;;  %v8886_v32 = vor.u32 %v9948_v40, %v8885_v39  ;;  %v8877_v18 = vld [vmem:[#allocation3 + $0x2d0] sm:$0xf]  ;;  %v9946_v5 = vld [vmem:[#allocation3 + $0x2d4] sm:$0xf0] }
 0x71d   :  { %4669 = vmatpush.bf16.msrb.mxu3 %v8741_v62  ;;  %v8821_v62 = vld [vmem:[#allocation3 + $0x260] sm:$0xf]  ;;  %v8890_v50 = vor.u32 %v9947_v3, %v8887_v16  ;;  %v8815_v19 = vld [vmem:[#allocation3 + $0x258] sm:$0xf0]  ;;  %v9945_v55 = vld [vmem:[#allocation3 + $0x2d4] sm:$0xf]  ;;  %v8878_v23 = vor.u32 %v9946_v5, %v8877_v18 }
 0x71e   :  { %4682 = vmatpush.bf16.msrb.mxu0 %v8681_v1  ;;  %v9932_v1 = vld [vmem:[#allocation3 + $0x264] sm:$0xf0]  ;;  %v8879_v36 = vld [vmem:[#allocation3 + $0x2d8] sm:$0xf0]  ;;  %v8869_v53 = vld [vmem:[#allocation3 + $0x2c0] sm:$0xf] }
 0x71f   :  { %4695 = vmatpush.bf16.msrb.mxu1 %v8745_v52  ;;  %v9931_v52 = vld [vmem:[#allocation3 + $0x264] sm:$0xf]  ;;  %v8822_v35 = vor.u32 %v9932_v1, %v8821_v62  ;;  %v8882_v30 = vor.u32 %v9945_v55, %v8879_v36  ;;  %v9944_v9 = vld [vmem:[#allocation3 + $0x2c4] sm:$0xf0]  ;;  %v8807_v33 = vld [vmem:[#allocation3 + $0x248] sm:$0xf0] }
 0x720   :  { %4657 = vmatpush.bf16.msrb.mxu2 %v8669_v37  ;;  %v8826_v37 = vor.u32 %v9931_v52, %v8823_v14  ;;  %v9943_v57 = vld [vmem:[#allocation3 + $0x2c4] sm:$0xf]  ;;  %v8871_v20 = vld [vmem:[#allocation3 + $0x2c8] sm:$0xf0]  ;;  %v8870_v59 = vor.u32 %v9944_v9, %v8869_v53  ;;  %v8797_v29 = vld [vmem:[#allocation3 + $0x230] sm:$0xf] }
 0x721   :  { %4670 = vmatpush.bf16.msrb.mxu3 %v8733_v45  ;;  %v8813_v45 = vld [vmem:[#allocation3 + $0x250] sm:$0xf]  ;;  %v9926_v61 = vld [vmem:[#allocation3 + $0x234] sm:$0xf0]  ;;  %v9925_v31 = vld [vmem:[#allocation3 + $0x234] sm:$0xf] }
 0x722   :  { %4683 = vmatpush.bf16.msrb.mxu0 %v8673_v63  ;;  %v9930_v63 = vld [vmem:[#allocation3 + $0x254] sm:$0xf0]  ;;  %v8799_v58 = vld [vmem:[#allocation3 + $0x238] sm:$0xf0]  ;;  %v8798_v44 = vor.u32 %v9926_v61, %v8797_v29  ;;  %v8789_v6 = vld [vmem:[#allocation3 + $0x220] sm:$0xf] }
 0x723   :  { %4696 = vmatpush.bf16.msrb.mxu1 %v8737_v47  ;;  %v9929_v47 = vld [vmem:[#allocation3 + $0x254] sm:$0xf]  ;;  %v8814_v42 = vor.u32 %v9930_v63, %v8813_v45  ;;  %v9942_v34 = vld [vmem:[#allocation3 + $0x2b4] sm:$0xf0]  ;;  %v8863_v17 = vld [vmem:[#allocation3 + $0x2b8] sm:$0xf0]  ;;  %v8802_v24 = vor.u32 %v9925_v31, %v8799_v58 }
 0x724   :  { %4658 = vmatpush.bf16.msrb.mxu2 %v8661_v0  ;;  %v8818_v0 = vor.u32 %v9929_v47, %v8815_v19  ;;  %v9924_v46 = vld [vmem:[#allocation3 + $0x224] sm:$0xf0]  ;;  %v9923_v56 = vld [vmem:[#allocation3 + $0x224] sm:$0xf]  ;;  %v8855_v41 = vld [vmem:[#allocation3 + $0x2a8] sm:$0xf0] }
 0x725   :  { %4671 = vmatpush.bf16.msrb.mxu3 %v8725_v28  ;;  %v8805_v28 = vld [vmem:[#allocation3 + $0x240] sm:$0xf]  ;;  %v9940_v27 = vld [vmem:[#allocation3 + $0x2a4] sm:$0xf0]  ;;  %v8790_v21 = vor.u32 %v9924_v46, %v8789_v6  ;;  %s12171_s8 = sld [smem:[#allocation27_spill]]  ;;  %vm6251_vm5 = vcmask 1041408  }
 0x726   :  { %4684 = vmatpush.bf16.msrb.mxu0 %v8665_v54  ;;  %v9928_v54 = vld [vmem:[#allocation3 + $0x244] sm:$0xf0]  ;;  %v8845_v62 = vld [vmem:[#allocation3 + $0x290] sm:$0xf]  ;;  %v9938_v39 = vld [vmem:[#allocation3 + $0x294] sm:$0xf0] }
 0x727   :  { %4697 = vmatpush.bf16.msrb.mxu1 %v8729_v25  ;;  %v9927_v25 = vld [vmem:[#allocation3 + $0x244] sm:$0xf]  ;;  %v8806_v60 = vor.u32 %v9928_v54, %v8805_v28  ;;  %v8783_v40 = vld [vmem:[#allocation3 + $0x218] sm:$0xf0]  ;;  %v9937_v52 = vld [vmem:[#allocation3 + $0x294] sm:$0xf]  ;;  %v8846_v45 = vor.u32 %v9938_v39, %v8845_v62 }
 0x728   :  { %4659 = vmatpush.bf16.msrb.mxu2 %v8653_v22  ;;  %v8810_v22 = vor.u32 %v9927_v25, %v8807_v33  ;;  %v8847_v14 = vld [vmem:[#allocation3 + $0x298] sm:$0xf0]  ;;  %v8773_v3 = vld [vmem:[#allocation3 + $0x200] sm:$0xf]  ;;  %v9936_v18 = vld [vmem:[#allocation3 + $0x284] sm:$0xf0] }
 0x729   :  { %4672 = vmatpush.bf16.msrb.mxu3 %v8717_v15  ;;  %v8861_v15 = vld [vmem:[#allocation3 + $0x2b0] sm:$0xf]  ;;  %s12172_s19 = sld [smem:[#allocation28_spill]]  ;;  %v8775_v5 = vld [vmem:[#allocation3 + $0x208] sm:$0xf0]  ;;  %v8850_v47 = vor.u32 %v9937_v52, %v8847_v14  ;;  %vm6254_vm6 = vcmask 1042432  }
 0x72a   :  { %4685 = vmatpush.bf16.msrb.mxu0 %v8657_v13  ;;  %v8874_v13 = vor.u32 %v9943_v57, %v8871_v20  ;;  %v8862_v26 = vor.u32 %v9942_v34, %v8861_v15  ;;  %v9935_v19 = vld [vmem:[#allocation3 + $0x284] sm:$0xf]  ;;  %v8839_v55 = vld [vmem:[#allocation3 + $0x288] sm:$0xf0]  ;;  %v8958_v36 = vld [vmem:[#allocation3 + $0x370] sm:$0xf] }
 0x72b   :  { %4698 = vmatpush.bf16.msrb.mxu1 %v8721_v8  ;;  %v9941_v8 = vld [vmem:[#allocation3 + $0x2b4] sm:$0xf]  ;;  %v8960_v53 = vld [vmem:[#allocation3 + $0x378] sm:$0xf0]  ;;  %v8842_v20 = vor.u32 %v9935_v19, %v8839_v55  ;;  %v8950_v29 = vld [vmem:[#allocation3 + $0x360] sm:$0xf] }
 0x72c   :  { %4660 = vmatpush.bf16.msrb.mxu2 %v8645_v48  ;;  %v8853_v48 = vld [vmem:[#allocation3 + $0x2a0] sm:$0xf]  ;;  %v8866_v4 = vor.u32 %v9941_v8, %v8863_v17  ;;  %v9965_v54 = vld [vmem:[#allocation3 + $0x374] sm:$0xf]  ;;  %v9024_v57 = vld [vmem:[#allocation3 + $0x3f8] sm:$0xf0] }
 0x72d   :  { %4673 = vmatpush.bf16.msrb.mxu3 %v8709_v43  ;;  %v8791_v43 = vld [vmem:[#allocation3 + $0x228] sm:$0xf0]  ;;  %v9981_v33 = vld [vmem:[#allocation3 + $0x3f4] sm:$0xf]  ;;  %v9964_v61 = vld [vmem:[#allocation3 + $0x364] sm:$0xf0] }
 0x72e   :  { %4686 = vmatpush.bf16.msrb.mxu0 %v8649_v12  ;;  %v9939_v12 = vld [vmem:[#allocation3 + $0x2a4] sm:$0xf]  ;;  %v9014_v15 = vld [vmem:[#allocation3 + $0x3e0] sm:$0xf]  ;;  %v9980_v34 = vld [vmem:[#allocation3 + $0x3e4] sm:$0xf0] }
 0x72f   :  { %4699 = vmatpush.bf16.msrb.mxu1 %v8713_v38  ;;  %4661 = vmatmul.bf16.vlgmr.msrb.gmra.mxu2 %v11556_v11  ;;  %v8854_v38 = vor.u32 %v9940_v27, %v8853_v48  ;;  %v8858_v1 = vor.u32 %v9939_v12, %v8855_v41  ;;  %v9963_v31 = vld [vmem:[#allocation3 + $0x364] sm:$0xf]  ;;  %v8952_v58 = vld [vmem:[#allocation3 + $0x368] sm:$0xf0]  ;;  %v8942_v6 = vld [vmem:[#allocation3 + $0x350] sm:$0xf] }
 0x730   :  { %4907 = vmatpush.bf16.msra.mxu2 %v8830_v49  ;;  %4674 = vmatmul.bf16.vlgmr.msrb.gmra.mxu3 %v11560_v10  ;;  %v8794_v49 = vor.u32 %v9923_v56, %v8791_v43  ;;  %v9979_v8 = vld [vmem:[#allocation3 + $0x3e4] sm:$0xf]  ;;  %v9016_v17 = vld [vmem:[#allocation3 + $0x3e8] sm:$0xf0]  ;;  %v9962_v46 = vld [vmem:[#allocation3 + $0x354] sm:$0xf0] }
 0x731   :  { %4920 = vmatpush.bf16.msra.mxu3 %v8894_v7  ;;  %4687 = vmatmul.bf16.vlgmr.msrb.gmra.mxu0 %v11556_v11  ;;  %v8781_v7 = vld [vmem:[#allocation3 + $0x210] sm:$0xf]  ;;  %v9978_v27 = vld [vmem:[#allocation3 + $0x3d4] sm:$0xf0]  ;;  %v9961_v56 = vld [vmem:[#allocation3 + $0x354] sm:$0xf] }
 0x732   :  { %4933 = vmatpush.bf16.msra.mxu0 %v8834_v2  ;;  %4700 = vmatmul.bf16.vlgmr.msrb.gmra.mxu1 %v11560_v10  ;;  %v9922_v2 = vld [vmem:[#allocation3 + $0x214] sm:$0xf0]  ;;  %v9006_v48 = vld [vmem:[#allocation3 + $0x3d0] sm:$0xf]  ;;  %v8944_v43 = vld [vmem:[#allocation3 + $0x358] sm:$0xf0] }
 0x733   :  { %4946 = vmatpush.bf16.msra.mxu1 %v8898_v51  ;;  %v9921_v51 = vld [vmem:[#allocation3 + $0x214] sm:$0xf]  ;;  %v8782_v16 = vor.u32 %v9922_v2, %v8781_v7  ;;  %v9008_v41 = vld [vmem:[#allocation3 + $0x3d8] sm:$0xf0]  ;;  %v9007_v7 = vor.u32 %v9978_v27, %v9006_v48  ;;  %v8947_v2 = vor.u32 %v9961_v56, %v8944_v43  ;;  %v8934_v62 = vld [vmem:[#allocation3 + $0x340] sm:$0xf] }
 0x734   :  { %4908 = vmatpush.bf16.msra.mxu2 %v8822_v35  ;;  %v9920_v35 = vld [vmem:[#allocation3 + $0x204] sm:$0xf0]  ;;  %v8786_v63 = vor.u32 %v9921_v51, %v8783_v40  ;;  %v9977_v12 = vld [vmem:[#allocation3 + $0x3d4] sm:$0xf]  ;;  %v8998_v39 = vld [vmem:[#allocation3 + $0x3c0] sm:$0xf] }
 0x735   :  { %4921 = vmatpush.bf16.msra.mxu3 %v8886_v32  ;;  %v8837_v32 = vld [vmem:[#allocation3 + $0x280] sm:$0xf]  ;;  %v8774_v28 = vor.u32 %v9920_v35, %v8773_v3  ;;  %v9011_v51 = vor.u32 %v9977_v12, %v9008_v41  ;;  %v9976_v40 = vld [vmem:[#allocation3 + $0x3c4] sm:$0xf0]  ;;  %v9959_v52 = vld [vmem:[#allocation3 + $0x344] sm:$0xf] }
 0x736   :  { %4934 = vmatpush.bf16.msra.mxu0 %v8826_v37  ;;  %v11571_v37 = vld [vmem:[%s12171_s8 + $0x8] sm:$0xff]  ;;  %v8838_v9 = vor.u32 %v9936_v18, %v8837_v32  ;;  %v9975_v3 = vld [vmem:[#allocation3 + $0x3c4] sm:$0xf]  ;;  %s12173_s24 = sld [smem:[#allocation31_spill]]  ;;  %v8999_v32 = vor.u32 %v9976_v40, %v8998_v39  ;;  %v9958_v18 = vld [vmem:[#allocation3 + $0x334] sm:$0xf0] }
 0x737   :  { %4947 = vmatpush.bf16.msra.mxu1 %v8890_v50  ;;  %v9919_v50 = vld [vmem:[#allocation3 + $0x204] sm:$0xf]  ;;  %6268 = vperm.xlu0 %10175, %v11571_v37   ;;  %v8936_v14 = vld [vmem:[#allocation3 + $0x348] sm:$0xf0]  ;;  %v9957_v19 = vld [vmem:[#allocation3 + $0x334] sm:$0xf] }
 0x738   :  { %4909 = vmatpush.bf16.msra.mxu2 %v8814_v42  ;;  %v9966_v42 = vld [vmem:[#allocation3 + $0x374] sm:$0xf0]  ;;  %v8778_v25 = vor.u32 %v9919_v50, %v8775_v5  ;;  %v8990_v50 = vld [vmem:[#allocation3 + $0x3b0] sm:$0xf]  ;;  %v8928_v55 = vld [vmem:[#allocation3 + $0x338] sm:$0xf0] }
 0x739   :  { %4922 = vmatpush.bf16.msra.mxu3 %v8878_v23  ;;  %v9022_v23 = vld [vmem:[#allocation3 + $0x3f0] sm:$0xf]  ;;  %s12174_s30 = sld [smem:[#allocation32_spill]]  ;;  %v8902_v27 = vld [vmem:[#allocation3 + $0x300] sm:$0xf]  ;;  %vm6278_vm7 = vcmask 1043456  }
 0x73a   :  { %4935 = vmatpush.bf16.msra.mxu0 %v8818_v0  ;;  %v9982_v0 = vld [vmem:[#allocation3 + $0x3f4] sm:$0xf0]  ;;  %s12175_s6 = sld [smem:[#allocation29_spill]]  ;;  %v9952_v41 = vld [vmem:[#allocation3 + $0x304] sm:$0xf0]  ;;  %vm6271_vm8 = vcmask 31744  }
 0x73b   :  { %4948 = vmatpush.bf16.msra.mxu1 %v8882_v30  ;;  %v11575_v30 = vld [vmem:[%s12172_s19 + $0x8] sm:$0xff]  ;;  %v9967_v39 = vld [vmem:[#allocation3 + $0x384] sm:$0xf]  ;;  %v9087_v40 = vld [vmem:[#allocation3 + $0x470] sm:$0xf]  ;;  %s12176_s12 = sld [smem:[#allocation33_spill]] }
 0x73c   :  { %4910 = vmatpush.bf16.msra.mxu2 %v8806_v60  ;;  %v8959_v60 = vor.u32 %v9966_v42, %v8958_v36  ;;  %6344 = vperm.xlu1 %10176, %v11575_v30   ;;  %v9973_v36 = vld [vmem:[#allocation3 + $0x3b4] sm:$0xf]  ;;  %v8992_v42 = vld [vmem:[#allocation3 + $0x3b8] sm:$0xf0]  ;;  %v11605_v56 = vld [vmem:[%s12173_s24 + $0x20] sm:$0xff]  ;;  %s12177_s22 = sld [smem:[#allocation25_spill]] }
 0x73d   :  { %4923 = vmatpush.bf16.msra.mxu3 %v8870_v59  ;;  %v9023_v59 = vor.u32 %v9982_v0, %v9022_v23  ;;  %v11591_v23 = vld [vmem:[%s12173_s24 + $0x38] sm:$0xff]  ;;  %s12178_s23 = sld [smem:[#allocation35_spill]]  ;;  %s10314_s10 = smov [#allocation7]  }
 0x73e   :  { %4936 = vmatpush.bf16.msra.mxu0 %v8810_v22  ;;  %v8963_v22 = vor.u32 %v9965_v54, %v8960_v53  ;;  %v8931_v53 = vor.u32 %v9957_v19, %v8928_v55  ;;  %v10012_v19 = vld [vmem:[#allocation3 + $0x4e4] sm:$0xf0]  ;;  %s12179_s26 = sld [smem:[#allocation26_spill]]  ;;  %s7350_s11 = sshll.u32 %s10314_s10, 4  ;;  %s7351_s11 = int_to_ptr.vmem [resolvable:$true] %s7350_s11 }
 0x73f   :  { %4949 = vmatpush.bf16.msra.mxu1 %v8874_v13  ;;  %v9027_v13 = vor.u32 %v9981_v33, %v9024_v57  ;;  %v8982_v33 = vld [vmem:[#allocation3 + $0x3a0] sm:$0xf]  ;;  %v8995_v57 = vor.u32 %v9973_v36, %v8992_v42  ;;  %s12180_s28 = sld [smem:[#allocation36_spill]]  ;;  %s7352_s15 = sshll.u32 %s10515_s14, 4  ;;  %s7353_s15 = int_to_ptr.hbm [resolvable:$true] %s7352_s15 }
 0x740   :  { %4911 = vmatpush.bf16.msra.mxu2 %v8798_v44  ;;  %v8951_v44 = vor.u32 %v9964_v61, %v8950_v29  ;;  %v8984_v29 = vld [vmem:[#allocation3 + $0x3a8] sm:$0xf0]  ;;  %s12181_s1 = sld [smem:[#allocation37_spill]]  ;;  %s10206_s16 = sshra.s32 %s7353_s15, 4  ;;  %s10207_s16 = int_to_ptr.hbm [resolvable:$true] %s10206_s16 }
 0x741   :  { %4924 = vmatpush.bf16.msra.mxu3 %v8862_v26  ;;  %v9015_v26 = vor.u32 %v9980_v34, %v9014_v15  ;;  %v8910_v15 = vld [vmem:[#allocation3 + $0x310] sm:$0xf]  ;;  %v11602_v48 = vld [vmem:[%s12175_s6 + $0x8] sm:$0xff]  ;;  %v11611_v36 = vld [vmem:[%s12176_s12 + $0x38] sm:$0xff]  ;;  %s12182_s2 = sld [smem:[#allocation30_spill]]  ;;  %s10208_s18 = scalar_lea.hbm %s10207_s16, 1 }
 0x742   :  { %4937 = vmatpush.bf16.msra.mxu0 %v8802_v24  ;;  %v8955_v24 = vor.u32 %v9963_v31, %v8952_v58  ;;  %v9954_v31 = vld [vmem:[#allocation3 + $0x314] sm:$0xf0]  ;;  %v8974_v58 = vld [vmem:[#allocation3 + $0x390] sm:$0xf]  ;;  %6360 = vperm.xlu2 %10177, %v11602_v48   ;;  %s12183_s7 = sld [smem:[#allocation34_spill]]  ;;  %p10209_p0 = scmp.ne.s32.totalorder %s10207_s16, %s10208_s18 }
 0x743   :  { %4950 = vmatpush.bf16.msra.mxu1 %v8866_v4  ;;  %v9019_v4 = vor.u32 %v9979_v8, %v9016_v17  ;;  %v9970_v8 = vld [vmem:[#allocation3 + $0x394] sm:$0xf0]  ;;  %s10210_s0 = scalar_lea.hbm %s10515_s14, 1  ;;  %p10211_p1 = scmp.lt.s32.totalorder %s10207_s16, %s10515_s14 }
 0x744   :  { %4912 = vmatpush.bf16.msra.mxu2 %v8790_v21  ;;  %v11582_v21 = vld [vmem:[%s12171_s8] sm:$0xff]  ;;  %v8975_v43 = vor.u32 %v9970_v8, %v8974_v58  ;;  %v11630_v58 = vld [vmem:[%s12173_s24 + $0x10] sm:$0xff]  ;;  %p10212_p2 = scmp.lt.s32.totalorder %s10210_s0, %s10208_s18 }
 0x745   :  { %4925 = vmatpush.bf16.msra.mxu3 %v8854_v38  ;;  %v8943_v38 = vor.u32 %v9962_v46, %v8942_v6  ;;  %6263 = vperm.xlu0 %10175, %v11582_v21   ;;  %v8976_v6 = vld [vmem:[#allocation3 + $0x398] sm:$0xf0]  ;;  %v9119_v8 = vld [vmem:[#allocation3 + $0x4b0] sm:$0xf] }
 0x746   :  { %4938 = vmatpush.bf16.msra.mxu0 %v8794_v49  ;;  %v11586_v49 = vld [vmem:[%s12172_s19] sm:$0xff]  ;;  %v11599_v46 = vld [vmem:[%s12174_s30 + $0x38] sm:$0xff]  ;;  %p10213_p3 = por %p10212_p2, %p10211_p1 }
 0x747   :  { %4951 = vmatpush.bf16.msra.mxu1 %v8858_v1  ;;  %v9960_v1 = vld [vmem:[#allocation3 + $0x344] sm:$0xf0]  ;;  %6339 = vperm.xlu1 %10176, %v11586_v49  }
 0x748   :  { %4913 = vmatpush.bf16.msra.mxu2 %v8782_v16  ;;  %v9000_v16 = vld [vmem:[#allocation3 + $0x3c8] sm:$0xf0]  ;;  %v8935_v35 = vor.u32 %v9960_v1, %v8934_v62  ;;  %v9951_v62 = vld [vmem:[#allocation3 + $0x304] sm:$0xf]  ;;  %p10214_p4 = pnand %p10213_p3, %p10209_p0 }
 0x749   :  { %4926 = vmatpush.bf16.msra.mxu3 %v8846_v45  ;;  %v8939_v45 = vor.u32 %v9959_v52, %v8936_v14  ;;  %v9003_v5 = vor.u32 %v9975_v3, %v9000_v16  ;;  %v8904_v1 = vld [vmem:[#allocation3 + $0x308] sm:$0xf0]  ;;  %v9998_v52 = vld [vmem:[#allocation3 + $0x474] sm:$0xf0]  ;;  %v8903_v14 = vor.u32 %v9952_v41, %v8902_v27  ;;  %v9151_v3 = vld [vmem:[#allocation3 + $0x4f0] sm:$0xf] }
 0x74a   :  { %4939 = vmatpush.bf16.msra.mxu0 %v8786_v63  ;;  %v8926_v63 = vld [vmem:[#allocation3 + $0x330] sm:$0xf]  ;;  %v10014_v16 = vld [vmem:[#allocation3 + $0x4f4] sm:$0xf0]  ;;  %v9111_v27 = vld [vmem:[#allocation3 + $0x4a0] sm:$0xf] }
 0x74b   :  { %4952 = vmatpush.bf16.msra.mxu1 %v8850_v47  ;;  %v9974_v47 = vld [vmem:[#allocation3 + $0x3b4] sm:$0xf0]  ;;  %v8927_v0 = vor.u32 %v9958_v18, %v8926_v63  ;;  %v9088_v63 = vor.u32 %v9998_v52, %v9087_v40  ;;  %v9152_v18 = vor.u32 %v10014_v16, %v9151_v3  ;;  %v11639_v41 = vld [vmem:[%s12176_s12 + $0x28] sm:$0xff]  ;;  %v9095_v16 = vld [vmem:[#allocation3 + $0x480] sm:$0xf] }
 0x74c   :  { %4914 = vmatpush.bf16.msra.mxu2 %v8774_v28  ;;  %v11594_v28 = vld [vmem:[%s12173_s24 + $0x30] sm:$0xff]  ;;  %v8991_v54 = vor.u32 %v9974_v47, %v8990_v50  ;;  %v9079_v50 = vld [vmem:[#allocation3 + $0x460] sm:$0xf]  ;;  %v9984_v3 = vld [vmem:[#allocation3 + $0x404] sm:$0xf0] }
 0x74d   :  { %4927 = vmatpush.bf16.msra.mxu3 %v8838_v9  ;;  %v8918_v9 = vld [vmem:[#allocation3 + $0x320] sm:$0xf]  ;;  %6420 = vperm.xlu0 %10175, %v11591_v23  }
 0x74e   :  { %4940 = vmatpush.bf16.msra.mxu0 %v8778_v25  ;;  %v9956_v25 = vld [vmem:[#allocation3 + $0x324] sm:$0xf0]  ;;  %v9143_v47 = vld [vmem:[#allocation3 + $0x4e0] sm:$0xf] }
 0x74f   :  { %4953 = vmatpush.bf16.msra.mxu1 %v8842_v20  ;;  %4915 = vmatmul.bf16.vlgmr.msra.gmra.mxu2 %v11556_v11  ;;  %v9972_v20 = vld [vmem:[#allocation3 + $0x3a4] sm:$0xf0]  ;;  %v8919_v61 = vor.u32 %v9956_v25, %v8918_v9  ;;  %v9144_v42 = vor.u32 %v10012_v19, %v9143_v47  ;;  %v9135_v9 = vld [vmem:[#allocation3 + $0x4d0] sm:$0xf]  ;;  %v10010_v25 = vld [vmem:[#allocation3 + $0x4d4] sm:$0xf0] }
 0x750   :  { %5161 = vmatpush.bf16.msrb.mxu2 %v8959_v60  ;;  %4928 = vmatmul.bf16.vlgmr.msra.gmra.mxu3 %v11560_v10  ;;  %v9955_v60 = vld [vmem:[#allocation3 + $0x324] sm:$0xf] }
 0x751   :  { %5174 = vmatpush.bf16.msrb.mxu3 %v9023_v59  ;;  %4941 = vmatmul.bf16.vlgmr.msra.gmra.mxu0 %v11556_v11  ;;  %v8920_v59 = vld [vmem:[#allocation3 + $0x328] sm:$0xf0] }
 0x752   :  { %5187 = vmatpush.bf16.msrb.mxu0 %v8963_v22  ;;  %4954 = vmatmul.bf16.vlgmr.msra.gmra.mxu1 %v11560_v10  ;;  %v9971_v22 = vld [vmem:[#allocation3 + $0x3a4] sm:$0xf]  ;;  %v8923_v34 = vor.u32 %v9955_v60, %v8920_v59  ;;  %v9063_v60 = vld [vmem:[#allocation3 + $0x440] sm:$0xf]  ;;  %v9992_v59 = vld [vmem:[#allocation3 + $0x444] sm:$0xf0] }
 0x753   :  { %5200 = vmatpush.bf16.msrb.mxu1 %v9027_v13  ;;  %6415 = vperm.xlu1 %10176, %v11594_v28   ;;  %v8983_v13 = vor.u32 %v9972_v20, %v8982_v33  ;;  %v8987_v17 = vor.u32 %v9971_v22, %v8984_v29  ;;  %v11620_v33 = vld [vmem:[%s12175_s6] sm:$0xff]  ;;  %v9136_v20 = vor.u32 %v10010_v25, %v9135_v9  ;;  %v10008_v29 = vld [vmem:[#allocation3 + $0x4c4] sm:$0xf0] }
 0x754   :  { %5162 = vmatpush.bf16.msrb.mxu2 %v8951_v44  ;;  %v9953_v44 = vld [vmem:[#allocation3 + $0x314] sm:$0xf]  ;;  %6355 = vperm.xlu2 %10177, %v11620_v33   ;;  %v9127_v22 = vld [vmem:[#allocation3 + $0x4c0] sm:$0xf]  ;;  %v10044_v25 = vld [vmem:[#allocation3 + $0x5e4] sm:$0xf0] }
 0x755   :  { %5175 = vmatpush.bf16.msrb.mxu3 %v9015_v26  ;;  %v8912_v26 = vld [vmem:[#allocation3 + $0x318] sm:$0xf0]  ;;  %6590 = vperm.xlu0 %10175, %v11599_v46   ;;  %v9272_v9 = vld [vmem:[#allocation3 + $0x5e0] sm:$0xf] }
 0x756   :  { %5188 = vmatpush.bf16.msrb.mxu0 %v8955_v24  ;;  %v9969_v24 = vld [vmem:[#allocation3 + $0x394] sm:$0xf]  ;;  %v8915_v12 = vor.u32 %v9953_v44, %v8912_v26  ;;  %v11633_v44 = vld [vmem:[%s12173_s24 + $0x28] sm:$0xff] }
 0x757   :  { %5201 = vmatpush.bf16.msrb.mxu1 %v9019_v4  ;;  %v8911_v4 = vor.u32 %v9954_v31, %v8910_v15  ;;  %v11627_v15 = vld [vmem:[%s12176_s12 + $0x30] sm:$0xff]  ;;  %v9990_v31 = vld [vmem:[#allocation3 + $0x434] sm:$0xf0] }
 0x758   :  { %5163 = vmatpush.bf16.msrb.mxu2 %v8943_v38  ;;  %v8966_v38 = vld [vmem:[#allocation3 + $0x380] sm:$0xf] }
 0x759   :  { %5176 = vmatpush.bf16.msrb.mxu3 %v9007_v7  ;;  %v9968_v7 = vld [vmem:[#allocation3 + $0x384] sm:$0xf0] }
 0x75a   :  { %5189 = vmatpush.bf16.msrb.mxu0 %v8947_v2  ;;  %v8979_v2 = vor.u32 %v9969_v24, %v8976_v6  ;;  %v9047_v6 = vld [vmem:[#allocation3 + $0x420] sm:$0xf] }
 0x75b   :  { %5202 = vmatpush.bf16.msrb.mxu1 %v9011_v51  ;;  %v8968_v51 = vld [vmem:[#allocation3 + $0x388] sm:$0xf0]  ;;  %6405 = vperm.xlu1 %10176, %v11605_v56  }
 0x75c   :  { %5164 = vmatpush.bf16.msrb.mxu2 %v8935_v35  ;;  %v8967_v35 = vor.u32 %v9968_v7, %v8966_v38  ;;  %6410 = vperm.xlu2 %10177, %v11633_v44   ;;  %v9039_v7 = vld [vmem:[#allocation3 + $0x410] sm:$0xf] }
 0x75d   :  { %5177 = vmatpush.bf16.msrb.mxu3 %v8999_v32  ;;  %v8907_v32 = vor.u32 %v9951_v62, %v8904_v1  ;;  %6654 = vperm.xlu0 %10175, %v11611_v36   ;;  %v11642_v62 = vld [vmem:[%s12173_s24 + $0x8] sm:$0xff]  ;;  %v9103_v1 = vld [vmem:[#allocation3 + $0x490] sm:$0xf] }
 0x75e   :  { %5190 = vmatpush.bf16.msrb.mxu0 %v8939_v45  ;;  %v8971_v45 = vor.u32 %v9967_v39, %v8968_v51  ;;  %v10002_v39 = vld [vmem:[#allocation3 + $0x494] sm:$0xf0]  ;;  %v11645_v51 = vld [vmem:[%s12174_s30 + $0x30] sm:$0xff] }
 0x75f   :  { %5203 = vmatpush.bf16.msrb.mxu1 %v9003_v5  ;;  %v9996_v5 = vld [vmem:[#allocation3 + $0x464] sm:$0xf0]  ;;  %v9104_v52 = vor.u32 %v10002_v39, %v9103_v1  ;;  %v10038_v1 = vld [vmem:[#allocation3 + $0x5b4] sm:$0xf0] }
 0x760   :  { %5165 = vmatpush.bf16.msrb.mxu2 %v8927_v0  ;;  %v9080_v55 = vor.u32 %v9996_v5, %v9079_v50  ;;  %v9071_v0 = vld [vmem:[#allocation3 + $0x450] sm:$0xf]  ;;  %v11651_v5 = vld [vmem:[%s12176_s12 + $0x20] sm:$0xff] }
 0x761   :  { %5178 = vmatpush.bf16.msrb.mxu3 %v8991_v54  ;;  %v9994_v54 = vld [vmem:[#allocation3 + $0x454] sm:$0xf0] }
 0x762   :  { %5191 = vmatpush.bf16.msrb.mxu0 %v8931_v53  ;;  %v11615_v53 = vld [vmem:[%s12173_s24 + $0x18] sm:$0xff] }
 0x763   :  { %5204 = vmatpush.bf16.msrb.mxu1 %v8995_v57  ;;  %v9072_v57 = vor.u32 %v9994_v54, %v9071_v0  ;;  %6400 = vperm.xlu1 %10176, %v11615_v53   ;;  %v9208_v0 = vld [vmem:[#allocation3 + $0x560] sm:$0xf]  ;;  %v10028_v54 = vld [vmem:[#allocation3 + $0x564] sm:$0xf0] }
 0x764   :  { %5166 = vmatpush.bf16.msrb.mxu2 %v8919_v61  ;;  %v9064_v61 = vor.u32 %v9992_v59, %v9063_v60  ;;  %6585 = vperm.xlu2 %10177, %v11645_v51   ;;  %v9273_v60 = vor.u32 %v10044_v25, %v9272_v9  ;;  %v9200_v59 = vld [vmem:[#allocation3 + $0x550] sm:$0xf]  ;;  %v10034_v25 = vld [vmem:[#allocation3 + $0x594] sm:$0xf0] }
 0x765   :  { %5179 = vmatpush.bf16.msrb.mxu3 %v8983_v13  ;;  %v9128_v13 = vor.u32 %v10008_v29, %v9127_v22  ;;  %6649 = vperm.xlu0 %10175, %v11627_v15   ;;  %v10026_v22 = vld [vmem:[#allocation3 + $0x554] sm:$0xf0]  ;;  %v9264_v29 = vld [vmem:[#allocation3 + $0x5d0] sm:$0xf] }
 0x766   :  { %5192 = vmatpush.bf16.msrb.mxu0 %v8923_v34  ;;  %v9055_v34 = vld [vmem:[#allocation3 + $0x430] sm:$0xf] }
 0x767   :  { %5205 = vmatpush.bf16.msrb.mxu1 %v8987_v17  ;;  %v10006_v17 = vld [vmem:[#allocation3 + $0x4b4] sm:$0xf0]  ;;  %v9056_v26 = vor.u32 %v9990_v31, %v9055_v34  ;;  %v9201_v34 = vor.u32 %v10026_v22, %v9200_v59  ;;  %v11668_v31 = vld [vmem:[%s12174_s30 + $0x8] sm:$0xff]  ;;  %v9232_v9 = vld [vmem:[#allocation3 + $0x590] sm:$0xf] }
 0x768   :  { %5167 = vmatpush.bf16.msrb.mxu2 %v8911_v4  ;;  %v9120_v24 = vor.u32 %v10006_v17, %v9119_v8  ;;  %v9988_v4 = vld [vmem:[#allocation3 + $0x424] sm:$0xf0]  ;;  %v9192_v17 = vld [vmem:[#allocation3 + $0x540] sm:$0xf]  ;;  %v9233_v22 = vor.u32 %v10034_v25, %v9232_v9 }
 0x769   :  { %5180 = vmatpush.bf16.msrb.mxu3 %v8975_v43  ;;  %v10004_v43 = vld [vmem:[#allocation3 + $0x4a4] sm:$0xf0]  ;;  %v9160_v59 = vld [vmem:[#allocation3 + $0x500] sm:$0xf] }
 0x76a   :  { %5193 = vmatpush.bf16.msrb.mxu0 %v8915_v12  ;;  %v9048_v12 = vor.u32 %v9988_v4, %v9047_v6  ;;  %v9112_v38 = vor.u32 %v10004_v43, %v9111_v27  ;;  %v10040_v6 = vld [vmem:[#allocation3 + $0x5c4] sm:$0xf0]  ;;  %v11672_v4 = vld [vmem:[%s12174_s30 + $0x20] sm:$0xff] }
 0x76b   :  { %5206 = vmatpush.bf16.msrb.mxu1 %v8979_v2  ;;  %6395 = vperm.xlu1 %10176, %v11630_v58   ;;  %v9986_v2 = vld [vmem:[#allocation3 + $0x414] sm:$0xf0]  ;;  %v10056_v25 = vld [vmem:[#allocation3 + $0x644] sm:$0xf0] }
 0x76c   :  { %5168 = vmatpush.bf16.msrb.mxu2 %v8903_v14  ;;  %v9040_v40 = vor.u32 %v9986_v2, %v9039_v7  ;;  %v9031_v14 = vld [vmem:[#allocation3 + $0x400] sm:$0xf]  ;;  %v9248_v2 = vld [vmem:[#allocation3 + $0x5b0] sm:$0xf] }
 0x76d   :  { %5181 = vmatpush.bf16.msrb.mxu3 %v8967_v35  ;;  %6644 = vperm.xlu0 %10175, %v11639_v41   ;;  %v10000_v35 = vld [vmem:[#allocation3 + $0x484] sm:$0xf0]  ;;  %v9032_v50 = vor.u32 %v9984_v3, %v9031_v14  ;;  %v9249_v3 = vor.u32 %v10038_v1, %v9248_v2 }
 0x76e   :  { %5194 = vmatpush.bf16.msrb.mxu0 %v8907_v32  ;;  %v9216_v32 = vld [vmem:[#allocation3 + $0x570] sm:$0xf]  ;;  %v9096_v47 = vor.u32 %v10000_v35, %v9095_v16  ;;  %v11684_v14 = vld [vmem:[%s12176_s12 + $0x8] sm:$0xff]  ;;  %v9176_v16 = vld [vmem:[#allocation3 + $0x520] sm:$0xf] }
 0x76f   :  { %5207 = vmatpush.bf16.msrb.mxu1 %v8971_v45  ;;  %5169 = vmatmul.bf16.vlgmr.msrb.gmra.mxu2 %v11556_v11  ;;  %v10030_v45 = vld [vmem:[#allocation3 + $0x574] sm:$0xf0]  ;;  %v10020_v35 = vld [vmem:[#allocation3 + $0x524] sm:$0xf0] }
 0x770   :  { %5415 = vmatpush.bf16.msra.mxu2 %v9088_v63  ;;  %5182 = vmatmul.bf16.vlgmr.msrb.gmra.mxu3 %v11560_v10  ;;  %v9280_v63 = vld [vmem:[#allocation3 + $0x5f0] sm:$0xf]  ;;  %v9217_v19 = vor.u32 %v10030_v45, %v9216_v32  ;;  %v9240_v32 = vld [vmem:[#allocation3 + $0x5a0] sm:$0xf]  ;;  %v10036_v45 = vld [vmem:[#allocation3 + $0x5a4] sm:$0xf0] }
 0x771   :  { %5428 = vmatpush.bf16.msra.mxu3 %v9152_v18  ;;  %5195 = vmatmul.bf16.vlgmr.msrb.gmra.mxu0 %v11556_v11  ;;  %v10046_v18 = vld [vmem:[#allocation3 + $0x5f4] sm:$0xf0] }
 0x772   :  { %5208 = vmatmul.bf16.vlgmr.msrb.gmra.mxu1 %v11560_v10 }
 0x773   :  { %6390 = vperm.xlu1 %10176, %v11642_v62  }
 0x774   :  { %5416 = vmatpush.bf16.msra.mxu2 %v9080_v55  ;;  %v11654_v55 = vld [vmem:[%s12173_s24] sm:$0xff] }
 0x775   :  { %5429 = vmatpush.bf16.msra.mxu3 %v9144_v42  ;;  %v9281_v42 = vor.u32 %v10046_v18, %v9280_v63  ;;  %6639 = vperm.xlu0 %10175, %v11651_v5   ;;  %v11690_v18 = vld [vmem:[%s12174_s30 + $0x18] sm:$0xff] }
 0x778   :  { %5417 = vmatpush.bf16.msra.mxu2 %v9072_v57  ;;  %v11658_v57 = vld [vmem:[%s12174_s30 + $0x28] sm:$0xff] }
 0x779   :  { %5430 = vmatpush.bf16.msra.mxu3 %v9136_v20  ;;  %v9209_v20 = vor.u32 %v10028_v54, %v9208_v0  ;;  %6580 = vperm.xlu2 %10177, %v11658_v57   ;;  %v10018_v0 = vld [vmem:[#allocation3 + $0x514] sm:$0xf0] }
 0x77b   :  { %6385 = vperm.xlu1 %10176, %v11654_v55  }
 0x77c   :  { %5418 = vmatpush.bf16.msra.mxu2 %v9064_v61  ;;  %v10042_v61 = vld [vmem:[#allocation3 + $0x5d4] sm:$0xf0] }
 0x77d   :  { %5431 = vmatpush.bf16.msra.mxu3 %v9128_v13  ;;  %v11665_v13 = vld [vmem:[%s12176_s12 + $0x18] sm:$0xff]  ;;  %v9265_v8 = vor.u32 %v10042_v61, %v9264_v29  ;;  %v10016_v29 = vld [vmem:[#allocation3 + $0x504] sm:$0xf0]  ;;  %v9224_v61 = vld [vmem:[#allocation3 + $0x580] sm:$0xf] }
 0x77e   :  { %6634 = vperm.xlu0 %10175, %v11665_v13  }
 0x780   :  { %5419 = vmatpush.bf16.msra.mxu2 %v9056_v26  ;;  %v10024_v26 = vld [vmem:[#allocation3 + $0x544] sm:$0xf0] }
 0x781   :  { %5432 = vmatpush.bf16.msra.mxu3 %v9120_v24  ;;  %v9256_v24 = vld [vmem:[#allocation3 + $0x5c0] sm:$0xf]  ;;  %v9193_v27 = vor.u32 %v10024_v26, %v9192_v17  ;;  %6575 = vperm.xlu2 %10177, %v11672_v4   ;;  %v10062_v17 = vld [vmem:[#allocation3 + $0x674] sm:$0xf0] }
 0x782   :  { %v9257_v43 = vor.u32 %v10040_v6, %v9256_v24  ;;  %v11698_v24 = vld [vmem:[%s12174_s30 + $0x10] sm:$0xff] }
 0x783   :  { %6560 = vperm.xlu1 %10176, %v11668_v31   ;;  %v9409_v6 = vld [vmem:[#allocation3 + $0x6f0] sm:$0xf] }
 0x784   :  { %5420 = vmatpush.bf16.msra.mxu2 %v9048_v12  ;;  %v9184_v12 = vld [vmem:[#allocation3 + $0x530] sm:$0xf] }
 0x785   :  { %5433 = vmatpush.bf16.msra.mxu3 %v9112_v38  ;;  %v10022_v38 = vld [vmem:[#allocation3 + $0x534] sm:$0xf0] }
 0x788   :  { %5421 = vmatpush.bf16.msra.mxu2 %v9040_v40  ;;  %v11681_v40 = vld [vmem:[%s12174_s30] sm:$0xff] }
 0x789   :  { %5434 = vmatpush.bf16.msra.mxu3 %v9104_v52  ;;  %v9185_v52 = vor.u32 %v10022_v38, %v9184_v12  ;;  %6555 = vperm.xlu0 %10175, %v11681_v40   ;;  %v9161_v12 = vor.u32 %v10016_v29, %v9160_v59  ;;  %v10072_v59 = vld [vmem:[#allocation3 + $0x6c4] sm:$0xf0]  ;;  %v10013_v29 = vld [vmem:[#allocation3 + $0x4f4] sm:$0xf] }
 0x78a   :  { %6570 = vperm.xlu2 %10177, %v11690_v18  }
 0x78b   :  { %6624 = vperm.xlu1 %10176, %v11684_v14  }
 0x78c   :  { %5422 = vmatpush.bf16.msra.mxu2 %v9032_v50 }
 0x78d   :  { %5435 = vmatpush.bf16.msra.mxu3 %v9096_v47  ;;  %v9177_v47 = vor.u32 %v10020_v35, %v9176_v16  ;;  %v9401_v16 = vld [vmem:[#allocation3 + $0x6e0] sm:$0xf] }
 0x78e   :  { %v11675_v7 = vpop.f32.mrf.mxu0 }
 0x78f   :  { %5423 = vmatmul.bf16.vlgmr.msra.gmra.mxu2 %v11556_v11  ;;  %v11678_v39 = vpop.f32.mrf.mxu1 }
 0x790   :  { %5669 = vmatpush.bf16.msrb.mxu2 %v9217_v19  ;;  %5436 = vmatmul.bf16.vlgmr.msra.gmra.mxu3 %v11560_v10  ;;  %v9241_v19 = vor.u32 %v10036_v45, %v9240_v32  ;;  %v10058_v45 = vld [vmem:[#allocation3 + $0x654] sm:$0xf0] }
 0x791   :  { %5682 = vmatpush.bf16.msrb.mxu3 %v9281_v42  ;;  %v9168_v42 = vld [vmem:[#allocation3 + $0x510] sm:$0xf]  ;;  %6818 = vperm.xlu0 %10175, %v11571_v37   ;;  %v10076_v37 = vld [vmem:[#allocation3 + $0x6e4] sm:$0xf0] }
 0x792   :  { %v11686_v63 = vpop.f32.mrf.mxu2  ;;  %6565 = vperm.xlu2 %10177, %v11698_v24   ;;  %v9402_v32 = vor.u32 %v10076_v37, %v9401_v16  ;;  %v9145_v16 = vld [vmem:[#allocation3 + $0x4e8] sm:$0xf0] }
 0x793   :  { %v11692_v50 = vpop.f32.mrf.mxu3  ;;  %6813 = vperm.xlu1 %10176, %v11582_v21   ;;  %v9329_v21 = vld [vmem:[#allocation3 + $0x650] sm:$0xf] }
 0x794   :  { %5670 = vmatpush.bf16.msrb.mxu2 %v9209_v20 }
 0x795   :  { %5683 = vmatpush.bf16.msrb.mxu3 %v9273_v60  ;;  %v9169_v60 = vor.u32 %v10018_v0, %v9168_v42  ;;  %v10074_v42 = vld [vmem:[#allocation3 + $0x6d4] sm:$0xf0]  ;;  %v9330_v0 = vor.u32 %v10058_v45, %v9329_v21  ;;  %v10052_v21 = vld [vmem:[#allocation3 + $0x624] sm:$0xf0]  ;;  %v9993_v45 = vld [vmem:[#allocation3 + $0x454] sm:$0xf] }
 0x796   :  { %v4436_v54 = vpop.f32.mrf.mxu0 }
 0x797   :  { %v4449_v20 = vpop.f32.mrf.mxu1  ;;  %v9321_v54 = vld [vmem:[#allocation3 + $0x640] sm:$0xf] }
 0x798   :  { %5671 = vmatpush.bf16.msrb.mxu2 %v9201_v34  ;;  %v10032_v34 = vld [vmem:[#allocation3 + $0x584] sm:$0xf0]  ;;  %v9997_v20 = vld [vmem:[#allocation3 + $0x474] sm:$0xf] }
 0x799   :  { %5684 = vmatpush.bf16.msrb.mxu3 %v9265_v8  ;;  %v9345_v8 = vld [vmem:[#allocation3 + $0x670] sm:$0xf]  ;;  %v9225_v38 = vor.u32 %v10032_v34, %v9224_v61  ;;  %6887 = vperm.xlu0 %10175, %v11586_v49   ;;  %v9089_v49 = vld [vmem:[#allocation3 + $0x478] sm:$0xf0] }
 0x79a   :  { %v4410_v26 = vpop.f32.mrf.mxu2  ;;  %v9346_v2 = vor.u32 %v10062_v17, %v9345_v8  ;;  %v9153_v61 = vld [vmem:[#allocation3 + $0x4f8] sm:$0xf0]  ;;  %v9313_v34 = vld [vmem:[#allocation3 + $0x630] sm:$0xf]  ;;  %v10054_v8 = vld [vmem:[#allocation3 + $0x634] sm:$0xf0] }
 0x79b   :  { %6908 = vperm.xlu1 %10176, %v11602_v48   ;;  %v9322_v48 = vor.u32 %v10056_v25, %v9321_v54  ;;  %v9156_v17 = vor.u32 %v10013_v29, %v9153_v61  ;;  %v9314_v37 = vor.u32 %v10054_v8, %v9313_v34  ;;  %v9137_v25 = vld [vmem:[#allocation3 + $0x4d8] sm:$0xf0]  ;;  %v10050_v29 = vld [vmem:[#allocation3 + $0x614] sm:$0xf0]  ;;  %v9991_v61 = vld [vmem:[#allocation3 + $0x444] sm:$0xf] }
 0x79c   :  { %5672 = vmatpush.bf16.msrb.mxu2 %v9193_v27  ;;  %v10078_v27 = vld [vmem:[#allocation3 + $0x6f4] sm:$0xf0] }
 0x79d   :  { %5685 = vmatpush.bf16.msrb.mxu3 %v9257_v43  ;;  %v4423_v43 = vpop.f32.mrf.mxu3  ;;  %v9410_v1 = vor.u32 %v10078_v27, %v9409_v6  ;;  %v11712_v6 = vld [vmem:[%s12176_s12] sm:$0xff]  ;;  %5454 = vmatpush.bf16.msra.mxu1 %v9156_v17  ;;  %v10066_v34 = vld [vmem:[#allocation3 + $0x694] sm:$0xf0]  ;;  %v9065_v17 = vld [vmem:[#allocation3 + $0x448] sm:$0xf0] }
 0x79e   :  { %v9995_v27 = vld [vmem:[#allocation3 + $0x464] sm:$0xf]  ;;  %v9081_v43 = vld [vmem:[#allocation3 + $0x468] sm:$0xf0] }
 0x7a0   :  { %5673 = vmatpush.bf16.msrb.mxu2 %v9185_v52  ;;  %v9337_v52 = vld [vmem:[#allocation3 + $0x660] sm:$0xf] }
 0x7a1   :  { %5686 = vmatpush.bf16.msrb.mxu3 %v9249_v3  ;;  %v10060_v3 = vld [vmem:[#allocation3 + $0x664] sm:$0xf0]  ;;  %6968 = vperm.xlu0 %10175, %v11591_v23  }
 0x7a2   :  { %v9338_v35 = vor.u32 %v10060_v3, %v9337_v52  ;;  %v10011_v3 = vld [vmem:[#allocation3 + $0x4e4] sm:$0xf] }
 0x7a3   :  { %6963 = vperm.xlu1 %10176, %v11594_v28   ;;  %v9148_v23 = vor.u32 %v10011_v3, %v9145_v16  ;;  %v10068_v28 = vld [vmem:[#allocation3 + $0x6a4] sm:$0xf0]  ;;  %v9353_v16 = vld [vmem:[#allocation3 + $0x680] sm:$0xf] }
 0x7a4   :  { %5674 = vmatpush.bf16.msrb.mxu2 %v9177_v47  ;;  %v11704_v47 = vld [vmem:[%s12176_s12 + $0x10] sm:$0xff]  ;;  %v10048_v3 = vld [vmem:[#allocation3 + $0x604] sm:$0xf0] }
 0x7a5   :  { %5687 = vmatpush.bf16.msrb.mxu3 %v9241_v19  ;;  %v9393_v19 = vld [vmem:[#allocation3 + $0x6d0] sm:$0xf]  ;;  %6629 = vperm.xlu2 %10177, %v11704_v47  }
 0x7a6   :  { %v9394_v9 = vor.u32 %v10074_v42, %v9393_v19  ;;  %v9073_v19 = vld [vmem:[#allocation3 + $0x458] sm:$0xf0]  ;;  %v9369_v42 = vld [vmem:[#allocation3 + $0x6a0] sm:$0xf]  ;;  %5455 = vmatpush.bf16.msra.mxu1 %v9148_v23  ;;  %v9474_v23 = vld [vmem:[#allocation3 + $0x770] sm:$0xf] }
 0x7a8   :  { %5675 = vmatpush.bf16.msrb.mxu2 %v9169_v60  ;;  %v9385_v60 = vld [vmem:[#allocation3 + $0x6c0] sm:$0xf] }
 0x7a9   :  { %5688 = vmatpush.bf16.msrb.mxu3 %v9233_v22  ;;  %v9092_v22 = vor.u32 %v9997_v20, %v9089_v49  ;;  %v9386_v26 = vor.u32 %v10072_v59, %v9385_v60  ;;  %v9370_v59 = vor.u32 %v10068_v28, %v9369_v42  ;;  %7138 = vperm.xlu0 %10175, %v11599_v46   ;;  %v9121_v42 = vld [vmem:[#allocation3 + $0x4b8] sm:$0xf0]  ;;  %v9538_v28 = vld [vmem:[#allocation3 + $0x7f0] sm:$0xf] }
 0x7ab   :  { %5441 = vmatpush.bf16.msra.mxu0 %v9092_v22  ;;  %v9297_v22 = vld [vmem:[#allocation3 + $0x610] sm:$0xf]  ;;  %6953 = vperm.xlu1 %10176, %v11605_v56   ;;  %v9989_v56 = vld [vmem:[#allocation3 + $0x434] sm:$0xf] }
 0x7ac   :  { %5676 = vmatpush.bf16.msrb.mxu2 %v9161_v12 }
 0x7ad   :  { %5689 = vmatpush.bf16.msrb.mxu3 %v9225_v38  ;;  %v9377_v38 = vld [vmem:[#allocation3 + $0x6b0] sm:$0xf]  ;;  %6619 = vperm.xlu2 %10177, %v11712_v6  }
 0x7ae   :  { %v11714_v12 = vpop.f32.mrf.mxu0 }
 0x7af   :  { %5677 = vmatmul.bf16.vlgmr.msrb.gmra.mxu2 %v11556_v11  ;;  %v11717_v52 = vpop.f32.mrf.mxu1 }
 0x7b0   :  { %5923 = vmatpush.bf16.msra.mxu2 %v9346_v2  ;;  %5690 = vmatmul.bf16.vlgmr.msrb.gmra.mxu3 %v11560_v10  ;;  %v10070_v2 = vld [vmem:[#allocation3 + $0x6b4] sm:$0xf0] }
 0x7b1   :  { %5936 = vmatpush.bf16.msra.mxu3 %v9410_v1  ;;  %v9084_v1 = vor.u32 %v9995_v27, %v9081_v43  ;;  %v9068_v43 = vor.u32 %v9991_v61, %v9065_v17  ;;  %7202 = vperm.xlu0 %10175, %v11611_v36  }
 0x7b2   :  { %v11720_v54 = vpop.f32.mrf.mxu2 }
 0x7b3   :  { %5442 = vmatpush.bf16.msra.mxu0 %v9084_v1  ;;  %v11722_v20 = vpop.f32.mrf.mxu3  ;;  %v9298_v1 = vor.u32 %v10050_v29, %v9297_v22  ;;  %v9987_v22 = vld [vmem:[#allocation3 + $0x424] sm:$0xf]  ;;  %v9049_v29 = vld [vmem:[#allocation3 + $0x428] sm:$0xf0]  ;;  %6948 = vperm.xlu1 %10176, %v11615_v53   ;;  %v10090_v53 = vld [vmem:[#allocation3 + $0x754] sm:$0xf0] }
 0x7b4   :  { %5924 = vmatpush.bf16.msra.mxu2 %v9338_v35  ;;  %v9305_v35 = vld [vmem:[#allocation3 + $0x620] sm:$0xf]  ;;  %v9052_v17 = vor.u32 %v9987_v22, %v9049_v29 }
 0x7b5   :  { %5937 = vmatpush.bf16.msra.mxu3 %v9402_v32  ;;  %v9378_v32 = vor.u32 %v10070_v2, %v9377_v38  ;;  %v9306_v49 = vor.u32 %v10052_v21, %v9305_v35  ;;  %v10007_v38 = vld [vmem:[#allocation3 + $0x4c4] sm:$0xf]  ;;  %v9129_v2 = vld [vmem:[#allocation3 + $0x4c8] sm:$0xf0]  ;;  %6892 = vperm.xlu2 %10177, %v11575_v30   ;;  %v10094_v21 = vld [vmem:[#allocation3 + $0x774] sm:$0xf0] }
 0x7b6   :  { %v4690_v8 = vpop.f32.mrf.mxu0  ;;  %v9132_v46 = vor.u32 %v10007_v38, %v9129_v2  ;;  %v9985_v2 = vld [vmem:[#allocation3 + $0x414] sm:$0xf] }
 0x7b7   :  { %v4703_v27 = vpop.f32.mrf.mxu1  ;;  %v9530_v8 = vld [vmem:[#allocation3 + $0x7e0] sm:$0xf] }
 0x7b8   :  { %5925 = vmatpush.bf16.msra.mxu2 %v9330_v0  ;;  %v9076_v0 = vor.u32 %v9993_v45, %v9073_v19  ;;  %v10005_v19 = vld [vmem:[#allocation3 + $0x4b4] sm:$0xf]  ;;  %v10108_v27 = vld [vmem:[#allocation3 + $0x7e4] sm:$0xf0] }
 0x7b9   :  { %5938 = vmatpush.bf16.msra.mxu3 %v9394_v9  ;;  %v10009_v9 = vld [vmem:[#allocation3 + $0x4d4] sm:$0xf]  ;;  %7197 = vperm.xlu0 %10175, %v11627_v15  }
 0x7ba   :  { %v9140_v60 = vor.u32 %v10009_v9, %v9137_v25  ;;  %5443 = vmatpush.bf16.msra.mxu0 %v9076_v0  ;;  %v10110_v0 = vld [vmem:[#allocation3 + $0x7f4] sm:$0xf0]  ;;  %v4664_v9 = vpop.f32.mrf.mxu2  ;;  %v9124_v25 = vor.u32 %v10005_v19, %v9121_v42  ;;  %v10029_v19 = vld [vmem:[#allocation3 + $0x574] sm:$0xf]  ;;  %v9218_v42 = vld [vmem:[#allocation3 + $0x578] sm:$0xf0] }
 0x7bb   :  { %v9539_v61 = vor.u32 %v10110_v0, %v9538_v28  ;;  %v9450_v0 = vld [vmem:[#allocation3 + $0x740] sm:$0xf]  ;;  %v10088_v9 = vld [vmem:[#allocation3 + $0x744] sm:$0xf0]  ;;  %6943 = vperm.xlu1 %10176, %v11630_v58   ;;  %v9221_v22 = vor.u32 %v10029_v19, %v9218_v42  ;;  %v10045_v15 = vld [vmem:[#allocation3 + $0x5f4] sm:$0xf] }
 0x7bc   :  { %5926 = vmatpush.bf16.msra.mxu2 %v9322_v48  ;;  %v9361_v48 = vld [vmem:[#allocation3 + $0x690] sm:$0xf]  ;;  %5456 = vmatpush.bf16.msra.mxu1 %v9140_v60  ;;  %v4677_v60 = vpop.f32.mrf.mxu3  ;;  %v10027_v58 = vld [vmem:[#allocation3 + $0x564] sm:$0xf] }
 0x7bd   :  { %5939 = vmatpush.bf16.msra.mxu3 %v9386_v26  ;;  %v9289_v26 = vld [vmem:[#allocation3 + $0x600] sm:$0xf]  ;;  %v9362_v35 = vor.u32 %v10066_v34, %v9361_v48  ;;  %v10092_v34 = vld [vmem:[#allocation3 + $0x764] sm:$0xf0]  ;;  %6903 = vperm.xlu2 %10177, %v11620_v33  }
 0x7be   :  { %5444 = vmatpush.bf16.msra.mxu0 %v9068_v43  ;;  %v9466_v48 = vld [vmem:[#allocation3 + $0x760] sm:$0xf]  ;;  %v10003_v43 = vld [vmem:[#allocation3 + $0x4a4] sm:$0xf] }
 0x7bf   :  { %v9467_v36 = vor.u32 %v10092_v34, %v9466_v48  ;;  %v9451_v48 = vor.u32 %v10088_v9, %v9450_v0  ;;  %v9442_v34 = vld [vmem:[#allocation3 + $0x730] sm:$0xf]  ;;  %v10082_v9 = vld [vmem:[#allocation3 + $0x714] sm:$0xf0] }
 0x7c0   :  { %5927 = vmatpush.bf16.msra.mxu2 %v9314_v37  ;;  %v10064_v37 = vld [vmem:[#allocation3 + $0x684] sm:$0xf0]  ;;  %5457 = vmatpush.bf16.msra.mxu1 %v9132_v46  ;;  %v9105_v46 = vld [vmem:[#allocation3 + $0x498] sm:$0xf0] }
 0x7c1   :  { %5940 = vmatpush.bf16.msra.mxu3 %v9378_v32  ;;  %v9057_v32 = vld [vmem:[#allocation3 + $0x438] sm:$0xf0]  ;;  %v9354_v30 = vor.u32 %v10064_v37, %v9353_v16  ;;  %v9531_v16 = vor.u32 %v10108_v27, %v9530_v8  ;;  %v9458_v37 = vld [vmem:[#allocation3 + $0x750] sm:$0xf]  ;;  %v10086_v27 = vld [vmem:[#allocation3 + $0x734] sm:$0xf0]  ;;  %7192 = vperm.xlu0 %10175, %v11639_v41  }
 0x7c2   :  { %v9060_v45 = vor.u32 %v9989_v56, %v9057_v32  ;;  %v9983_v32 = vld [vmem:[#allocation3 + $0x404] sm:$0xf]  ;;  %v9266_v41 = vld [vmem:[#allocation3 + $0x5d8] sm:$0xf0] }
 0x7c3   :  { %6938 = vperm.xlu1 %10176, %v11642_v62  }
 0x7c4   :  { %5928 = vmatpush.bf16.msra.mxu2 %v9306_v49  ;;  %v9290_v49 = vor.u32 %v10048_v3, %v9289_v26  ;;  %5445 = vmatpush.bf16.msra.mxu0 %v9060_v45  ;;  %v9113_v26 = vld [vmem:[#allocation3 + $0x4a8] sm:$0xf0]  ;;  %v10001_v3 = vld [vmem:[#allocation3 + $0x494] sm:$0xf]  ;;  %v9459_v45 = vor.u32 %v10090_v53, %v9458_v37  ;;  %v9434_v37 = vld [vmem:[#allocation3 + $0x720] sm:$0xf] }
 0x7c5   :  { %5941 = vmatpush.bf16.msra.mxu3 %v9370_v59  ;;  %v9475_v59 = vor.u32 %v10094_v21, %v9474_v23  ;;  %5458 = vmatpush.bf16.msra.mxu1 %v9124_v25  ;;  %v9116_v38 = vor.u32 %v10003_v43, %v9113_v26  ;;  %v10106_v23 = vld [vmem:[#allocation3 + $0x7d4] sm:$0xf0]  ;;  %v9108_v33 = vor.u32 %v10001_v3, %v9105_v46  ;;  %v9033_v21 = vld [vmem:[#allocation3 + $0x408] sm:$0xf0]  ;;  %v9514_v25 = vld [vmem:[#allocation3 + $0x7c0] sm:$0xf] }
 0x7c6   :  { %v9036_v60 = vor.u32 %v9983_v32, %v9033_v21  ;;  %6958 = vperm.xlu2 %10177, %v11633_v44   ;;  %v9210_v43 = vld [vmem:[#allocation3 + $0x568] sm:$0xf0]  ;;  %v9506_v26 = vld [vmem:[#allocation3 + $0x7b0] sm:$0xf]  ;;  %v10100_v32 = vld [vmem:[#allocation3 + $0x7a4] sm:$0xf0] }
 0x7c7   :  { %v9213_v44 = vor.u32 %v10027_v58, %v9210_v43  ;;  %v10021_v58 = vld [vmem:[#allocation3 + $0x534] sm:$0xf]  ;;  %v9186_v43 = vld [vmem:[#allocation3 + $0x538] sm:$0xf0] }
 0x7c8   :  { %5929 = vmatpush.bf16.msra.mxu2 %v9298_v1  ;;  %v9041_v1 = vld [vmem:[#allocation3 + $0x418] sm:$0xf0]  ;;  %5446 = vmatpush.bf16.msra.mxu0 %v9052_v17 }
 0x7c9   :  { %5942 = vmatpush.bf16.msra.mxu3 %v9362_v35  ;;  %v9522_v35 = vld [vmem:[#allocation3 + $0x7d0] sm:$0xf]  ;;  %5459 = vmatpush.bf16.msra.mxu1 %v9116_v38  ;;  %v9044_v56 = vor.u32 %v9985_v2, %v9041_v1  ;;  %v10102_v38 = vld [vmem:[#allocation3 + $0x7b4] sm:$0xf0]  ;;  %v10043_v2 = vld [vmem:[#allocation3 + $0x5e4] sm:$0xf] }
 0x7ca   :  { %v9523_v28 = vor.u32 %v10106_v23, %v9522_v35  ;;  %v9274_v1 = vld [vmem:[#allocation3 + $0x5e8] sm:$0xf0]  ;;  %v9507_v46 = vor.u32 %v10102_v38, %v9506_v26  ;;  %v10084_v35 = vld [vmem:[#allocation3 + $0x724] sm:$0xf0]  ;;  %v10025_v23 = vld [vmem:[#allocation3 + $0x554] sm:$0xf]  ;;  %7187 = vperm.xlu0 %10175, %v11651_v5  }
 0x7cb   :  { %v9277_v53 = vor.u32 %v10043_v2, %v9274_v1  ;;  %v9435_v42 = vor.u32 %v10084_v35, %v9434_v37  ;;  %6933 = vperm.xlu1 %10176, %v11654_v55   ;;  %v9482_v26 = vld [vmem:[#allocation3 + $0x780] sm:$0xf]  ;;  %v10096_v38 = vld [vmem:[#allocation3 + $0x784] sm:$0xf0]  ;;  %v9189_v2 = vor.u32 %v10021_v58, %v9186_v43  ;;  %v10037_v1 = vld [vmem:[#allocation3 + $0x5b4] sm:$0xf] }
 0x7cc   :  { %5930 = vmatpush.bf16.msra.mxu2 %v9290_v49  ;;  %v10104_v49 = vld [vmem:[#allocation3 + $0x7c4] sm:$0xf0]  ;;  %5447 = vmatpush.bf16.msra.mxu0 %v9044_v56  ;;  %v9202_v56 = vld [vmem:[#allocation3 + $0x558] sm:$0xf0]  ;;  %v9483_v35 = vor.u32 %v10096_v38, %v9482_v26  ;;  %v10077_v58 = vld [vmem:[#allocation3 + $0x6f4] sm:$0xf] }
 0x7cd   :  { %5943 = vmatpush.bf16.msra.mxu3 %v9354_v30  ;;  %5460 = vmatpush.bf16.msra.mxu1 %v9108_v33  ;;  %v9999_v30 = vld [vmem:[#allocation3 + $0x484] sm:$0xf]  ;;  %v9515_v17 = vor.u32 %v10104_v49, %v9514_v25  ;;  %v9498_v33 = vld [vmem:[#allocation3 + $0x7a0] sm:$0xf]  ;;  %v9205_v21 = vor.u32 %v10025_v23, %v9202_v56  ;;  %v9194_v49 = vld [vmem:[#allocation3 + $0x548] sm:$0xf0] }
 0x7ce   :  { %7133 = vperm.xlu2 %10177, %v11645_v51   ;;  %v9499_v0 = vor.u32 %v10100_v32, %v9498_v33  ;;  %v10023_v25 = vld [vmem:[#allocation3 + $0x544] sm:$0xf]  ;;  %v10098_v51 = vld [vmem:[#allocation3 + $0x794] sm:$0xf0]  ;;  %v9178_v33 = vld [vmem:[#allocation3 + $0x528] sm:$0xf0] }
 0x7cf   :  { %5931 = vmatmul.bf16.vlgmr.msra.gmra.mxu2 %v11556_v11  ;;  %v11737_v3 = vpop.f32.mrf.mxu1  ;;  %v11755_v5 = vld [vmem:[%s12177_s22] ss:$8 sm:$0x3]  ;;  %v8770_v37 = vld [vmem:[%s12177_s22 + $0x2] ss:$8 sm:$0x3] }
 0x7d0   :  { %6177 = vmatpush.bf16.msrb.mxu2 %v9475_v59  ;;  %5944 = vmatmul.bf16.vlgmr.msra.gmra.mxu3 %v11560_v10  ;;  %v9097_v59 = vld [vmem:[#allocation3 + $0x488] sm:$0xf0]  ;;  %v10019_v56 = vld [vmem:[#allocation3 + $0x524] sm:$0xf]  ;;  %v9411_v43 = vld [vmem:[#allocation3 + $0x6f8] sm:$0xf0] }
 0x7d1   :  { %6190 = vmatpush.bf16.msrb.mxu3 %v9539_v61  ;;  %v9100_v29 = vor.u32 %v9999_v30, %v9097_v59  ;;  %v9282_v61 = vld [vmem:[#allocation3 + $0x5f8] sm:$0xf0]  ;;  %5448 = vmatpush.bf16.msra.mxu0 %v9036_v60  ;;  %v9490_v60 = vld [vmem:[#allocation3 + $0x790] sm:$0xf] }
 0x7d2   :  { %v9285_v8 = vor.u32 %v10045_v15, %v9282_v61  ;;  %v11744_v19 = vpop.f32.mrf.mxu2  ;;  %v9258_v15 = vld [vmem:[#allocation3 + $0x5c8] sm:$0xf0]  ;;  %v11749_v61 = vld [vmem:[%s12177_s22 + $0x1] ss:$8 sm:$0x3]  ;;  %7182 = vperm.xlu0 %10175, %v11665_v13  }
 0x7d3   :  { %5461 = vmatpush.bf16.msra.mxu1 %v9100_v29  ;;  %v11746_v62 = vpop.f32.mrf.mxu3  ;;  %v10039_v29 = vld [vmem:[#allocation3 + $0x5c4] sm:$0xf]  ;;  %v4650_v55 = vperm.slane %v11749_v61, 1  ;;  %7108 = vperm.xlu1 %10176, %v11668_v31   ;;  %v10033_v13 = vld [vmem:[#allocation3 + $0x594] sm:$0xf] }
 0x7d4   :  { %6178 = vmatpush.bf16.msrb.mxu2 %v9467_v36  ;;  %v11735_v36 = vpop.f32.mrf.mxu0  ;;  %5449 = vmatmul.bf16.vlgmr.msra.gmra.mxu0 %v11556_v11  ;;  %v11770_v31 = vld [vmem:[%s12177_s22 + $0x3] ss:$8 sm:$0x3] }
 0x7d5   :  { %6191 = vmatpush.bf16.msrb.mxu3 %v9531_v16  ;;  %5695 = vmatpush.bf16.msrb.mxu0 %v9221_v22  ;;  %v9443_v16 = vor.u32 %v10086_v27, %v9442_v34  ;;  %v9197_v22 = vor.u32 %v10023_v25, %v9194_v49  ;;  %v9418_v34 = vld [vmem:[#allocation3 + $0x700] sm:$0xf]  ;;  %v10080_v27 = vld [vmem:[#allocation3 + $0x704] sm:$0xf0]  ;;  %v5158_v38 = vperm.slane %v11770_v31, 1 }
 0x7d6   :  { %5462 = vmatmul.bf16.vlgmr.msra.gmra.mxu1 %v11560_v10  ;;  %7128 = vperm.xlu2 %10177, %v11658_v57   ;;  %v4396_v57 = vperm.slane %v11755_v5, 1 }
 0x7d7   :  { %5708 = vmatpush.bf16.msrb.mxu1 %v9285_v8  ;;  %v4957_v8 = vpop.f32.mrf.mxu1 }
 0x7d8   :  { %6179 = vmatpush.bf16.msrb.mxu2 %v9459_v45  ;;  %v10041_v45 = vld [vmem:[#allocation3 + $0x5d4] sm:$0xf]  ;;  %v4435_v49 = vadd.f32 %v11675_v7, %v4396_v57  ;;  %v10015_v7 = vld [vmem:[#allocation3 + $0x504] sm:$0xf]  ;;  %v9226_v8 = vld [vmem:[#allocation3 + $0x588] sm:$0xf0] }
 0x7d9   :  { %6192 = vmatpush.bf16.msrb.mxu3 %v9523_v28  ;;  %5696 = vmatpush.bf16.msrb.mxu0 %v9213_v44  ;;  %v9426_v28 = vld [vmem:[#allocation3 + $0x710] sm:$0xf]  ;;  %v9269_v30 = vor.u32 %v10041_v45, %v9266_v41  ;;  %v9261_v44 = vor.u32 %v10039_v29, %v9258_v15  ;;  %v9242_v45 = vld [vmem:[#allocation3 + $0x5a8] sm:$0xf0]  ;;  %v4904_v41 = vperm.slane %v8770_v37, 1 }
 0x7da   :  { %v9162_v29 = vld [vmem:[#allocation3 + $0x508] sm:$0xf0]  ;;  %7103 = vperm.xlu0 %10175, %v11681_v40   ;;  %v9414_v40 = vor.u32 %v10077_v58, %v9411_v43  ;;  %v9331_v57 = vld [vmem:[#allocation3 + $0x658] sm:$0xf0]  ;;  %v10053_v58 = vld [vmem:[#allocation3 + $0x634] sm:$0xf] }
 0x7db   :  { %5709 = vmatpush.bf16.msrb.mxu1 %v9277_v53  ;;  %v9419_v53 = vor.u32 %v10080_v27, %v9418_v34  ;;  %v4931_v23 = vpop.f32.mrf.mxu3  ;;  %7172 = vperm.xlu1 %10176, %v11684_v14   ;;  %v10075_v14 = vld [vmem:[#allocation3 + $0x6e4] sm:$0xf]  ;;  %v9315_v43 = vld [vmem:[#allocation3 + $0x638] sm:$0xf0] }
 0x7dc   :  { %6180 = vmatpush.bf16.msrb.mxu2 %v9451_v48  ;;  %v4944_v59 = vpop.f32.mrf.mxu0  ;;  %v9427_v48 = vor.u32 %v10082_v9, %v9426_v28  ;;  %v4689_v28 = vadd.f32 %v11714_v12, %v4650_v55  ;;  %v9170_v9 = vld [vmem:[#allocation3 + $0x518] sm:$0xf0]  ;;  %v4943_v12 = vadd.f32 %v11735_v36, %v4904_v41  ;;  %v10031_v36 = vld [vmem:[#allocation3 + $0x584] sm:$0xf]  ;;  %v5157_v23 = vperm.slane %v11770_v31, 0 }
 0x7dd   :  { %6193 = vmatpush.bf16.msrb.mxu3 %v9515_v17  ;;  %5697 = vmatpush.bf16.msrb.mxu0 %v9205_v21  ;;  %v9491_v17 = vor.u32 %v10098_v51, %v9490_v60  ;;  %v10035_v21 = vld [vmem:[#allocation3 + $0x5a4] sm:$0xf]  ;;  %v4649_v60 = vperm.slane %v11749_v61, 0  ;;  %v9234_v51 = vld [vmem:[#allocation3 + $0x598] sm:$0xf0] }
 0x7de   :  { %v9245_v25 = vor.u32 %v10035_v21, %v9242_v45  ;;  %7123 = vperm.xlu2 %10177, %v11672_v4   ;;  %v9237_v15 = vor.u32 %v10033_v13, %v9234_v51  ;;  %v10061_v61 = vld [vmem:[#allocation3 + $0x674] sm:$0xf]  ;;  %v4448_v4 = vadd.f32 %v11678_v39, %v4435_v49 }
 0x7df   :  { %5710 = vmatpush.bf16.msrb.mxu1 %v9269_v30  ;;  %v4903_v30 = vperm.slane %v8770_v37, 0  ;;  %v4663_v34 = vadd.f32 %v11720_v54, %v4649_v60  ;;  %v4395_v54 = vperm.slane %v11755_v5, 0 }
 0x7e0   :  { %6181 = vmatpush.bf16.msrb.mxu2 %v9443_v16  ;;  %v9250_v16 = vld [vmem:[#allocation3 + $0x5b8] sm:$0xf0] }
 0x7e1   :  { %6194 = vmatpush.bf16.msrb.mxu3 %v9507_v46  ;;  %5698 = vmatpush.bf16.msrb.mxu0 %v9197_v22  ;;  %v4918_v46 = vpop.f32.mrf.mxu2  ;;  %v9253_v32 = vor.u32 %v10037_v1, %v9250_v16  ;;  %v4702_v22 = vadd.f32 %v11717_v52, %v4689_v28  ;;  %v4917_v27 = vadd.f32 %v11744_v19, %v4903_v30  ;;  %v4452_v1 = vmax.f32 %v4448_v4, 0.0  ;;  %v10073_v28 = vld [vmem:[#allocation3 + $0x6d4] sm:$0xf]  ;;  %v9323_v30 = vld [vmem:[#allocation3 + $0x648] sm:$0xf0] }
 0x7e2   :  { %v9165_v52 = vor.u32 %v10015_v7, %v9162_v29  ;;  %v4676_v19 = vadd.f32 %v11722_v20, %v4663_v34  ;;  %v9403_v46 = vld [vmem:[#allocation3 + $0x6e8] sm:$0xf0] }
 0x7e3   :  { %5711 = vmatpush.bf16.msrb.mxu1 %v9261_v44  ;;  %v4706_v26 = vmax.f32 %v4702_v22, 0.0  ;;  %v9229_v44 = vor.u32 %v10031_v36, %v9226_v8  ;;  %v4930_v37 = vadd.f32 %v11746_v62, %v4917_v27  ;;  %v9406_v45 = vor.u32 %v10075_v14, %v9403_v46  ;;  %v6769_v36 = vld [vmem:[%s12181_s1] sm:$0x7]  ;;  %v9387_v27 = vld [vmem:[#allocation3 + $0x6c8] sm:$0xf0] }
 0x7e4   :  { %6182 = vmatpush.bf16.msrb.mxu2 %v9435_v42  ;;  %v9181_v42 = vor.u32 %v10019_v56, %v9178_v33  ;;  %v6674_v56 = vld [vmem:[%s12178_s23] sm:$0x7]  ;;  %v4705_v21 = vmax.f32 %v4676_v19, 0.0  ;;  %v9379_v19 = vld [vmem:[#allocation3 + $0x6b8] sm:$0xf0] }
 0x7e5   :  { %6195 = vmatpush.bf16.msrb.mxu3 %v9499_v0  ;;  %5699 = vmatpush.bf16.msrb.mxu0 %v9189_v2  ;;  %v10017_v0 = vld [vmem:[#allocation3 + $0x514] sm:$0xf]  ;;  %v10059_v2 = vld [vmem:[#allocation3 + $0x664] sm:$0xf]  ;;  %v6234_v5 = vrot.slane %v4706_v26, 7 }
 0x7e6   :  { %v9173_v59 = vor.u32 %v10017_v0, %v9170_v9  ;;  %7118 = vperm.xlu2 %10177, %v11690_v18   ;;  %v4409_v18 = vadd.f32 %v11686_v63, %v4395_v54  ;;  %v7222_v33 = vld [vmem:[%s12178_s23] sm:$0x7]  ;;  %6677 = vperm.xlu0 %10175, %v6674_v56   ;;  %v9395_v0 = vld [vmem:[#allocation3 + $0x6d8] sm:$0xf0]  ;;  %v6233_v31 = vrot.slane %v4705_v21, 7 }
 0x7e7   :  { %5712 = vmatpush.bf16.msrb.mxu1 %v9253_v32  ;;  %v10057_v32 = vld [vmem:[#allocation3 + $0x654] sm:$0xf]  ;;  %7225 = vperm.xlu1 %10176, %v7222_v33   ;;  %v6250_v60 = vsel %vm2442_vm3, %v4452_v1, %v6234_v5  ;;  %v9398_v22 = vor.u32 %v10073_v28, %v9395_v0  ;;  %v10067_v5 = vld [vmem:[#allocation3 + $0x6a4] sm:$0xf]  ;;  %v9476_v21 = vld [vmem:[#allocation3 + $0x778] sm:$0xf0] }
 0x7e8   :  { %6183 = vmatpush.bf16.msrb.mxu2 %v9427_v48  ;;  %v9347_v48 = vld [vmem:[#allocation3 + $0x678] sm:$0xf0]  ;;  %v9334_v63 = vor.u32 %v10057_v32, %v9331_v57  ;;  %v4422_v49 = vadd.f32 %v11692_v50, %v4409_v18  ;;  %v10047_v33 = vld [vmem:[#allocation3 + $0x604] sm:$0xf]  ;;  %v9291_v32 = vld [vmem:[#allocation3 + $0x608] sm:$0xf0] }
 0x7e9   :  { %6196 = vmatpush.bf16.msrb.mxu3 %v9491_v17  ;;  %5700 = vmatpush.bf16.msrb.mxu0 %v9181_v42  ;;  %v4956_v17 = vadd.f32 %v11737_v3, %v4943_v12  ;;  %v9350_v39 = vor.u32 %v10061_v61, %v9347_v48  ;;  %v9339_v3 = vld [vmem:[#allocation3 + $0x668] sm:$0xf0]  ;;  %v4959_v42 = vmax.f32 %v4930_v37, 0.0  ;;  %v10055_v12 = vld [vmem:[#allocation3 + $0x644] sm:$0xf] }
 0x7ea   :  { %v9342_v20 = vor.u32 %v10059_v2, %v9339_v3  ;;  %v11795_v61 = vld [vmem:[%s12179_s26] sm:$0xff]  ;;  %v9326_v8 = vor.u32 %v10055_v12, %v9323_v30  ;;  %v9318_v2 = vor.u32 %v10053_v58, %v9315_v43  ;;  %v10069_v3 = vld [vmem:[#allocation3 + $0x6b4] sm:$0xf]  ;;  %v9307_v37 = vld [vmem:[#allocation3 + $0x628] sm:$0xf0] }
 0x7eb   :  { %5713 = vmatpush.bf16.msrb.mxu1 %v9245_v25  ;;  %v4960_v16 = vmax.f32 %v4956_v17, 0.0  ;;  %v6239_v7 = vrot.slane %v4959_v42, 6  ;;  %v7309_v48 = vld [vmem:[%s12180_s28] sm:$0x7]  ;;  %v10071_v17 = vld [vmem:[#allocation3 + $0x6c4] sm:$0xf]  ;;  %v9382_v14 = vor.u32 %v10069_v3, %v9379_v19 }
 0x7ec   :  { %6184 = vmatpush.bf16.msrb.mxu2 %v9419_v53  ;;  %v9363_v18 = vld [vmem:[#allocation3 + $0x698] sm:$0xf0]  ;;  %v10093_v57 = vld [vmem:[#allocation3 + $0x774] sm:$0xf]  ;;  %v9355_v42 = vld [vmem:[#allocation3 + $0x688] sm:$0xf0] }
 0x7ed   :  { %6197 = vmatpush.bf16.msrb.mxu3 %v9483_v35  ;;  %5701 = vmatpush.bf16.msrb.mxu0 %v9173_v59  ;;  %v6240_v41 = vrot.slane %v4960_v16, 6  ;;  %v10051_v16 = vld [vmem:[#allocation3 + $0x624] sm:$0xf]  ;;  %v9479_v28 = vor.u32 %v10093_v57, %v9476_v21  ;;  %v10109_v0 = vld [vmem:[#allocation3 + $0x7f4] sm:$0xf] }
 0x7ee   :  { %v5196_v53 = vpop.f32.mrf.mxu0  ;;  %7113 = vperm.xlu2 %10177, %v11698_v24   ;;  %v4451_v24 = vmax.f32 %v4422_v49, 0.0  ;;  %7312 = vperm.xlu0 %10175, %v7309_v48   ;;  %v9310_v46 = vor.u32 %v10051_v16, %v9307_v37  ;;  %v10107_v12 = vld [vmem:[#allocation3 + $0x7e4] sm:$0xf]  ;;  %v9532_v30 = vld [vmem:[#allocation3 + $0x7e8] sm:$0xf0] }
 0x7ef   :  { %6185 = vmatmul.bf16.vlgmr.msrb.gmra.mxu2 %v11556_v11  ;;  %5714 = vmatpush.bf16.msrb.mxu1 %v9237_v15  ;;  %v5197_v55 = vadd.f32 %v5196_v53, %v5158_v38  ;;  %v5209_v35 = vpop.f32.mrf.mxu1  ;;  %v6253_v50 = vsel %vm6251_vm5, %v6250_v60, %v6240_v41  ;;  %v11811_v53 = vld [vmem:[%s12179_s26 + $0x8] sm:$0xff]  ;;  %v10063_v41 = vld [vmem:[#allocation3 + $0x684] sm:$0xf] }
 0x7f0   :  { %6198 = vmatmul.bf16.vlgmr.msrb.gmra.mxu3 %v11560_v10  ;;  %v6249_v26 = vsel %vm2442_vm3, %v4451_v24, %v6233_v31  ;;  %6772 = vperm.xlu1 %10176, %v6769_v36   ;;  %v9358_v49 = vor.u32 %v10063_v41, %v9355_v42  ;;  %v11820_v60 = vld [vmem:[%s12177_s22 + $0x4] ss:$8 sm:$0x3]  ;;  %v10089_v31 = vld [vmem:[#allocation3 + $0x754] sm:$0xf] }
 0x7f1   :  { %5702 = vmatpush.bf16.msrb.mxu0 %v9165_v52  ;;  %v5210_v62 = vadd.f32 %v5209_v35, %v5197_v55  ;;  %v6252_v54 = vsel %vm6251_vm5, %v6249_v26, %v6239_v7  ;;  %v9371_v55 = vld [vmem:[#allocation3 + $0x6a8] sm:$0xf0]  ;;  %v10049_v35 = vld [vmem:[#allocation3 + $0x614] sm:$0xf]  ;;  %v10103_v58 = vld [vmem:[#allocation3 + $0x7c4] sm:$0xf] }
 0x7f2   :  { %v5170_v25 = vpop.f32.mrf.mxu2  ;;  %v9374_v56 = vor.u32 %v10067_v5, %v9371_v55  ;;  %v9516_v43 = vld [vmem:[#allocation3 + $0x7c8] sm:$0xf0]  ;;  %v10085_v26 = vld [vmem:[#allocation3 + $0x734] sm:$0xf]  ;;  %v10083_v19 = vld [vmem:[#allocation3 + $0x724] sm:$0xf] }
 0x7f3   :  { %5715 = vmatpush.bf16.msrb.mxu1 %v9229_v44  ;;  %v5214_v9 = vmax.f32 %v5210_v62, 0.0  ;;  %v5171_v13 = vadd.f32 %v5170_v25, %v5157_v23  ;;  %v5183_v51 = vpop.f32.mrf.mxu3  ;;  %v9299_v23 = vld [vmem:[#allocation3 + $0x618] sm:$0xf0]  ;;  %v10091_v25 = vld [vmem:[#allocation3 + $0x764] sm:$0xf] }
 0x7f4   :  { %5703 = vmatmul.bf16.vlgmr.msrb.gmra.mxu0 %v11556_v11  ;;  %v10081_v5 = vld [vmem:[#allocation3 + $0x714] sm:$0xf]  ;;  %v9428_v55 = vld [vmem:[#allocation3 + $0x718] sm:$0xf0]  ;;  %v10095_v57 = vld [vmem:[#allocation3 + $0x784] sm:$0xf] }
 0x7f5   :  { %5949 = vmatpush.bf16.msra.mxu0 %v9350_v39  ;;  %v6246_v59 = vrot.slane %v5214_v9, 5  ;;  %v5184_v29 = vadd.f32 %v5183_v51, %v5171_v13  ;;  %v9390_v39 = vor.u32 %v10071_v17, %v9387_v27  ;;  %v9540_v9 = vld [vmem:[#allocation3 + $0x7f8] sm:$0xf0]  ;;  %v7317_v17 = vld [vmem:[%s12181_s1] sm:$0x7] }
 0x7f6   :  { %5716 = vmatmul.bf16.vlgmr.msrb.gmra.mxu1 %v11560_v10  ;;  %v5198_v15 = vpop.f32.mrf.mxu0  ;;  %7177 = vperm.xlu2 %10177, %v11704_v47   ;;  %v9302_v47 = vor.u32 %v10049_v35, %v9299_v23  ;;  %v9543_v13 = vor.u32 %v10109_v0, %v9540_v9  ;;  %v9431_v23 = vor.u32 %v10081_v5, %v9428_v55  ;;  %v9484_v21 = vld [vmem:[#allocation3 + $0x788] sm:$0xf0]  ;;  %v6361_v55 = vpop.permute.xlu2 %6360 }
 0x7f7   :  { %5962 = vmatpush.bf16.msra.mxu1 %v9414_v40  ;;  %v5211_v4 = vpop.f32.mrf.mxu1  ;;  %v6256_v34 = vsel %vm6254_vm6, %v6253_v50, %v6246_v59  ;;  %v5213_v52 = vmax.f32 %v5184_v29, 0.0  ;;  %v9460_v59 = vld [vmem:[#allocation3 + $0x758] sm:$0xf0]  ;;  %v9535_v50 = vor.u32 %v10107_v12, %v9532_v30  ;;  %v10105_v29 = vld [vmem:[#allocation3 + $0x7d4] sm:$0xf] }
 0x7f8   :  { %9547 = vmatpush.msk.msra.mxu3 %vm6278_vm7, %v6256_v34  ;;  %v9463_v7 = vor.u32 %v10089_v31, %v9460_v59  ;;  %v9524_v15 = vld [vmem:[#allocation3 + $0x7d8] sm:$0xf0]  ;;  %v10087_v4 = vld [vmem:[#allocation3 + $0x744] sm:$0xf]  ;;  %v9452_v34 = vld [vmem:[#allocation3 + $0x748] sm:$0xf0] }
 0x7f9   :  { %5950 = vmatpush.bf16.msra.mxu0 %v9342_v20  ;;  %v6245_v38 = vrot.slane %v5213_v52, 5  ;;  %v10065_v20 = vld [vmem:[#allocation3 + $0x694] sm:$0xf]  ;;  %v9527_v27 = vor.u32 %v10105_v29, %v9524_v15  ;;  %v9455_v52 = vor.u32 %v10087_v4, %v9452_v34  ;;  %v11831_v12 = vld [vmem:[%s12177_s22 + $0x6] ss:$8 sm:$0x3] }
 0x7fa   :  { %v5172_v44 = vpop.f32.mrf.mxu2  ;;  %v9366_v62 = vor.u32 %v10065_v20, %v9363_v18  ;;  %v10079_v20 = vld [vmem:[#allocation3 + $0x704] sm:$0xf]  ;;  %v9420_v18 = vld [vmem:[#allocation3 + $0x708] sm:$0xf0]  ;;  %v5919_v30 = vperm.slane %v11831_v12, 0 }
 0x7fb   :  { %5963 = vmatpush.bf16.msra.mxu1 %v9406_v45  ;;  %v5185_v40 = vpop.f32.mrf.mxu3  ;;  %v6255_v1 = vsel %vm6254_vm6, %v6252_v54, %v6245_v38  ;;  %v9294_v45 = vor.u32 %v10047_v33, %v9291_v32  ;;  %v9444_v38 = vld [vmem:[#allocation3 + $0x738] sm:$0xf0]  ;;  %v10101_v44 = vld [vmem:[#allocation3 + $0x7b4] sm:$0xf]  ;;  %v9423_v32 = vor.u32 %v10079_v20, %v9420_v18 }
 0x7fc   :  { %9544 = vmatpush.msk.msra.mxu2 %vm6278_vm7, %v6255_v1  ;;  %v9447_v54 = vor.u32 %v10085_v26, %v9444_v38  ;;  %v9436_v40 = vld [vmem:[#allocation3 + $0x728] sm:$0xf0] }
 0x7fd   :  { %5951 = vmatpush.bf16.msra.mxu0 %v9334_v63  ;;  %v9468_v63 = vld [vmem:[#allocation3 + $0x768] sm:$0xf0]  ;;  %v9439_v37 = vor.u32 %v10083_v19, %v9436_v40 }
 0x7fe   :  { %7167 = vperm.xlu2 %10177, %v11712_v6   ;;  %v6761_v6 = vld [vmem:[%s12180_s28] sm:$0x7]  ;;  %v9471_v51 = vor.u32 %v10091_v25, %v9468_v63 }
 0x7ff   :  { %5964 = vmatpush.bf16.msra.mxu1 %v9398_v22  ;;  %9545 = vmatmul.msk.f32.vlgmr.msra.gmra.mxu2 %vm6271_vm8, %v11795_v61  ;;  %v5411_v22 = vperm.slane %v11820_v60, 0 }
 0x800   :  { %9548 = vmatmul.msk.f32.vlgmr.msra.gmra.mxu3 %vm6271_vm8, %v11795_v61 }
 0x801   :  { %5952 = vmatpush.bf16.msra.mxu0 %v9326_v8 }
 0x803   :  { %5965 = vmatpush.bf16.msra.mxu1 %v9390_v39  ;;  %v9519_v39 = vor.u32 %v10103_v58, %v9516_v43  ;;  %v5412_v58 = vperm.slane %v11820_v60, 1 }
 0x805   :  { %5953 = vmatpush.bf16.msra.mxu0 %v9318_v2  ;;  %v9508_v2 = vld [vmem:[#allocation3 + $0x7b8] sm:$0xf0] }
 0x806   :  { %6764 = vperm.xlu2 %10177, %v6761_v6   ;;  %v9511_v16 = vor.u32 %v10101_v44, %v9508_v2  ;;  %v6269_v2 = vpop.permute.xlu0 %6268 }
 0x807   :  { %5966 = vmatpush.bf16.msra.mxu1 %v9382_v14  ;;  %9546 = vmatmul.msk.f32.gmra.mxu2 %vm6271_vm8, %v11811_v53  ;;  %v10099_v14 = vld [vmem:[#allocation3 + $0x7a4] sm:$0xf] }
 0x808   :  { %9549 = vmatmul.msk.f32.gmra.mxu3 %vm6271_vm8, %v11811_v53 }
 0x809   :  { %5954 = vmatpush.bf16.msra.mxu0 %v9310_v46  ;;  %v9500_v46 = vld [vmem:[#allocation3 + $0x7a8] sm:$0xf0] }
 0x80a   :  { %v9503_v35 = vor.u32 %v10099_v14, %v9500_v46 }
 0x80b   :  { %5967 = vmatpush.bf16.msra.mxu1 %v9374_v56  ;;  %v10097_v56 = vld [vmem:[#allocation3 + $0x794] sm:$0xf] }
 0x80d   :  { %5955 = vmatpush.bf16.msra.mxu0 %v9302_v47  ;;  %v9492_v47 = vld [vmem:[#allocation3 + $0x798] sm:$0xf0] }
 0x80e   :  { %7320 = vperm.xlu2 %10177, %v7317_v17   ;;  %v9495_v33 = vor.u32 %v10097_v56, %v9492_v47 }
 0x80f   :  { %5968 = vmatpush.bf16.msra.mxu1 %v9366_v62  ;;  %v9487_v62 = vor.u32 %v10095_v57, %v9484_v21 }
 0x811   :  { %5956 = vmatpush.bf16.msra.mxu0 %v9294_v45  ;;  %v9157_v45 = vld [vmem:[%s12177_s22 + $0x5] ss:$8 sm:$0x3] }
 0x812   :  { %v5424_v48 = vpop.f32.mrf.mxu2  ;;  %v5665_v41 = vperm.slane %v9157_v45, 0 }
 0x813   :  { %5969 = vmatpush.bf16.msra.mxu1 %v9358_v49  ;;  %v5425_v36 = vadd.f32 %v5424_v48, %v5411_v22  ;;  %v5437_v8 = vpop.f32.mrf.mxu3  ;;  %v11836_v48 = vld [vmem:[%s12177_s22 + $0x7] ss:$8 sm:$0x3] }
 0x814   :  { %5957 = vmatmul.bf16.vlgmr.msra.gmra.mxu0 %v11556_v11  ;;  %v6173_v4 = vperm.slane %v11836_v48, 0 }
 0x815   :  { %6203 = vmatpush.bf16.msrb.mxu0 %v9479_v28  ;;  %v5438_v24 = vadd.f32 %v5437_v8, %v5425_v36 }
 0x816   :  { %5970 = vmatmul.bf16.vlgmr.msra.gmra.mxu1 %v11560_v10 }
 0x817   :  { %6216 = vmatpush.bf16.msrb.mxu1 %v9543_v13  ;;  %v5467_v25 = vmax.f32 %v5438_v24, 0.0 }
 0x819   :  { %6204 = vmatpush.bf16.msrb.mxu0 %v9471_v51 }
 0x81a   :  { %v5426_v3 = vpop.f32.mrf.mxu2 }
 0x81b   :  { %6217 = vmatpush.bf16.msrb.mxu1 %v9535_v50  ;;  %v5439_v1 = vpop.f32.mrf.mxu3 }
 0x81c   :  { %v6345_v1 = vpop.permute.xlu1 %6344 }
 0x81d   :  { %6205 = vmatpush.bf16.msrb.mxu0 %v9463_v7 }
 0x81f   :  { %6218 = vmatpush.bf16.msrb.mxu1 %v9527_v27 }
 0x821   :  { %6206 = vmatpush.bf16.msrb.mxu0 %v9455_v52 }
 0x823   :  { %6219 = vmatpush.bf16.msrb.mxu1 %v9519_v39 }
 0x824   :  { %v6340_v21 = vpop.permute.xlu1 %6339 }
 0x825   :  { %6207 = vmatpush.bf16.msrb.mxu0 %v9447_v54 }
 0x827   :  { %6220 = vmatpush.bf16.msrb.mxu1 %v9511_v16  ;;  %v6264_v16 = vpop.permute.xlu0 %6263 }
 0x829   :  { %6208 = vmatpush.bf16.msrb.mxu0 %v9439_v37  ;;  %v5666_v37 = vperm.slane %v9157_v45, 1 }
 0x82b   :  { %6221 = vmatpush.bf16.msrb.mxu1 %v9503_v35 }
 0x82d   :  { %6209 = vmatpush.bf16.msrb.mxu0 %v9431_v23 }
 0x82f   :  { %6222 = vmatpush.bf16.msrb.mxu1 %v9495_v33 }
 0x831   :  { %6210 = vmatpush.bf16.msrb.mxu0 %v9423_v32 }
 0x832   :  { %v5678_v42 = vpop.f32.mrf.mxu2 }
 0x833   :  { %6223 = vmatpush.bf16.msrb.mxu1 %v9487_v62  ;;  %v5679_v28 = vadd.f32 %v5678_v42, %v5665_v41  ;;  %v5691_v0 = vpop.f32.mrf.mxu3 }
 0x834   :  { %6211 = vmatmul.bf16.vlgmr.msrb.gmra.mxu0 %v11556_v11 }
 0x835   :  { %v5692_v9 = vadd.f32 %v5691_v0, %v5679_v28 }
 0x836   :  { %6224 = vmatmul.bf16.vlgmr.msrb.gmra.mxu1 %v11560_v10 }
 0x837   :  { %v5721_v63 = vmax.f32 %v5692_v9, 0.0 }
 0x839   :  { %v6785_v6 = vrot.slane %v5721_v63, 7 }
 0x83a   :  { %v5680_v49 = vpop.f32.mrf.mxu2 }
 0x83b   :  { %v6801_v13 = vsel %vm2442_vm3, %v5467_v25, %v6785_v6  ;;  %v5693_v51 = vpop.f32.mrf.mxu3  ;;  %v6356_v49 = vpop.permute.xlu2 %6355 }
 0x851   :  { %v5450_v43 = vpop.f32.mrf.mxu0 }
 0x852   :  { %v5932_v31 = vpop.f32.mrf.mxu2  ;;  %v5451_v39 = vadd.f32 %v5450_v43, %v5412_v58 }
 0x853   :  { %v5933_v11 = vadd.f32 %v5932_v31, %v5919_v30  ;;  %v5945_v59 = vpop.f32.mrf.mxu3  ;;  %v5463_v54 = vpop.f32.mrf.mxu1  ;;  %v11845_v30 = vld [vmem:[%s12182_s2] sm:$0xff] }
 0x854   :  { %v5464_v44 = vadd.f32 %v5463_v54, %v5451_v39  ;;  %v11876_v54 = vld [vmem:[%s12182_s2 + $0x20] sm:$0xff] }
 0x855   :  { %v5946_v22 = vadd.f32 %v5945_v59, %v5933_v11 }
 0x856   :  { %v5468_v33 = vmax.f32 %v5464_v44, 0.0 }
 0x857   :  { %v5975_v10 = vmax.f32 %v5946_v22, 0.0  ;;  %v5920_v22 = vperm.slane %v11831_v12, 1 }
 0x859   :  { %v6791_v50 = vrot.slane %v5975_v10, 6  ;;  %v5452_v3 = vpop.f32.mrf.mxu0 }
 0x85a   :  { %v5934_v7 = vpop.f32.mrf.mxu2 }
 0x85b   :  { %v6803_v29 = vsel %vm6251_vm5, %v6801_v13, %v6791_v50  ;;  %v5947_v15 = vpop.f32.mrf.mxu3  ;;  %v5465_v19 = vpop.f32.mrf.mxu1 }
 0x871   :  { %v5704_v14 = vpop.f32.mrf.mxu0 }
 0x872   :  { %v6186_v34 = vpop.f32.mrf.mxu2  ;;  %v5705_v60 = vadd.f32 %v5704_v14, %v5666_v37  ;;  %v6421_v14 = vpop.permute.xlu0 %6420 }
 0x873   :  { %v6187_v36 = vadd.f32 %v6186_v34, %v6173_v4  ;;  %v6199_v8 = vpop.f32.mrf.mxu3  ;;  %v5717_v35 = vpop.f32.mrf.mxu1  ;;  %v11853_v4 = vld [vmem:[%s12182_s2 + $0x8] sm:$0xff] }
 0x874   :  { %v5718_v56 = vadd.f32 %v5717_v35, %v5705_v60 }
 0x875   :  { %v6200_v17 = vadd.f32 %v6199_v8, %v6187_v36 }
 0x876   :  { %v5722_v32 = vmax.f32 %v5718_v56, 0.0 }
 0x877   :  { %v6229_v27 = vmax.f32 %v6200_v17, 0.0 }
 0x878   :  { %v6786_v62 = vrot.slane %v5722_v32, 7 }
 0x879   :  { %v6797_v24 = vrot.slane %v6229_v27, 5  ;;  %v5706_v41 = vpop.f32.mrf.mxu0  ;;  %v11861_v27 = vld [vmem:[%s12182_s2 + $0x10] sm:$0xff] }
 0x87a   :  { %v6188_v52 = vpop.f32.mrf.mxu2  ;;  %v6802_v25 = vsel %vm2442_vm3, %v5468_v33, %v6786_v62  ;;  %v11908_v35 = vpop.permute.xlu0 %6590 }
 0x87b   :  { %v6201_v26 = vpop.f32.mrf.mxu3  ;;  %v11841_v38 = vsel %vm6254_vm6, %v6803_v29, %v6797_v24  ;;  %v5719_v63 = vpop.f32.mrf.mxu1  ;;  %v11868_v24 = vld [vmem:[%s12182_s2 + $0x18] sm:$0xff]  ;;  %v6174_v52 = vperm.slane %v11836_v48, 1 }
 0x882   :  { %v6302_v5 = vpop.f32.mrf.mxu2  ;;  %v11912_v33 = vpop.permute.xlu0 %6654 }
 0x883   :  { %v6325_v40 = vpop.f32.mrf.mxu3  ;;  %v6303_v18 = vadd.f32 %v6302_v5, %v6264_v16 }
 0x884   :  { %v6326_v46 = vadd.f32 %v6325_v40, %v6264_v16  ;;  %v11886_v40 = vld [vmem:[%s12182_s2 + $0x28] sm:$0xff]  ;;  %v11900_v16 = vld [vmem:[%s12182_s2 + $0x38] sm:$0xff] }
 0x885   :  { %v6331_v0 = vmax.f32 %v6303_v18, 0.0 }
 0x886   :  { %v6332_v47 = vmax.f32 %v6326_v46, 0.0  ;;  %v6416_v46 = vpop.permute.xlu1 %6415 }
 0x887   :  { %v6347_v31 = vmul.f32 %v6340_v21, %v6331_v0 }
 0x888   :  { %v6348_v42 = vmul.f32 %v6340_v21, %v6332_v47 }
 0x889   :  { %v6363_v50 = vadd.f32 %v6356_v49, %v6347_v31 }
 0x88a   :  { %v6305_v28 = vpop.f32.mrf.mxu2  ;;  %v6364_v51 = vadd.f32 %v6356_v49, %v6348_v42  ;;  %v11914_v41 = vpop.permute.xlu0 %6649 }
 0x88b   :  { %v6328_v23 = vpop.f32.mrf.mxu3  ;;  %v6306_v9 = vadd.f32 %v6305_v28, %v6269_v2 }
 0x88c   :  { %v6329_v20 = vadd.f32 %v6328_v23, %v6269_v2 }
 0x88d   :  { %v6333_v13 = vmax.f32 %v6306_v9, 0.0 }
 0x88e   :  { %v6334_v57 = vmax.f32 %v6329_v20, 0.0  ;;  %v6406_v56 = vpop.permute.xlu1 %6405 }
 0x88f   :  { %v6349_v11 = vmul.f32 %v6345_v1, %v6333_v13 }
 0x890   :  { %v6350_v45 = vmul.f32 %v6345_v1, %v6334_v57  ;;  %v11893_v1 = vld [vmem:[%s12182_s2 + $0x30] sm:$0xff] }
 0x891   :  { %v6365_v59 = vadd.f32 %v6361_v55, %v6349_v11  ;;  %v5958_v10 = vpop.f32.mrf.mxu0 }
 0x892   :  { %v6366_v6 = vadd.f32 %v6361_v55, %v6350_v45  ;;  %v5959_v7 = vadd.f32 %v5958_v10, %v5920_v22  ;;  %v6411_v55 = vpop.permute.xlu2 %6410 }
 0x893   :  { %6461 = vmatpush.msra.mxu0 %v6365_v59  ;;  %v5971_v29 = vpop.f32.mrf.mxu1 }
 0x894   :  { %6502 = vmatpush.msra.mxu1 %v6366_v6  ;;  %v5972_v15 = vadd.f32 %v5971_v29, %v5959_v7 }
 0x895   :  { %6462 = vmatpush.msra.mxu0 %v6363_v50 }
 0x896   :  { %6503 = vmatpush.msra.mxu1 %v6364_v51  ;;  %9550 = vmatmul.msk.f32.vlgmr.msra.gmra.mxu0 %vm1833_vm2, %v11845_v30  ;;  %v5976_v34 = vmax.f32 %v5972_v15, 0.0  ;;  %v6401_v32 = vpop.permute.xlu1 %6400 }
 0x897   :  { %9558 = vmatmul.msk.f32.vlgmr.msra.gmra.mxu1 %vm1833_vm2, %v11845_v30 }
 0x898   :  { %v6792_v36 = vrot.slane %v5976_v34, 6 }
 0x899   :  { %v5960_v12 = vpop.f32.mrf.mxu0 }
 0x89a   :  { %v6804_v8 = vsel %vm6251_vm5, %v6802_v25, %v6792_v36  ;;  %v6586_v47 = vpop.permute.xlu2 %6585  ;;  %v11918_v25 = vpop.permute.xlu0 %6644 }
 0x89b   :  { %v5973_v17 = vpop.f32.mrf.mxu1 }
 0x89e   :  { %9551 = vmatmul.msk.f32.gmra.mxu0 %vm1833_vm2, %v11853_v4  ;;  %v6396_v45 = vpop.permute.xlu1 %6395 }
 0x89f   :  { %9559 = vmatmul.msk.f32.gmra.mxu1 %vm1833_vm2, %v11853_v4 }
 0x8a2   :  { %v6581_v21 = vpop.permute.xlu2 %6580  ;;  %v11922_v51 = vpop.permute.xlu0 %6639 }
 0x8a6   :  { %9552 = vmatmul.msk.f32.gmra.mxu0 %vm1833_vm2, %v11861_v27  ;;  %v6391_v63 = vpop.permute.xlu1 %6390 }
 0x8a7   :  { %9560 = vmatmul.msk.f32.gmra.mxu1 %vm1833_vm2, %v11861_v27 }
 0x8aa   :  { %v11916_v28 = vpop.permute.xlu2 %6575 }
 0x8ae   :  { %9553 = vmatmul.msk.f32.gmra.mxu0 %vm1833_vm2, %v11868_v24  ;;  %v6386_v59 = vpop.permute.xlu1 %6385 }
 0x8af   :  { %9561 = vmatmul.msk.f32.gmra.mxu1 %vm1833_vm2, %v11868_v24 }
 0x8b1   :  { %v6212_v58 = vpop.f32.mrf.mxu0 }
 0x8b2   :  { %v6213_v43 = vadd.f32 %v6212_v58, %v6174_v52  ;;  %v11920_v49 = vpop.permute.xlu2 %6570 }
 0x8b3   :  { %v6225_v26 = vpop.f32.mrf.mxu1 }
 0x8b4   :  { %v6226_v39 = vadd.f32 %v6225_v26, %v6213_v43 }
 0x8b6   :  { %v6230_v44 = vmax.f32 %v6226_v39, 0.0  ;;  %9554 = vmatmul.msk.f32.gmra.mxu0 %vm1833_vm2, %v11876_v54 }
 0x8b7   :  { %9562 = vmatmul.msk.f32.gmra.mxu1 %vm1833_vm2, %v11876_v54 }
 0x8b8   :  { %v6798_v2 = vrot.slane %v6230_v44, 5  ;;  %v6635_v44 = vpop.permute.xlu0 %6634 }
 0x8b9   :  { %v6214_v48 = vpop.f32.mrf.mxu0 }
 0x8ba   :  { %v11881_v3 = vsel %vm6254_vm6, %v6804_v8, %v6798_v2  ;;  %v11924_v10 = vpop.permute.xlu2 %6565 }
 0x8bb   :  { %v6227_v19 = vpop.f32.mrf.mxu1 }
 0x8be   :  { %9555 = vmatmul.msk.f32.gmra.mxu0 %vm1833_vm2, %v11886_v40 }
 0x8bf   :  { %9563 = vmatmul.msk.f32.gmra.mxu1 %vm1833_vm2, %v11886_v40 }
 0x8c6   :  { %9556 = vmatmul.msk.f32.gmra.mxu0 %vm1833_vm2, %v11893_v1 }
 0x8c7   :  { %9564 = vmatmul.msk.f32.gmra.mxu1 %vm1833_vm2, %v11893_v1 }
 0x8ce   :  { %9557 = vmatmul.msk.f32.gmra.mxu0 %vm1833_vm2, %v11900_v16 }
 0x8cf   :  { %9565 = vmatmul.msk.f32.gmra.mxu1 %vm1833_vm2, %v11900_v16 }
 0x913   :  { %v11906_v5 = vpop.f32.mrf.mxu0 }
 0x914   :  { %v6505_v37 = vpop.f32.mrf.mxu1 }
 0x91b   :  { %v11910_v23 = vpop.f32.mrf.mxu0 }
 0x91c   :  { %v6508_v60 = vpop.f32.mrf.mxu1 }
 0x923   :  { %v6470_v18 = vpop.f32.mrf.mxu0 }
 0x924   :  { %v6511_v20 = vpop.f32.mrf.mxu1 }
 0x925   :  { %v6512_v52 = vadd.f32 %v6511_v20, %v6396_v45 }
 0x927   :  { %v6534_v20 = vmax.f32 %v6512_v52, 0.0 }
 0x92b   :  { %v6473_v62 = vpop.f32.mrf.mxu0 }
 0x92c   :  { %v6514_v57 = vpop.f32.mrf.mxu1 }
 0x92d   :  { %v6515_v36 = vadd.f32 %v6514_v57, %v6401_v32  ;;  %v6474_v57 = vadd.f32 %v6473_v62, %v6401_v32 }
 0x92f   :  { %v6535_v62 = vmax.f32 %v6474_v57, 0.0 }
 0x933   :  { %v6476_v0 = vpop.f32.mrf.mxu0 }
 0x934   :  { %v6517_v42 = vpop.f32.mrf.mxu1  ;;  %v6477_v2 = vadd.f32 %v6476_v0, %v6406_v56 }
 0x935   :  { %v6518_v7 = vadd.f32 %v6517_v42, %v6406_v56  ;;  %v6471_v56 = vadd.f32 %v6470_v18, %v6396_v45 }
 0x936   :  { %v6537_v0 = vmax.f32 %v6477_v2, 0.0 }
 0x937   :  { %v6538_v58 = vmax.f32 %v6518_v7, 0.0  ;;  %v6630_v7 = vpop.permute.xlu2 %6629  ;;  %v6533_v18 = vmax.f32 %v6471_v56, 0.0 }
 0x938   :  { %v6601_v45 = vmul.f32 %v11916_v28, %v6537_v0 }
 0x93b   :  { %v6479_v6 = vpop.f32.mrf.mxu0 }
 0x93c   :  { %v6520_v9 = vpop.f32.mrf.mxu1  ;;  %v6480_v17 = vadd.f32 %v6479_v6, %v6411_v55  ;;  %v6602_v6 = vmul.f32 %v11916_v28, %v6538_v58  ;;  %v6597_v28 = vmul.f32 %v11924_v10, %v6533_v18 }
 0x93d   :  { %v6521_v22 = vadd.f32 %v6520_v9, %v6411_v55  ;;  %v6509_v9 = vadd.f32 %v6508_v60, %v6391_v63  ;;  %v6506_v55 = vadd.f32 %v6505_v37, %v6386_v59  ;;  %v6468_v37 = vadd.f32 %v11910_v23, %v6391_v63 }
 0x93f   :  { %v6540_v12 = vmax.f32 %v6521_v22, 0.0  ;;  %v6531_v63 = vmax.f32 %v6468_v37, 0.0  ;;  %v6620_v2 = vpop.permute.xlu2 %6619 }
 0x941   :  { %v6604_v42 = vmul.f32 %v6581_v21, %v6540_v12  ;;  %v6530_v12 = vmax.f32 %v6506_v55, 0.0 }
 0x943   :  { %v6482_v11 = vpop.f32.mrf.mxu0  ;;  %v6668_v32 = vadd.f32 %v11918_v25, %v6604_v42 }
 0x944   :  { %v6523_v13 = vpop.f32.mrf.mxu1  ;;  %v6483_v34 = vadd.f32 %v6482_v11, %v6416_v46  ;;  %v6539_v11 = vmax.f32 %v6480_v17, 0.0 }
 0x945   :  { %v6524_v31 = vadd.f32 %v6523_v13, %v6416_v46  ;;  %v6536_v13 = vmax.f32 %v6515_v36, 0.0  ;;  %v6561_v46 = vpop.permute.xlu1 %6560 }
 0x946   :  { %v6541_v48 = vmax.f32 %v6483_v34, 0.0  ;;  %v6603_v34 = vmul.f32 %v6581_v21, %v6539_v11  ;;  %v6556_v21 = vpop.permute.xlu0 %6555 }
 0x947   :  { %v6542_v29 = vmax.f32 %v6524_v31, 0.0 }
 0x948   :  { %v6667_v58 = vadd.f32 %v11918_v25, %v6603_v34  ;;  %v6673_v25 = vld [vmem:[%s12183_s7] sm:$0x7] }
 0x949   :  { %v6606_v43 = vmul.f32 %v6586_v47, %v6542_v29  ;;  %v6532_v29 = vmax.f32 %v6509_v9, 0.0 }
 0x94b   :  { %v6485_v39 = vpop.f32.mrf.mxu0  ;;  %v6596_v52 = vmul.f32 %v6561_v46, %v6532_v29 }
 0x94c   :  { %v6526_v50 = vpop.f32.mrf.mxu1  ;;  %v6486_v19 = vadd.f32 %v6485_v39, %v6421_v14 }
 0x94d   :  { %v6527_v15 = vadd.f32 %v6526_v50, %v6421_v14  ;;  %v6670_v50 = vadd.f32 %v11914_v41, %v6606_v43  ;;  %v6605_v14 = vmul.f32 %v6586_v47, %v6541_v48  ;;  %v6666_v47 = vadd.f32 %v11922_v51, %v6602_v6 }
 0x94e   :  { %v6543_v22 = vmax.f32 %v6486_v19, 0.0  ;;  %v6594_v43 = vmul.f32 %v6556_v21, %v6530_v12  ;;  %v6595_v48 = vmul.f32 %v6561_v46, %v6531_v63  ;;  %v11963_v46 = vpop.permute.xlu2 %6892 }
 0x94f   :  { %v6544_v8 = vmax.f32 %v6527_v15, 0.0  ;;  %v6600_v15 = vmul.f32 %v11920_v49, %v6536_v13  ;;  %v6669_v17 = vadd.f32 %v11914_v41, %v6605_v14  ;;  %v6665_v41 = vadd.f32 %v11922_v51, %v6601_v45 }
 0x950   :  { %v6607_v60 = vmul.f32 %v11908_v35, %v6543_v22  ;;  %v6658_v19 = vadd.f32 %v6620_v2, %v6594_v43  ;;  %v6661_v13 = vadd.f32 %v6630_v7, %v6597_v28 }
 0x951   :  { %v6608_v26 = vmul.f32 %v11908_v35, %v6544_v8  ;;  %v6598_v8 = vmul.f32 %v11924_v10, %v6534_v20  ;;  %v6465_v35 = vadd.f32 %v11906_v5, %v6386_v59  ;;  %v6664_v23 = vadd.f32 %v6635_v44, %v6600_v15  ;;  %v6625_v59 = vpop.permute.xlu1 %6624 }
 0x952   :  { %v6671_v36 = vadd.f32 %v11912_v33, %v6607_v60  ;;  %v6660_v39 = vadd.f32 %v6625_v59, %v6596_v52  ;;  %v6659_v10 = vadd.f32 %v6625_v59, %v6595_v48 }
 0x953   :  { %v6672_v31 = vadd.f32 %v11912_v33, %v6608_v26  ;;  %v6599_v33 = vmul.f32 %v11920_v49, %v6535_v62  ;;  %v6662_v5 = vadd.f32 %v6630_v7, %v6598_v8  ;;  %v6529_v26 = vmax.f32 %v6465_v35, 0.0 }
 0x954   :  { %6691 = vmatpush.msrb.mxu2 %v6671_v36 }
 0x955   :  { %6711 = vmatpush.msrb.mxu3 %v6672_v31  ;;  %v6663_v49 = vadd.f32 %v6635_v44, %v6599_v33  ;;  %v6593_v9 = vmul.f32 %v6556_v21, %v6529_v26 }
 0x956   :  { %6692 = vmatpush.msrb.mxu2 %v6669_v17  ;;  %v11969_v11 = vpop.permute.xlu2 %6903 }
 0x957   :  { %6712 = vmatpush.msrb.mxu3 %v6670_v50  ;;  %v6657_v51 = vadd.f32 %v6620_v2, %v6593_v9 }
 0x958   :  { %6693 = vmatpush.msrb.mxu2 %v6667_v58 }
 0x959   :  { %6713 = vmatpush.msrb.mxu3 %v6668_v32  ;;  %v6814_v31 = vpop.permute.xlu1 %6813 }
 0x95a   :  { %6694 = vmatpush.msrb.mxu2 %v6665_v41 }
 0x95b   :  { %6714 = vmatpush.msrb.mxu3 %v6666_v47 }
 0x95c   :  { %6695 = vmatpush.msrb.mxu2 %v6663_v49 }
 0x95d   :  { %6715 = vmatpush.msrb.mxu3 %v6664_v23 }
 0x95e   :  { %6696 = vmatpush.msrb.mxu2 %v6661_v13  ;;  %v11975_v55 = vpop.permute.xlu2 %6958 }
 0x95f   :  { %6716 = vmatpush.msrb.mxu3 %v6662_v5 }
 0x960   :  { %6697 = vmatpush.msrb.mxu2 %v6659_v10 }
 0x961   :  { %6717 = vmatpush.msrb.mxu3 %v6660_v39  ;;  %v11967_v57 = vpop.permute.xlu1 %6908 }
 0x962   :  { %6698 = vmatpush.msrb.mxu2 %v6657_v51 }
 0x963   :  { %6718 = vmatpush.msrb.mxu3 %v6658_v19  ;;  %9566 = vmatmul.msk.f32.vlgmr.msrb.gmra.mxu2 %vm1679_vm1, %v6673_v25 }
 0x964   :  { %9567 = vmatmul.msk.f32.vlgmr.msrb.gmra.mxu3 %vm1679_vm1, %v6673_v25  ;;  %9570 = vmatpush.msk.msra.mxu2 %vm6278_vm7, %v11841_v38 }
 0x965   :  { %9573 = vmatpush.msk.msra.mxu3 %vm6278_vm7, %v11881_v3  ;;  %v6819_v3 = vpop.permute.xlu0 %6818 }
 0x966   :  { %v11981_v6 = vpop.permute.xlu2 %7133 }
 0x969   :  { %v11973_v22 = vpop.permute.xlu1 %6963 }
 0x96b   :  { %9571 = vmatmul.msk.f32.vlgmr.msra.gmra.mxu2 %vm6271_vm8, %v11795_v61 }
 0x96c   :  { %9574 = vmatmul.msk.f32.vlgmr.msra.gmra.mxu3 %vm6271_vm8, %v11795_v61 }
 0x96d   :  { %v11959_v44 = vpop.permute.xlu0 %6887 }
 0x96e   :  { %v11987_v56 = vpop.permute.xlu2 %7128 }
 0x971   :  { %v11979_v20 = vpop.permute.xlu1 %6953 }
 0x973   :  { %9572 = vmatmul.msk.f32.gmra.mxu2 %vm6271_vm8, %v11811_v53 }
 0x974   :  { %9575 = vmatmul.msk.f32.gmra.mxu3 %vm6271_vm8, %v11811_v53 }
 0x975   :  { %v11961_v42 = vpop.permute.xlu0 %6968 }
 0x976   :  { %v11993_v60 = vpop.permute.xlu2 %7123 }
 0x979   :  { %v11985_v7 = vpop.permute.xlu1 %6948 }
 0x97d   :  { %v11965_v38 = vpop.permute.xlu0 %7138 }
 0x97e   :  { %v11999_v32 = vpop.permute.xlu2 %7118 }
 0x981   :  { %v11991_v14 = vpop.permute.xlu1 %6943 }
 0x985   :  { %v11971_v61 = vpop.permute.xlu0 %7202 }
 0x986   :  { %v12005_v34 = vpop.permute.xlu2 %7113 }
 0x989   :  { %v11997_v15 = vpop.permute.xlu1 %6938 }
 0x98d   :  { %v11977_v53 = vpop.permute.xlu0 %7197 }
 0x98e   :  { %v12009_v23 = vpop.permute.xlu2 %7177 }
 0x991   :  { %v12003_v62 = vpop.permute.xlu1 %6933 }
 0x995   :  { %v11983_v50 = vpop.permute.xlu0 %7192 }
 0x996   :  { %v12013_v48 = vpop.permute.xlu2 %7167 }
 0x999   :  { %v12007_v47 = vpop.permute.xlu1 %7108 }
 0x99d   :  { %v11989_v0 = vpop.permute.xlu0 %7187 }
 0x9a1   :  { %v12011_v33 = vpop.permute.xlu1 %7172 }
 0x9a5   :  { %v11995_v29 = vpop.permute.xlu0 %7182 }
 0x9ad   :  { %v12001_v37 = vpop.permute.xlu0 %7103 }
 0x9b5   :  { %v6678_v36 = vpop.permute.xlu0 %6677 }
 0x9e6   :  { %v6700_v18 = vpop.f32.mrf.mxu2 }
 0x9e7   :  { %v6720_v12 = vpop.f32.mrf.mxu3  ;;  %v6701_v45 = vadd.f32 %v6700_v18, %v6678_v36 }
 0x9e8   :  { %v6721_v8 = vadd.f32 %v6720_v12, %v6678_v36  ;;  %v12017_v36 = vpop.permute.xlu1 %7225 }
 0x9e9   :  { %v9568_v17 = vmul.f32 -1.442695, %v6701_v45 }
 0x9ea   :  { %v9569_v35 = vmul.f32 -1.442695, %v6721_v8 }
 0x9ec   :  { %10178 = vpow2.f32 %v9569_v35 }
 0x9ed   :  { %10180 = vpow2.f32 %v9568_v17 }
 0x9ee   :  { %v6850_v58 = vpop.f32.mrf.mxu2 }
 0x9ef   :  { %v6873_v52 = vpop.f32.mrf.mxu3  ;;  %v6851_v39 = vadd.f32 %v6850_v58, %v6814_v31 }
 0x9f0   :  { %v6874_v43 = vadd.f32 %v6873_v52, %v6814_v31 }
 0x9f1   :  { %v6879_v13 = vmax.f32 %v6851_v39, 0.0 }
 0x9f2   :  { %v10179_v21 = vpop.eup %10178  ;;  %v6880_v41 = vmax.f32 %v6874_v43, 0.0 }
 0x9f3   :  { %v6730_v63 = vadd.f32 1.0, %v10179_v21  ;;  %v10181_v5 = vpop.eup %10180  ;;  %v6895_v21 = vmul.f32 %v11959_v44, %v6879_v13 }
 0x9f4   :  { %v6729_v26 = vadd.f32 1.0, %v10181_v5  ;;  %v6896_v9 = vmul.f32 %v11959_v44, %v6880_v41  ;;  %v6765_v44 = vpop.permute.xlu2 %6764 }
 0x9f5   :  { %10182 = vrcp.f32 %v6730_v63  ;;  %v6757_v8 = vand.u32 2147483648, %v6730_v63  ;;  %v6755_v17 = vand.u32 2147483647, %v6730_v63  ;;  %vm6751_vm10 = vweird.f32 %v6730_v63 }
 0x9f6   :  { %10184 = vrcp.f32 %v6729_v26  ;;  %v6853_v25 = vpop.f32.mrf.mxu2  ;;  %v6912_v43 = vadd.f32 %v11969_v11, %v6896_v9  ;;  %v6740_v39 = vand.u32 2147483647, %v6729_v26  ;;  %vm6736_vm14 = vweird.f32 %v6729_v26 }
 0x9f7   :  { %v6876_v59 = vpop.f32.mrf.mxu3  ;;  %v6854_v51 = vadd.f32 %v6853_v25, %v6819_v3  ;;  %v6758_v5 = vor.u32 1.1754944e-38, %v6757_v8  ;;  %vm6756_vm12 = vcmp.eq.f32.partialorder %v6755_v17, 8.507059e+37 }
 0x9f8   :  { %v6877_v28 = vadd.f32 %v6876_v59, %v6819_v3  ;;  %vm6741_vm0 = vcmp.eq.f32.partialorder %v6740_v39, 8.507059e+37 }
 0x9f9   :  { %v6881_v31 = vmax.f32 %v6854_v51, 0.0 }
 0x9fa   :  { %v6882_v49 = vmax.f32 %v6877_v28, 0.0 }
 0x9fb   :  { %v10183_v2 = vpop.eup %10182  ;;  %v6897_v58 = vmul.f32 %v11963_v46, %v6881_v31 }
 0x9fc   :  { %v6747_v19 = vmul.f32 %v10183_v2, %v6730_v63  ;;  %v6898_v10 = vmul.f32 %v11963_v46, %v6882_v49  ;;  %v10185_v18 = vpop.eup %10184  ;;  %vm6752_vm9 = vweird.f32 %v10183_v2  ;;  %v6742_v49 = vand.u32 2147483648, %v6729_v26 }
 0x9fd   :  { %v6732_v52 = vmul.f32 %v10185_v18, %v6729_v26  ;;  %vm6753_vm11 = vmor %vm6751_vm10, %vm6752_vm9  ;;  %v6913_v28 = vadd.f32 %v11967_v57, %v6897_v58  ;;  %vm6737_vm13 = vweird.f32 %v10185_v18  ;;  %v6911_v63 = vadd.f32 %v11969_v11, %v6895_v21 }
 0x9fe   :  { %v6748_v12 = vsub.f32 1.0, %v6747_v19  ;;  %v6914_v35 = vadd.f32 %v11967_v57, %v6898_v10  ;;  %v6773_v57 = vpop.permute.xlu1 %6772  ;;  %vm6738_vm15 = vmor %vm6736_vm14, %vm6737_vm13 }
 0x9ff   :  { %v6733_v59 = vsub.f32 1.0, %v6732_v52  ;;  %7009 = vmatpush.msrb.mxu2 %v6913_v28 }
 0xa00   :  { %v6749_v45 = vmul.f32 %v10183_v2, %v6748_v12  ;;  %7050 = vmatpush.msrb.mxu3 %v6914_v35 }
 0xa01   :  { %v6734_v19 = vmul.f32 %v10185_v18, %v6733_v59  ;;  %7010 = vmatpush.msrb.mxu2 %v6911_v63 }
 0xa02   :  { %v6750_v3 = vadd.f32 %v10183_v2, %v6749_v45  ;;  %7051 = vmatpush.msrb.mxu3 %v6912_v43  ;;  %9576 = vmatmul.msk.f32.vlgmr.msrb.gmra.mxu2 %vm1833_vm2, %v11845_v30 }
 0xa03   :  { %9584 = vmatmul.msk.f32.vlgmr.msrb.gmra.mxu3 %vm1833_vm2, %v11845_v30  ;;  %v6735_v9 = vadd.f32 %v10185_v18, %v6734_v19 }
 0xa04   :  { %v6754_v41 = vsel %vm6753_vm11, %v10183_v2, %v6750_v3  ;;  %v6743_v2 = vor.u32 1.1754944e-38, %v6742_v49 }
 0xa05   :  { %v6759_v46 = vsel %vm6756_vm12, %v6758_v5, %v6754_v41  ;;  %v6739_v10 = vsel %vm6738_vm15, %v10185_v18, %v6735_v9 }
 0xa06   :  { %v6768_v25 = vmul.f32 %v6765_v44, %v6759_v46  ;;  %v6744_v51 = vsel %vm6741_vm0, %v6743_v2, %v6739_v10 }
 0xa07   :  { %v6767_v12 = vmul.f32 %v6765_v44, %v6744_v51 }
 0xa08   :  { %v6776_v13 = vadd.f32 %v6773_v57, %v6768_v25 }
 0xa09   :  { %v6775_v8 = vadd.f32 %v6773_v57, %v6767_v12 }
 0xa0a   :  { %v6779_v11 = vrot.slane %v6776_v13, 4  ;;  %9577 = vmatmul.msk.f32.gmra.mxu2 %vm1833_vm2, %v11853_v4 }
 0xa0b   :  { %9585 = vmatmul.msk.f32.gmra.mxu3 %vm1833_vm2, %v11853_v4 }
 0xa0c   :  { %v6780_v35 = vsel %vm6278_vm7, %v6775_v8, %v6779_v11 }
 0xa0d   :  { %6782 = vst [vmem:[%s10505_s27] sm:$0x77] %v6780_v35 }
 0xa12   :  { %9578 = vmatmul.msk.f32.gmra.mxu2 %vm1833_vm2, %v11861_v27 }
 0xa13   :  { %9586 = vmatmul.msk.f32.gmra.mxu3 %vm1833_vm2, %v11861_v27 }
 0xa1a   :  { %9579 = vmatmul.msk.f32.gmra.mxu2 %vm1833_vm2, %v11868_v24 }
 0xa1b   :  { %9587 = vmatmul.msk.f32.gmra.mxu3 %vm1833_vm2, %v11868_v24 }
 0xa22   :  { %9580 = vmatmul.msk.f32.gmra.mxu2 %vm1833_vm2, %v11876_v54 }
 0xa23   :  { %9588 = vmatmul.msk.f32.gmra.mxu3 %vm1833_vm2, %v11876_v54 }
 0xa2a   :  { %9581 = vmatmul.msk.f32.gmra.mxu2 %vm1833_vm2, %v11886_v40 }
 0xa2b   :  { %9589 = vmatmul.msk.f32.gmra.mxu3 %vm1833_vm2, %v11886_v40 }
 0xa32   :  { %9582 = vmatmul.msk.f32.gmra.mxu2 %vm1833_vm2, %v11893_v1 }
 0xa33   :  { %9590 = vmatmul.msk.f32.gmra.mxu3 %vm1833_vm2, %v11893_v1 }
 0xa3a   :  { %9583 = vmatmul.msk.f32.gmra.mxu2 %vm1833_vm2, %v11900_v16 }
 0xa3b   :  { %9591 = vmatmul.msk.f32.gmra.mxu3 %vm1833_vm2, %v11900_v16 }
 0xa85   :  { %v7012_v4 = vpop.f32.mrf.mxu2 }
 0xa86   :  { %v7053_v30 = vpop.f32.mrf.mxu3 }
 0xa8d   :  { %v7015_v24 = vpop.f32.mrf.mxu2 }
 0xa8e   :  { %v7056_v27 = vpop.f32.mrf.mxu3 }
 0xa8f   :  { %v7057_v13 = vadd.f32 %v7056_v27, %v11997_v15 }
 0xa95   :  { %v7018_v26 = vpop.f32.mrf.mxu2 }
 0xa96   :  { %v7059_v54 = vpop.f32.mrf.mxu3 }
 0xa97   :  { %v7060_v46 = vadd.f32 %v7059_v54, %v11991_v14  ;;  %v7019_v54 = vadd.f32 %v7018_v26, %v11991_v14 }
 0xa99   :  { %v7082_v35 = vmax.f32 %v7060_v46, 0.0 }
 0xa9d   :  { %v7021_v40 = vpop.f32.mrf.mxu2 }
 0xa9e   :  { %v7062_v31 = vpop.f32.mrf.mxu3  ;;  %v7022_v51 = vadd.f32 %v7021_v40, %v11985_v7  ;;  %v7080_v40 = vmax.f32 %v7057_v13, 0.0 }
 0xa9f   :  { %v7063_v41 = vadd.f32 %v7062_v31, %v11985_v7 }
 0xaa1   :  { %v7084_v10 = vmax.f32 %v7063_v41, 0.0  ;;  %v7221_v41 = vld [vmem:[%s12183_s7] sm:$0x7] }
 0xaa5   :  { %v7024_v45 = vpop.f32.mrf.mxu2 }
 0xaa6   :  { %v7065_v18 = vpop.f32.mrf.mxu3  ;;  %v7025_v63 = vadd.f32 %v7024_v45, %v11979_v20  ;;  %v7016_v45 = vadd.f32 %v7015_v24, %v11997_v15 }
 0xaa7   :  { %v7066_v16 = vadd.f32 %v7065_v18, %v11979_v20  ;;  %v7054_v20 = vadd.f32 %v7053_v30, %v12003_v62 }
 0xaa8   :  { %v7085_v18 = vmax.f32 %v7025_v63, 0.0 }
 0xaa9   :  { %v7086_v19 = vmax.f32 %v7066_v16, 0.0 }
 0xaab   :  { %v7150_v31 = vmul.f32 %v11993_v60, %v7086_v19 }
 0xaad   :  { %v7027_v52 = vpop.f32.mrf.mxu2  ;;  %v7214_v15 = vadd.f32 %v11989_v0, %v7150_v31 }
 0xaae   :  { %v7068_v17 = vpop.f32.mrf.mxu3  ;;  %v7028_v49 = vadd.f32 %v7027_v52, %v11975_v55  ;;  %v7083_v52 = vmax.f32 %v7022_v51, 0.0 }
 0xaaf   :  { %v7069_v43 = vadd.f32 %v7068_v17, %v11975_v55  ;;  %v7148_v17 = vmul.f32 %v11999_v32, %v7084_v10 }
 0xab0   :  { %v7087_v12 = vmax.f32 %v7028_v49, 0.0 }
 0xab1   :  { %v7088_v39 = vmax.f32 %v7069_v43, 0.0  ;;  %v7147_v43 = vmul.f32 %v11999_v32, %v7083_v52 }
 0xab2   :  { %v7151_v30 = vmul.f32 %v11987_v56, %v7087_v12 }
 0xab3   :  { %v7152_v55 = vmul.f32 %v11987_v56, %v7088_v39  ;;  %v7144_v56 = vmul.f32 %v12007_v47, %v7080_v40 }
 0xab5   :  { %v7030_v1 = vpop.f32.mrf.mxu2  ;;  %v7216_v26 = vadd.f32 %v11983_v50, %v7152_v55 }
 0xab6   :  { %v7071_v21 = vpop.f32.mrf.mxu3  ;;  %v7031_v59 = vadd.f32 %v7030_v1, %v11973_v22  ;;  %v7081_v1 = vmax.f32 %v7019_v54, 0.0 }
 0xab7   :  { %v7072_v58 = vadd.f32 %v7071_v21, %v11973_v22  ;;  %v7078_v21 = vmax.f32 %v7054_v20, 0.0 }
 0xab8   :  { %v7089_v57 = vmax.f32 %v7031_v59, 0.0  ;;  %v7208_v59 = vadd.f32 %v12011_v33, %v7144_v56 }
 0xab9   :  { %v7090_v5 = vmax.f32 %v7072_v58, 0.0  ;;  %v7149_v58 = vmul.f32 %v11993_v60, %v7085_v18  ;;  %v7142_v16 = vmul.f32 %v12001_v37, %v7078_v21 }
 0xabb   :  { %v7154_v9 = vmul.f32 %v11981_v6, %v7090_v5  ;;  %v7213_v5 = vadd.f32 %v11989_v0, %v7149_v58 }
 0xabd   :  { %v7033_v25 = vpop.f32.mrf.mxu2  ;;  %v7218_v7 = vadd.f32 %v11977_v53, %v7154_v9 }
 0xabe   :  { %v7074_v3 = vpop.f32.mrf.mxu3  ;;  %v7034_v22 = vadd.f32 %v7033_v25, %v11961_v42 }
 0xabf   :  { %v7075_v28 = vadd.f32 %v7074_v3, %v11961_v42  ;;  %v7153_v42 = vmul.f32 %v11981_v6, %v7089_v57  ;;  %v7013_v6 = vadd.f32 %v7012_v4, %v12003_v62  ;;  %v7212_v62 = vadd.f32 %v11995_v29, %v7148_v17 }
 0xac0   :  { %v7091_v8 = vmax.f32 %v7034_v22, 0.0  ;;  %v7215_v4 = vadd.f32 %v11983_v50, %v7151_v30  ;;  %v7145_v3 = vmul.f32 %v12005_v34, %v7081_v1  ;;  %v7211_v50 = vadd.f32 %v11995_v29, %v7147_v43 }
 0xac1   :  { %v7092_v44 = vmax.f32 %v7075_v28, 0.0  ;;  %v7217_v24 = vadd.f32 %v11977_v53, %v7153_v42  ;;  %v7077_v60 = vmax.f32 %v7013_v6, 0.0 }
 0xac2   :  { %v7155_v27 = vmul.f32 %v11965_v38, %v7091_v8  ;;  %v7209_v39 = vadd.f32 %v12009_v23, %v7145_v3 }
 0xac3   :  { %v7156_v2 = vmul.f32 %v11965_v38, %v7092_v44  ;;  %v7146_v38 = vmul.f32 %v12005_v34, %v7082_v35  ;;  %v7141_v28 = vmul.f32 %v12001_v37, %v7077_v60  ;;  %v7206_v34 = vadd.f32 %v12013_v48, %v7142_v16 }
 0xac4   :  { %v7219_v14 = vadd.f32 %v11971_v61, %v7155_v27 }
 0xac5   :  { %v7220_v11 = vadd.f32 %v11971_v61, %v7156_v2  ;;  %v7079_v61 = vmax.f32 %v7016_v45, 0.0  ;;  %v7210_v53 = vadd.f32 %v12009_v23, %v7146_v38  ;;  %v7205_v29 = vadd.f32 %v12013_v48, %v7141_v28 }
 0xac6   :  { %7239 = vmatpush.msrb.mxu0 %v7219_v14 }
 0xac7   :  { %7259 = vmatpush.msrb.mxu1 %v7220_v11  ;;  %v7143_v32 = vmul.f32 %v12007_v47, %v7079_v61 }
 0xac8   :  { %7240 = vmatpush.msrb.mxu0 %v7217_v24 }
 0xac9   :  { %7260 = vmatpush.msrb.mxu1 %v7218_v7  ;;  %v7207_v0 = vadd.f32 %v12011_v33, %v7143_v32 }
 0xaca   :  { %7241 = vmatpush.msrb.mxu0 %v7215_v4 }
 0xacb   :  { %7261 = vmatpush.msrb.mxu1 %v7216_v26 }
 0xacc   :  { %7242 = vmatpush.msrb.mxu0 %v7213_v5 }
 0xacd   :  { %7262 = vmatpush.msrb.mxu1 %v7214_v15 }
 0xace   :  { %7243 = vmatpush.msrb.mxu0 %v7211_v50 }
 0xacf   :  { %7263 = vmatpush.msrb.mxu1 %v7212_v62 }
 0xad0   :  { %7244 = vmatpush.msrb.mxu0 %v7209_v39 }
 0xad1   :  { %7264 = vmatpush.msrb.mxu1 %v7210_v53 }
 0xad2   :  { %7245 = vmatpush.msrb.mxu0 %v7207_v0 }
 0xad3   :  { %7265 = vmatpush.msrb.mxu1 %v7208_v59 }
 0xad4   :  { %7246 = vmatpush.msrb.mxu0 %v7205_v29 }
 0xad5   :  { %7266 = vmatpush.msrb.mxu1 %v7206_v34  ;;  %9592 = vmatmul.msk.f32.vlgmr.msrb.gmra.mxu0 %vm1679_vm1, %v7221_v41 }
 0xad6   :  { %9593 = vmatmul.msk.f32.vlgmr.msrb.gmra.mxu1 %vm1679_vm1, %v7221_v41 }
 0xad7   :  { %10217 = shalt.err (!%p10214_p4)
}
 0xad8   :  { %7355 = dma.vmem_to_hbm [thread:$0]  %s7351_s11, 16, %s7353_s15, [#allocation8]  }
 0xad9   :  { %s7341_s5 = sshll.u32 %s10510_s4, 4  ;;  %s10315_s9 = smov [#allocation5]   ;;  %s7342_s5 = int_to_ptr.hbm [resolvable:$true] %s7341_s5 }
 0xada   :  { %s7339_s13 = sshll.u32 %s10315_s9, 4  ;;  %s10230_s17 = sshra.s32 %s7342_s5, 4  ;;  %s7340_s13 = int_to_ptr.vmem [resolvable:$true] %s7339_s13  ;;  %s10231_s17 = int_to_ptr.hbm [resolvable:$true] %s10230_s17 }
 0xadb   :  { %s10232_s21 = scalar_lea.hbm %s10231_s17, 1  ;;  %s10234_s25 = scalar_lea.hbm %s10510_s4, 1 }
 0xadc   :  { %p10233_p5 = scmp.ne.s32.totalorder %s10231_s17, %s10232_s21  ;;  %p10235_p6 = scmp.lt.s32.totalorder %s10231_s17, %s10510_s4 }
 0xadd   :  { %p10236_p7 = scmp.lt.s32.totalorder %s10234_s25, %s10232_s21 }
 0xadf   :  { %p10237_p8 = por %p10236_p7, %p10235_p6 }
 0xae1   :  { %p10238_p9 = pnand %p10237_p8, %p10233_p5 }
 0xae3   :  { %10241 = shalt.err (!%p10238_p9)
}
 0xae4   :  { %7344 = dma.vmem_to_hbm [thread:$0]  %s7340_s13, 16, %s7342_s5, [#allocation6]  }
 0xae5   :  { %s10316_s14 = smov [#allocation9]   ;;  %s7363_s3 = sshll.u32 %s10520_s20, 4  ;;  %s7364_s3 = int_to_ptr.hbm [resolvable:$true] %s7363_s3 }
 0xae6   :  { %s7361_s29 = sshll.u32 %s10316_s14, 4  ;;  %s10254_s8 = sshra.s32 %s7364_s3, 4  ;;  %s7362_s29 = int_to_ptr.vmem [resolvable:$true] %s7361_s29  ;;  %s10255_s8 = int_to_ptr.hbm [resolvable:$true] %s10254_s8 }
 0xae7   :  { %s10256_s19 = scalar_lea.hbm %s10255_s8, 1  ;;  %s10258_s24 = scalar_lea.hbm %s10520_s20, 1 }
 0xae8   :  { %p10257_p10 = scmp.ne.s32.totalorder %s10255_s8, %s10256_s19  ;;  %p10259_p11 = scmp.lt.s32.totalorder %s10255_s8, %s10520_s20 }
 0xae9   :  { %p10260_p12 = scmp.lt.s32.totalorder %s10258_s24, %s10256_s19 }
 0xaeb   :  { %p10261_p13 = por %p10260_p12, %p10259_p11 }
 0xaed   :  { %p10262_p0 = pnand %p10261_p13, %p10257_p10 }
 0xaef   :  { %10265 = shalt.err (!%p10262_p0)
}
 0xaf0   :  { %7366 = dma.vmem_to_hbm [thread:$0]  %s7362_s29, 16, %s7364_s3, [#allocation8]   ;;  %v7313_v54 = vpop.permute.xlu0 %7312  ;;  %v7321_v27 = vpop.permute.xlu2 %7320 }
 0xb52   :  { %v7248_v33 = vpop.f32.mrf.mxu0 }
 0xb53   :  { %v7268_v37 = vpop.f32.mrf.mxu1  ;;  %v7249_v48 = vadd.f32 %v7248_v33, %v12017_v36 }
 0xb54   :  { %v7269_v47 = vadd.f32 %v7268_v37, %v12017_v36 }
 0xb55   :  { %v9594_v49 = vmul.f32 -1.442695, %v7249_v48 }
 0xb56   :  { %v9595_v23 = vmul.f32 -1.442695, %v7269_v47 }
 0xb58   :  { %10186 = vpow2.f32 %v9595_v23 }
 0xb59   :  { %10188 = vpow2.f32 %v9594_v49 }
 0xb5e   :  { %v10187_v44 = vpop.eup %10186 }
 0xb5f   :  { %v7278_v46 = vadd.f32 1.0, %v10187_v44  ;;  %v10189_v19 = vpop.eup %10188 }
 0xb60   :  { %v7277_v63 = vadd.f32 1.0, %v10189_v19 }
 0xb61   :  { %10190 = vrcp.f32 %v7278_v46  ;;  %v7303_v22 = vand.u32 2147483647, %v7278_v46  ;;  %v7305_v13 = vand.u32 2147483648, %v7278_v46  ;;  %vm7299_vm2 = vweird.f32 %v7278_v46 }
 0xb62   :  { %10192 = vrcp.f32 %v7277_v63  ;;  %v7290_v11 = vand.u32 2147483648, %v7277_v63  ;;  %v7288_v35 = vand.u32 2147483647, %v7277_v63  ;;  %vm7284_vm6 = vweird.f32 %v7277_v63 }
 0xb63   :  { %vm7304_vm4 = vcmp.eq.f32.partialorder %v7303_v22, 8.507059e+37  ;;  %v7306_v12 = vor.u32 1.1754944e-38, %v7305_v13 }
 0xb64   :  { %v7291_v7 = vor.u32 1.1754944e-38, %v7290_v11  ;;  %vm7289_vm9 = vcmp.eq.f32.partialorder %v7288_v35, 8.507059e+37 }
 0xb67   :  { %v10191_v25 = vpop.eup %10190 }
 0xb68   :  { %v7295_v9 = vmul.f32 %v10191_v25, %v7278_v46  ;;  %v10193_v2 = vpop.eup %10192  ;;  %vm7300_vm1 = vweird.f32 %v10191_v25 }
 0xb69   :  { %v7280_v51 = vmul.f32 %v10193_v2, %v7277_v63  ;;  %vm7301_vm3 = vmor %vm7299_vm2, %vm7300_vm1  ;;  %vm7285_vm5 = vweird.f32 %v10193_v2 }
 0xb6a   :  { %v7296_v57 = vsub.f32 1.0, %v7295_v9  ;;  %vm7286_vm8 = vmor %vm7284_vm6, %vm7285_vm5 }
 0xb6b   :  { %v7281_v36 = vsub.f32 1.0, %v7280_v51 }
 0xb6c   :  { %v7297_v10 = vmul.f32 %v10191_v25, %v7296_v57 }
 0xb6d   :  { %v7282_v20 = vmul.f32 %v10193_v2, %v7281_v36 }
 0xb6e   :  { %v7298_v55 = vadd.f32 %v10191_v25, %v7297_v10 }
 0xb6f   :  { %v7283_v42 = vadd.f32 %v10193_v2, %v7282_v20 }
 0xb70   :  { %v7302_v8 = vsel %vm7301_vm3, %v10191_v25, %v7298_v55 }
 0xb71   :  { %v7307_v31 = vsel %vm7304_vm4, %v7306_v12, %v7302_v8  ;;  %v7287_v45 = vsel %vm7286_vm8, %v10193_v2, %v7283_v42 }
 0xb72   :  { %v7316_v18 = vmul.f32 %v7313_v54, %v7307_v31  ;;  %v7292_v17 = vsel %vm7289_vm9, %v7291_v7, %v7287_v45 }
 0xb73   :  { %v7315_v52 = vmul.f32 %v7313_v54, %v7292_v17 }
 0xb74   :  { %v7324_v40 = vadd.f32 %v7321_v27, %v7316_v18 }
 0xb75   :  { %v7323_v14 = vadd.f32 %v7321_v27, %v7315_v52 }
 0xb76   :  { %v7327_v30 = vrot.slane %v7324_v40, 4 }
 0xb78   :  { %v7328_v26 = vsel %vm6278_vm7, %v7323_v14, %v7327_v30 }
 0xb79   :  { %9596 = vst [vmem:[%s10505_s27 + $0x8] sm:$0x77] %v7328_v26 }
 0xb7a   :  { %10270 = dma.done.wait [#allocation6], 16  }
 0xb7b   :  { %10271 = vsyncadd [#allocation6], 4294967280 }
 0xb7c   :  { %10272 = dma.done.wait [#allocation8], 32  }
 0xb7d   :  { %10273 = vsyncadd [#allocation8], 4294967264 }
 0xb7e   :  { %7381 = vsyncpa [#allocation6], 1 }
 0xb7f   :  { %7382 = vsyncpa [#allocation8], 1 }
 0xb80   :  { %7383 = vsyncmov [#allocation4] }
 0xb83   :  { %s7384_s20 = vpop.sfrf %7383 }
 0xb84   :  { %p9597_p1 = scmp.ne.s32.totalorder %s7384_s20, 0 }
 0xb86   :  { %7388 = shalt.err (%p9597_p1)  }
 0xb87   :  { %7390 = vsyncmov [#allocation4 + $0x1] }
 0xb8a   :  { %s7391_s4 = vpop.sfrf %7390 }
 0xb8b   :  { %p9598_p2 = scmp.ne.s32.totalorder %s7391_s4, 0 }
 0xb8d   :  { %7395 = shalt.err (%p9598_p2)  }

</bundles_post_ra>
